<compile_context>
chip_gen: v7x
topology: tpu7x:2x2x1
jax: 0.10.0
libtpu: 0.0.40
codegen_flags: <defaults>
</compile_context>

<pallas_src>
import jax
import jax.numpy as jnp
from jax import lax
from jax.experimental import pallas as pl
from jax.experimental.pallas import tpu as pltpu

EMB_DIM = 64            # GRU / embedding dim (see note above)
E_DIM = 64              # ExplainDrug e_dim
NUM_ASP_DIAG = 1958     # hard-coded in ExpDrug.__init__
NUM_ASP_PRO = 1430
NUM_ASP_MED = 131
MED_SIZE = 131          # mapping output size == ddi_adj rows/cols

# lane-padded sizes (multiples of 128)
PAD_DIAG = 2048
PAD_PRO = 1536
PAD_MED = 256
MED_PAD = 256

# fused-GRU lane layout
GATE_PAD = 256          # per-gate block: [g_diag(64)|g_proc(64)|g_med(64)|pad(64)]
GATE_W = 3 * GATE_PAD   # 768 = [r-block | z-block | n-block]
H_PAD = 256             # hidden layout: [h_diag|h_proc|h_med|pad]
DDI_ROWS = 136          # 131 rounded up to a sublane multiple (of 8)

NEG_BIG = -1e30         # softmax-logit pad value -> exp() underflows to 0


def _spec(shape):
    """Whole-array BlockSpec for a trivial grid=(1,) pallas_call."""
    nd = len(shape)
    return pl.BlockSpec(shape, lambda i, _nd=nd: (0,) * _nd)


def _pad_last(x, target):
    pad = target - x.shape[-1]
    return jnp.pad(x, [(0, 0)] * (x.ndim - 1) + [(0, pad)])


# ----------------------------------------------------------------------------
# Single fused kernel: fused 3-stream GRU -> 3 ExplainDrug heads -> mapping MLP
# -> DDI penalty.  Large head weights + ddi stream in via manual async copies.
# ----------------------------------------------------------------------------
def fused_kernel(
    # --- auto-pipelined (VMEM) operands -------------------------------------
    x_ref,        # (T, 192)   f32   [x_diag | x_proc | x_med] lane-concat
    wih_ref,      # (192, 768) bf16  block-diag, gate-major [r|z|n] x stream
    whh_ref,      # (256, 768) bf16  block-diag (pad rows 192:256 = 0)
    bih_ref,      # (1, 768)   f32
    bhh_ref,      # (1, 768)   f32
    w1e_ref,      # (3, 128, 192) bf16   ExplainDrug first MLP layer (stacked)
    b1e_ref,      # (3, 1, 192)   f32
    asp_d_ref,    # (1, 2048)  f32
    b2_d_ref,     # (1, 2048)  f32   (pads = -1e30)
    asp_p_ref,    # (1, 1536)  f32
    b2_p_ref,     # (1, 1536)  f32
    asp_m_ref,    # (1, 256)   f32
    wasp_m_ref,   # (256, 128) bf16
    w2_m_ref,     # (192, 256) bf16
    b2_m_ref,     # (1, 256)   f32   (pads = -1e30)
    w1m_ref,      # (256, 64)  bf16  mapping layer 1 (pad rows zero)
    b1m_ref,      # (1, 64)    f32
    w2m_ref,      # (64, 256)  bf16  mapping layer 2 (pad cols zero)
    b2m_ref,      # (1, 256)   f32
    zhalf_ref,    # (1, 1)     f32   = 0.5 * (131*131 - nnz(ddi))
    # --- big weights left in HBM (manual, overlapped DMA) -------------------
    w2_d_hbm,     # (192, 2048) bf16
    wasp_d_hbm,   # (2048, 128) bf16
    w2_p_hbm,     # (192, 1536) bf16
    wasp_p_hbm,   # (1536, 128) bf16
    ddi_hbm,      # (256, 256)  f32
    # --- outputs -------------------------------------------------------------
    out_ref,      # (1, 256) f32
    neg_ref,      # (1, 1)   f32
    sim_ref,      # (1, 1)   f32
    # --- scratch -------------------------------------------------------------
    w2_d_s, wasp_d_s, w2_p_s, wasp_p_s, ddi_s, sems,
):
    # ---- kick off the big-weight DMAs so they stream behind the GRU --------
    cp_w2d = pltpu.make_async_copy(w2_d_hbm, w2_d_s, sems.at[0]); cp_w2d.start()
    cp_wad = pltpu.make_async_copy(wasp_d_hbm, wasp_d_s, sems.at[1]); cp_wad.start()
    cp_w2p = pltpu.make_async_copy(w2_p_hbm, w2_p_s, sems.at[2]); cp_w2p.start()
    cp_wap = pltpu.make_async_copy(wasp_p_hbm, wasp_p_s, sems.at[3]); cp_wap.start()
    cp_ddi = pltpu.make_async_copy(ddi_hbm, ddi_s, sems.at[4]); cp_ddi.start()

    T = x_ref.shape[0]
    GP = GATE_PAD

    # ---- fused 3-stream GRU (only the last hidden state is used downstream)
    # input->hidden contribution for all timesteps at once (hoisted)
    gi_all = (jnp.dot(x_ref[...].astype(jnp.bfloat16), wih_ref[...],
                      preferred_element_type=jnp.float32) + bih_ref[...])  # (T, 768)
    h = jnp.zeros((1, H_PAD), jnp.float32)
    for t in range(T):                                   # static, fully unrolled
        gh = (jnp.dot(h.astype(jnp.bfloat16), whh_ref[...],
                      preferred_element_type=jnp.float32) + bhh_ref[...])  # (1, 768)
        gi = gi_all[t:t + 1, :]
        r = jax.nn.sigmoid(gi[:, 0:GP] + gh[:, 0:GP])
        z = jax.nn.sigmoid(gi[:, GP:2 * GP] + gh[:, GP:2 * GP])
        n = jnp.tanh(gi[:, 2 * GP:3 * GP] + r * gh[:, 2 * GP:3 * GP])
        h = (1.0 - z) * n + z * h                        # pad lanes stay 0
    # h = [o1_last | o2_last | o3_last | 0]   (1, 256)

    q128 = h[:, 0:128]                                   # [o1 | o2]
    q128_bf = q128.astype(jnp.bfloat16)
    q_sq = jnp.sum(q128 * q128, axis=-1, keepdims=True)

    # ---- ExplainDrug heads: MLP -> softmax -> weighted aspect sum -> -cos --
    def explain(s, asp, w2_bf, b2, wasp_bf):
        hq = jnp.maximum(
            jnp.dot(q128_bf, w1e_ref[s], preferred_element_type=jnp.float32)
            + b1e_ref[s], 0.0)                           # (1, 192)
        logits = (jnp.dot(hq.astype(jnp.bfloat16), w2_bf,
                          preferred_element_type=jnp.float32) + b2)  # (1, Apad)
        m = jnp.max(logits, axis=-1, keepdims=True)
        e = jnp.exp(logits - m)                          # pads -> exactly 0
        denom = jnp.sum(e, axis=-1, keepdims=True)
        factor = e * pl.reciprocal(denom, approx=True)
        weighted = asp * factor                          # asp pads are 0
        pa = jnp.dot(weighted.astype(jnp.bfloat16), wasp_bf,
                     preferred_element_type=jnp.float32)  # (1, 128)
        num = jnp.sum(pa * q128, axis=-1, keepdims=True)
        # F.cosine_similarity clamps the PRODUCT of the norms by eps
        norms = jnp.sqrt(jnp.sum(pa * pa, axis=-1, keepdims=True) * q_sq)
        return -(num * pl.reciprocal(jnp.maximum(norms, 1e-8), approx=True))

    cp_w2d.wait(); cp_wad.wait()
    sim_d = explain(0, asp_d_ref[...], w2_d_s[...], b2_d_ref[...], wasp_d_s[...])
    cp_w2p.wait(); cp_wap.wait()
    sim_p = explain(1, asp_p_ref[...], w2_p_s[...], b2_p_ref[...], wasp_p_s[...])
    sim_m = explain(2, asp_m_ref[...], w2_m_ref[...], b2_m_ref[...], wasp_m_ref[...])
    sim_ref[...] = (sim_d + sim_p + sim_m) * (1.0 / 3.0)

    # ---- mapping MLP (Linear -> ReLU -> Linear) -----------------------------
    hm = jnp.maximum(
        jnp.dot(h.astype(jnp.bfloat16), w1m_ref[...],
                preferred_element_type=jnp.float32) + b1m_ref[...], 0.0)   # (1, 64)
    out = (jnp.dot(hm.astype(jnp.bfloat16), w2m_ref[...],
                   preferred_element_type=jnp.float32) + b2m_ref[...])     # (1, 256)
    out_ref[...] = out

    # ---- DDI penalty: sum(sigmoid((p^T p) * ddi_adj)) over the 131x131 block
    p = jax.nn.sigmoid(out)                              # (1, 256); pads = 0.5 (masked)
    cp_ddi.wait()
    outer = lax.dot_general(p, p, (((0,), (0,)), ((), ())),
                            preferred_element_type=jnp.float32)  # (256,256) = p^T @ p (MXU)
    ot = outer[0:DDI_ROWS, :]                            # sublane-trimmed region
    dd = ddi_s[0:DDI_ROWS, :]
    # ddi>0 entries -> sigmoid(outer*ddi); ddi==0 entries of the valid 131x131
    # block each contribute sigmoid(0)=0.5, folded into the precomputed const.
    contrib = jnp.where(dd > 0.0, jax.nn.sigmoid(ot * dd), 0.0)
    neg_ref[...] = jnp.sum(contrib, keepdims=True) + zhalf_ref[...]


# ----------------------------------------------------------------------------
# Forward wrapper (embedding gathers stay in plain JAX; everything else fused)
# ----------------------------------------------------------------------------
def exp_drug_forward(params, input_adms, diag, pro, med, step):
    emb0, emb1, emb2 = params["embeddings"]

    def sum_emb(table, codes):
        idx = jnp.asarray(codes, dtype=jnp.int32)
        return jnp.sum(table[idx], axis=0)               # (EMB_DIM,)

    # dropout(p=0.5) is identity in eval mode (deterministic forward)
    diag_rows = [sum_emb(emb0, adm[0]) for adm in input_adms]
    proc_rows = [sum_emb(emb1, adm[1]) for adm in input_adms]
    med_rows = []
    for idx in range(len(input_adms)):
        if len(input_adms) <= 1 or idx == 0:
            med_rows.append(jnp.zeros((EMB_DIM,), jnp.float32))
        else:
            med_rows.append(sum_emb(emb2, input_adms[idx - 1][2]))

    x_cat = jnp.concatenate(
        [jnp.stack(diag_rows), jnp.stack(proc_rows), jnp.stack(med_rows)],
        axis=-1).astype(jnp.float32)                     # (T, 192)

    asp_d = _pad_last(diag[step].reshape(1, -1).astype(jnp.float32), PAD_DIAG)
    asp_p = _pad_last(pro[step].reshape(1, -1).astype(jnp.float32), PAD_PRO)
    asp_m = _pad_last(med[step].reshape(1, -1).astype(jnp.float32), PAD_MED)

    g = params["gru"]
    mp = params["mapping"]
    ed, epo, emh = params["exp_diag"], params["exp_pro"], params["exp_med"]

    vmem_args = (x_cat, g["wih_bd"], g["whh_bd"], g["bih_bd"], g["bhh_bd"],
                 params["exp_w1"], params["exp_b1"],
                 asp_d, ed["b2"],
                 asp_p, epo["b2"],
                 asp_m, emh["W_asp"], emh["w2_t"], emh["b2"],
                 mp["w1_t"], mp["b1"], mp["w2_t"], mp["b2"],
                 params["ddi_zero_half"])
    any_args = (ed["w2_t"], ed["W_asp"], epo["w2_t"], epo["W_asp"],
                params["ddi_adj"])
    args = vmem_args + any_args

    in_specs = ([_spec(a.shape) for a in vmem_args]
                + [pl.BlockSpec(memory_space=pl.ANY)] * len(any_args))

    out_pad, neg, sim = pl.pallas_call(
        fused_kernel,
        grid=(1,),
        in_specs=in_specs,
        out_specs=(_spec((1, MED_PAD)), _spec((1, 1)), _spec((1, 1))),
        out_shape=(jax.ShapeDtypeStruct((1, MED_PAD), jnp.float32),
                   jax.ShapeDtypeStruct((1, 1), jnp.float32),
                   jax.ShapeDtypeStruct((1, 1), jnp.float32)),
        scratch_shapes=[
            pltpu.VMEM((3 * EMB_DIM, PAD_DIAG), jnp.bfloat16),   # w2_d
            pltpu.VMEM((PAD_DIAG, 2 * E_DIM), jnp.bfloat16),     # W_asp_d
            pltpu.VMEM((3 * EMB_DIM, PAD_PRO), jnp.bfloat16),    # w2_p
            pltpu.VMEM((PAD_PRO, 2 * E_DIM), jnp.bfloat16),      # W_asp_p
            pltpu.VMEM((MED_PAD, MED_PAD), jnp.float32),         # ddi
            pltpu.SemaphoreType.DMA((5,)),
        ],
        compiler_params=pltpu.CompilerParams(
            dimension_semantics=("arbitrary",),
            vmem_limit_bytes=32 * 1024 * 1024),
    )(*args)

    out = out_pad[:, :MED_SIZE]                          # (1, 131)
    # TODO(synk): self.query / self.map_vocab_size / ddi_mask_H are unused in
    # the reference forward, so they are not materialized here.  Batching
    # multiple steps/patients (grid-resident weights, row-batched matmuls,
    # v7x two-core sharding) would be the next win but is out of scope for a
    # single-sample forward.
    return out, neg[0, 0], sim.reshape(1)


# ----------------------------------------------------------------------------
# Deterministic parameter construction (synthetic, not a checkpoint load).
# Weights are pre-padded / pre-stacked / pre-fused once so the per-call kernel
# sees lane-dense tiles with no per-forward reshaping.
# ----------------------------------------------------------------------------
def init_params(key):
    ks = iter(jax.random.split(key, 64))
    vocab_size = (30, 25, 20)
    initrange = 0.1
    embeddings = tuple(
        jax.random.uniform(next(ks), (vocab_size[i], EMB_DIM), jnp.float32,
                           -initrange, initrange) for i in range(3))

    # ---- GRUs (torch layout), fused into one block-diagonal recurrence -----
    def gru_raw():
        kk = 1.0 / (EMB_DIM ** 0.5)
        wih = jax.random.uniform(next(ks), (3 * EMB_DIM, EMB_DIM), jnp.float32, -kk, kk)
        whh = jax.random.uniform(next(ks), (3 * EMB_DIM, EMB_DIM), jnp.float32, -kk, kk)
        bih = jax.random.uniform(next(ks), (3 * EMB_DIM,), jnp.float32, -kk, kk)
        bhh = jax.random.uniform(next(ks), (3 * EMB_DIM,), jnp.float32, -kk, kk)
        return wih, whh, bih, bhh

    raws = [gru_raw() for _ in range(3)]
    wih_bd = jnp.zeros((3 * EMB_DIM, GATE_W), jnp.float32)
    whh_bd = jnp.zeros((H_PAD, GATE_W), jnp.float32)
    bih_bd = jnp.zeros((1, GATE_W), jnp.float32)
    bhh_bd = jnp.zeros((1, GATE_W), jnp.float32)
    for s, (wih, whh, bih, bhh) in enumerate(raws):
        wih_t, whh_t = wih.T, whh.T                      # (64, 192), cols [r|z|n]
        for gi in range(3):
            r0 = s * EMB_DIM
            c0 = gi * GATE_PAD + s * EMB_DIM
            src = slice(gi * EMB_DIM, (gi + 1) * EMB_DIM)
            wih_bd = wih_bd.at[r0:r0 + EMB_DIM, c0:c0 + EMB_DIM].set(wih_t[:, src])
            whh_bd = whh_bd.at[r0:r0 + EMB_DIM, c0:c0 + EMB_DIM].set(whh_t[:, src])
            bih_bd = bih_bd.at[0, c0:c0 + EMB_DIM].set(bih[src])
            bhh_bd = bhh_bd.at[0, c0:c0 + EMB_DIM].set(bhh[src])
    gru = {"wih_bd": wih_bd.astype(jnp.bfloat16),        # (192, 768)
           "whh_bd": whh_bd.astype(jnp.bfloat16),        # (256, 768)
           "bih_bd": bih_bd, "bhh_bd": bhh_bd}           # (1, 768) f32

    # ---- ExplainDrug heads --------------------------------------------------
    def explain_params(num_asp, pad_asp):
        two_e, three_e = 2 * E_DIM, 3 * E_DIM
        W_asp = jax.random.normal(next(ks), (num_asp, two_e), jnp.float32)
        k1 = 1.0 / (two_e ** 0.5)
        w1 = jax.random.uniform(next(ks), (three_e, two_e), jnp.float32, -k1, k1)
        b1 = jax.random.uniform(next(ks), (three_e,), jnp.float32, -k1, k1)
        k2 = 1.0 / (three_e ** 0.5)
        w2 = jax.random.uniform(next(ks), (num_asp, three_e), jnp.float32, -k2, k2)
        b2 = jax.random.uniform(next(ks), (num_asp,), jnp.float32, -k2, k2)
        npad = pad_asp - num_asp
        return {
            "W_asp": jnp.pad(W_asp, ((0, npad), (0, 0))).astype(jnp.bfloat16),   # (Apad,128)
            "w1_t": w1.T.astype(jnp.bfloat16),                                   # (128, 192)
            "b1": b1.reshape(1, -1),                                             # (1, 192)
            "w2_t": jnp.pad(w2.T, ((0, 0), (0, npad))).astype(jnp.bfloat16),     # (192, Apad)
            "b2": jnp.pad(b2.reshape(1, -1), ((0, 0), (0, npad)),
                          constant_values=NEG_BIG),                              # (1, Apad)
        }

    exp_diag = explain_params(NUM_ASP_DIAG, PAD_DIAG)
    exp_pro = explain_params(NUM_ASP_PRO, PAD_PRO)
    exp_med = explain_params(NUM_ASP_MED, PAD_MED)
    exp_w1 = jnp.stack([exp_diag["w1_t"], exp_pro["w1_t"], exp_med["w1_t"]])  # (3,128,192) bf16
    exp_b1 = jnp.stack([exp_diag["b1"], exp_pro["b1"], exp_med["b1"]])        # (3,1,192) f32

    # ---- mapping MLP + DDI ---------------------------------------------------
    k1 = 1.0 / ((3 * EMB_DIM) ** 0.5)
    wm1 = jax.random.uniform(next(ks), (64, 3 * EMB_DIM), jnp.float32, -k1, k1)
    bm1 = jax.random.uniform(next(ks), (64,), jnp.float32, -k1, k1)
    k2 = 1.0 / (64 ** 0.5)
    wm2 = jax.random.uniform(next(ks), (MED_SIZE, 64), jnp.float32, -k2, k2)
    bm2 = jax.random.uniform(next(ks), (MED_SIZE,), jnp.float32, -k2, k2)
    mpad = MED_PAD - MED_SIZE
    mapping = {
        "w1_t": jnp.pad(wm1.T, ((0, H_PAD - 3 * EMB_DIM), (0, 0))
                        ).astype(jnp.bfloat16),                     # (256, 64)
        "b1": bm1.reshape(1, -1),                                   # (1, 64)
        "w2_t": jnp.pad(wm2.T, ((0, 0), (0, mpad))).astype(jnp.bfloat16),  # (64, 256)
        "b2": jnp.pad(bm2.reshape(1, -1), ((0, 0), (0, mpad))),     # (1, 256)
    }

    ddi_adj = (jax.random.uniform(next(ks), (MED_SIZE, MED_SIZE)) > 0.9
               ).astype(jnp.float32)
    ddi_pad = jnp.pad(ddi_adj, ((0, mpad), (0, mpad)))              # (256, 256)
    nnz = jnp.sum((ddi_adj > 0.0).astype(jnp.float32))
    ddi_zero_half = (0.5 * (float(MED_SIZE * MED_SIZE) - nnz)
                     ).astype(jnp.float32).reshape(1, 1)

    return {"embeddings": embeddings, "gru": gru,
            "exp_w1": exp_w1, "exp_b1": exp_b1,
            "exp_diag": exp_diag, "exp_pro": exp_pro, "exp_med": exp_med,
            "mapping": mapping, "ddi_adj": ddi_pad,
            "ddi_zero_half": ddi_zero_half}


if __name__ == "__main__":
    params = init_params(jax.random.PRNGKey(0))

    # Synthetic patient record: 3 admissions of (diag codes, proc codes, med codes)
    input_adms = [
        ([1, 3, 5], [2, 4], [0, 1]),
        ([0, 2], [1, 5, 6], [2, 3, 4]),
        ([4, 7, 8, 9], [0, 3], [1, 5]),
    ]
    num_steps = 2
    step = 1
    kd, kp, km = jax.random.split(jax.random.PRNGKey(1), 3)
    diag = (jax.random.uniform(kd, (num_steps, NUM_ASP_DIAG)) > 0.5).astype(jnp.float32)
    pro = (jax.random.uniform(kp, (num_steps, NUM_ASP_PRO)) > 0.5).astype(jnp.float32)
    med = (jax.random.uniform(km, (num_steps, NUM_ASP_MED)) > 0.5).astype(jnp.float32)

    out, batch_neg, sim = exp_drug_forward(params, input_adms, diag, pro, med, step)
    jax.block_until_ready((out, batch_neg, sim))
    assert out.shape == (1, MED_SIZE)
    assert batch_neg.shape == ()
    assert sim.shape == (1,)
    print("KERNEL_OK")
</pallas_src>

<mosaic_0001>
module attributes {stable_mosaic.version = 11 : i64} {
  func.func @fused_kernel(%arg0: i32, %arg1: memref<3x192xf32, #tpu.memory_space<vmem>>, %arg2: memref<192x768xbf16, #tpu.memory_space<vmem>>, %arg3: memref<256x768xbf16, #tpu.memory_space<vmem>>, %arg4: memref<1x768xf32, #tpu.memory_space<vmem>>, %arg5: memref<1x768xf32, #tpu.memory_space<vmem>>, %arg6: memref<3x128x192xbf16, #tpu.memory_space<vmem>>, %arg7: memref<3x1x192xf32, #tpu.memory_space<vmem>>, %arg8: memref<1x2048xf32, #tpu.memory_space<vmem>>, %arg9: memref<1x2048xf32, #tpu.memory_space<vmem>>, %arg10: memref<1x1536xf32, #tpu.memory_space<vmem>>, %arg11: memref<1x1536xf32, #tpu.memory_space<vmem>>, %arg12: memref<1x256xf32, #tpu.memory_space<vmem>>, %arg13: memref<256x128xbf16, #tpu.memory_space<vmem>>, %arg14: memref<192x256xbf16, #tpu.memory_space<vmem>>, %arg15: memref<1x256xf32, #tpu.memory_space<vmem>>, %arg16: memref<256x64xbf16, #tpu.memory_space<vmem>>, %arg17: memref<1x64xf32, #tpu.memory_space<vmem>>, %arg18: memref<64x256xbf16, #tpu.memory_space<vmem>>, %arg19: memref<1x256xf32, #tpu.memory_space<vmem>>, %arg20: memref<1x1xf32, #tpu.memory_space<vmem>>, %arg21: memref<192x2048xbf16, #tpu.memory_space<any>>, %arg22: memref<2048x128xbf16, #tpu.memory_space<any>>, %arg23: memref<192x1536xbf16, #tpu.memory_space<any>>, %arg24: memref<1536x128xbf16, #tpu.memory_space<any>>, %arg25: memref<256x256xf32, #tpu.memory_space<any>>, %arg26: memref<1x256xf32, #tpu.memory_space<vmem>>, %arg27: memref<1x1xf32, #tpu.memory_space<vmem>>, %arg28: memref<1x1xf32, #tpu.memory_space<vmem>>, %arg29: memref<192x2048xbf16, #tpu.memory_space<vmem>>, %arg30: memref<2048x128xbf16, #tpu.memory_space<vmem>>, %arg31: memref<192x1536xbf16, #tpu.memory_space<vmem>>, %arg32: memref<1536x128xbf16, #tpu.memory_space<vmem>>, %arg33: memref<256x256xf32, #tpu.memory_space<vmem>>, %arg34: memref<5x!tpu.dma_semaphore, #tpu.memory_space<semaphore_mem>>) attributes {dimension_semantics = [#tpu.dimension_semantics<arbitrary>], iteration_bounds = array<i64: 1>, scalar_prefetch = 0 : i64, scratch_operands = 6 : i64, tpu.core_type = #tpu.core_type<tc>, window_params = [{pipeline_mode = #tpu.pipeline_mode<synchronous>, transform_indices = @transform_0, window_bounds = array<i64: 3, 192>}, {pipeline_mode = #tpu.pipeline_mode<synchronous>, transform_indices = @transform_1, window_bounds = array<i64: 192, 768>}, {pipeline_mode = #tpu.pipeline_mode<synchronous>, transform_indices = @transform_2, window_bounds = array<i64: 256, 768>}, {pipeline_mode = #tpu.pipeline_mode<synchronous>, transform_indices = @transform_3, window_bounds = array<i64: 1, 768>}, {pipeline_mode = #tpu.pipeline_mode<synchronous>, transform_indices = @transform_4, window_bounds = array<i64: 1, 768>}, {pipeline_mode = #tpu.pipeline_mode<synchronous>, transform_indices = @transform_5, window_bounds = array<i64: 3, 128, 192>}, {pipeline_mode = #tpu.pipeline_mode<synchronous>, transform_indices = @transform_6, window_bounds = array<i64: 3, 1, 192>}, {pipeline_mode = #tpu.pipeline_mode<synchronous>, transform_indices = @transform_7, window_bounds = array<i64: 1, 2048>}, {pipeline_mode = #tpu.pipeline_mode<synchronous>, transform_indices = @transform_8, window_bounds = array<i64: 1, 2048>}, {pipeline_mode = #tpu.pipeline_mode<synchronous>, transform_indices = @transform_9, window_bounds = array<i64: 1, 1536>}, {pipeline_mode = #tpu.pipeline_mode<synchronous>, transform_indices = @transform_10, window_bounds = array<i64: 1, 1536>}, {pipeline_mode = #tpu.pipeline_mode<synchronous>, transform_indices = @transform_11, window_bounds = array<i64: 1, 256>}, {pipeline_mode = #tpu.pipeline_mode<synchronous>, transform_indices = @transform_12, window_bounds = array<i64: 256, 128>}, {pipeline_mode = #tpu.pipeline_mode<synchronous>, transform_indices = @transform_13, window_bounds = array<i64: 192, 256>}, {pipeline_mode = #tpu.pipeline_mode<synchronous>, transform_indices = @transform_14, window_bounds = array<i64: 1, 256>}, {pipeline_mode = #tpu.pipeline_mode<synchronous>, transform_indices = @transform_15, window_bounds = array<i64: 256, 64>}, {pipeline_mode = #tpu.pipeline_mode<synchronous>, transform_indices = @transform_16, window_bounds = array<i64: 1, 64>}, {pipeline_mode = #tpu.pipeline_mode<synchronous>, transform_indices = @transform_17, window_bounds = array<i64: 64, 256>}, {pipeline_mode = #tpu.pipeline_mode<synchronous>, transform_indices = @transform_18, window_bounds = array<i64: 1, 256>}, {pipeline_mode = #tpu.pipeline_mode<synchronous>, transform_indices = @transform_19, window_bounds = array<i64: 1, 1>}, {}, {}, {}, {}, {}, {pipeline_mode = #tpu.pipeline_mode<synchronous>, transform_indices = @transform_25, window_bounds = array<i64: 1, 256>}, {pipeline_mode = #tpu.pipeline_mode<synchronous>, transform_indices = @transform_26, window_bounds = array<i64: 1, 1>}, {pipeline_mode = #tpu.pipeline_mode<synchronous>, transform_indices = @transform_27, window_bounds = array<i64: 1, 1>}]} {
    %c0_i32 = arith.constant 0 : i32
    %0 = tpu.memref_slice %arg34[%c0_i32] : memref<5x!tpu.dma_semaphore, #tpu.memory_space<semaphore_mem>> -> memref<1x!tpu.dma_semaphore, #tpu.memory_space<semaphore_mem>>
    %1 = tpu.memref_squeeze %0 : memref<1x!tpu.dma_semaphore, #tpu.memory_space<semaphore_mem>> -> memref<!tpu.dma_semaphore, #tpu.memory_space<semaphore_mem>>
    tpu.enqueue_dma source(%arg21 : memref<192x2048xbf16, #tpu.memory_space<any>>) target(%arg29 : memref<192x2048xbf16, #tpu.memory_space<vmem>>) target_semaphore(%1 : memref<!tpu.dma_semaphore, #tpu.memory_space<semaphore_mem>>)
    %c1_i32 = arith.constant 1 : i32
    %2 = tpu.memref_slice %arg34[%c1_i32] : memref<5x!tpu.dma_semaphore, #tpu.memory_space<semaphore_mem>> -> memref<1x!tpu.dma_semaphore, #tpu.memory_space<semaphore_mem>>
    %3 = tpu.memref_squeeze %2 : memref<1x!tpu.dma_semaphore, #tpu.memory_space<semaphore_mem>> -> memref<!tpu.dma_semaphore, #tpu.memory_space<semaphore_mem>>
    tpu.enqueue_dma source(%arg22 : memref<2048x128xbf16, #tpu.memory_space<any>>) target(%arg30 : memref<2048x128xbf16, #tpu.memory_space<vmem>>) target_semaphore(%3 : memref<!tpu.dma_semaphore, #tpu.memory_space<semaphore_mem>>)
    %c2_i32 = arith.constant 2 : i32
    %4 = tpu.memref_slice %arg34[%c2_i32] : memref<5x!tpu.dma_semaphore, #tpu.memory_space<semaphore_mem>> -> memref<1x!tpu.dma_semaphore, #tpu.memory_space<semaphore_mem>>
    %5 = tpu.memref_squeeze %4 : memref<1x!tpu.dma_semaphore, #tpu.memory_space<semaphore_mem>> -> memref<!tpu.dma_semaphore, #tpu.memory_space<semaphore_mem>>
    tpu.enqueue_dma source(%arg23 : memref<192x1536xbf16, #tpu.memory_space<any>>) target(%arg31 : memref<192x1536xbf16, #tpu.memory_space<vmem>>) target_semaphore(%5 : memref<!tpu.dma_semaphore, #tpu.memory_space<semaphore_mem>>)
    %c3_i32 = arith.constant 3 : i32
    %6 = tpu.memref_slice %arg34[%c3_i32] : memref<5x!tpu.dma_semaphore, #tpu.memory_space<semaphore_mem>> -> memref<1x!tpu.dma_semaphore, #tpu.memory_space<semaphore_mem>>
    %7 = tpu.memref_squeeze %6 : memref<1x!tpu.dma_semaphore, #tpu.memory_space<semaphore_mem>> -> memref<!tpu.dma_semaphore, #tpu.memory_space<semaphore_mem>>
    tpu.enqueue_dma source(%arg24 : memref<1536x128xbf16, #tpu.memory_space<any>>) target(%arg32 : memref<1536x128xbf16, #tpu.memory_space<vmem>>) target_semaphore(%7 : memref<!tpu.dma_semaphore, #tpu.memory_space<semaphore_mem>>)
    %c4_i32 = arith.constant 4 : i32
    %8 = tpu.memref_slice %arg34[%c4_i32] : memref<5x!tpu.dma_semaphore, #tpu.memory_space<semaphore_mem>> -> memref<1x!tpu.dma_semaphore, #tpu.memory_space<semaphore_mem>>
    %9 = tpu.memref_squeeze %8 : memref<1x!tpu.dma_semaphore, #tpu.memory_space<semaphore_mem>> -> memref<!tpu.dma_semaphore, #tpu.memory_space<semaphore_mem>>
    tpu.enqueue_dma source(%arg25 : memref<256x256xf32, #tpu.memory_space<any>>) target(%arg33 : memref<256x256xf32, #tpu.memory_space<vmem>>) target_semaphore(%9 : memref<!tpu.dma_semaphore, #tpu.memory_space<semaphore_mem>>)
    %c0 = arith.constant 0 : index
    %c0_0 = arith.constant 0 : index
    %10 = vector.load %arg1[%c0, %c0_0] : memref<3x192xf32, #tpu.memory_space<vmem>>, vector<3x192xf32>
    %11 = arith.truncf %10 : vector<3x192xf32> to vector<3x192xbf16>
    %c0_1 = arith.constant 0 : index
    %c0_2 = arith.constant 0 : index
    %12 = vector.load %arg2[%c0_1, %c0_2] : memref<192x768xbf16, #tpu.memory_space<vmem>>, vector<192x768xbf16>
    %cst = arith.constant dense<0.000000e+00> : vector<3x768xf32>
    %13 = tpu.matmul %11, %12, %cst {dimension_numbers = #tpu.dot_dimension_numbers<[1], [0], [0], [1], [0, 0, 1, 1], [], []>} : vector<3x192xbf16>, vector<192x768xbf16>, vector<3x768xf32> -> vector<3x768xf32>
    %c0_3 = arith.constant 0 : index
    %c0_4 = arith.constant 0 : index
    %14 = vector.load %arg4[%c0_3, %c0_4] : memref<1x768xf32, #tpu.memory_space<vmem>>, vector<1x768xf32>
    %15 = vector.broadcast %14 : vector<1x768xf32> to vector<3x768xf32>
    %16 = arith.addf %13, %15 : vector<3x768xf32>
    %cst_5 = arith.constant 0.000000e+00 : f32
    %17 = vector.broadcast %cst_5 : f32 to vector<1x256xf32>
    %18 = arith.truncf %17 : vector<1x256xf32> to vector<1x256xbf16>
    %c0_6 = arith.constant 0 : index
    %c0_7 = arith.constant 0 : index
    %19 = vector.load %arg3[%c0_6, %c0_7] : memref<256x768xbf16, #tpu.memory_space<vmem>>, vector<256x768xbf16>
    %cst_8 = arith.constant dense<0.000000e+00> : vector<1x768xf32>
    %20 = tpu.matmul %18, %19, %cst_8 {dimension_numbers = #tpu.dot_dimension_numbers<[1], [0], [0], [1], [0, 0, 1, 1], [], []>} : vector<1x256xbf16>, vector<256x768xbf16>, vector<1x768xf32> -> vector<1x768xf32>
    %c0_9 = arith.constant 0 : index
    %c0_10 = arith.constant 0 : index
    %21 = vector.load %arg5[%c0_9, %c0_10] : memref<1x768xf32, #tpu.memory_space<vmem>>, vector<1x768xf32>
    %22 = arith.addf %20, %21 : vector<1x768xf32>
    %23 = vector.extract_strided_slice %16 {offsets = [0, 0], sizes = [1, 768], strides = [1, 1]} : vector<3x768xf32> to vector<1x768xf32>
    %24 = vector.extract_strided_slice %23 {offsets = [0, 0], sizes = [1, 256], strides = [1, 1]} : vector<1x768xf32> to vector<1x256xf32>
    %25 = vector.extract_strided_slice %22 {offsets = [0, 0], sizes = [1, 256], strides = [1, 1]} : vector<1x768xf32> to vector<1x256xf32>
    %26 = arith.addf %24, %25 : vector<1x256xf32>
    %27 = arith.negf %26 : vector<1x256xf32>
    %28 = math.exp %27 : vector<1x256xf32>
    %cst_11 = arith.constant 1.000000e+00 : f32
    %29 = vector.broadcast %cst_11 : f32 to vector<1x256xf32>
    %30 = arith.addf %29, %28 : vector<1x256xf32>
    %31 = arith.divf %29, %30 : vector<1x256xf32>
    %32 = vector.extract_strided_slice %23 {offsets = [0, 256], sizes = [1, 256], strides = [1, 1]} : vector<1x768xf32> to vector<1x256xf32>
    %33 = vector.extract_strided_slice %22 {offsets = [0, 256], sizes = [1, 256], strides = [1, 1]} : vector<1x768xf32> to vector<1x256xf32>
    %34 = arith.addf %32, %33 : vector<1x256xf32>
    %35 = arith.negf %34 : vector<1x256xf32>
    %36 = math.exp %35 : vector<1x256xf32>
    %cst_12 = arith.constant 1.000000e+00 : f32
    %37 = vector.broadcast %cst_12 : f32 to vector<1x256xf32>
    %38 = arith.addf %37, %36 : vector<1x256xf32>
    %39 = arith.divf %37, %38 : vector<1x256xf32>
    %40 = vector.extract_strided_slice %23 {offsets = [0, 512], sizes = [1, 256], strides = [1, 1]} : vector<1x768xf32> to vector<1x256xf32>
    %41 = vector.extract_strided_slice %22 {offsets = [0, 512], sizes = [1, 256], strides = [1, 1]} : vector<1x768xf32> to vector<1x256xf32>
    %42 = arith.mulf %31, %41 : vector<1x256xf32>
    %43 = arith.addf %40, %42 : vector<1x256xf32>
    %44 = math.tanh %43 : vector<1x256xf32>
    %cst_13 = arith.constant 1.000000e+00 : f32
    %45 = vector.broadcast %cst_13 : f32 to vector<1x256xf32>
    %46 = arith.subf %45, %39 : vector<1x256xf32>
    %47 = arith.mulf %46, %44 : vector<1x256xf32>
    %48 = arith.mulf %39, %17 : vector<1x256xf32>
    %49 = arith.addf %47, %48 : vector<1x256xf32>
    %50 = arith.truncf %49 : vector<1x256xf32> to vector<1x256xbf16>
    %c0_14 = arith.constant 0 : index
    %c0_15 = arith.constant 0 : index
    %51 = vector.load %arg3[%c0_14, %c0_15] : memref<256x768xbf16, #tpu.memory_space<vmem>>, vector<256x768xbf16>
    %cst_16 = arith.constant dense<0.000000e+00> : vector<1x768xf32>
    %52 = tpu.matmul %50, %51, %cst_16 {dimension_numbers = #tpu.dot_dimension_numbers<[1], [0], [0], [1], [0, 0, 1, 1], [], []>} : vector<1x256xbf16>, vector<256x768xbf16>, vector<1x768xf32> -> vector<1x768xf32>
    %c0_17 = arith.constant 0 : index
    %c0_18 = arith.constant 0 : index
    %53 = vector.load %arg5[%c0_17, %c0_18] : memref<1x768xf32, #tpu.memory_space<vmem>>, vector<1x768xf32>
    %54 = arith.addf %52, %53 : vector<1x768xf32>
    %55 = vector.extract_strided_slice %16 {offsets = [1, 0], sizes = [1, 768], strides = [1, 1]} : vector<3x768xf32> to vector<1x768xf32>
    %56 = vector.extract_strided_slice %55 {offsets = [0, 0], sizes = [1, 256], strides = [1, 1]} : vector<1x768xf32> to vector<1x256xf32>
    %57 = vector.extract_strided_slice %54 {offsets = [0, 0], sizes = [1, 256], strides = [1, 1]} : vector<1x768xf32> to vector<1x256xf32>
    %58 = arith.addf %56, %57 : vector<1x256xf32>
    %59 = arith.negf %58 : vector<1x256xf32>
    %60 = math.exp %59 : vector<1x256xf32>
    %cst_19 = arith.constant 1.000000e+00 : f32
    %61 = vector.broadcast %cst_19 : f32 to vector<1x256xf32>
    %62 = arith.addf %61, %60 : vector<1x256xf32>
    %63 = arith.divf %61, %62 : vector<1x256xf32>
    %64 = vector.extract_strided_slice %55 {offsets = [0, 256], sizes = [1, 256], strides = [1, 1]} : vector<1x768xf32> to vector<1x256xf32>
    %65 = vector.extract_strided_slice %54 {offsets = [0, 256], sizes = [1, 256], strides = [1, 1]} : vector<1x768xf32> to vector<1x256xf32>
    %66 = arith.addf %64, %65 : vector<1x256xf32>
    %67 = arith.negf %66 : vector<1x256xf32>
    %68 = math.exp %67 : vector<1x256xf32>
    %cst_20 = arith.constant 1.000000e+00 : f32
    %69 = vector.broadcast %cst_20 : f32 to vector<1x256xf32>
    %70 = arith.addf %69, %68 : vector<1x256xf32>
    %71 = arith.divf %69, %70 : vector<1x256xf32>
    %72 = vector.extract_strided_slice %55 {offsets = [0, 512], sizes = [1, 256], strides = [1, 1]} : vector<1x768xf32> to vector<1x256xf32>
    %73 = vector.extract_strided_slice %54 {offsets = [0, 512], sizes = [1, 256], strides = [1, 1]} : vector<1x768xf32> to vector<1x256xf32>
    %74 = arith.mulf %63, %73 : vector<1x256xf32>
    %75 = arith.addf %72, %74 : vector<1x256xf32>
    %76 = math.tanh %75 : vector<1x256xf32>
    %cst_21 = arith.constant 1.000000e+00 : f32
    %77 = vector.broadcast %cst_21 : f32 to vector<1x256xf32>
    %78 = arith.subf %77, %71 : vector<1x256xf32>
    %79 = arith.mulf %78, %76 : vector<1x256xf32>
    %80 = arith.mulf %71, %49 : vector<1x256xf32>
    %81 = arith.addf %79, %80 : vector<1x256xf32>
    %82 = arith.truncf %81 : vector<1x256xf32> to vector<1x256xbf16>
    %c0_22 = arith.constant 0 : index
    %c0_23 = arith.constant 0 : index
    %83 = vector.load %arg3[%c0_22, %c0_23] : memref<256x768xbf16, #tpu.memory_space<vmem>>, vector<256x768xbf16>
    %cst_24 = arith.constant dense<0.000000e+00> : vector<1x768xf32>
    %84 = tpu.matmul %82, %83, %cst_24 {dimension_numbers = #tpu.dot_dimension_numbers<[1], [0], [0], [1], [0, 0, 1, 1], [], []>} : vector<1x256xbf16>, vector<256x768xbf16>, vector<1x768xf32> -> vector<1x768xf32>
    %c0_25 = arith.constant 0 : index
    %c0_26 = arith.constant 0 : index
    %85 = vector.load %arg5[%c0_25, %c0_26] : memref<1x768xf32, #tpu.memory_space<vmem>>, vector<1x768xf32>
    %86 = arith.addf %84, %85 : vector<1x768xf32>
    %87 = vector.extract_strided_slice %16 {offsets = [2, 0], sizes = [1, 768], strides = [1, 1]} : vector<3x768xf32> to vector<1x768xf32>
    %88 = vector.extract_strided_slice %87 {offsets = [0, 0], sizes = [1, 256], strides = [1, 1]} : vector<1x768xf32> to vector<1x256xf32>
    %89 = vector.extract_strided_slice %86 {offsets = [0, 0], sizes = [1, 256], strides = [1, 1]} : vector<1x768xf32> to vector<1x256xf32>
    %90 = arith.addf %88, %89 : vector<1x256xf32>
    %91 = arith.negf %90 : vector<1x256xf32>
    %92 = math.exp %91 : vector<1x256xf32>
    %cst_27 = arith.constant 1.000000e+00 : f32
    %93 = vector.broadcast %cst_27 : f32 to vector<1x256xf32>
    %94 = arith.addf %93, %92 : vector<1x256xf32>
    %95 = arith.divf %93, %94 : vector<1x256xf32>
    %96 = vector.extract_strided_slice %87 {offsets = [0, 256], sizes = [1, 256], strides = [1, 1]} : vector<1x768xf32> to vector<1x256xf32>
    %97 = vector.extract_strided_slice %86 {offsets = [0, 256], sizes = [1, 256], strides = [1, 1]} : vector<1x768xf32> to vector<1x256xf32>
    %98 = arith.addf %96, %97 : vector<1x256xf32>
    %99 = arith.negf %98 : vector<1x256xf32>
    %100 = math.exp %99 : vector<1x256xf32>
    %cst_28 = arith.constant 1.000000e+00 : f32
    %101 = vector.broadcast %cst_28 : f32 to vector<1x256xf32>
    %102 = arith.addf %101, %100 : vector<1x256xf32>
    %103 = arith.divf %101, %102 : vector<1x256xf32>
    %104 = vector.extract_strided_slice %87 {offsets = [0, 512], sizes = [1, 256], strides = [1, 1]} : vector<1x768xf32> to vector<1x256xf32>
    %105 = vector.extract_strided_slice %86 {offsets = [0, 512], sizes = [1, 256], strides = [1, 1]} : vector<1x768xf32> to vector<1x256xf32>
    %106 = arith.mulf %95, %105 : vector<1x256xf32>
    %107 = arith.addf %104, %106 : vector<1x256xf32>
    %108 = math.tanh %107 : vector<1x256xf32>
    %cst_29 = arith.constant 1.000000e+00 : f32
    %109 = vector.broadcast %cst_29 : f32 to vector<1x256xf32>
    %110 = arith.subf %109, %103 : vector<1x256xf32>
    %111 = arith.mulf %110, %108 : vector<1x256xf32>
    %112 = arith.mulf %103, %81 : vector<1x256xf32>
    %113 = arith.addf %111, %112 : vector<1x256xf32>
    %114 = vector.extract_strided_slice %113 {offsets = [0, 0], sizes = [1, 128], strides = [1, 1]} : vector<1x256xf32> to vector<1x128xf32>
    %115 = arith.truncf %114 : vector<1x128xf32> to vector<1x128xbf16>
    %116 = arith.mulf %114, %114 : vector<1x128xf32>
    %cst_30 = arith.constant dense<0.000000e+00> : vector<1xf32>
    %117 = vector.multi_reduction <add>, %116, %cst_30 [1] : vector<1x128xf32> to vector<1xf32>
    %118 = vector.shape_cast %117 : vector<1xf32> to vector<1x1xf32>
    %c0_i32_31 = arith.constant 0 : i32
    %119 = tpu.memref_slice %arg34[%c0_i32_31] : memref<5x!tpu.dma_semaphore, #tpu.memory_space<semaphore_mem>> -> memref<1x!tpu.dma_semaphore, #tpu.memory_space<semaphore_mem>>
    %120 = tpu.memref_squeeze %119 : memref<1x!tpu.dma_semaphore, #tpu.memory_space<semaphore_mem>> -> memref<!tpu.dma_semaphore, #tpu.memory_space<semaphore_mem>>
    tpu.wait_dma2 semaphore(%120 : memref<!tpu.dma_semaphore, #tpu.memory_space<semaphore_mem>>) src(%arg21 : memref<192x2048xbf16, #tpu.memory_space<any>>) dst(%arg29 : memref<192x2048xbf16, #tpu.memory_space<vmem>>)
    %c1_i32_32 = arith.constant 1 : i32
    %121 = tpu.memref_slice %arg34[%c1_i32_32] : memref<5x!tpu.dma_semaphore, #tpu.memory_space<semaphore_mem>> -> memref<1x!tpu.dma_semaphore, #tpu.memory_space<semaphore_mem>>
    %122 = tpu.memref_squeeze %121 : memref<1x!tpu.dma_semaphore, #tpu.memory_space<semaphore_mem>> -> memref<!tpu.dma_semaphore, #tpu.memory_space<semaphore_mem>>
    tpu.wait_dma2 semaphore(%122 : memref<!tpu.dma_semaphore, #tpu.memory_space<semaphore_mem>>) src(%arg22 : memref<2048x128xbf16, #tpu.memory_space<any>>) dst(%arg30 : memref<2048x128xbf16, #tpu.memory_space<vmem>>)
    %c0_33 = arith.constant 0 : index
    %c0_34 = arith.constant 0 : index
    %123 = vector.load %arg8[%c0_33, %c0_34] : memref<1x2048xf32, #tpu.memory_space<vmem>>, vector<1x2048xf32>
    %c0_35 = arith.constant 0 : index
    %c0_36 = arith.constant 0 : index
    %124 = vector.load %arg29[%c0_35, %c0_36] : memref<192x2048xbf16, #tpu.memory_space<vmem>>, vector<192x2048xbf16>
    %c0_37 = arith.constant 0 : index
    %c0_38 = arith.constant 0 : index
    %125 = vector.load %arg9[%c0_37, %c0_38] : memref<1x2048xf32, #tpu.memory_space<vmem>>, vector<1x2048xf32>
    %c0_39 = arith.constant 0 : index
    %c0_40 = arith.constant 0 : index
    %126 = vector.load %arg30[%c0_39, %c0_40] : memref<2048x128xbf16, #tpu.memory_space<vmem>>, vector<2048x128xbf16>
    %c0_41 = arith.constant 0 : index
    %c0_42 = arith.constant 0 : index
    %c0_43 = arith.constant 0 : index
    %127 = vector.load %arg6[%c0_41, %c0_42, %c0_43] : memref<3x128x192xbf16, #tpu.memory_space<vmem>>, vector<1x128x192xbf16>
    %128 = vector.shape_cast %127 : vector<1x128x192xbf16> to vector<128x192xbf16>
    %cst_44 = arith.constant dense<0.000000e+00> : vector<1x192xf32>
    %129 = tpu.matmul %115, %128, %cst_44 {dimension_numbers = #tpu.dot_dimension_numbers<[1], [0], [0], [1], [0, 0, 1, 1], [], []>} : vector<1x128xbf16>, vector<128x192xbf16>, vector<1x192xf32> -> vector<1x192xf32>
    %c0_45 = arith.constant 0 : index
    %c0_46 = arith.constant 0 : index
    %c0_47 = arith.constant 0 : index
    %130 = vector.load %arg7[%c0_45, %c0_46, %c0_47] : memref<3x1x192xf32, #tpu.memory_space<vmem>>, vector<1x1x192xf32>
    %131 = vector.shape_cast %130 : vector<1x1x192xf32> to vector<1x192xf32>
    %132 = arith.addf %129, %131 : vector<1x192xf32>
    %cst_48 = arith.constant 0.000000e+00 : f32
    %133 = vector.broadcast %cst_48 : f32 to vector<1x192xf32>
    %134 = arith.maximumf %132, %133 : vector<1x192xf32>
    %135 = arith.truncf %134 : vector<1x192xf32> to vector<1x192xbf16>
    %cst_49 = arith.constant dense<0.000000e+00> : vector<1x2048xf32>
    %136 = tpu.matmul %135, %124, %cst_49 {dimension_numbers = #tpu.dot_dimension_numbers<[1], [0], [0], [1], [0, 0, 1, 1], [], []>} : vector<1x192xbf16>, vector<192x2048xbf16>, vector<1x2048xf32> -> vector<1x2048xf32>
    %137 = arith.addf %136, %125 : vector<1x2048xf32>
    %cst_50 = arith.constant dense<0xFF800000> : vector<1xf32>
    %138 = vector.multi_reduction <maximumf>, %137, %cst_50 [1] : vector<1x2048xf32> to vector<1xf32>
    %139 = vector.shape_cast %138 : vector<1xf32> to vector<1x1xf32>
    %140 = vector.broadcast %139 : vector<1x1xf32> to vector<1x2048xf32>
    %141 = arith.subf %137, %140 : vector<1x2048xf32>
    %142 = math.exp %141 : vector<1x2048xf32>
    %cst_51 = arith.constant dense<0.000000e+00> : vector<1xf32>
    %143 = vector.multi_reduction <add>, %142, %cst_51 [1] : vector<1x2048xf32> to vector<1xf32>
    %144 = vector.shape_cast %143 : vector<1xf32> to vector<1x1xf32>
    %145 = tpu.reciprocal %144 {approx = true} : vector<1x1xf32> -> vector<1x1xf32>
    %146 = vector.broadcast %145 : vector<1x1xf32> to vector<1x2048xf32>
    %147 = arith.mulf %142, %146 : vector<1x2048xf32>
    %148 = arith.mulf %123, %147 : vector<1x2048xf32>
    %149 = arith.truncf %148 : vector<1x2048xf32> to vector<1x2048xbf16>
    %cst_52 = arith.constant dense<0.000000e+00> : vector<1x128xf32>
    %150 = tpu.matmul %149, %126, %cst_52 {dimension_numbers = #tpu.dot_dimension_numbers<[1], [0], [0], [1], [0, 0, 1, 1], [], []>} : vector<1x2048xbf16>, vector<2048x128xbf16>, vector<1x128xf32> -> vector<1x128xf32>
    %151 = arith.mulf %150, %114 : vector<1x128xf32>
    %cst_53 = arith.constant dense<0.000000e+00> : vector<1xf32>
    %152 = vector.multi_reduction <add>, %151, %cst_53 [1] : vector<1x128xf32> to vector<1xf32>
    %153 = vector.shape_cast %152 : vector<1xf32> to vector<1x1xf32>
    %154 = arith.mulf %150, %150 : vector<1x128xf32>
    %cst_54 = arith.constant dense<0.000000e+00> : vector<1xf32>
    %155 = vector.multi_reduction <add>, %154, %cst_54 [1] : vector<1x128xf32> to vector<1xf32>
    %156 = vector.shape_cast %155 : vector<1xf32> to vector<1x1xf32>
    %157 = arith.mulf %156, %118 : vector<1x1xf32>
    %158 = math.sqrt %157 : vector<1x1xf32>
    %cst_55 = arith.constant 9.99999993E-9 : f32
    %159 = vector.broadcast %cst_55 : f32 to vector<1x1xf32>
    %160 = arith.maximumf %158, %159 : vector<1x1xf32>
    %161 = tpu.reciprocal %160 {approx = true} : vector<1x1xf32> -> vector<1x1xf32>
    %162 = arith.mulf %153, %161 : vector<1x1xf32>
    %cst_56 = arith.constant 0.000000e+00 : f32
    %163 = vector.broadcast %cst_56 : f32 to vector<1x1xf32>
    %164 = arith.subf %163, %162 : vector<1x1xf32>
    %c2_i32_57 = arith.constant 2 : i32
    %165 = tpu.memref_slice %arg34[%c2_i32_57] : memref<5x!tpu.dma_semaphore, #tpu.memory_space<semaphore_mem>> -> memref<1x!tpu.dma_semaphore, #tpu.memory_space<semaphore_mem>>
    %166 = tpu.memref_squeeze %165 : memref<1x!tpu.dma_semaphore, #tpu.memory_space<semaphore_mem>> -> memref<!tpu.dma_semaphore, #tpu.memory_space<semaphore_mem>>
    tpu.wait_dma2 semaphore(%166 : memref<!tpu.dma_semaphore, #tpu.memory_space<semaphore_mem>>) src(%arg23 : memref<192x1536xbf16, #tpu.memory_space<any>>) dst(%arg31 : memref<192x1536xbf16, #tpu.memory_space<vmem>>)
    %c3_i32_58 = arith.constant 3 : i32
    %167 = tpu.memref_slice %arg34[%c3_i32_58] : memref<5x!tpu.dma_semaphore, #tpu.memory_space<semaphore_mem>> -> memref<1x!tpu.dma_semaphore, #tpu.memory_space<semaphore_mem>>
    %168 = tpu.memref_squeeze %167 : memref<1x!tpu.dma_semaphore, #tpu.memory_space<semaphore_mem>> -> memref<!tpu.dma_semaphore, #tpu.memory_space<semaphore_mem>>
    tpu.wait_dma2 semaphore(%168 : memref<!tpu.dma_semaphore, #tpu.memory_space<semaphore_mem>>) src(%arg24 : memref<1536x128xbf16, #tpu.memory_space<any>>) dst(%arg32 : memref<1536x128xbf16, #tpu.memory_space<vmem>>)
    %c0_59 = arith.constant 0 : index
    %c0_60 = arith.constant 0 : index
    %169 = vector.load %arg10[%c0_59, %c0_60] : memref<1x1536xf32, #tpu.memory_space<vmem>>, vector<1x1536xf32>
    %c0_61 = arith.constant 0 : index
    %c0_62 = arith.constant 0 : index
    %170 = vector.load %arg31[%c0_61, %c0_62] : memref<192x1536xbf16, #tpu.memory_space<vmem>>, vector<192x1536xbf16>
    %c0_63 = arith.constant 0 : index
    %c0_64 = arith.constant 0 : index
    %171 = vector.load %arg11[%c0_63, %c0_64] : memref<1x1536xf32, #tpu.memory_space<vmem>>, vector<1x1536xf32>
    %c0_65 = arith.constant 0 : index
    %c0_66 = arith.constant 0 : index
    %172 = vector.load %arg32[%c0_65, %c0_66] : memref<1536x128xbf16, #tpu.memory_space<vmem>>, vector<1536x128xbf16>
    %c1 = arith.constant 1 : index
    %c0_67 = arith.constant 0 : index
    %c0_68 = arith.constant 0 : index
    %173 = vector.load %arg6[%c1, %c0_67, %c0_68] : memref<3x128x192xbf16, #tpu.memory_space<vmem>>, vector<1x128x192xbf16>
    %174 = vector.shape_cast %173 : vector<1x128x192xbf16> to vector<128x192xbf16>
    %cst_69 = arith.constant dense<0.000000e+00> : vector<1x192xf32>
    %175 = tpu.matmul %115, %174, %cst_69 {dimension_numbers = #tpu.dot_dimension_numbers<[1], [0], [0], [1], [0, 0, 1, 1], [], []>} : vector<1x128xbf16>, vector<128x192xbf16>, vector<1x192xf32> -> vector<1x192xf32>
    %c1_70 = arith.constant 1 : index
    %c0_71 = arith.constant 0 : index
    %c0_72 = arith.constant 0 : index
    %176 = vector.load %arg7[%c1_70, %c0_71, %c0_72] : memref<3x1x192xf32, #tpu.memory_space<vmem>>, vector<1x1x192xf32>
    %177 = vector.shape_cast %176 : vector<1x1x192xf32> to vector<1x192xf32>
    %178 = arith.addf %175, %177 : vector<1x192xf32>
    %cst_73 = arith.constant 0.000000e+00 : f32
    %179 = vector.broadcast %cst_73 : f32 to vector<1x192xf32>
    %180 = arith.maximumf %178, %179 : vector<1x192xf32>
    %181 = arith.truncf %180 : vector<1x192xf32> to vector<1x192xbf16>
    %cst_74 = arith.constant dense<0.000000e+00> : vector<1x1536xf32>
    %182 = tpu.matmul %181, %170, %cst_74 {dimension_numbers = #tpu.dot_dimension_numbers<[1], [0], [0], [1], [0, 0, 1, 1], [], []>} : vector<1x192xbf16>, vector<192x1536xbf16>, vector<1x1536xf32> -> vector<1x1536xf32>
    %183 = arith.addf %182, %171 : vector<1x1536xf32>
    %cst_75 = arith.constant dense<0xFF800000> : vector<1xf32>
    %184 = vector.multi_reduction <maximumf>, %183, %cst_75 [1] : vector<1x1536xf32> to vector<1xf32>
    %185 = vector.shape_cast %184 : vector<1xf32> to vector<1x1xf32>
    %186 = vector.broadcast %185 : vector<1x1xf32> to vector<1x1536xf32>
    %187 = arith.subf %183, %186 : vector<1x1536xf32>
    %188 = math.exp %187 : vector<1x1536xf32>
    %cst_76 = arith.constant dense<0.000000e+00> : vector<1xf32>
    %189 = vector.multi_reduction <add>, %188, %cst_76 [1] : vector<1x1536xf32> to vector<1xf32>
    %190 = vector.shape_cast %189 : vector<1xf32> to vector<1x1xf32>
    %191 = tpu.reciprocal %190 {approx = true} : vector<1x1xf32> -> vector<1x1xf32>
    %192 = vector.broadcast %191 : vector<1x1xf32> to vector<1x1536xf32>
    %193 = arith.mulf %188, %192 : vector<1x1536xf32>
    %194 = arith.mulf %169, %193 : vector<1x1536xf32>
    %195 = arith.truncf %194 : vector<1x1536xf32> to vector<1x1536xbf16>
    %cst_77 = arith.constant dense<0.000000e+00> : vector<1x128xf32>
    %196 = tpu.matmul %195, %172, %cst_77 {dimension_numbers = #tpu.dot_dimension_numbers<[1], [0], [0], [1], [0, 0, 1, 1], [], []>} : vector<1x1536xbf16>, vector<1536x128xbf16>, vector<1x128xf32> -> vector<1x128xf32>
    %197 = arith.mulf %196, %114 : vector<1x128xf32>
    %cst_78 = arith.constant dense<0.000000e+00> : vector<1xf32>
    %198 = vector.multi_reduction <add>, %197, %cst_78 [1] : vector<1x128xf32> to vector<1xf32>
    %199 = vector.shape_cast %198 : vector<1xf32> to vector<1x1xf32>
    %200 = arith.mulf %196, %196 : vector<1x128xf32>
    %cst_79 = arith.constant dense<0.000000e+00> : vector<1xf32>
    %201 = vector.multi_reduction <add>, %200, %cst_79 [1] : vector<1x128xf32> to vector<1xf32>
    %202 = vector.shape_cast %201 : vector<1xf32> to vector<1x1xf32>
    %203 = arith.mulf %202, %118 : vector<1x1xf32>
    %204 = math.sqrt %203 : vector<1x1xf32>
    %cst_80 = arith.constant 9.99999993E-9 : f32
    %205 = vector.broadcast %cst_80 : f32 to vector<1x1xf32>
    %206 = arith.maximumf %204, %205 : vector<1x1xf32>
    %207 = tpu.reciprocal %206 {approx = true} : vector<1x1xf32> -> vector<1x1xf32>
    %208 = arith.mulf %199, %207 : vector<1x1xf32>
    %cst_81 = arith.constant 0.000000e+00 : f32
    %209 = vector.broadcast %cst_81 : f32 to vector<1x1xf32>
    %210 = arith.subf %209, %208 : vector<1x1xf32>
    %c0_82 = arith.constant 0 : index
    %c0_83 = arith.constant 0 : index
    %211 = vector.load %arg12[%c0_82, %c0_83] : memref<1x256xf32, #tpu.memory_space<vmem>>, vector<1x256xf32>
    %c0_84 = arith.constant 0 : index
    %c0_85 = arith.constant 0 : index
    %212 = vector.load %arg14[%c0_84, %c0_85] : memref<192x256xbf16, #tpu.memory_space<vmem>>, vector<192x256xbf16>
    %c0_86 = arith.constant 0 : index
    %c0_87 = arith.constant 0 : index
    %213 = vector.load %arg15[%c0_86, %c0_87] : memref<1x256xf32, #tpu.memory_space<vmem>>, vector<1x256xf32>
    %c0_88 = arith.constant 0 : index
    %c0_89 = arith.constant 0 : index
    %214 = vector.load %arg13[%c0_88, %c0_89] : memref<256x128xbf16, #tpu.memory_space<vmem>>, vector<256x128xbf16>
    %c2 = arith.constant 2 : index
    %c0_90 = arith.constant 0 : index
    %c0_91 = arith.constant 0 : index
    %215 = vector.load %arg6[%c2, %c0_90, %c0_91] : memref<3x128x192xbf16, #tpu.memory_space<vmem>>, vector<1x128x192xbf16>
    %216 = vector.shape_cast %215 : vector<1x128x192xbf16> to vector<128x192xbf16>
    %cst_92 = arith.constant dense<0.000000e+00> : vector<1x192xf32>
    %217 = tpu.matmul %115, %216, %cst_92 {dimension_numbers = #tpu.dot_dimension_numbers<[1], [0], [0], [1], [0, 0, 1, 1], [], []>} : vector<1x128xbf16>, vector<128x192xbf16>, vector<1x192xf32> -> vector<1x192xf32>
    %c2_93 = arith.constant 2 : index
    %c0_94 = arith.constant 0 : index
    %c0_95 = arith.constant 0 : index
    %218 = vector.load %arg7[%c2_93, %c0_94, %c0_95] : memref<3x1x192xf32, #tpu.memory_space<vmem>>, vector<1x1x192xf32>
    %219 = vector.shape_cast %218 : vector<1x1x192xf32> to vector<1x192xf32>
    %220 = arith.addf %217, %219 : vector<1x192xf32>
    %cst_96 = arith.constant 0.000000e+00 : f32
    %221 = vector.broadcast %cst_96 : f32 to vector<1x192xf32>
    %222 = arith.maximumf %220, %221 : vector<1x192xf32>
    %223 = arith.truncf %222 : vector<1x192xf32> to vector<1x192xbf16>
    %cst_97 = arith.constant dense<0.000000e+00> : vector<1x256xf32>
    %224 = tpu.matmul %223, %212, %cst_97 {dimension_numbers = #tpu.dot_dimension_numbers<[1], [0], [0], [1], [0, 0, 1, 1], [], []>} : vector<1x192xbf16>, vector<192x256xbf16>, vector<1x256xf32> -> vector<1x256xf32>
    %225 = arith.addf %224, %213 : vector<1x256xf32>
    %cst_98 = arith.constant dense<0xFF800000> : vector<1xf32>
    %226 = vector.multi_reduction <maximumf>, %225, %cst_98 [1] : vector<1x256xf32> to vector<1xf32>
    %227 = vector.shape_cast %226 : vector<1xf32> to vector<1x1xf32>
    %228 = vector.broadcast %227 : vector<1x1xf32> to vector<1x256xf32>
    %229 = arith.subf %225, %228 : vector<1x256xf32>
    %230 = math.exp %229 : vector<1x256xf32>
    %cst_99 = arith.constant dense<0.000000e+00> : vector<1xf32>
    %231 = vector.multi_reduction <add>, %230, %cst_99 [1] : vector<1x256xf32> to vector<1xf32>
    %232 = vector.shape_cast %231 : vector<1xf32> to vector<1x1xf32>
    %233 = tpu.reciprocal %232 {approx = true} : vector<1x1xf32> -> vector<1x1xf32>
    %234 = vector.broadcast %233 : vector<1x1xf32> to vector<1x256xf32>
    %235 = arith.mulf %230, %234 : vector<1x256xf32>
    %236 = arith.mulf %211, %235 : vector<1x256xf32>
    %237 = arith.truncf %236 : vector<1x256xf32> to vector<1x256xbf16>
    %cst_100 = arith.constant dense<0.000000e+00> : vector<1x128xf32>
    %238 = tpu.matmul %237, %214, %cst_100 {dimension_numbers = #tpu.dot_dimension_numbers<[1], [0], [0], [1], [0, 0, 1, 1], [], []>} : vector<1x256xbf16>, vector<256x128xbf16>, vector<1x128xf32> -> vector<1x128xf32>
    %239 = arith.mulf %238, %114 : vector<1x128xf32>
    %cst_101 = arith.constant dense<0.000000e+00> : vector<1xf32>
    %240 = vector.multi_reduction <add>, %239, %cst_101 [1] : vector<1x128xf32> to vector<1xf32>
    %241 = vector.shape_cast %240 : vector<1xf32> to vector<1x1xf32>
    %242 = arith.mulf %238, %238 : vector<1x128xf32>
    %cst_102 = arith.constant dense<0.000000e+00> : vector<1xf32>
    %243 = vector.multi_reduction <add>, %242, %cst_102 [1] : vector<1x128xf32> to vector<1xf32>
    %244 = vector.shape_cast %243 : vector<1xf32> to vector<1x1xf32>
    %245 = arith.mulf %244, %118 : vector<1x1xf32>
    %246 = math.sqrt %245 : vector<1x1xf32>
    %cst_103 = arith.constant 9.99999993E-9 : f32
    %247 = vector.broadcast %cst_103 : f32 to vector<1x1xf32>
    %248 = arith.maximumf %246, %247 : vector<1x1xf32>
    %249 = tpu.reciprocal %248 {approx = true} : vector<1x1xf32> -> vector<1x1xf32>
    %250 = arith.mulf %241, %249 : vector<1x1xf32>
    %cst_104 = arith.constant 0.000000e+00 : f32
    %251 = vector.broadcast %cst_104 : f32 to vector<1x1xf32>
    %252 = arith.subf %251, %250 : vector<1x1xf32>
    %253 = arith.addf %164, %210 : vector<1x1xf32>
    %254 = arith.addf %253, %252 : vector<1x1xf32>
    %cst_105 = arith.constant 0.333333343 : f32
    %255 = vector.broadcast %cst_105 : f32 to vector<1x1xf32>
    %256 = arith.mulf %254, %255 : vector<1x1xf32>
    %c0_106 = arith.constant 0 : index
    %c0_107 = arith.constant 0 : index
    %257 = vector.load %arg28[%c0_106, %c0_107] : memref<1x1xf32, #tpu.memory_space<vmem>>, vector<1x1xf32>
    tpu.vector_store %arg28[%c0_106, %c0_107], %256 {strides = array<i32>} : memref<1x1xf32, #tpu.memory_space<vmem>>, vector<1x1xf32>,
    %258 = arith.truncf %113 : vector<1x256xf32> to vector<1x256xbf16>
    %c0_108 = arith.constant 0 : index
    %c0_109 = arith.constant 0 : index
    %259 = vector.load %arg16[%c0_108, %c0_109] : memref<256x64xbf16, #tpu.memory_space<vmem>>, vector<256x64xbf16>
    %cst_110 = arith.constant dense<0.000000e+00> : vector<1x64xf32>
    %260 = tpu.matmul %258, %259, %cst_110 {dimension_numbers = #tpu.dot_dimension_numbers<[1], [0], [0], [1], [0, 0, 1, 1], [], []>} : vector<1x256xbf16>, vector<256x64xbf16>, vector<1x64xf32> -> vector<1x64xf32>
    %c0_111 = arith.constant 0 : index
    %c0_112 = arith.constant 0 : index
    %261 = vector.load %arg17[%c0_111, %c0_112] : memref<1x64xf32, #tpu.memory_space<vmem>>, vector<1x64xf32>
    %262 = arith.addf %260, %261 : vector<1x64xf32>
    %cst_113 = arith.constant 0.000000e+00 : f32
    %263 = vector.broadcast %cst_113 : f32 to vector<1x64xf32>
    %264 = arith.maximumf %262, %263 : vector<1x64xf32>
    %265 = arith.truncf %264 : vector<1x64xf32> to vector<1x64xbf16>
    %c0_114 = arith.constant 0 : index
    %c0_115 = arith.constant 0 : index
    %266 = vector.load %arg18[%c0_114, %c0_115] : memref<64x256xbf16, #tpu.memory_space<vmem>>, vector<64x256xbf16>
    %cst_116 = arith.constant dense<0.000000e+00> : vector<1x256xf32>
    %267 = tpu.matmul %265, %266, %cst_116 {dimension_numbers = #tpu.dot_dimension_numbers<[1], [0], [0], [1], [0, 0, 1, 1], [], []>} : vector<1x64xbf16>, vector<64x256xbf16>, vector<1x256xf32> -> vector<1x256xf32>
    %c0_117 = arith.constant 0 : index
    %c0_118 = arith.constant 0 : index
    %268 = vector.load %arg19[%c0_117, %c0_118] : memref<1x256xf32, #tpu.memory_space<vmem>>, vector<1x256xf32>
    %269 = arith.addf %267, %268 : vector<1x256xf32>
    %c0_119 = arith.constant 0 : index
    %c0_120 = arith.constant 0 : index
    %270 = vector.load %arg26[%c0_119, %c0_120] : memref<1x256xf32, #tpu.memory_space<vmem>>, vector<1x256xf32>
    tpu.vector_store %arg26[%c0_119, %c0_120], %269 {strides = array<i32>} : memref<1x256xf32, #tpu.memory_space<vmem>>, vector<1x256xf32>,
    %271 = arith.negf %269 : vector<1x256xf32>
    %272 = math.exp %271 : vector<1x256xf32>
    %cst_121 = arith.constant 1.000000e+00 : f32
    %273 = vector.broadcast %cst_121 : f32 to vector<1x256xf32>
    %274 = arith.addf %273, %272 : vector<1x256xf32>
    %275 = arith.divf %273, %274 : vector<1x256xf32>
    %c4_i32_122 = arith.constant 4 : i32
    %276 = tpu.memref_slice %arg34[%c4_i32_122] : memref<5x!tpu.dma_semaphore, #tpu.memory_space<semaphore_mem>> -> memref<1x!tpu.dma_semaphore, #tpu.memory_space<semaphore_mem>>
    %277 = tpu.memref_squeeze %276 : memref<1x!tpu.dma_semaphore, #tpu.memory_space<semaphore_mem>> -> memref<!tpu.dma_semaphore, #tpu.memory_space<semaphore_mem>>
    tpu.wait_dma2 semaphore(%277 : memref<!tpu.dma_semaphore, #tpu.memory_space<semaphore_mem>>) src(%arg25 : memref<256x256xf32, #tpu.memory_space<any>>) dst(%arg33 : memref<256x256xf32, #tpu.memory_space<vmem>>)
    %cst_123 = arith.constant dense<0.000000e+00> : vector<256x256xf32>
    %278 = tpu.matmul %275, %275, %cst_123 {dimension_numbers = #tpu.dot_dimension_numbers<[0], [0], [1], [1], [0, 1, 1, 1], [], []>} : vector<1x256xf32>, vector<1x256xf32>, vector<256x256xf32> -> vector<256x256xf32>
    %279 = vector.extract_strided_slice %278 {offsets = [0, 0], sizes = [136, 256], strides = [1, 1]} : vector<256x256xf32> to vector<136x256xf32>
    %c0_124 = arith.constant 0 : index
    %c0_125 = arith.constant 0 : index
    %280 = vector.load %arg33[%c0_124, %c0_125] : memref<256x256xf32, #tpu.memory_space<vmem>>, vector<136x256xf32>
    %cst_126 = arith.constant 0.000000e+00 : f32
    %281 = vector.broadcast %cst_126 : f32 to vector<136x256xf32>
    %282 = arith.cmpf ogt, %280, %281 : vector<136x256xf32>
    %283 = arith.mulf %279, %280 : vector<136x256xf32>
    %284 = arith.negf %283 : vector<136x256xf32>
    %285 = math.exp %284 : vector<136x256xf32>
    %cst_127 = arith.constant 1.000000e+00 : f32
    %286 = vector.broadcast %cst_127 : f32 to vector<136x256xf32>
    %287 = arith.addf %286, %285 : vector<136x256xf32>
    %288 = arith.divf %286, %287 : vector<136x256xf32>
    %cst_128 = arith.constant 0.000000e+00 : f32
    %289 = vector.broadcast %cst_128 : f32 to vector<136x256xf32>
    %290 = arith.select %282, %288, %289 : vector<136x256xi1>, vector<136x256xf32>
    %291 = vector.shape_cast %290 : vector<136x256xf32> to vector<1x136x256xf32>
    %cst_129 = arith.constant dense<0.000000e+00> : vector<1xf32>
    %292 = vector.multi_reduction <add>, %291, %cst_129 [1, 2] : vector<1x136x256xf32> to vector<1xf32>
    %293 = vector.shape_cast %292 : vector<1xf32> to vector<1x1x1xf32>
    %294 = vector.extract %293[0, 0, 0] : f32 from vector<1x1x1xf32>
    %295 = vector.broadcast %294 : f32 to vector<1x1xf32>
    %c0_130 = arith.constant 0 : index
    %c0_131 = arith.constant 0 : index
    %296 = vector.load %arg20[%c0_130, %c0_131] : memref<1x1xf32, #tpu.memory_space<vmem>>, vector<1x1xf32>
    %297 = arith.addf %295, %296 : vector<1x1xf32>
    %c0_132 = arith.constant 0 : index
    %c0_133 = arith.constant 0 : index
    %298 = vector.load %arg27[%c0_132, %c0_133] : memref<1x1xf32, #tpu.memory_space<vmem>>, vector<1x1xf32>
    tpu.vector_store %arg27[%c0_132, %c0_133], %297 {strides = array<i32>} : memref<1x1xf32, #tpu.memory_space<vmem>>, vector<1x1xf32>,
    return
  }
  func.func @transform_0(%arg0: i32) -> (i32, i32) {
    %c0_i32 = arith.constant 0 : i32
    %c0_i32_0 = arith.constant 0 : i32
    %c0_i32_1 = arith.constant 0 : i32
    return %c0_i32, %c0_i32_0 : i32, i32
  }
  func.func @transform_1(%arg0: i32) -> (i32, i32) {
    %c0_i32 = arith.constant 0 : i32
    %c0_i32_0 = arith.constant 0 : i32
    %c0_i32_1 = arith.constant 0 : i32
    return %c0_i32, %c0_i32_0 : i32, i32
  }
  func.func @transform_2(%arg0: i32) -> (i32, i32) {
    %c0_i32 = arith.constant 0 : i32
    %c0_i32_0 = arith.constant 0 : i32
    %c0_i32_1 = arith.constant 0 : i32
    return %c0_i32, %c0_i32_0 : i32, i32
  }
  func.func @transform_3(%arg0: i32) -> (i32, i32) {
    %c0_i32 = arith.constant 0 : i32
    %c0_i32_0 = arith.constant 0 : i32
    %c0_i32_1 = arith.constant 0 : i32
    return %c0_i32, %c0_i32_0 : i32, i32
  }
  func.func @transform_4(%arg0: i32) -> (i32, i32) {
    %c0_i32 = arith.constant 0 : i32
    %c0_i32_0 = arith.constant 0 : i32
    %c0_i32_1 = arith.constant 0 : i32
    return %c0_i32, %c0_i32_0 : i32, i32
  }
  func.func @transform_5(%arg0: i32) -> (i32, i32, i32) {
    %c0_i32 = arith.constant 0 : i32
    %c0_i32_0 = arith.constant 0 : i32
    %c0_i32_1 = arith.constant 0 : i32
    %c0_i32_2 = arith.constant 0 : i32
    return %c0_i32, %c0_i32_0, %c0_i32_1 : i32, i32, i32
  }
  func.func @transform_6(%arg0: i32) -> (i32, i32, i32) {
    %c0_i32 = arith.constant 0 : i32
    %c0_i32_0 = arith.constant 0 : i32
    %c0_i32_1 = arith.constant 0 : i32
    %c0_i32_2 = arith.constant 0 : i32
    return %c0_i32, %c0_i32_0, %c0_i32_1 : i32, i32, i32
  }
  func.func @transform_7(%arg0: i32) -> (i32, i32) {
    %c0_i32 = arith.constant 0 : i32
    %c0_i32_0 = arith.constant 0 : i32
    %c0_i32_1 = arith.constant 0 : i32
    return %c0_i32, %c0_i32_0 : i32, i32
  }
  func.func @transform_8(%arg0: i32) -> (i32, i32) {
    %c0_i32 = arith.constant 0 : i32
    %c0_i32_0 = arith.constant 0 : i32
    %c0_i32_1 = arith.constant 0 : i32
    return %c0_i32, %c0_i32_0 : i32, i32
  }
  func.func @transform_9(%arg0: i32) -> (i32, i32) {
    %c0_i32 = arith.constant 0 : i32
    %c0_i32_0 = arith.constant 0 : i32
    %c0_i32_1 = arith.constant 0 : i32
    return %c0_i32, %c0_i32_0 : i32, i32
  }
  func.func @transform_10(%arg0: i32) -> (i32, i32) {
    %c0_i32 = arith.constant 0 : i32
    %c0_i32_0 = arith.constant 0 : i32
    %c0_i32_1 = arith.constant 0 : i32
    return %c0_i32, %c0_i32_0 : i32, i32
  }
  func.func @transform_11(%arg0: i32) -> (i32, i32) {
    %c0_i32 = arith.constant 0 : i32
    %c0_i32_0 = arith.constant 0 : i32
    %c0_i32_1 = arith.constant 0 : i32
    return %c0_i32, %c0_i32_0 : i32, i32
  }
  func.func @transform_12(%arg0: i32) -> (i32, i32) {
    %c0_i32 = arith.constant 0 : i32
    %c0_i32_0 = arith.constant 0 : i32
    %c0_i32_1 = arith.constant 0 : i32
    return %c0_i32, %c0_i32_0 : i32, i32
  }
  func.func @transform_13(%arg0: i32) -> (i32, i32) {
    %c0_i32 = arith.constant 0 : i32
    %c0_i32_0 = arith.constant 0 : i32
    %c0_i32_1 = arith.constant 0 : i32
    return %c0_i32, %c0_i32_0 : i32, i32
  }
  func.func @transform_14(%arg0: i32) -> (i32, i32) {
    %c0_i32 = arith.constant 0 : i32
    %c0_i32_0 = arith.constant 0 : i32
    %c0_i32_1 = arith.constant 0 : i32
    return %c0_i32, %c0_i32_0 : i32, i32
  }
  func.func @transform_15(%arg0: i32) -> (i32, i32) {
    %c0_i32 = arith.constant 0 : i32
    %c0_i32_0 = arith.constant 0 : i32
    %c0_i32_1 = arith.constant 0 : i32
    return %c0_i32, %c0_i32_0 : i32, i32
  }
  func.func @transform_16(%arg0: i32) -> (i32, i32) {
    %c0_i32 = arith.constant 0 : i32
    %c0_i32_0 = arith.constant 0 : i32
    %c0_i32_1 = arith.constant 0 : i32
    return %c0_i32, %c0_i32_0 : i32, i32
  }
  func.func @transform_17(%arg0: i32) -> (i32, i32) {
    %c0_i32 = arith.constant 0 : i32
    %c0_i32_0 = arith.constant 0 : i32
    %c0_i32_1 = arith.constant 0 : i32
    return %c0_i32, %c0_i32_0 : i32, i32
  }
  func.func @transform_18(%arg0: i32) -> (i32, i32) {
    %c0_i32 = arith.constant 0 : i32
    %c0_i32_0 = arith.constant 0 : i32
    %c0_i32_1 = arith.constant 0 : i32
    return %c0_i32, %c0_i32_0 : i32, i32
  }
  func.func @transform_19(%arg0: i32) -> (i32, i32) {
    %c0_i32 = arith.constant 0 : i32
    %c0_i32_0 = arith.constant 0 : i32
    %c0_i32_1 = arith.constant 0 : i32
    return %c0_i32, %c0_i32_0 : i32, i32
  }
  func.func @transform_25(%arg0: i32) -> (i32, i32) {
    %c0_i32 = arith.constant 0 : i32
    %c0_i32_0 = arith.constant 0 : i32
    %c0_i32_1 = arith.constant 0 : i32
    return %c0_i32, %c0_i32_0 : i32, i32
  }
  func.func @transform_26(%arg0: i32) -> (i32, i32) {
    %c0_i32 = arith.constant 0 : i32
    %c0_i32_0 = arith.constant 0 : i32
    %c0_i32_1 = arith.constant 0 : i32
    return %c0_i32, %c0_i32_0 : i32, i32
  }
  func.func @transform_27(%arg0: i32) -> (i32, i32) {
    %c0_i32 = arith.constant 0 : i32
    %c0_i32_0 = arith.constant 0 : i32
    %c0_i32_1 = arith.constant 0 : i32
    return %c0_i32, %c0_i32_0 : i32, i32
  }
}

</mosaic_0001>

<bundles_post_ra>
// kernel: tpu_custom_call.1
= control target key start
LH: loop header
LB: loop body
LE: loop exit
PB: predicated region body
PF: predicated region fallthrough
CT: control target
= control target key end

     0   :  { %s10964_s0 = inlined_call_operand.hbm [shape: f32[3,192], index: 0, kind: input, shape index: {}]   ;;  %s10965_s1 = inlined_call_operand.hbm [shape: bf16[192,768], index: 1, kind: input, shape index: {}]   ;;  %s10966_s2 = inlined_call_operand.vmem [shape: bf16[256,768], index: 2, kind: input, shape index: {}]   ;;  %s10967_s3 = inlined_call_operand.hbm [shape: f32[1,768], index: 3, kind: input, shape index: {}]   ;;  %s10968_s4 = inlined_call_operand.hbm [shape: f32[1,768], index: 4, kind: input, shape index: {}]   ;;  %s10969_s5 = inlined_call_operand.vmem [shape: bf16[3,128,192], index: 5, kind: input, shape index: {}]   ;;  %s10970_s6 = inlined_call_operand.hbm [shape: f32[3,1,192], index: 6, kind: input, shape index: {}]   ;;  %s10971_s7 = inlined_call_operand.hbm [shape: f32[1,2048], index: 7, kind: input, shape index: {}]   ;;  %s10972_s8 = inlined_call_operand.hbm [shape: f32[1,2048], index: 8, kind: input, shape index: {}]   ;;  %s10973_s9 = inlined_call_operand.hbm [shape: f32[1,1536], index: 9, kind: input, shape index: {}]   ;;  %s10974_s10 = inlined_call_operand.hbm [shape: f32[1,1536], index: 10, kind: input, shape index: {}]   ;;  %s10975_s11 = inlined_call_operand.vmem [shape: f32[1,256], index: 11, kind: input, shape index: {}]   ;;  %s10976_s12 = inlined_call_operand.vmem [shape: bf16[256,128], index: 12, kind: input, shape index: {}]   ;;  %s10977_s13 = inlined_call_operand.hbm [shape: bf16[192,256], index: 13, kind: input, shape index: {}]   ;;  %s10978_s14 = inlined_call_operand.vmem [shape: f32[1,256], index: 14, kind: input, shape index: {}]   ;;  %s10979_s15 = inlined_call_operand.vmem [shape: bf16[256,64], index: 15, kind: input, shape index: {}]   ;;  %s10980_s16 = inlined_call_operand.vmem [shape: f32[1,64], index: 16, kind: input, shape index: {}]   ;;  %s10981_s17 = inlined_call_operand.hbm [shape: bf16[64,256], index: 17, kind: input, shape index: {}]   ;;  %s10982_s18 = inlined_call_operand.vmem [shape: f32[1,256], index: 18, kind: input, shape index: {}]   ;;  %s10983_s19 = inlined_call_operand.<no memory space> [shape: f32[1,1], index: 19, kind: input, shape index: {}]   ;;  %s10984_s20 = inlined_call_operand.hbm [shape: bf16[192,2048], index: 20, kind: input, shape index: {}]   ;;  %s10985_s21 = inlined_call_operand.hbm [shape: bf16[2048,128], index: 21, kind: input, shape index: {}]   ;;  %s10986_s22 = inlined_call_operand.hbm [shape: bf16[192,1536], index: 22, kind: input, shape index: {}]   ;;  %s10987_s23 = inlined_call_operand.hbm [shape: bf16[1536,128], index: 23, kind: input, shape index: {}]   ;;  %s10988_s24 = inlined_call_operand.hbm [shape: f32[256,256], index: 24, kind: input, shape index: {}]   ;;  %s10989_s25 = inlined_call_operand.hbm [shape: f32[1,256], index: 25, kind: output, shape index: {0}]   ;;  %s10990_s26 = inlined_call_operand.hbm [shape: f32[1,1], index: 26, kind: output, shape index: {1}]   ;;  %s10991_s27 = inlined_call_operand.hbm [shape: f32[1,1], index: 27, kind: output, shape index: {2}]  }
   0x1   :  { %11122 = sst [smem:[#allocation124_spill]] %s10964_s0  ;;  %v33_v0 = vstv %s10983_s19 }
   0x2   :  { %11123 = sst [smem:[#allocation125_spill]] %s10965_s1  ;;  %34 = vst [vmem:[#allocation8] sm:$0x1] %v33_v0 }
   0x3   :  { %11124 = sst [smem:[#allocation126_spill]] %s10966_s2 }
   0x4   :  { %11125 = sst [smem:[#allocation127_spill]] %s10967_s3 }
   0x5   :  { %11126 = sst [smem:[#allocation128_spill]] %s10968_s4 }
   0x6   :  { %11127 = sst [smem:[#allocation129_spill]] %s10969_s5 }
   0x7   :  { %11128 = sst [smem:[#allocation130_spill]] %s10970_s6 }
   0x8   :  { %11129 = sst [smem:[#allocation131_spill]] %s10971_s7 }
   0x9   :  { %11130 = sst [smem:[#allocation132_spill]] %s10972_s8 }
   0xa   :  { %11131 = sst [smem:[#allocation133_spill]] %s10973_s9 }
   0xb   :  { %11132 = sst [smem:[#allocation134_spill]] %s10974_s10 }
   0xc   :  { %11133 = sst [smem:[#allocation135_spill]] %s10975_s11 }
   0xd   :  { %11134 = sst [smem:[#allocation136_spill]] %s10990_s26 }
   0xe   :  { %11135 = sst [smem:[#allocation137_spill]] %s10991_s27 }
   0xf   :  { %35 = vsyncpa [#allocation10], 0 }
  0x10   :  { %36 = vsyncpa [#allocation13], 0 }
  0x11   :  { %37 = vsyncpa [#allocation16], 0 }
  0x12   :  { %38 = vsyncpa [#allocation19], 0 }
  0x13   :  { %39 = vsyncpa [#allocation22], 0 }
  0x14   :  { %40 = vsyncpa [#allocation25], 0 }
  0x15   :  { %41 = vsyncpa [#allocation11], 0 }
  0x16   :  { %42 = vsyncpa [#allocation29], 0  ;;  %s8605_s8 = smov [#allocation12]   ;;  %s11136_s28 = sld [smem:[#allocation125_spill]] }
  0x17   :  { %s58_s30 = sshll.u32 %s8605_s8, 4  ;;  %s59_s30 = int_to_ptr.vmem [resolvable:$true] %s58_s30 }
  0x1c   :  { %s8205_s0 = scalar_lea.hbm %s11136_s28, 9216 }
  0x1d   :  { %p8206_p0 = scmp.ne.s32.totalorder %s11136_s28, %s8205_s0  ;;  %p8209_p1 = scmp.lt.u32.totalorder %s8205_s0, %s11136_s28 }
  0x1f   :  { %p8211_p2 = pnand %p8209_p1, %p8206_p0 }
  0x21   :  { %8214 = shalt.err (!%p8211_p2)
}
  0x22   :  { %s8215_s6 = scalar_lea.vmem %s59_s30, 9216  ;;  %p8220_p4 = scmp.lt.s32.totalorder %s59_s30, %s59_s30 }
  0x23   :  { %p8216_p3 = scmp.ne.s32.totalorder %s59_s30, %s8215_s6  ;;  %p8221_p5 = scmp.lt.s32.totalorder %s8215_s6, %s8215_s6 }
  0x25   :  { %p8222_p6 = por %p8221_p5, %p8220_p4 }
  0x27   :  { %p8223_p7 = pnand %p8222_p6, %p8216_p3 }
  0x29   :  { %8226 = shalt.err (!%p8223_p7)
}
  0x2a   :  { %s8606_s11 = smov 384   ;;  %s8607_s2 = smov 24  }
  0x2b   :  { %64 = dma.hbm_to_vmem [thread:$0]  %s11136_s28, 9216, %s59_s30, [#allocation13], %s8606_s11, %s8606_s11, %s8607_s2  }
  0x2c   :  { %s8608_s4 = smov [#allocation15]   ;;  %s8609_s9 = smov [#allocation18]  }
  0x2d   :  { %s83_s8 = sshll.u32 %s8608_s4, 4  ;;  %s107_s5 = sshll.u32 %s8609_s9, 4  ;;  %s84_s8 = int_to_ptr.vmem [resolvable:$true] %s83_s8  ;;  %s108_s5 = int_to_ptr.vmem [resolvable:$true] %s107_s5 }
  0x2e   :  { %s11137_s29 = sld [smem:[#allocation128_spill]] }
  0x34   :  { %s8227_s19 = scalar_lea.hbm %s11137_s29, 96 }
  0x35   :  { %p8228_p8 = scmp.ne.s32.totalorder %s11137_s29, %s8227_s19  ;;  %p8231_p9 = scmp.lt.u32.totalorder %s8227_s19, %s11137_s29 }
  0x37   :  { %p8233_p10 = pnand %p8231_p9, %p8228_p8 }
  0x39   :  { %8236 = shalt.err (!%p8233_p10)
}
  0x3a   :  { %s8237_s30 = scalar_lea.vmem %s84_s8, 96  ;;  %p8242_p12 = scmp.lt.s32.totalorder %s84_s8, %s84_s8 }
  0x3b   :  { %p8238_p11 = scmp.ne.s32.totalorder %s84_s8, %s8237_s30  ;;  %p8243_p13 = scmp.lt.s32.totalorder %s8237_s30, %s8237_s30 }
  0x3d   :  { %p8244_p0 = por %p8243_p13, %p8242_p12 }
  0x3f   :  { %p8245_p1 = pnand %p8244_p0, %p8238_p11 }
  0x41   :  { %8248 = shalt.err (!%p8245_p1)
}
  0x42   :  { %86 = dma.hbm_to_vmem [thread:$0]  %s11137_s29, 96, %s84_s8, [#allocation16]  }
  0x43   :  { %s11138_s7 = sld [smem:[#allocation131_spill]] }
  0x49   :  { %s8249_s4 = scalar_lea.hbm %s11138_s7, 256 }
  0x4a   :  { %p8250_p2 = scmp.ne.s32.totalorder %s11138_s7, %s8249_s4  ;;  %p8253_p3 = scmp.lt.u32.totalorder %s8249_s4, %s11138_s7 }
  0x4c   :  { %p8255_p4 = pnand %p8253_p3, %p8250_p2 }
  0x4e   :  { %8258 = shalt.err (!%p8255_p4)
}
  0x4f   :  { %s8259_s10 = scalar_lea.vmem %s108_s5, 256  ;;  %p8264_p6 = scmp.lt.s32.totalorder %s108_s5, %s108_s5 }
  0x50   :  { %p8260_p5 = scmp.ne.s32.totalorder %s108_s5, %s8259_s10  ;;  %p8265_p7 = scmp.lt.s32.totalorder %s8259_s10, %s8259_s10 }
  0x52   :  { %p8266_p8 = por %p8265_p7, %p8264_p6 }
  0x54   :  { %p8267_p9 = pnand %p8266_p8, %p8260_p5 }
  0x56   :  { %8270 = shalt.err (!%p8267_p9)
}
  0x57   :  { %110 = dma.hbm_to_vmem [thread:$0]  %s11138_s7, 256, %s108_s5, [#allocation19]  }
  0x58   :  { %s8610_s19 = smov [#allocation21]   ;;  %s8611_s6 = smov [#allocation24]  }
  0x59   :  { %s127_s1 = sshll.u32 %s8610_s19, 4  ;;  %s150_s30 = sshll.u32 %s8611_s6, 4  ;;  %s128_s1 = int_to_ptr.vmem [resolvable:$true] %s127_s1  ;;  %s151_s30 = int_to_ptr.vmem [resolvable:$true] %s150_s30 }
  0x5a   :  { %s11139_s2 = sld [smem:[#allocation133_spill]] }
  0x60   :  { %s8271_s3 = scalar_lea.hbm %s11139_s2, 192 }
  0x61   :  { %p8272_p10 = scmp.ne.s32.totalorder %s11139_s2, %s8271_s3  ;;  %p8275_p11 = scmp.lt.u32.totalorder %s8271_s3, %s11139_s2 }
  0x63   :  { %p8277_p12 = pnand %p8275_p11, %p8272_p10 }
  0x65   :  { %8280 = shalt.err (!%p8277_p12)
}
  0x66   :  { %s8281_s5 = scalar_lea.vmem %s128_s1, 192  ;;  %p8286_p0 = scmp.lt.s32.totalorder %s128_s1, %s128_s1 }
  0x67   :  { %p8282_p13 = scmp.ne.s32.totalorder %s128_s1, %s8281_s5  ;;  %p8287_p1 = scmp.lt.s32.totalorder %s8281_s5, %s8281_s5 }
  0x69   :  { %p8288_p2 = por %p8287_p1, %p8286_p0 }
  0x6b   :  { %p8289_p3 = pnand %p8288_p2, %p8282_p13 }
  0x6d   :  { %8292 = shalt.err (!%p8289_p3)
}
  0x6e   :  { %130 = dma.hbm_to_vmem [thread:$0]  %s11139_s2, 192, %s128_s1, [#allocation22]  }
  0x6f   :  { %s8293_s29 = scalar_lea.hbm %s10977_s13, 3072 }
  0x70   :  { %p8294_p4 = scmp.ne.s32.totalorder %s10977_s13, %s8293_s29  ;;  %p8297_p5 = scmp.lt.u32.totalorder %s8293_s29, %s10977_s13 }
  0x72   :  { %p8299_p6 = pnand %p8297_p5, %p8294_p4 }
  0x74   :  { %8302 = shalt.err (!%p8299_p6)
}
  0x75   :  { %s8303_s3 = scalar_lea.vmem %s151_s30, 3072  ;;  %p8308_p8 = scmp.lt.s32.totalorder %s151_s30, %s151_s30 }
  0x76   :  { %p8304_p7 = scmp.ne.s32.totalorder %s151_s30, %s8303_s3  ;;  %p8309_p9 = scmp.lt.s32.totalorder %s8303_s3, %s8303_s3 }
  0x78   :  { %p8310_p10 = por %p8309_p9, %p8308_p8 }
  0x7a   :  { %p8311_p11 = pnand %p8310_p10, %p8304_p7 }
  0x7c   :  { %8314 = shalt.err (!%p8311_p11)
}
  0x7d   :  { %s11005_s1 = smov 128   ;;  %s8613_s2 = smov 8  }
  0x7e   :  { %156 = dma.hbm_to_vmem [thread:$0]  %s10977_s13, 3072, %s151_s30, [#allocation25], %s11005_s1, %s11005_s1, %s8613_s2  }
  0x7f   :  { %s8614_s27 = smov [#allocation9]   ;;  %s8615_s5 = smov [#allocation14]  }
  0x80   :  { %s49_s9 = sshll.u32 %s8614_s27, 4  ;;  %s73_s7 = sshll.u32 %s8615_s5, 4  ;;  %s50_s9 = int_to_ptr.vmem [resolvable:$true] %s49_s9  ;;  %s74_s7 = int_to_ptr.vmem [resolvable:$true] %s73_s7 }
  0x81   :  { %s11140_s8 = sld [smem:[#allocation124_spill]] }
  0x87   :  { %s8315_s29 = scalar_lea.hbm %s11140_s8, 128 }
  0x88   :  { %p8316_p12 = scmp.ne.s32.totalorder %s11140_s8, %s8315_s29  ;;  %p8319_p13 = scmp.lt.u32.totalorder %s8315_s29, %s11140_s8 }
  0x8a   :  { %p8321_p0 = pnand %p8319_p13, %p8316_p12 }
  0x8c   :  { %8324 = shalt.err (!%p8321_p0)
}
  0x8d   :  { %s8325_s13 = scalar_lea.vmem %s50_s9, 128  ;;  %p8330_p2 = scmp.lt.s32.totalorder %s50_s9, %s50_s9 }
  0x8e   :  { %p8326_p1 = scmp.ne.s32.totalorder %s50_s9, %s8325_s13  ;;  %p8331_p3 = scmp.lt.s32.totalorder %s8325_s13, %s8325_s13 }
  0x90   :  { %p8332_p4 = por %p8331_p3, %p8330_p2 }
  0x92   :  { %p8333_p5 = pnand %p8332_p4, %p8326_p1 }
  0x94   :  { %8336 = shalt.err (!%p8333_p5)
}
  0x95   :  { %52 = dma.hbm_to_vmem [thread:$0]  %s11140_s8, 128, %s50_s9, [#allocation10]  }
  0x96   :  { %s11141_s27 = sld [smem:[#allocation127_spill]] }
  0x9c   :  { %s8337_s5 = scalar_lea.hbm %s11141_s27, 96 }
  0x9d   :  { %p8338_p6 = scmp.ne.s32.totalorder %s11141_s27, %s8337_s5  ;;  %p8341_p7 = scmp.lt.u32.totalorder %s8337_s5, %s11141_s27 }
  0x9f   :  { %p8343_p8 = pnand %p8341_p7, %p8338_p6 }
  0xa1   :  { %8346 = shalt.err (!%p8343_p8)
}
  0xa2   :  { %s8347_s6 = scalar_lea.vmem %s74_s7, 96  ;;  %p8352_p10 = scmp.lt.s32.totalorder %s74_s7, %s74_s7 }
  0xa3   :  { %p8348_p9 = scmp.ne.s32.totalorder %s74_s7, %s8347_s6  ;;  %p8353_p11 = scmp.lt.s32.totalorder %s8347_s6, %s8347_s6 }
  0xa5   :  { %p8354_p12 = por %p8353_p11, %p8352_p10 }
  0xa7   :  { %p8355_p13 = pnand %p8354_p12, %p8348_p9 }
  0xa9   :  { %8358 = shalt.err (!%p8355_p13)
}
  0xaa   :  { %76 = dma.hbm_to_vmem [thread:$0]  %s11141_s27, 96, %s74_s7, [#allocation13]  }
  0xab   :  { %s8616_s28 = smov [#allocation17]   ;;  %s11142_s3 = sld [smem:[#allocation130_spill]] }
  0xac   :  { %s94_s11 = sshll.u32 %s8616_s28, 4  ;;  %s95_s11 = int_to_ptr.vmem [resolvable:$true] %s94_s11 }
  0xb1   :  { %s8359_s4 = scalar_lea.hbm %s11142_s3, 96 }
  0xb2   :  { %p8360_p0 = scmp.ne.s32.totalorder %s11142_s3, %s8359_s4  ;;  %p8363_p1 = scmp.lt.u32.totalorder %s8359_s4, %s11142_s3 }
  0xb4   :  { %p8365_p2 = pnand %p8363_p1, %p8360_p0 }
  0xb6   :  { %8368 = shalt.err (!%p8365_p2)
}
  0xb7   :  { %s8369_s29 = scalar_lea.vmem %s95_s11, 96  ;;  %p8374_p4 = scmp.lt.s32.totalorder %s95_s11, %s95_s11 }
  0xb8   :  { %p8370_p3 = scmp.ne.s32.totalorder %s95_s11, %s8369_s29  ;;  %p8375_p5 = scmp.lt.s32.totalorder %s8369_s29, %s8369_s29 }
  0xba   :  { %p8376_p6 = por %p8375_p5, %p8374_p4 }
  0xbc   :  { %p8377_p7 = pnand %p8376_p6, %p8370_p3 }
  0xbe   :  { %8380 = shalt.err (!%p8377_p7)
}
  0xbf   :  { %s8617_s7 = smov 32   ;;  %s8618_s27 = smov 2  }
  0xc0   :  { %100 = dma.hbm_to_vmem [thread:$0]  %s11142_s3, 96, %s95_s11, [#allocation16], %s8617_s7, %s8617_s7, %s8618_s27  }
  0xc1   :  { %s8619_s9 = smov [#allocation20]   ;;  %s8620_s28 = smov [#allocation23]  }
  0xc2   :  { %s117_s8 = sshll.u32 %s8619_s9, 4  ;;  %s137_s13 = sshll.u32 %s8620_s28, 4  ;;  %s118_s8 = int_to_ptr.vmem [resolvable:$true] %s117_s8  ;;  %s138_s13 = int_to_ptr.vmem [resolvable:$true] %s137_s13 }
  0xc3   :  { %s11143_s26 = sld [smem:[#allocation132_spill]] }
  0xc9   :  { %s8381_s5 = scalar_lea.hbm %s11143_s26, 256 }
  0xca   :  { %p8382_p8 = scmp.ne.s32.totalorder %s11143_s26, %s8381_s5  ;;  %p8385_p9 = scmp.lt.u32.totalorder %s8381_s5, %s11143_s26 }
  0xcc   :  { %p8387_p10 = pnand %p8385_p9, %p8382_p8 }
  0xce   :  { %8390 = shalt.err (!%p8387_p10)
}
  0xcf   :  { %s8391_s11 = scalar_lea.vmem %s118_s8, 256  ;;  %p8396_p12 = scmp.lt.s32.totalorder %s118_s8, %s118_s8 }
  0xd0   :  { %p8392_p11 = scmp.ne.s32.totalorder %s118_s8, %s8391_s11  ;;  %p8397_p13 = scmp.lt.s32.totalorder %s8391_s11, %s8391_s11 }
  0xd2   :  { %p8398_p0 = por %p8397_p13, %p8396_p12 }
  0xd4   :  { %p8399_p1 = pnand %p8398_p0, %p8392_p11 }
  0xd6   :  { %8402 = shalt.err (!%p8399_p1)
}
  0xd7   :  { %120 = dma.hbm_to_vmem [thread:$0]  %s11143_s26, 256, %s118_s8, [#allocation19]  }
  0xd8   :  { %s11144_s9 = sld [smem:[#allocation134_spill]] }
  0xde   :  { %s8403_s28 = scalar_lea.hbm %s11144_s9, 192 }
  0xdf   :  { %p8404_p2 = scmp.ne.s32.totalorder %s11144_s9, %s8403_s28  ;;  %p8407_p3 = scmp.lt.u32.totalorder %s8403_s28, %s11144_s9 }
  0xe1   :  { %p8409_p4 = pnand %p8407_p3, %p8404_p2 }
  0xe3   :  { %8412 = shalt.err (!%p8409_p4)
}
  0xe4   :  { %s8413_s0 = scalar_lea.vmem %s138_s13, 192  ;;  %p8418_p6 = scmp.lt.s32.totalorder %s138_s13, %s138_s13 }
  0xe5   :  { %p8414_p5 = scmp.ne.s32.totalorder %s138_s13, %s8413_s0  ;;  %p8419_p7 = scmp.lt.s32.totalorder %s8413_s0, %s8413_s0 }
  0xe7   :  { %p8420_p8 = por %p8419_p7, %p8418_p6 }
  0xe9   :  { %p8421_p9 = pnand %p8420_p8, %p8414_p5 }
  0xeb   :  { %8424 = shalt.err (!%p8421_p9)
}
  0xec   :  { %140 = dma.hbm_to_vmem [thread:$0]  %s11144_s9, 192, %s138_s13, [#allocation22]  }
  0xed   :  { %s8621_s10 = smov [#allocation26]   ;;  %s8425_s7 = scalar_lea.hbm %s10981_s17, 1024 }
  0xee   :  { %s168_s29 = sshll.u32 %s8621_s10, 4  ;;  %p8426_p10 = scmp.ne.s32.totalorder %s10981_s17, %s8425_s7  ;;  %s169_s29 = int_to_ptr.vmem [resolvable:$true] %s168_s29 }
  0xef   :  { %p8429_p11 = scmp.lt.u32.totalorder %s8425_s7, %s10981_s17 }
  0xf1   :  { %p8431_p12 = pnand %p8429_p11, %p8426_p10 }
  0xf3   :  { %8434 = shalt.err (!%p8431_p12)
}
  0xf4   :  { %s8435_s1 = scalar_lea.vmem %s169_s29, 1024  ;;  %p8440_p0 = scmp.lt.s32.totalorder %s169_s29, %s169_s29 }
  0xf5   :  { %p8436_p13 = scmp.ne.s32.totalorder %s169_s29, %s8435_s1  ;;  %p8441_p1 = scmp.lt.s32.totalorder %s8435_s1, %s8435_s1 }
  0xf7   :  { %p8442_p2 = por %p8441_p1, %p8440_p0 }
  0xf9   :  { %p8443_p3 = pnand %p8442_p2, %p8436_p13 }
  0xfb   :  { %8446 = shalt.err (!%p8443_p3)
}
  0xfc   :  { %s11145_s13 = smov 128  }
  0xfd   :  { %174 = dma.hbm_to_vmem [thread:$0]  %s10981_s17, 1024, %s169_s29, [#allocation25], %s11145_s13, %s11145_s13, %s8613_s2  }
  0xfe   :  { %8579 = dma.done.wait [#allocation10], 128  }
  0xff   :  { %8580 = vsyncadd [#allocation10], 4294967168 }
 0x100   :  { %8581 = dma.done.wait [#allocation13], 9312  }
 0x101   :  { %8582 = vsyncadd [#allocation13], 4294957984 }
 0x102   :  { %8583 = dma.done.wait [#allocation16], 192  }
 0x103   :  { %8584 = vsyncadd [#allocation16], 4294967104 }
 0x104   :  { %8585 = dma.done.wait [#allocation19], 512  }
 0x105   :  { %8586 = vsyncadd [#allocation19], 4294966784 }
 0x106   :  { %8587 = dma.done.wait [#allocation22], 384  }
 0x107   :  { %8588 = vsyncadd [#allocation22], 4294966912 }
 0x108   :  { %8589 = dma.done.wait [#allocation25], 4096  }
 0x109   :  { %8590 = vsyncadd [#allocation25], 4294963200  ;;  %s217_s5 = sld [smem:[#allocation0]]   ;;  %s8622_s0 = smov 2048  }
 0x10a   :  { %229 = sst [smem:[#allocation32]] %s8622_s0  ;;  %s8623_s8 = smov 16  }
 0x10b   :  { %231 = sst [smem:[#allocation32 + $0x1]] %s8622_s0  ;;  %s8624_s26 = smov 64  }
 0x10c   :  { %233 = sst [smem:[#allocation32 + $0x2]] %s8623_s8  ;;  %s8625_s17 = smov [#allocation2]  }
 0x10d   :  { %235 = sst [smem:[#allocation32 + $0x3]] %s8624_s26  ;;  %s225_s2 = sshll.u32 %s8625_s17, 4  ;;  %s226_s2 = int_to_ptr.vmem [resolvable:$true] %s225_s2 }
 0x10e   :  { %237 = sst [smem:[#allocation32 + $0x4]] %s11145_s13  ;;  %s8626_s29 = smov 1024  }
 0x10f   :  { %239 = sst [smem:[#allocation32 + $0x5]] %s8618_s27  ;;  %s6698_s10 = sshll.u32 %s217_s5, 26 }
 0x110   :  { %241 = sst [smem:[#allocation32 + $0x6]] %s8626_s29  ;;  %s8930_s11 = sadd.s32 134217728, %s6698_s10 }
 0x111   :  { %243 = sst [smem:[#allocation32 + $0x7]] %s8624_s26  ;;  %s8627_s3 = smov 4  }
 0x112   :  { %245 = sst [smem:[#allocation32 + $0x8]] %s8627_s3  ;;  %s8628_s7 = smov [#allocation7]  }
 0x113   :  { %s8629_s19 = smov [#allocation31]   ;;  %s8630_s30 = smov 1536  }
 0x114   :  { %247 = dma.general %s10984_s20, 24576, %s226_s2, %s8628_s7, %s8629_s19, [#allocation32], %s8930_s11, 0  }
 0x115   :  { %276 = sst [smem:[#allocation38]] %s8630_s30  ;;  %s8631_s1 = smov 12  }
 0x116   :  { %278 = sst [smem:[#allocation38 + $0x1]] %s8630_s30  ;;  %s8632_s9 = smov [#allocation3]  }
 0x117   :  { %280 = sst [smem:[#allocation38 + $0x2]] %s8631_s1  ;;  %s256_s4 = sshll.u32 %s8632_s9, 4  ;;  %s257_s4 = int_to_ptr.vmem [resolvable:$true] %s256_s4 }
 0x118   :  { %282 = sst [smem:[#allocation38 + $0x3]] %s8624_s26  ;;  %s8633_s5 = smov [#allocation4]  }
 0x119   :  { %284 = sst [smem:[#allocation38 + $0x4]] %s11145_s13  ;;  %s272_s0 = sshll.u32 %s8633_s5, 4  ;;  %s273_s0 = int_to_ptr.vmem [resolvable:$true] %s272_s0 }
 0x11a   :  { %286 = sst [smem:[#allocation38 + $0x5]] %s8618_s27  ;;  %s8634_s8 = smov 768  }
 0x11b   :  { %288 = sst [smem:[#allocation38 + $0x6]] %s8634_s8  ;;  %s8447_s2 = scalar_lea.hbm %s10985_s21, 16384 }
 0x11c   :  { %290 = sst [smem:[#allocation38 + $0x7]] %s8624_s26  ;;  %p8448_p4 = scmp.ne.s32.totalorder %s10985_s21, %s8447_s2 }
 0x11d   :  { %292 = sst [smem:[#allocation38 + $0x8]] %s8627_s3  ;;  %p8451_p5 = scmp.lt.u32.totalorder %s8447_s2, %s10985_s21 }
 0x11f   :  { %p8453_p6 = pnand %p8451_p5, %p8448_p4 }
 0x121   :  { %8456 = shalt.err (!%p8453_p6)  }
 0x122   :  { %s8457_s27 = scalar_lea.vmem %s257_s4, 16384  ;;  %p8462_p8 = scmp.lt.s32.totalorder %s257_s4, %s257_s4 }
 0x123   :  { %p8458_p7 = scmp.ne.s32.totalorder %s257_s4, %s8457_s27  ;;  %p8463_p9 = scmp.lt.s32.totalorder %s8457_s27, %s8457_s27 }
 0x125   :  { %p8464_p10 = por %p8463_p9, %p8462_p8 }
 0x127   :  { %p8465_p11 = pnand %p8464_p10, %p8458_p7 }
 0x129   :  { %8468 = shalt.err (!%p8465_p11)  }
 0x12a   :  { %259 = dma.hbm_to_vmem [thread:$0]  %s10985_s21, 16384, %s257_s4, [#allocation7 + $0x1]  ;;  %vm789_vm0 = vcmask 523264   ;;  %v11007_v63 = vmov 0  }
 0x12b   :  { %s8635_s19 = smov [#allocation7 + $0x2]   ;;  %s8636_s6 = smov [#allocation37]  }
 0x12c   :  { %294 = dma.general %s10986_s22, 18432, %s273_s0, %s8635_s19, %s8636_s6, [#allocation38], %s8930_s11, 0  }
 0x12d   :  { %v7516_v1 = vld [vmem:[#allocation12 + $0x4] ss:$24 sps:$4 sm:$0xff]   ;;  %v7520_v3 = vld [vmem:[#allocation12] ss:$24 sps:$4 sm:$0xff]   ;;  %v7522_v5 = vld [vmem:[#allocation12 + $0x34] ss:$24 sps:$4 sm:$0xff]  }
 0x12e   :  { %v7518_v2 = vld [vmem:[#allocation12 + $0xc] ss:$24 sps:$4 sm:$0xff]   ;;  %793 = vmatprep.subr.bf16.mxu0 %v7516_v1  ;;  %v7521_v4 = vld [vmem:[#allocation12 + $0x8] ss:$24 sps:$4 sm:$0xff]   ;;  %v7524_v6 = vld [vmem:[#allocation12 + $0x3c] ss:$24 sps:$4 sm:$0xff]  }
 0x12f   :  { %834 = vmatprep.subr.bf16.mxu1 %v7518_v2  ;;  %794 = vmatpush1.bf16.msra.mxu0 %v7520_v3  ;;  %v7526_v7 = vld [vmem:[#allocation12 + $0x30] ss:$24 sps:$4 sm:$0xff]   ;;  %v7528_v9 = vld [vmem:[#allocation12 + $0x64] ss:$24 sps:$4 sm:$0xff]   ;;  %v7532_v11 = vld [vmem:[#allocation12 + $0x60] ss:$24 sps:$4 sm:$0xff]  }
 0x130   :  { %835 = vmatpush1.bf16.msra.mxu1 %v7521_v4  ;;  %795 = vmatprep.subr.bf16.mxu0 %v7522_v5  ;;  %v7527_v8 = vld [vmem:[#allocation12 + $0x38] ss:$24 sps:$4 sm:$0xff]   ;;  %v7530_v10 = vld [vmem:[#allocation12 + $0x6c] ss:$24 sps:$4 sm:$0xff]   ;;  %v7533_v12 = vld [vmem:[#allocation12 + $0x68] ss:$24 sps:$4 sm:$0xff]  }
 0x131   :  { %836 = vmatprep.subr.bf16.mxu1 %v7524_v6  ;;  %v7534_v13 = vld [vmem:[#allocation12 + $0x94] ss:$24 sps:$4 sm:$0xff]   ;;  %v7538_v15 = vld [vmem:[#allocation12 + $0x90] ss:$24 sps:$4 sm:$0xff]   ;;  %v7540_v17 = vld [vmem:[#allocation12 + $0xc4] ss:$24 sps:$4 sm:$0xff]  }
 0x132   :  { %v7536_v14 = vld [vmem:[#allocation12 + $0x9c] ss:$24 sps:$4 sm:$0xff]   ;;  %v7539_v16 = vld [vmem:[#allocation12 + $0x98] ss:$24 sps:$4 sm:$0xff]   ;;  %v7542_v18 = vld [vmem:[#allocation12 + $0xcc] ss:$24 sps:$4 sm:$0xff]  }
 0x133   :  { %796 = vmatpush1.bf16.msra.mxu0 %v7526_v7  ;;  %v7544_v19 = vld [vmem:[#allocation12 + $0xc0] ss:$24 sps:$4 sm:$0xff]   ;;  %v7546_v21 = vld [vmem:[#allocation12 + $0xf4] ss:$24 sps:$4 sm:$0xff]   ;;  %v7550_v23 = vld [vmem:[#allocation12 + $0xf0] ss:$24 sps:$4 sm:$0xff]  }
 0x134   :  { %837 = vmatpush1.bf16.msra.mxu1 %v7527_v8  ;;  %797 = vmatprep.subr.bf16.mxu0 %v7528_v9  ;;  %v7545_v20 = vld [vmem:[#allocation12 + $0xc8] ss:$24 sps:$4 sm:$0xff]   ;;  %v7548_v22 = vld [vmem:[#allocation12 + $0xfc] ss:$24 sps:$4 sm:$0xff]   ;;  %v7551_v24 = vld [vmem:[#allocation12 + $0xf8] ss:$24 sps:$4 sm:$0xff]  }
 0x135   :  { %838 = vmatprep.subr.bf16.mxu1 %v7530_v10  ;;  %v7552_v25 = vld [vmem:[#allocation12 + $0x124] ss:$24 sps:$4 sm:$0xff]   ;;  %v7556_v27 = vld [vmem:[#allocation12 + $0x120] ss:$24 sps:$4 sm:$0xff]   ;;  %v7558_v29 = vld [vmem:[#allocation12 + $0x154] ss:$24 sps:$4 sm:$0xff]  }
 0x136   :  { %v7554_v26 = vld [vmem:[#allocation12 + $0x12c] ss:$24 sps:$4 sm:$0xff]   ;;  %v7557_v28 = vld [vmem:[#allocation12 + $0x128] ss:$24 sps:$4 sm:$0xff]   ;;  %v7560_v30 = vld [vmem:[#allocation12 + $0x15c] ss:$24 sps:$4 sm:$0xff]  }
 0x137   :  { %798 = vmatpush1.bf16.msra.mxu0 %v7532_v11  ;;  %v7562_v31 = vld [vmem:[#allocation12 + $0x150] ss:$24 sps:$4 sm:$0xff]   ;;  %v7564_v33 = vld [vmem:[#allocation12 + $0x184] ss:$24 sps:$4 sm:$0xff]   ;;  %v7568_v35 = vld [vmem:[#allocation12 + $0x180] ss:$24 sps:$4 sm:$0xff]  }
 0x138   :  { %839 = vmatpush1.bf16.msra.mxu1 %v7533_v12  ;;  %799 = vmatprep.subr.bf16.mxu0 %v7534_v13  ;;  %v7563_v32 = vld [vmem:[#allocation12 + $0x158] ss:$24 sps:$4 sm:$0xff]   ;;  %v7566_v34 = vld [vmem:[#allocation12 + $0x18c] ss:$24 sps:$4 sm:$0xff]   ;;  %v7569_v36 = vld [vmem:[#allocation12 + $0x188] ss:$24 sps:$4 sm:$0xff]  }
 0x139   :  { %840 = vmatprep.subr.bf16.mxu1 %v7536_v14  ;;  %v319_v37 = vld [vmem:[#allocation9] sm:$0x77]  ;;  %v7570_v38 = vld [vmem:[#allocation12 + $0x1b4] ss:$24 sps:$4 sm:$0xff]   ;;  %v7574_v41 = vld [vmem:[#allocation12 + $0x1b0] ss:$24 sps:$4 sm:$0xff]  }
 0x13a   :  { %v7572_v39 = vld [vmem:[#allocation12 + $0x1bc] ss:$24 sps:$4 sm:$0xff]   ;;  %v321_v40 = vcombine.high %v319_v37, %v319_v37  ;;  %v7575_v43 = vld [vmem:[#allocation12 + $0x1b8] ss:$24 sps:$4 sm:$0xff]   ;;  %v7578_v45 = vld [vmem:[#allocation12 + $0x1ec] ss:$24 sps:$4 sm:$0xff]   ;;  %v8964_v54 = vpack.c.bf16 %v319_v37, %v319_v37 }
 0x13b   :  { %800 = vmatpush1.bf16.msra.mxu0 %v7538_v15  ;;  %v7576_v44 = vld [vmem:[#allocation12 + $0x1e4] ss:$24 sps:$4 sm:$0xff]   ;;  %v7580_v46 = vld [vmem:[#allocation12 + $0x1e0] ss:$24 sps:$4 sm:$0xff]   ;;  %v7582_v48 = vld [vmem:[#allocation12 + $0x214] ss:$24 sps:$4 sm:$0xff]  }
 0x13c   :  { %841 = vmatpush1.bf16.msra.mxu1 %v7539_v16  ;;  %801 = vmatprep.subr.bf16.mxu0 %v7540_v17  ;;  %v324_v42 = vpack.c.bf16 %v321_v40, %v321_v40  ;;  %v7581_v47 = vld [vmem:[#allocation12 + $0x1e8] ss:$24 sps:$4 sm:$0xff]   ;;  %v7584_v49 = vld [vmem:[#allocation12 + $0x21c] ss:$24 sps:$4 sm:$0xff]   ;;  %v7587_v51 = vld [vmem:[#allocation12 + $0x218] ss:$24 sps:$4 sm:$0xff]  }
 0x13d   :  { %842 = vmatprep.subr.bf16.mxu1 %v7542_v18  ;;  %v7586_v50 = vld [vmem:[#allocation12 + $0x210] ss:$24 sps:$4 sm:$0xff]   ;;  %v7591_v52 = vld [vmem:[#allocation12 + $0x14] ss:$24 sps:$4 sm:$0xff]   ;;  %s11146_s11 = sld [smem:[#allocation126_spill]]  ;;  %s8639_s30 = smov [#allocation6]  }
 0x13e   :  { %6774 = vmatprep.mubr.msk.bf16.mxu0 %vm789_vm0, %v324_v42  ;;  %6775 = vmatprep.mubr.msk.bf16.mxu1 %vm789_vm0, %v324_v42  ;;  %v7589_v55 = vld [vmem:[#allocation12 + $0x10] ss:$24 sps:$4 sm:$0xff]   ;;  %v7597_v57 = vld [vmem:[#allocation12 + $0x44] ss:$24 sps:$4 sm:$0xff]   ;;  %v7595_v59 = vld [vmem:[#allocation12 + $0x40] ss:$24 sps:$4 sm:$0xff]  }
 0x13f   :  { %802 = vmatpush1.bf16.msra.mxu0 %v7544_v19  ;;  %v7603_v61 = vld [vmem:[#allocation12 + $0x74] ss:$24 sps:$4 sm:$0xff]   ;;  %v7601_v0 = vld [vmem:[#allocation12 + $0x70] ss:$24 sps:$4 sm:$0xff]   ;;  %v7609_v2 = vld [vmem:[#allocation12 + $0xa4] ss:$24 sps:$4 sm:$0xff]  }
 0x140   :  { %843 = vmatpush1.bf16.msra.mxu1 %v7545_v20  ;;  %803 = vmatprep.subr.bf16.mxu0 %v7546_v21  ;;  %v7607_v4 = vld [vmem:[#allocation12 + $0xa0] ss:$24 sps:$4 sm:$0xff]   ;;  %v7615_v6 = vld [vmem:[#allocation12 + $0xd4] ss:$24 sps:$4 sm:$0xff]   ;;  %v7613_v8 = vld [vmem:[#allocation12 + $0xd0] ss:$24 sps:$4 sm:$0xff]  }
 0x141   :  { %844 = vmatprep.subr.bf16.mxu1 %v7548_v22  ;;  %v7621_v10 = vld [vmem:[#allocation12 + $0x104] ss:$24 sps:$4 sm:$0xff]   ;;  %v7619_v12 = vld [vmem:[#allocation12 + $0x100] ss:$24 sps:$4 sm:$0xff]   ;;  %v7627_v14 = vld [vmem:[#allocation12 + $0x134] ss:$24 sps:$4 sm:$0xff]  }
 0x142   :  { %v7625_v16 = vld [vmem:[#allocation12 + $0x130] ss:$24 sps:$4 sm:$0xff]   ;;  %v7633_v18 = vld [vmem:[#allocation12 + $0x164] ss:$24 sps:$4 sm:$0xff]   ;;  %v7631_v20 = vld [vmem:[#allocation12 + $0x160] ss:$24 sps:$4 sm:$0xff]  }
 0x143   :  { %804 = vmatpush1.bf16.msra.mxu0 %v7550_v23  ;;  %v8962_v53 = vld [vmem:[%s11146_s11 + $0x4] ss:$24 sps:$4 sm:$0xff]   ;;  %v8969_v56 = vld [vmem:[%s11146_s11] ss:$24 sps:$4 sm:$0xff]   ;;  %v8975_v58 = vld [vmem:[%s11146_s11 + $0x34] ss:$24 sps:$4 sm:$0xff]  }
 0x144   :  { %845 = vmatpush1.bf16.msra.mxu1 %v7551_v24  ;;  %805 = vmatprep.subr.bf16.mxu0 %v7552_v25  ;;  %v8983_v60 = vld [vmem:[%s11146_s11 + $0x30] ss:$24 sps:$4 sm:$0xff]   ;;  %v8989_v62 = vld [vmem:[%s11146_s11 + $0x64] ss:$24 sps:$4 sm:$0xff]   ;;  %v8997_v1 = vld [vmem:[%s11146_s11 + $0x60] ss:$24 sps:$4 sm:$0xff]  }
 0x145   :  { %846 = vmatprep.subr.bf16.mxu1 %v7554_v26  ;;  %v9003_v3 = vld [vmem:[%s11146_s11 + $0x94] ss:$24 sps:$4 sm:$0xff]   ;;  %v9009_v5 = vld [vmem:[%s11146_s11 + $0x90] ss:$24 sps:$4 sm:$0xff]   ;;  %v9015_v7 = vld [vmem:[%s11146_s11 + $0xc4] ss:$24 sps:$4 sm:$0xff]  }
 0x146   :  { %v9021_v9 = vld [vmem:[%s11146_s11 + $0xc0] ss:$24 sps:$4 sm:$0xff]   ;;  %v9027_v11 = vld [vmem:[%s11146_s11 + $0xf4] ss:$24 sps:$4 sm:$0xff]   ;;  %v9033_v13 = vld [vmem:[%s11146_s11 + $0xf0] ss:$24 sps:$4 sm:$0xff]  }
 0x147   :  { %806 = vmatpush1.bf16.msra.mxu0 %v7556_v27  ;;  %v9039_v15 = vld [vmem:[%s11146_s11 + $0x124] ss:$24 sps:$4 sm:$0xff]   ;;  %v9045_v17 = vld [vmem:[%s11146_s11 + $0x120] ss:$24 sps:$4 sm:$0xff]   ;;  %v9051_v19 = vld [vmem:[%s11146_s11 + $0x154] ss:$24 sps:$4 sm:$0xff]  }
 0x148   :  { %847 = vmatpush1.bf16.msra.mxu1 %v7557_v28  ;;  %807 = vmatprep.subr.bf16.mxu0 %v7558_v29  ;;  %v9057_v21 = vld [vmem:[%s11146_s11 + $0x150] ss:$24 sps:$4 sm:$0xff]   ;;  %v7639_v22 = vld [vmem:[#allocation12 + $0x194] ss:$24 sps:$4 sm:$0xff]   ;;  %s315_s21 = sshll.u32 %s8639_s30, 4  ;;  %s8469_s9 = scalar_lea.hbm %s10987_s23, 12288  ;;  %s316_s21 = int_to_ptr.vmem [resolvable:$true] %s315_s21 }
 0x149   :  { %848 = vmatprep.subr.bf16.mxu1 %v7560_v30  ;;  %v9063_v23 = vld [vmem:[%s11146_s11 + $0x184] ss:$24 sps:$4 sm:$0xff]   ;;  %v9069_v25 = vld [vmem:[%s11146_s11 + $0x180] ss:$24 sps:$4 sm:$0xff]   ;;  %v9075_v27 = vld [vmem:[%s11146_s11 + $0x1b4] ss:$24 sps:$4 sm:$0xff]   ;;  %p8470_p12 = scmp.ne.s32.totalorder %s10987_s23, %s8469_s9  ;;  %p8473_p13 = scmp.lt.u32.totalorder %s8469_s9, %s10987_s23 }
 0x14a   :  { %v7637_v24 = vld [vmem:[#allocation12 + $0x190] ss:$24 sps:$4 sm:$0xff]   ;;  %v7645_v26 = vld [vmem:[#allocation12 + $0x1c4] ss:$24 sps:$4 sm:$0xff]   ;;  %v7643_v28 = vld [vmem:[#allocation12 + $0x1c0] ss:$24 sps:$4 sm:$0xff]  }
 0x14b   :  { %808 = vmatpush1.bf16.msra.mxu0 %v7562_v31  ;;  %v9081_v29 = vld [vmem:[%s11146_s11 + $0x1b0] ss:$24 sps:$4 sm:$0xff]   ;;  %v7651_v30 = vld [vmem:[#allocation12 + $0x1f4] ss:$24 sps:$4 sm:$0xff]   ;;  %p8475_p0 = pnand %p8473_p13, %p8470_p12 }
 0x14c   :  { %849 = vmatpush1.bf16.msra.mxu1 %v7563_v32  ;;  %809 = vmatprep.subr.bf16.mxu0 %v7564_v33  ;;  %v9087_v31 = vld [vmem:[%s11146_s11 + $0x1e4] ss:$24 sps:$4 sm:$0xff]   ;;  %v9093_v33 = vld [vmem:[%s11146_s11 + $0x1e0] ss:$24 sps:$4 sm:$0xff]   ;;  %v9105_v37 = vld [vmem:[%s11146_s11 + $0x210] ss:$24 sps:$4 sm:$0xff]  }
 0x14d   :  { %850 = vmatprep.subr.bf16.mxu1 %v7566_v34  ;;  %v7649_v32 = vld [vmem:[#allocation12 + $0x1f0] ss:$24 sps:$4 sm:$0xff]   ;;  %v7657_v34 = vld [vmem:[#allocation12 + $0x224] ss:$24 sps:$4 sm:$0xff]  }
 0x14e   :  { %v9121_v40 = vld [vmem:[%s11146_s11 + $0x240] ss:$24 sps:$4 sm:$0xff]  }
 0x14f   :  { %810 = vmatpush1.bf16.msra.mxu0 %v7568_v35  ;;  %v9099_v35 = vld [vmem:[%s11146_s11 + $0x214] ss:$24 sps:$4 sm:$0xff]  }
 0x150   :  { %851 = vmatpush1.bf16.msra.mxu1 %v7569_v36  ;;  %811 = vmatprep.subr.bf16.mxu0 %v7570_v38  ;;  %v7655_v36 = vld [vmem:[#allocation12 + $0x220] ss:$24 sps:$4 sm:$0xff]  }
 0x151   :  { %852 = vmatprep.subr.bf16.mxu1 %v7572_v39  ;;  %v9111_v38 = vld [vmem:[%s11146_s11 + $0x244] ss:$24 sps:$4 sm:$0xff]  }
 0x152   :  { %v9116_v39 = vld [vmem:[%s11146_s11 + $0xc] ss:$24 sps:$4 sm:$0xff]  }
 0x153   :  { %812 = vmatpush1.bf16.msra.mxu0 %v7574_v41  ;;  %v9127_v41 = vld [vmem:[%s11146_s11 + $0x8] ss:$24 sps:$4 sm:$0xff]  }
 0x154   :  { %853 = vmatpush1.bf16.msra.mxu1 %v7575_v43  ;;  %813 = vmatprep.subr.bf16.mxu0 %v7576_v44  ;;  %v9139_v43 = vld [vmem:[%s11146_s11 + $0x3c] ss:$24 sps:$4 sm:$0xff]   ;;  %v9145_v44 = vld [vmem:[%s11146_s11 + $0x270] ss:$24 sps:$4 sm:$0xff]  }
 0x155   :  { %854 = vmatprep.subr.bf16.mxu1 %v7578_v45  ;;  %11147 = vst [vmem:[#allocation56_spill] sm:$0xff] %v9139_v43  ;;  %v9152_v45 = vld [vmem:[%s11146_s11 + $0x38] ss:$24 sps:$4 sm:$0xff]  }
 0x156   :  { %11148 = vst [vmem:[#allocation57_spill] sm:$0xff] %v9152_v45 }
 0x157   :  { %814 = vmatpush1.bf16.msra.mxu0 %v7580_v46  ;;  %v9159_v46 = vld [vmem:[%s11146_s11 + $0x2a4] ss:$24 sps:$4 sm:$0xff]  }
 0x158   :  { %855 = vmatpush1.bf16.msra.mxu1 %v7581_v47  ;;  %815 = vmatprep.subr.bf16.mxu0 %v7582_v48  ;;  %v9164_v47 = vld [vmem:[%s11146_s11 + $0x6c] ss:$24 sps:$4 sm:$0xff]   ;;  %v9170_v48 = vld [vmem:[%s11146_s11 + $0x2a0] ss:$24 sps:$4 sm:$0xff]  }
 0x159   :  { %856 = vmatprep.subr.bf16.mxu1 %v7584_v49  ;;  %11149 = vst [vmem:[#allocation58_spill] sm:$0xff] %v9164_v47  ;;  %v9177_v49 = vld [vmem:[%s11146_s11 + $0x68] ss:$24 sps:$4 sm:$0xff]  }
 0x15a   :  { %11150 = vst [vmem:[#allocation59_spill] sm:$0xff] %v9177_v49 }
 0x15b   :  { %816 = vmatpush1.bf16.msra.mxu0 %v7586_v50  ;;  %v9184_v50 = vld [vmem:[%s11146_s11 + $0x2d4] ss:$24 sps:$4 sm:$0xff]  }
 0x15c   :  { %857 = vmatpush1.bf16.msra.mxu1 %v7587_v51  ;;  %875 = vmatprep.subr.bf16.mxu0 %v7591_v52  ;;  %v9189_v51 = vld [vmem:[%s11146_s11 + $0x9c] ss:$24 sps:$4 sm:$0xff]   ;;  %v9194_v52 = vld [vmem:[%s11146_s11 + $0x2d0] ss:$24 sps:$4 sm:$0xff]  }
 0x15d   :  { %1524 = vmatprep.subr.bf16.mxu1 %v8962_v53  ;;  %11151 = vst [vmem:[#allocation60_spill] sm:$0xff] %v9189_v51 }
 0x15e   :  { %826 = vmatmul.mubr.bf16.vlgmr.msra.gmra.mrb[0].mxu0 %v8964_v54 }
 0x15f   :  { %867 = vmatmul.mubr.bf16.vlgmr.msra.gmra.mrb[0].mxu1 %v8964_v54  ;;  %876 = vmatpush1.bf16.msra.mxu0 %v7589_v55  ;;  %v9208_v55 = vld [vmem:[%s11146_s11 + $0xcc] ss:$24 sps:$4 sm:$0xff]  }
 0x160   :  { %1525 = vmatpush1.bf16.msra.mxu1 %v8969_v56  ;;  %877 = vmatprep.subr.bf16.mxu0 %v7597_v57  ;;  %11153 = vst [vmem:[#allocation62_spill] sm:$0xff] %v9208_v55  ;;  %v9213_v57 = vld [vmem:[%s11146_s11 + $0x14] ss:$24 sps:$4 sm:$0xff]  }
 0x161   :  { %1526 = vmatprep.subr.bf16.mxu1 %v8975_v58  ;;  %6776 = vmatprep.mubr.msk.bf16.mxu0 %vm789_vm0, %v324_v42  ;;  %v9134_v42 = vld [vmem:[%s11146_s11 + $0x274] ss:$24 sps:$4 sm:$0xff]  }
 0x162   :  { %1556 = vmatprep.mubr.bf16.mxu1 %v11007_v63 }
 0x163   :  { %878 = vmatpush1.bf16.msra.mxu0 %v7595_v59  ;;  %v9220_v59 = vld [vmem:[%s11146_s11 + $0xc8] ss:$24 sps:$4 sm:$0xff]  }
 0x164   :  { %1527 = vmatpush1.bf16.msra.mxu1 %v8983_v60  ;;  %879 = vmatprep.subr.bf16.mxu0 %v7603_v61  ;;  %11154 = vst [vmem:[#allocation63_spill] sm:$0xff] %v9220_v59  ;;  %v9225_v61 = vld [vmem:[%s11146_s11 + $0x10] ss:$24 sps:$4 sm:$0xff]  }
 0x165   :  { %1528 = vmatprep.subr.bf16.mxu1 %v8989_v62  ;;  %11155 = vst [vmem:[#allocation64_spill] sm:$0xff] %v9225_v61 }
 0x167   :  { %880 = vmatpush1.bf16.msra.mxu0 %v7601_v0  ;;  %v9232_v0 = vld [vmem:[%s11146_s11 + $0xfc] ss:$24 sps:$4 sm:$0xff]  }
 0x168   :  { %1529 = vmatpush1.bf16.msra.mxu1 %v8997_v1  ;;  %881 = vmatprep.subr.bf16.mxu0 %v7609_v2  ;;  %11156 = vst [vmem:[#allocation65_spill] sm:$0xff] %v9232_v0  ;;  %v9237_v2 = vld [vmem:[%s11146_s11 + $0x44] ss:$24 sps:$4 sm:$0xff]  }
 0x169   :  { %1530 = vmatprep.subr.bf16.mxu1 %v9003_v3  ;;  %11157 = vst [vmem:[#allocation66_spill] sm:$0xff] %v9237_v2 }
 0x16b   :  { %882 = vmatpush1.bf16.msra.mxu0 %v7607_v4  ;;  %v9245_v4 = vld [vmem:[%s11146_s11 + $0xf8] ss:$24 sps:$4 sm:$0xff]  }
 0x16c   :  { %1531 = vmatpush1.bf16.msra.mxu1 %v9009_v5  ;;  %883 = vmatprep.subr.bf16.mxu0 %v7615_v6  ;;  %11158 = vst [vmem:[#allocation67_spill] sm:$0xff] %v9245_v4  ;;  %v9250_v6 = vld [vmem:[%s11146_s11 + $0x40] ss:$24 sps:$4 sm:$0xff]  }
 0x16d   :  { %1532 = vmatprep.subr.bf16.mxu1 %v9015_v7  ;;  %11159 = vst [vmem:[#allocation68_spill] sm:$0xff] %v9250_v6 }
 0x16f   :  { %884 = vmatpush1.bf16.msra.mxu0 %v7613_v8  ;;  %v9257_v8 = vld [vmem:[%s11146_s11 + $0x12c] ss:$24 sps:$4 sm:$0xff]  }
 0x170   :  { %1533 = vmatpush1.bf16.msra.mxu1 %v9021_v9  ;;  %885 = vmatprep.subr.bf16.mxu0 %v7621_v10  ;;  %11160 = vst [vmem:[#allocation69_spill] sm:$0xff] %v9257_v8  ;;  %v9262_v10 = vld [vmem:[%s11146_s11 + $0x74] ss:$24 sps:$4 sm:$0xff]  }
 0x171   :  { %1534 = vmatprep.subr.bf16.mxu1 %v9027_v11  ;;  %11161 = vst [vmem:[#allocation70_spill] sm:$0xff] %v9262_v10 }
 0x173   :  { %886 = vmatpush1.bf16.msra.mxu0 %v7619_v12  ;;  %v9270_v12 = vld [vmem:[%s11146_s11 + $0x128] ss:$24 sps:$4 sm:$0xff]  }
 0x174   :  { %1535 = vmatpush1.bf16.msra.mxu1 %v9033_v13  ;;  %887 = vmatprep.subr.bf16.mxu0 %v7627_v14  ;;  %11162 = vst [vmem:[#allocation71_spill] sm:$0xff] %v9270_v12  ;;  %v9275_v14 = vld [vmem:[%s11146_s11 + $0x70] ss:$24 sps:$4 sm:$0xff]  }
 0x175   :  { %1536 = vmatprep.subr.bf16.mxu1 %v9039_v15  ;;  %11163 = vst [vmem:[#allocation72_spill] sm:$0xff] %v9275_v14 }
 0x177   :  { %888 = vmatpush1.bf16.msra.mxu0 %v7625_v16  ;;  %v9282_v16 = vld [vmem:[%s11146_s11 + $0x15c] ss:$24 sps:$4 sm:$0xff]  }
 0x178   :  { %1537 = vmatpush1.bf16.msra.mxu1 %v9045_v17  ;;  %889 = vmatprep.subr.bf16.mxu0 %v7633_v18  ;;  %11164 = vst [vmem:[#allocation73_spill] sm:$0xff] %v9282_v16  ;;  %v9287_v18 = vld [vmem:[%s11146_s11 + $0xa4] ss:$24 sps:$4 sm:$0xff]  }
 0x179   :  { %1538 = vmatprep.subr.bf16.mxu1 %v9051_v19  ;;  %11165 = vst [vmem:[#allocation74_spill] sm:$0xff] %v9287_v18 }
 0x17b   :  { %890 = vmatpush1.bf16.msra.mxu0 %v7631_v20  ;;  %v9294_v20 = vld [vmem:[%s11146_s11 + $0x158] ss:$24 sps:$4 sm:$0xff]  }
 0x17c   :  { %1539 = vmatpush1.bf16.msra.mxu1 %v9057_v21  ;;  %891 = vmatprep.subr.bf16.mxu0 %v7639_v22  ;;  %11166 = vst [vmem:[#allocation75_spill] sm:$0xff] %v9294_v20  ;;  %v9299_v22 = vld [vmem:[%s11146_s11 + $0xa0] ss:$24 sps:$4 sm:$0xff]  }
 0x17d   :  { %1540 = vmatprep.subr.bf16.mxu1 %v9063_v23  ;;  %11167 = vst [vmem:[#allocation76_spill] sm:$0xff] %v9299_v22 }
 0x17f   :  { %892 = vmatpush1.bf16.msra.mxu0 %v7637_v24  ;;  %v9306_v24 = vld [vmem:[%s11146_s11 + $0x18c] ss:$24 sps:$4 sm:$0xff]  }
 0x180   :  { %1541 = vmatpush1.bf16.msra.mxu1 %v9069_v25  ;;  %893 = vmatprep.subr.bf16.mxu0 %v7645_v26  ;;  %11168 = vst [vmem:[#allocation77_spill] sm:$0xff] %v9306_v24  ;;  %v9311_v26 = vld [vmem:[%s11146_s11 + $0xd4] ss:$24 sps:$4 sm:$0xff]  }
 0x181   :  { %1542 = vmatprep.subr.bf16.mxu1 %v9075_v27  ;;  %11169 = vst [vmem:[#allocation78_spill] sm:$0xff] %v9311_v26 }
 0x183   :  { %894 = vmatpush1.bf16.msra.mxu0 %v7643_v28  ;;  %v9318_v28 = vld [vmem:[%s11146_s11 + $0x188] ss:$24 sps:$4 sm:$0xff]  }
 0x184   :  { %1543 = vmatpush1.bf16.msra.mxu1 %v9081_v29  ;;  %895 = vmatprep.subr.bf16.mxu0 %v7651_v30  ;;  %11170 = vst [vmem:[#allocation79_spill] sm:$0xff] %v9318_v28  ;;  %v9323_v30 = vld [vmem:[%s11146_s11 + $0xd0] ss:$24 sps:$4 sm:$0xff]  }
 0x185   :  { %1544 = vmatprep.subr.bf16.mxu1 %v9087_v31  ;;  %11171 = vst [vmem:[#allocation80_spill] sm:$0xff] %v9323_v30 }
 0x187   :  { %896 = vmatpush1.bf16.msra.mxu0 %v7649_v32  ;;  %v9330_v32 = vld [vmem:[%s11146_s11 + $0x1bc] ss:$24 sps:$4 sm:$0xff]  }
 0x188   :  { %1545 = vmatpush1.bf16.msra.mxu1 %v9093_v33  ;;  %897 = vmatprep.subr.bf16.mxu0 %v7657_v34  ;;  %11172 = vst [vmem:[#allocation81_spill] sm:$0xff] %v9330_v32  ;;  %v9335_v34 = vld [vmem:[%s11146_s11 + $0x104] ss:$24 sps:$4 sm:$0xff]  }
 0x189   :  { %1546 = vmatprep.subr.bf16.mxu1 %v9099_v35  ;;  %11173 = vst [vmem:[#allocation82_spill] sm:$0xff] %v9335_v34 }
 0x18b   :  { %898 = vmatpush1.bf16.msra.mxu0 %v7655_v36  ;;  %v9342_v36 = vld [vmem:[%s11146_s11 + $0x1b8] ss:$24 sps:$4 sm:$0xff]  }
 0x18c   :  { %1547 = vmatpush1.bf16.msra.mxu1 %v9105_v37  ;;  %1565 = vmatprep.subr.bf16.mxu0 %v9116_v39  ;;  %11174 = vst [vmem:[#allocation83_spill] sm:$0xff] %v9342_v36 }
 0x18d   :  { %1548 = vmatprep.subr.bf16.mxu1 %v9111_v38 }
 0x18e   :  { %908 = vmatmul.mubr.bf16.vlgmr.msra.gmra.mrb[4].mxu0 %v8964_v54  ;;  %v9201_v54 = vld [vmem:[%s11146_s11 + $0x98] ss:$24 sps:$4 sm:$0xff]  }
 0x18f   :  { %1566 = vmatpush1.bf16.msra.mxu0 %v9127_v41  ;;  %1597 = vmatprep.mubr.bf16.mxu0 %v11007_v63  ;;  %11152 = vst [vmem:[#allocation61_spill] sm:$0xff] %v9201_v54 }
 0x190   :  { %1549 = vmatpush1.bf16.msra.mxu1 %v9121_v40  ;;  %1567 = vmatprep.subr.bf16.mxu0 %v9139_v43 }
 0x191   :  { %1550 = vmatprep.subr.bf16.mxu1 %v9134_v42 }
 0x193   :  { %1568 = vmatpush1.bf16.msra.mxu0 %v9152_v45 }
 0x194   :  { %1551 = vmatpush1.bf16.msra.mxu1 %v9145_v44  ;;  %1569 = vmatprep.subr.bf16.mxu0 %v9164_v47 }
 0x195   :  { %1552 = vmatprep.subr.bf16.mxu1 %v9159_v46 }
 0x197   :  { %1570 = vmatpush1.bf16.msra.mxu0 %v9177_v49 }
 0x198   :  { %1553 = vmatpush1.bf16.msra.mxu1 %v9170_v48  ;;  %1571 = vmatprep.subr.bf16.mxu0 %v9189_v51 }
 0x199   :  { %1554 = vmatprep.subr.bf16.mxu1 %v9184_v50 }
 0x19b   :  { %1572 = vmatpush1.bf16.msra.mxu0 %v9201_v54 }
 0x19c   :  { %1555 = vmatpush1.bf16.msra.mxu1 %v9194_v52  ;;  %1573 = vmatprep.subr.bf16.mxu0 %v9208_v55 }
 0x19d   :  { %1606 = vmatprep.subr.bf16.mxu1 %v9213_v57 }
 0x19f   :  { %1557 = vmatmul.mubr.bf16.vlgmr.msra.gmra.mrb[4].mxu1 %v11007_v63  ;;  %1574 = vmatpush1.bf16.msra.mxu0 %v9220_v59 }
 0x1a0   :  { %1607 = vmatpush1.bf16.msra.mxu1 %v9225_v61  ;;  %1575 = vmatprep.subr.bf16.mxu0 %v9232_v0  ;;  %v9438_v61 = vld [vmem:[%s11146_s11 + $0x278] ss:$24 sps:$4 sm:$0xff]  }
 0x1a1   :  { %1608 = vmatprep.subr.bf16.mxu1 %v9237_v2  ;;  %1638 = vmatprep.mubr.bf16.mxu1 %v11007_v63  ;;  %v9347_v63 = vld [vmem:[%s11146_s11 + $0x100] ss:$24 sps:$4 sm:$0xff]   ;;  %v9426_v2 = vld [vmem:[%s11146_s11 + $0x27c] ss:$24 sps:$4 sm:$0xff]   ;;  %11190 = vst [vmem:[#allocation99_spill] sm:$0xff] %v9438_v61 }
 0x1a2   :  { %11175 = vst [vmem:[#allocation84_spill] sm:$0xff] %v9347_v63  ;;  %11188 = vst [vmem:[#allocation97_spill] sm:$0xff] %v9426_v2 }
 0x1a3   :  { %1576 = vmatpush1.bf16.msra.mxu0 %v9245_v4 }
 0x1a4   :  { %1609 = vmatpush1.bf16.msra.mxu1 %v9250_v6  ;;  %1577 = vmatprep.subr.bf16.mxu0 %v9257_v8  ;;  %v9414_v6 = vld [vmem:[%s11146_s11 + $0x248] ss:$24 sps:$4 sm:$0xff]  }
 0x1a5   :  { %1610 = vmatprep.subr.bf16.mxu1 %v9262_v10  ;;  %v9402_v10 = vld [vmem:[%s11146_s11 + $0x24c] ss:$24 sps:$4 sm:$0xff]   ;;  %11186 = vst [vmem:[#allocation95_spill] sm:$0xff] %v9414_v6 }
 0x1a6   :  { %11184 = vst [vmem:[#allocation93_spill] sm:$0xff] %v9402_v10 }
 0x1a7   :  { %1578 = vmatpush1.bf16.msra.mxu0 %v9270_v12 }
 0x1a8   :  { %1611 = vmatpush1.bf16.msra.mxu1 %v9275_v14  ;;  %1579 = vmatprep.subr.bf16.mxu0 %v9282_v16  ;;  %v9390_v14 = vld [vmem:[%s11146_s11 + $0x218] ss:$24 sps:$4 sm:$0xff]  }
 0x1a9   :  { %1612 = vmatprep.subr.bf16.mxu1 %v9287_v18  ;;  %v9378_v18 = vld [vmem:[%s11146_s11 + $0x21c] ss:$24 sps:$4 sm:$0xff]   ;;  %11182 = vst [vmem:[#allocation91_spill] sm:$0xff] %v9390_v14 }
 0x1aa   :  { %11180 = vst [vmem:[#allocation89_spill] sm:$0xff] %v9378_v18 }
 0x1ab   :  { %1580 = vmatpush1.bf16.msra.mxu0 %v9294_v20 }
 0x1ac   :  { %1613 = vmatpush1.bf16.msra.mxu1 %v9299_v22  ;;  %1581 = vmatprep.subr.bf16.mxu0 %v9306_v24  ;;  %v9366_v22 = vld [vmem:[%s11146_s11 + $0x1e8] ss:$24 sps:$4 sm:$0xff]  }
 0x1ad   :  { %1614 = vmatprep.subr.bf16.mxu1 %v9311_v26  ;;  %v9354_v26 = vld [vmem:[%s11146_s11 + $0x1ec] ss:$24 sps:$4 sm:$0xff]   ;;  %11178 = vst [vmem:[#allocation87_spill] sm:$0xff] %v9366_v22 }
 0x1ae   :  { %11176 = vst [vmem:[#allocation85_spill] sm:$0xff] %v9354_v26 }
 0x1af   :  { %1582 = vmatpush1.bf16.msra.mxu0 %v9318_v28 }
 0x1b0   :  { %1615 = vmatpush1.bf16.msra.mxu1 %v9323_v30  ;;  %1583 = vmatprep.subr.bf16.mxu0 %v9330_v32  ;;  %v9359_v30 = vld [vmem:[%s11146_s11 + $0x134] ss:$24 sps:$4 sm:$0xff]  }
 0x1b1   :  { %1616 = vmatprep.subr.bf16.mxu1 %v9335_v34  ;;  %11177 = vst [vmem:[#allocation86_spill] sm:$0xff] %v9359_v30  ;;  %v9371_v34 = vld [vmem:[%s11146_s11 + $0x130] ss:$24 sps:$4 sm:$0xff]  }
 0x1b2   :  { %11179 = vst [vmem:[#allocation88_spill] sm:$0xff] %v9371_v34 }
 0x1b3   :  { %1584 = vmatpush1.bf16.msra.mxu0 %v9342_v36 }
 0x1b4   :  { %1617 = vmatpush1.bf16.msra.mxu1 %v9347_v63  ;;  %1585 = vmatprep.subr.bf16.mxu0 %v9354_v26  ;;  %v9383_v63 = vld [vmem:[%s11146_s11 + $0x164] ss:$24 sps:$4 sm:$0xff]  }
 0x1b5   :  { %1618 = vmatprep.subr.bf16.mxu1 %v9359_v30  ;;  %11181 = vst [vmem:[#allocation90_spill] sm:$0xff] %v9383_v63  ;;  %v9395_v30 = vld [vmem:[%s11146_s11 + $0x160] ss:$24 sps:$4 sm:$0xff]  }
 0x1b6   :  { %11183 = vst [vmem:[#allocation92_spill] sm:$0xff] %v9395_v30 }
 0x1b7   :  { %1586 = vmatpush1.bf16.msra.mxu0 %v9366_v22 }
 0x1b8   :  { %1619 = vmatpush1.bf16.msra.mxu1 %v9371_v34  ;;  %1587 = vmatprep.subr.bf16.mxu0 %v9378_v18  ;;  %v9407_v34 = vld [vmem:[%s11146_s11 + $0x194] ss:$24 sps:$4 sm:$0xff]  }
 0x1b9   :  { %1620 = vmatprep.subr.bf16.mxu1 %v9383_v63  ;;  %11185 = vst [vmem:[#allocation94_spill] sm:$0xff] %v9407_v34  ;;  %v9419_v63 = vld [vmem:[%s11146_s11 + $0x190] ss:$24 sps:$4 sm:$0xff]  }
 0x1ba   :  { %11187 = vst [vmem:[#allocation96_spill] sm:$0xff] %v9419_v63 }
 0x1bb   :  { %1588 = vmatpush1.bf16.msra.mxu0 %v9390_v14 }
 0x1bc   :  { %1621 = vmatpush1.bf16.msra.mxu1 %v9395_v30  ;;  %1589 = vmatprep.subr.bf16.mxu0 %v9402_v10  ;;  %v9431_v30 = vld [vmem:[%s11146_s11 + $0x1c4] ss:$24 sps:$4 sm:$0xff]  }
 0x1bd   :  { %1622 = vmatprep.subr.bf16.mxu1 %v9407_v34  ;;  %11189 = vst [vmem:[#allocation98_spill] sm:$0xff] %v9431_v30  ;;  %v9443_v34 = vld [vmem:[%s11146_s11 + $0x1c0] ss:$24 sps:$4 sm:$0xff]  }
 0x1be   :  { %11191 = vst [vmem:[#allocation100_spill] sm:$0xff] %v9443_v34 }
 0x1bf   :  { %1590 = vmatpush1.bf16.msra.mxu0 %v9414_v6  ;;  %v9450_v6 = vld [vmem:[%s11146_s11 + $0x2ac] ss:$24 sps:$4 sm:$0xff]  }
 0x1c0   :  { %1623 = vmatpush1.bf16.msra.mxu1 %v9419_v63  ;;  %1591 = vmatprep.subr.bf16.mxu0 %v9426_v2  ;;  %11192 = vst [vmem:[#allocation101_spill] sm:$0xff] %v9450_v6  ;;  %v9455_v63 = vld [vmem:[%s11146_s11 + $0x1f4] ss:$24 sps:$4 sm:$0xff]   ;;  %v9462_v2 = vld [vmem:[%s11146_s11 + $0x2a8] ss:$24 sps:$4 sm:$0xff]  }
 0x1c1   :  { %1624 = vmatprep.subr.bf16.mxu1 %v9431_v30  ;;  %11193 = vst [vmem:[#allocation102_spill] sm:$0xff] %v9455_v63  ;;  %11194 = vst [vmem:[#allocation103_spill] sm:$0xff] %v9462_v2  ;;  %v9467_v30 = vld [vmem:[%s11146_s11 + $0x1f0] ss:$24 sps:$4 sm:$0xff]  }
 0x1c2   :  { %11195 = vst [vmem:[#allocation104_spill] sm:$0xff] %v9467_v30 }
 0x1c3   :  { %1592 = vmatpush1.bf16.msra.mxu0 %v9438_v61  ;;  %v9474_v61 = vld [vmem:[%s11146_s11 + $0x2dc] ss:$24 sps:$4 sm:$0xff]  }
 0x1c4   :  { %1625 = vmatpush1.bf16.msra.mxu1 %v9443_v34  ;;  %1593 = vmatprep.subr.bf16.mxu0 %v9450_v6  ;;  %11196 = vst [vmem:[#allocation105_spill] sm:$0xff] %v9474_v61  ;;  %v9479_v34 = vld [vmem:[%s11146_s11 + $0x224] ss:$24 sps:$4 sm:$0xff]   ;;  %v9486_v6 = vld [vmem:[%s11146_s11 + $0x2d8] ss:$24 sps:$4 sm:$0xff]  }
 0x1c5   :  { %1626 = vmatprep.subr.bf16.mxu1 %v9455_v63  ;;  %11197 = vst [vmem:[#allocation106_spill] sm:$0xff] %v9479_v34  ;;  %11198 = vst [vmem:[#allocation107_spill] sm:$0xff] %v9486_v6  ;;  %v9491_v63 = vld [vmem:[%s11146_s11 + $0x220] ss:$24 sps:$4 sm:$0xff]  }
 0x1c6   :  { %11199 = vst [vmem:[#allocation108_spill] sm:$0xff] %v9491_v63 }
 0x1c7   :  { %1594 = vmatpush1.bf16.msra.mxu0 %v9462_v2  ;;  %v9498_v2 = vld [vmem:[%s11146_s11 + $0x254] ss:$24 sps:$4 sm:$0xff]  }
 0x1c8   :  { %1627 = vmatpush1.bf16.msra.mxu1 %v9467_v30  ;;  %1595 = vmatprep.subr.bf16.mxu0 %v9474_v61  ;;  %11200 = vst [vmem:[#allocation109_spill] sm:$0xff] %v9498_v2  ;;  %v9505_v30 = vld [vmem:[%s11146_s11 + $0x250] ss:$24 sps:$4 sm:$0xff]   ;;  %v11202_v61 = vmov 0  }
 0x1c9   :  { %1628 = vmatprep.subr.bf16.mxu1 %v9479_v34  ;;  %11201 = vst [vmem:[#allocation110_spill] sm:$0xff] %v9505_v30  ;;  %v9511_v34 = vld [vmem:[%s11146_s11 + $0x284] ss:$24 sps:$4 sm:$0xff]  }
 0x1cb   :  { %1596 = vmatpush1.bf16.msra.mxu0 %v9486_v6 }
 0x1cc   :  { %1629 = vmatpush1.bf16.msra.mxu1 %v9491_v63  ;;  %1691 = vmatprep.subr.bf16.mxu0 %v8962_v53  ;;  %v9519_v63 = vld [vmem:[%s11146_s11 + $0x280] ss:$24 sps:$4 sm:$0xff]  }
 0x1cd   :  { %1630 = vmatprep.subr.bf16.mxu1 %v9498_v2  ;;  %v9526_v2 = vld [vmem:[%s11146_s11 + $0x2b4] ss:$24 sps:$4 sm:$0xff]  }
 0x1ce   :  { %1598 = vmatmul.mubr.bf16.vlgmr.msra.gmra.mrb[8].mxu0 %v11202_v61 }
 0x1cf   :  { %1692 = vmatpush1.bf16.msra.mxu0 %v8969_v56  ;;  %v9540_v56 = vld [vmem:[%s11146_s11 + $0x2e4] ss:$24 sps:$4 sm:$0xff]  }
 0x1d0   :  { %1631 = vmatpush1.bf16.msra.mxu1 %v9505_v30  ;;  %1693 = vmatprep.subr.bf16.mxu0 %v8975_v58  ;;  %v9533_v30 = vld [vmem:[%s11146_s11 + $0x2b0] ss:$24 sps:$4 sm:$0xff]   ;;  %v9547_v58 = vld [vmem:[%s11146_s11 + $0x2e0] ss:$24 sps:$4 sm:$0xff]  }
 0x1d1   :  { %1632 = vmatprep.subr.bf16.mxu1 %v9511_v34 }
 0x1d3   :  { %1694 = vmatpush1.bf16.msra.mxu0 %v8983_v60 }
 0x1d4   :  { %1633 = vmatpush1.bf16.msra.mxu1 %v9519_v63  ;;  %1695 = vmatprep.subr.bf16.mxu0 %v8989_v62 }
 0x1d5   :  { %1634 = vmatprep.subr.bf16.mxu1 %v9526_v2 }
 0x1d7   :  { %1696 = vmatpush1.bf16.msra.mxu0 %v8997_v1 }
 0x1d8   :  { %1635 = vmatpush1.bf16.msra.mxu1 %v9533_v30  ;;  %1697 = vmatprep.subr.bf16.mxu0 %v9003_v3 }
 0x1d9   :  { %1636 = vmatprep.subr.bf16.mxu1 %v9540_v56 }
 0x1db   :  { %1698 = vmatpush1.bf16.msra.mxu0 %v9009_v5 }
 0x1dc   :  { %1637 = vmatpush1.bf16.msra.mxu1 %v9547_v58  ;;  %1699 = vmatprep.subr.bf16.mxu0 %v9015_v7 }
 0x1dd   :  { %1732 = vmatprep.subr.bf16.mxu1 %v9116_v39 }
 0x1df   :  { %1639 = vmatmul.mubr.bf16.vlgmr.msra.gmra.mrb[8].mxu1 %v11202_v61  ;;  %1700 = vmatpush1.bf16.msra.mxu0 %v9021_v9  ;;  %v11203_v61 = vld [vmem:[#allocation95_spill] sm:$0xff] }
 0x1e0   :  { %1733 = vmatpush1.bf16.msra.mxu1 %v9127_v41  ;;  %1701 = vmatprep.subr.bf16.mxu0 %v9027_v11 }
 0x1e1   :  { %1734 = vmatprep.subr.bf16.mxu1 %v9139_v43 }
 0x1e3   :  { %1702 = vmatpush1.bf16.msra.mxu0 %v9033_v13 }
 0x1e4   :  { %1735 = vmatpush1.bf16.msra.mxu1 %v9152_v45  ;;  %1703 = vmatprep.subr.bf16.mxu0 %v9039_v15 }
 0x1e5   :  { %1736 = vmatprep.subr.bf16.mxu1 %v9164_v47 }
 0x1e7   :  { %1704 = vmatpush1.bf16.msra.mxu0 %v9045_v17 }
 0x1e8   :  { %1737 = vmatpush1.bf16.msra.mxu1 %v9177_v49  ;;  %1705 = vmatprep.subr.bf16.mxu0 %v9051_v19 }
 0x1e9   :  { %1738 = vmatprep.subr.bf16.mxu1 %v9189_v51 }
 0x1eb   :  { %1706 = vmatpush1.bf16.msra.mxu0 %v9057_v21 }
 0x1ec   :  { %1739 = vmatpush1.bf16.msra.mxu1 %v9201_v54  ;;  %1707 = vmatprep.subr.bf16.mxu0 %v9063_v23 }
 0x1ed   :  { %1740 = vmatprep.subr.bf16.mxu1 %v9208_v55 }
 0x1ef   :  { %1708 = vmatpush1.bf16.msra.mxu0 %v9069_v25 }
 0x1f0   :  { %1741 = vmatpush1.bf16.msra.mxu1 %v9220_v59  ;;  %1709 = vmatprep.subr.bf16.mxu0 %v9075_v27  ;;  %v1012_v59 = vld [vmem:[#allocation15] sm:$0x3f] }
 0x1f1   :  { %1742 = vmatprep.subr.bf16.mxu1 %v9232_v0  ;;  %v11089_v0 = vlaneseq }
 0x1f3   :  { %1710 = vmatpush1.bf16.msra.mxu0 %v9081_v29 }
 0x1f4   :  { %1743 = vmatpush1.bf16.msra.mxu1 %v9245_v4  ;;  %1711 = vmatprep.subr.bf16.mxu0 %v9087_v31 }
 0x1f5   :  { %1744 = vmatprep.subr.bf16.mxu1 %v9257_v8 }
 0x1f7   :  { %1712 = vmatpush1.bf16.msra.mxu0 %v9093_v33 }
 0x1f8   :  { %1745 = vmatpush1.bf16.msra.mxu1 %v9270_v12  ;;  %1713 = vmatprep.subr.bf16.mxu0 %v9099_v35 }
 0x1f9   :  { %1746 = vmatprep.subr.bf16.mxu1 %v9282_v16 }
 0x1fb   :  { %1714 = vmatpush1.bf16.msra.mxu0 %v9105_v37 }
 0x1fc   :  { %1747 = vmatpush1.bf16.msra.mxu1 %v9294_v20  ;;  %1715 = vmatprep.subr.bf16.mxu0 %v9111_v38 }
 0x1fd   :  { %1748 = vmatprep.subr.bf16.mxu1 %v9306_v24 }
 0x1ff   :  { %1716 = vmatpush1.bf16.msra.mxu0 %v9121_v40 }
 0x200   :  { %1749 = vmatpush1.bf16.msra.mxu1 %v9318_v28  ;;  %1717 = vmatprep.subr.bf16.mxu0 %v9134_v42 }
 0x201   :  { %1750 = vmatprep.subr.bf16.mxu1 %v9330_v32  ;;  %v11207_v32 = vld [vmem:[#allocation103_spill] sm:$0xff] }
 0x203   :  { %1718 = vmatpush1.bf16.msra.mxu0 %v9145_v44 }
 0x204   :  { %1751 = vmatpush1.bf16.msra.mxu1 %v9342_v36  ;;  %1719 = vmatprep.subr.bf16.mxu0 %v9159_v46  ;;  %v11205_v36 = vld [vmem:[#allocation99_spill] sm:$0xff] }
 0x205   :  { %1752 = vmatprep.subr.bf16.mxu1 %v9354_v26  ;;  %v11204_v26 = vld [vmem:[#allocation97_spill] sm:$0xff] }
 0x207   :  { %1720 = vmatpush1.bf16.msra.mxu0 %v9170_v48 }
 0x208   :  { %1753 = vmatpush1.bf16.msra.mxu1 %v9366_v22  ;;  %1721 = vmatprep.subr.bf16.mxu0 %v9184_v50  ;;  %v11206_v22 = vld [vmem:[#allocation101_spill] sm:$0xff] }
 0x209   :  { %1754 = vmatprep.subr.bf16.mxu1 %v9378_v18  ;;  %v11208_v18 = vld [vmem:[#allocation105_spill] sm:$0xff] }
 0x20b   :  { %1722 = vmatpush1.bf16.msra.mxu0 %v9194_v52 }
 0x20c   :  { %1755 = vmatpush1.bf16.msra.mxu1 %v9390_v14  ;;  %1773 = vmatprep.subr.bf16.mxu0 %v9213_v57 }
 0x20d   :  { %1756 = vmatprep.subr.bf16.mxu1 %v9402_v10 }
 0x210   :  { %1757 = vmatpush1.bf16.msra.mxu1 %v11203_v61 }
 0x211   :  { %1758 = vmatprep.subr.bf16.mxu1 %v11204_v26 }
 0x214   :  { %1759 = vmatpush1.bf16.msra.mxu1 %v11205_v36 }
 0x215   :  { %1760 = vmatprep.subr.bf16.mxu1 %v11206_v22 }
 0x218   :  { %1761 = vmatpush1.bf16.msra.mxu1 %v11207_v32 }
 0x219   :  { %1762 = vmatprep.subr.bf16.mxu1 %v11208_v18 }
 0x21c   :  { %1763 = vmatpush1.bf16.msra.mxu1 %v9486_v6 }
 0x21d   :  { %1890 = vmatprep.subr.bf16.mxu1 %v8962_v53  ;;  %v9618_v53 = vshrl.u32 %v11089_v0, 7 }
 0x21f   :  { %11209 = vst [vmem:[#allocation111_spill] sm:$0xff] %v9618_v53  ;;  %v9647_v45 = vsub.s32 2, %v9618_v53 }
 0x221   :  { %11216 = vst [vmem:[#allocation118_spill] sm:$0xff] %v9647_v45 }
 0x231   :  { %v827_v14 = vpop.f32.mrb[0].mxu0 }
 0x232   :  { %v868_v10 = vpop.f32.mrb[0].mxu1  ;;  %v829_v28 = vpop.f32.mrb[1].mxu0 }
 0x233   :  { %v870_v24 = vpop.f32.mrb[1].mxu1  ;;  %v831_v20 = vpop.f32.mrb[2].mxu0 }
 0x234   :  { %v872_v61 = vpop.f32.mrb[2].mxu1  ;;  %v832_v16 = vpop.f32.mrb[3].mxu0  ;;  %v9621_v20 = vsub.s32 0, %v9618_v53 }
 0x235   :  { %v873_v26 = vpop.f32.mrb[3].mxu1  ;;  %v9623_v61 = vld [vmem:[#allocation14] sm:$0x3f] }
 0x236   :  { %11210 = vst [vmem:[#allocation112_spill] sm:$0xff] %v9621_v20  ;;  %v9626_v16 = vrot.slane %v1012_v59, %v9621_v20 }
 0x238   :  { %11211 = vst [vmem:[#allocation113_spill] sm:$0xff] %v9626_v16 }
 0x261   :  { %v9613_v12 = vpop.f32.mrb[4].mxu0 }
 0x262   :  { %v9615_v36 = vpop.f32.mrb[5].mxu0 }
 0x263   :  { %v913_v22 = vpop.f32.mrb[6].mxu0 }
 0x264   :  { %v914_v32 = vpop.f32.mrb[7].mxu0  ;;  %v9629_v22 = vsub.s32 1, %v9618_v53 }
 0x266   :  { %11212 = vst [vmem:[#allocation114_spill] sm:$0xff] %v9629_v22  ;;  %v406_v32 = vrot.slane %v9623_v61, %v9629_v22 }
 0x268   :  { %v9643_v51 = vadd.f32 %v829_v28, %v406_v32 }
 0x26a   :  { %11215 = vst [vmem:[#allocation117_spill] sm:$0xff] %v9643_v51 }
 0x272   :  { %v1558_v8 = vpop.f32.mrb[4].mxu1 }
 0x273   :  { %v1560_v18 = vpop.f32.mrb[5].mxu1  ;;  %v1559_v26 = vadd.f32 %v1558_v8, %v9626_v16  ;;  %v9650_v8 = vsub.s32 3, %v9618_v53 }
 0x274   :  { %v1562_v4 = vpop.f32.mrb[6].mxu1 }
 0x275   :  { %v1563_v6 = vpop.f32.mrb[7].mxu1  ;;  %v402_v4 = vrot.slane %v9623_v61, %v9621_v20  ;;  %11217 = vst [vmem:[#allocation119_spill] sm:$0xff] %v9650_v8  ;;  %v414_v28 = vrot.slane %v9623_v61, %v9650_v8 }
 0x276   :  { %v9634_v6 = vrot.slane %v1012_v59, %v9629_v22 }
 0x277   :  { %v9639_v0 = vadd.f32 %v827_v14, %v402_v4  ;;  %v410_v14 = vrot.slane %v9623_v61, %v9647_v45  ;;  %v9665_v32 = vadd.f32 %v870_v24, %v414_v28  ;;  %v9674_v24 = vsub.s32 5, %v9618_v53 }
 0x278   :  { %11213 = vst [vmem:[#allocation115_spill] sm:$0xff] %v9634_v6  ;;  %v1561_v55 = vadd.f32 %v1560_v18, %v9634_v6  ;;  %v9655_v18 = vrot.slane %v1012_v59, %v9647_v45 }
 0x279   :  { %11214 = vst [vmem:[#allocation116_spill] sm:$0xff] %v9639_v0  ;;  %v1647_v54 = vadd.f32 %v1559_v26, %v9639_v0  ;;  %11218 = vst [vmem:[#allocation120_spill] sm:$0xff] %v9665_v32 }
 0x27a   :  { %v1648_v49 = vadd.f32 %v1561_v55, %v9643_v51  ;;  %v9662_v55 = vadd.f32 %v868_v10, %v410_v14  ;;  %v9671_v14 = vsub.s32 4, %v9618_v53  ;;  %11220 = vst [vmem:[#allocation122_spill] sm:$0xff] %v9674_v24 }
 0x27b   :  { %v6873_v47 = vmul.f32 -1.442695, %v1647_v54  ;;  %v9660_v54 = vrot.slane %v1012_v59, %v9650_v8 }
 0x27c   :  { %v6874_v20 = vmul.f32 -1.442695, %v1648_v49  ;;  %11219 = vst [vmem:[#allocation121_spill] sm:$0xff] %v9671_v14 }
 0x27d   :  { %7769 = vpow2.f32 %v6873_v47 }
 0x27e   :  { %7771 = vpow2.f32 %v6874_v20 }
 0x287   :  { %v7770_v47 = vpop.eup %7769 }
 0x288   :  { %v7772_v26 = vpop.eup %7771  ;;  %v1655_v22 = vadd.f32 1.0, %v7770_v47 }
 0x289   :  { %v1656_v16 = vadd.f32 1.0, %v7772_v26 }
 0x28a   :  { %7773 = vrcp.f32 %v1655_v22 }
 0x2a1   :  { %v1599_v49 = vpop.f32.mrb[8].mxu0 }
 0x2a2   :  { %v1600_v20 = vadd.f32 %v1599_v49, %v9655_v18  ;;  %v1601_v4 = vpop.f32.mrb[9].mxu0 }
 0x2a3   :  { %v1602_v45 = vadd.f32 %v1601_v4, %v9660_v54  ;;  %v1603_v51 = vpop.f32.mrb[10].mxu0 }
 0x2a4   :  { %v1661_v0 = vadd.f32 %v1600_v20, %v9662_v55  ;;  %v1604_v6 = vpop.f32.mrb[11].mxu0  ;;  %v9677_v51 = vrot.slane %v1012_v59, %v9671_v14 }
 0x2a5   :  { %v1662_v8 = vadd.f32 %v1602_v45, %v9665_v32  ;;  %v9680_v6 = vrot.slane %v1012_v59, %v9674_v24  ;;  %v418_v45 = vrot.slane %v9623_v61, %v9671_v14 }
 0x2a6   :  { %v6875_v43 = vmul.f32 -1.442695, %v1661_v0  ;;  %11221 = vst [vmem:[#allocation123_spill] sm:$0xff] %v9677_v51  ;;  %v7774_v0 = vpop.eup %7773 }
 0x2a7   :  { %v6876_v10 = vmul.f32 -1.442695, %v1662_v8  ;;  %v9689_v59 = vadd.f32 %v9613_v12, %v418_v45 }
 0x2a8   :  { %7775 = vpow2.f32 %v6875_v43  ;;  %v422_v43 = vrot.slane %v9623_v61, %v9674_v24 }
 0x2a9   :  { %7777 = vpow2.f32 %v6876_v10 }
 0x2aa   :  { %7779 = vrcp.f32 %v1656_v16  ;;  %v9692_v32 = vadd.f32 %v9615_v36, %v422_v43 }
 0x2b2   :  { %v1640_v16 = vpop.f32.mrb[8].mxu1  ;;  %v7776_v22 = vpop.eup %7775 }
 0x2b3   :  { %v1641_v8 = vadd.f32 %v1640_v16, %v9677_v51  ;;  %v1642_v28 = vpop.f32.mrb[9].mxu1  ;;  %v7778_v47 = vpop.eup %7777  ;;  %v1669_v49 = vadd.f32 1.0, %v7776_v22 }
 0x2b4   :  { %v1643_v20 = vadd.f32 %v1642_v28, %v9680_v6  ;;  %v1644_v4 = vpop.f32.mrb[10].mxu1  ;;  %v7780_v26 = vpop.eup %7779  ;;  %v1670_v10 = vadd.f32 1.0, %v7778_v47 }
 0x2b5   :  { %v1675_v14 = vmul.f32 %v7774_v0, %v1641_v8  ;;  %v1645_v53 = vpop.f32.mrb[11].mxu1  ;;  %7781 = vrcp.f32 %v1669_v49 }
 0x2b6   :  { %v1676_v61 = vmul.f32 %v7780_v26, %v1643_v20  ;;  %7783 = vrcp.f32 %v1670_v10  ;;  %v11223_v26 = vld [vmem:[#allocation66_spill] sm:$0xff]  ;;  %v7829_v10 = vld [vmem:[%s11146_s11] ss:$24 sps:$4 sm:$0xff]  }
 0x2b7   :  { %v1677_v16 = vadd.f32 %v1675_v14, %v9689_v59 }
 0x2b8   :  { %v1678_v22 = vadd.f32 %v1676_v61, %v9692_v32  ;;  %v7830_v61 = vld [vmem:[%s11146_s11 + $0x34] ss:$24 sps:$4 sm:$0xff]   ;;  %s8638_s11 = smov [#allocation5]  }
 0x2b9   :  { %7785 = vtanh.f32 %v1677_v16  ;;  %v11224_v16 = vld [vmem:[#allocation68_spill] sm:$0xff]  ;;  %s303_s28 = sshll.u32 %s8638_s11, 4  ;;  %s304_s28 = int_to_ptr.vmem [resolvable:$true] %s303_s28 }
 0x2ba   :  { %7787 = vtanh.f32 %v1678_v22  ;;  %v11225_v22 = vld [vmem:[#allocation70_spill] sm:$0xff] }
 0x2bf   :  { %v7782_v28 = vpop.eup %7781 }
 0x2c0   :  { %v7784_v4 = vpop.eup %7783  ;;  %v1681_v24 = vsub.f32 1.0, %v7782_v28  ;;  %v1685_v53 = vmul.f32 0.0, %v7782_v28  ;;  %v11226_v28 = vld [vmem:[#allocation72_spill] sm:$0xff] }
 0x2c1   :  { %v1682_v12 = vsub.f32 1.0, %v7784_v4  ;;  %v1686_v36 = vmul.f32 0.0, %v7784_v4  ;;  %v11227_v4 = vld [vmem:[#allocation74_spill] sm:$0xff] }
 0x2c3   :  { %v7786_v45 = vpop.eup %7785 }
 0x2c4   :  { %v7788_v47 = vpop.eup %7787  ;;  %v1683_v0 = vmul.f32 %v7786_v45, %v1681_v24  ;;  %v11222_v24 = vld [vmem:[#allocation64_spill] sm:$0xff]  ;;  %v11229_v45 = vld [vmem:[#allocation78_spill] sm:$0xff] }
 0x2c5   :  { %v1684_v8 = vmul.f32 %v7788_v47, %v1682_v12  ;;  %v11228_v12 = vld [vmem:[#allocation76_spill] sm:$0xff] }
 0x2c6   :  { %v9696_v43 = vadd.f32 %v1685_v53, %v1683_v0  ;;  %v11230_v47 = vld [vmem:[#allocation80_spill] sm:$0xff]  ;;  %v11263_v0 = vld [vmem:[#allocation81_spill] sm:$0xff]  ;;  %v11264_v53 = vld [vmem:[#allocation83_spill] sm:$0xff] }
 0x2c7   :  { %v9698_v49 = vadd.f32 %v1686_v36, %v1684_v8  ;;  %v11265_v8 = vld [vmem:[#allocation85_spill] sm:$0xff]  ;;  %v11266_v36 = vld [vmem:[#allocation87_spill] sm:$0xff] }
 0x2c8   :  { %v9704_v20 = vpack.c.bf16 %v9696_v43, %v9696_v43 }
 0x2c9   :  { %v1690_v14 = vpack.c.bf16 %v9698_v49, %v9698_v49 }
 0x2cb   :  { %1723 = vmatprep.mubr.bf16.mxu0 %v1690_v14  ;;  %1764 = vmatprep.mubr.bf16.mxu1 %v1690_v14 }
 0x2cc   :  { %1724 = vmatmul.mubr.bf16.vlgmr.msra.gmra.mrb[12].mxu0 %v9704_v20  ;;  %1765 = vmatmul.mubr.bf16.vlgmr.msra.gmra.mrb[12].mxu1 %v9704_v20 }
 0x2cd   :  { %1774 = vmatpush1.bf16.msra.mxu0 %v11222_v24  ;;  %1805 = vmatprep.mubr.bf16.mxu0 %v1690_v14  ;;  %v11267_v14 = vld [vmem:[#allocation89_spill] sm:$0xff] }
 0x2ce   :  { %1775 = vmatprep.subr.bf16.mxu0 %v11223_v26  ;;  %1891 = vmatpush1.bf16.msra.mxu1 %v7829_v10  ;;  %v11269_v10 = vld [vmem:[#allocation93_spill] sm:$0xff] }
 0x2cf   :  { %1892 = vmatprep.subr.bf16.mxu1 %v7830_v61  ;;  %v11270_v61 = vld [vmem:[#allocation95_spill] sm:$0xff] }
 0x2d1   :  { %1776 = vmatpush1.bf16.msra.mxu0 %v11224_v16 }
 0x2d2   :  { %1777 = vmatprep.subr.bf16.mxu0 %v11225_v22  ;;  %1893 = vmatpush1.bf16.msra.mxu1 %v8983_v60  ;;  %v11231_v60 = vld [vmem:[#allocation82_spill] sm:$0xff] }
 0x2d3   :  { %1894 = vmatprep.subr.bf16.mxu1 %v8989_v62  ;;  %v11232_v62 = vld [vmem:[#allocation84_spill] sm:$0xff] }
 0x2d5   :  { %1778 = vmatpush1.bf16.msra.mxu0 %v11226_v28 }
 0x2d6   :  { %1779 = vmatprep.subr.bf16.mxu0 %v11227_v4  ;;  %1895 = vmatpush1.bf16.msra.mxu1 %v8997_v1  ;;  %v11233_v1 = vld [vmem:[#allocation86_spill] sm:$0xff] }
 0x2d7   :  { %1896 = vmatprep.subr.bf16.mxu1 %v9003_v3  ;;  %v11234_v3 = vld [vmem:[#allocation88_spill] sm:$0xff] }
 0x2d9   :  { %1780 = vmatpush1.bf16.msra.mxu0 %v11228_v12 }
 0x2da   :  { %1781 = vmatprep.subr.bf16.mxu0 %v11229_v45  ;;  %1897 = vmatpush1.bf16.msra.mxu1 %v9009_v5  ;;  %v11235_v5 = vld [vmem:[#allocation90_spill] sm:$0xff] }
 0x2db   :  { %1898 = vmatprep.subr.bf16.mxu1 %v9015_v7  ;;  %v11236_v7 = vld [vmem:[#allocation92_spill] sm:$0xff] }
 0x2dd   :  { %1782 = vmatpush1.bf16.msra.mxu0 %v11230_v47 }
 0x2de   :  { %1783 = vmatprep.subr.bf16.mxu0 %v11231_v60  ;;  %1899 = vmatpush1.bf16.msra.mxu1 %v9021_v9  ;;  %v11237_v9 = vld [vmem:[#allocation94_spill] sm:$0xff] }
 0x2df   :  { %1900 = vmatprep.subr.bf16.mxu1 %v9027_v11  ;;  %v11238_v11 = vld [vmem:[#allocation96_spill] sm:$0xff] }
 0x2e1   :  { %1784 = vmatpush1.bf16.msra.mxu0 %v11232_v62 }
 0x2e2   :  { %1785 = vmatprep.subr.bf16.mxu0 %v11233_v1  ;;  %1901 = vmatpush1.bf16.msra.mxu1 %v9033_v13  ;;  %v11239_v13 = vld [vmem:[#allocation98_spill] sm:$0xff] }
 0x2e3   :  { %1902 = vmatprep.subr.bf16.mxu1 %v9039_v15  ;;  %v11240_v15 = vld [vmem:[#allocation100_spill] sm:$0xff] }
 0x2e5   :  { %1786 = vmatpush1.bf16.msra.mxu0 %v11234_v3 }
 0x2e6   :  { %1787 = vmatprep.subr.bf16.mxu0 %v11235_v5  ;;  %1903 = vmatpush1.bf16.msra.mxu1 %v9045_v17  ;;  %v11241_v17 = vld [vmem:[#allocation102_spill] sm:$0xff] }
 0x2e7   :  { %1904 = vmatprep.subr.bf16.mxu1 %v9051_v19  ;;  %v11242_v19 = vld [vmem:[#allocation104_spill] sm:$0xff] }
 0x2e9   :  { %1788 = vmatpush1.bf16.msra.mxu0 %v11236_v7 }
 0x2ea   :  { %1789 = vmatprep.subr.bf16.mxu0 %v11237_v9  ;;  %1905 = vmatpush1.bf16.msra.mxu1 %v9057_v21  ;;  %v11243_v21 = vld [vmem:[#allocation106_spill] sm:$0xff] }
 0x2eb   :  { %1906 = vmatprep.subr.bf16.mxu1 %v9063_v23  ;;  %v11244_v23 = vld [vmem:[#allocation108_spill] sm:$0xff] }
 0x2ed   :  { %1790 = vmatpush1.bf16.msra.mxu0 %v11238_v11 }
 0x2ee   :  { %1791 = vmatprep.subr.bf16.mxu0 %v11239_v13  ;;  %1907 = vmatpush1.bf16.msra.mxu1 %v9069_v25  ;;  %v11245_v25 = vld [vmem:[#allocation109_spill] sm:$0xff] }
 0x2ef   :  { %1908 = vmatprep.subr.bf16.mxu1 %v9075_v27  ;;  %v11246_v27 = vld [vmem:[#allocation110_spill] sm:$0xff] }
 0x2f1   :  { %1792 = vmatpush1.bf16.msra.mxu0 %v11240_v15 }
 0x2f2   :  { %1793 = vmatprep.subr.bf16.mxu0 %v11241_v17  ;;  %1909 = vmatpush1.bf16.msra.mxu1 %v9081_v29  ;;  %v11247_v29 = vld [vmem:[#allocation56_spill] sm:$0xff] }
 0x2f3   :  { %1910 = vmatprep.subr.bf16.mxu1 %v9087_v31  ;;  %v11248_v31 = vld [vmem:[#allocation57_spill] sm:$0xff] }
 0x2f5   :  { %1794 = vmatpush1.bf16.msra.mxu0 %v11242_v19 }
 0x2f6   :  { %1795 = vmatprep.subr.bf16.mxu0 %v11243_v21  ;;  %1911 = vmatpush1.bf16.msra.mxu1 %v9093_v33  ;;  %v11249_v33 = vld [vmem:[#allocation58_spill] sm:$0xff] }
 0x2f7   :  { %1912 = vmatprep.subr.bf16.mxu1 %v9099_v35  ;;  %v11250_v35 = vld [vmem:[#allocation59_spill] sm:$0xff] }
 0x2f9   :  { %1796 = vmatpush1.bf16.msra.mxu0 %v11244_v23 }
 0x2fa   :  { %1797 = vmatprep.subr.bf16.mxu0 %v11245_v25  ;;  %1913 = vmatpush1.bf16.msra.mxu1 %v9105_v37  ;;  %v11251_v37 = vld [vmem:[#allocation60_spill] sm:$0xff] }
 0x2fb   :  { %1914 = vmatprep.subr.bf16.mxu1 %v9111_v38  ;;  %v11252_v38 = vld [vmem:[#allocation61_spill] sm:$0xff] }
 0x2fd   :  { %1798 = vmatpush1.bf16.msra.mxu0 %v11246_v27 }
 0x2fe   :  { %1799 = vmatprep.subr.bf16.mxu0 %v9511_v34  ;;  %1915 = vmatpush1.bf16.msra.mxu1 %v9121_v40  ;;  %v11254_v40 = vld [vmem:[#allocation63_spill] sm:$0xff] }
 0x2ff   :  { %1916 = vmatprep.subr.bf16.mxu1 %v9134_v42  ;;  %v11255_v42 = vld [vmem:[#allocation65_spill] sm:$0xff] }
 0x301   :  { %1800 = vmatpush1.bf16.msra.mxu0 %v9519_v63 }
 0x302   :  { %1801 = vmatprep.subr.bf16.mxu0 %v9526_v2  ;;  %1917 = vmatpush1.bf16.msra.mxu1 %v9145_v44  ;;  %v11256_v44 = vld [vmem:[#allocation67_spill] sm:$0xff] }
 0x303   :  { %1918 = vmatprep.subr.bf16.mxu1 %v9159_v46  ;;  %v11258_v46 = vld [vmem:[#allocation71_spill] sm:$0xff] }
 0x305   :  { %1802 = vmatpush1.bf16.msra.mxu0 %v9533_v30 }
 0x306   :  { %1803 = vmatprep.subr.bf16.mxu0 %v9540_v56  ;;  %1919 = vmatpush1.bf16.msra.mxu1 %v9170_v48  ;;  %v11259_v48 = vld [vmem:[#allocation73_spill] sm:$0xff] }
 0x307   :  { %1920 = vmatprep.subr.bf16.mxu1 %v9184_v50  ;;  %v11260_v50 = vld [vmem:[#allocation75_spill] sm:$0xff] }
 0x309   :  { %1804 = vmatpush1.bf16.msra.mxu0 %v9547_v58 }
 0x30a   :  { %1931 = vmatprep.subr.bf16.mxu0 %v9116_v39  ;;  %1921 = vmatpush1.bf16.msra.mxu1 %v9194_v52  ;;  %v11253_v39 = vld [vmem:[#allocation62_spill] sm:$0xff]  ;;  %v11261_v52 = vld [vmem:[#allocation77_spill] sm:$0xff] }
 0x30b   :  { %1972 = vmatprep.subr.bf16.mxu1 %v9213_v57  ;;  %v11262_v57 = vld [vmem:[#allocation79_spill] sm:$0xff] }
 0x30c   :  { %1806 = vmatmul.mubr.bf16.vlgmr.msra.gmra.mrb[16].mxu0 %v9704_v20  ;;  %v11268_v20 = vld [vmem:[#allocation91_spill] sm:$0xff] }
 0x30d   :  { %1932 = vmatpush1.bf16.msra.mxu0 %v9127_v41  ;;  %v11257_v41 = vld [vmem:[#allocation69_spill] sm:$0xff] }
 0x30e   :  { %1933 = vmatprep.subr.bf16.mxu0 %v11247_v29  ;;  %v11271_v29 = vld [vmem:[#allocation97_spill] sm:$0xff] }
 0x311   :  { %1934 = vmatpush1.bf16.msra.mxu0 %v11248_v31  ;;  %v11272_v31 = vld [vmem:[#allocation99_spill] sm:$0xff] }
 0x312   :  { %1935 = vmatprep.subr.bf16.mxu0 %v11249_v33  ;;  %v11273_v33 = vld [vmem:[#allocation101_spill] sm:$0xff] }
 0x315   :  { %1936 = vmatpush1.bf16.msra.mxu0 %v11250_v35  ;;  %v11274_v35 = vld [vmem:[#allocation103_spill] sm:$0xff] }
 0x316   :  { %1937 = vmatprep.subr.bf16.mxu0 %v11251_v37  ;;  %v11275_v37 = vld [vmem:[#allocation105_spill] sm:$0xff] }
 0x319   :  { %1938 = vmatpush1.bf16.msra.mxu0 %v11252_v38  ;;  %v11276_v38 = vld [vmem:[#allocation107_spill] sm:$0xff] }
 0x31a   :  { %1939 = vmatprep.subr.bf16.mxu0 %v11253_v39 }
 0x31d   :  { %1940 = vmatpush1.bf16.msra.mxu0 %v11254_v40 }
 0x31e   :  { %1941 = vmatprep.subr.bf16.mxu0 %v11255_v42 }
 0x321   :  { %1942 = vmatpush1.bf16.msra.mxu0 %v11256_v44 }
 0x322   :  { %1943 = vmatprep.subr.bf16.mxu0 %v11257_v41 }
 0x325   :  { %1944 = vmatpush1.bf16.msra.mxu0 %v11258_v46 }
 0x326   :  { %1945 = vmatprep.subr.bf16.mxu0 %v11259_v48 }
 0x329   :  { %1946 = vmatpush1.bf16.msra.mxu0 %v11260_v50 }
 0x32a   :  { %1947 = vmatprep.subr.bf16.mxu0 %v11261_v52 }
 0x32d   :  { %1948 = vmatpush1.bf16.msra.mxu0 %v11262_v57 }
 0x32e   :  { %1949 = vmatprep.subr.bf16.mxu0 %v11263_v0 }
 0x331   :  { %1950 = vmatpush1.bf16.msra.mxu0 %v11264_v53 }
 0x332   :  { %1951 = vmatprep.subr.bf16.mxu0 %v11265_v8 }
 0x335   :  { %1952 = vmatpush1.bf16.msra.mxu0 %v11266_v36  ;;  %v11277_v36 = vld [vmem:[#allocation120_spill] sm:$0xff] }
 0x336   :  { %1953 = vmatprep.subr.bf16.mxu0 %v11267_v14 }
 0x339   :  { %1954 = vmatpush1.bf16.msra.mxu0 %v11268_v20 }
 0x33a   :  { %1955 = vmatprep.subr.bf16.mxu0 %v11269_v10 }
 0x33d   :  { %1956 = vmatpush1.bf16.msra.mxu0 %v11270_v61 }
 0x33e   :  { %1957 = vmatprep.subr.bf16.mxu0 %v11271_v29 }
 0x341   :  { %1958 = vmatpush1.bf16.msra.mxu0 %v11272_v31 }
 0x342   :  { %1959 = vmatprep.subr.bf16.mxu0 %v11273_v33 }
 0x345   :  { %1960 = vmatpush1.bf16.msra.mxu0 %v11274_v35  ;;  %v11278_v35 = vld [vmem:[#allocation113_spill] sm:$0xff] }
 0x346   :  { %1961 = vmatprep.subr.bf16.mxu0 %v11275_v37 }
 0x349   :  { %1962 = vmatpush1.bf16.msra.mxu0 %v11276_v38  ;;  %v11279_v38 = vld [vmem:[#allocation115_spill] sm:$0xff] }
 0x39f   :  { %v1725_v39 = vpop.f32.mrb[12].mxu0  ;;  %v1766_v40 = vpop.f32.mrb[12].mxu1 }
 0x3a0   :  { %v1767_v42 = vadd.f32 %v1766_v40, %v9655_v18  ;;  %v1727_v44 = vpop.f32.mrb[13].mxu0  ;;  %v1768_v41 = vpop.f32.mrb[13].mxu1  ;;  %v1726_v37 = vadd.f32 %v1725_v39, %v11278_v35 }
 0x3a1   :  { %v1769_v46 = vadd.f32 %v1768_v41, %v9660_v54  ;;  %v1729_v48 = vpop.f32.mrb[14].mxu0  ;;  %v1770_v50 = vpop.f32.mrb[14].mxu1  ;;  %v1728_v40 = vadd.f32 %v1727_v44, %v11279_v38 }
 0x3a2   :  { %v1836_v52 = vrot.slane %v1767_v42, 7  ;;  %v1730_v57 = vpop.f32.mrb[15].mxu0  ;;  %v1771_v0 = vpop.f32.mrb[15].mxu1  ;;  %v1816_v42 = vrot.slane %v1726_v37, 7  ;;  %v11280_v50 = vld [vmem:[#allocation116_spill] sm:$0xff] }
 0x3a3   :  { %v1837_v53 = vrot.slane %v1769_v46, 7  ;;  %v1817_v41 = vrot.slane %v1728_v40, 7  ;;  %v1872_v46 = vrot.slane %v9696_v43, 7  ;;  %v1873_v57 = vrot.slane %v9698_v49, 7  ;;  %v11281_v0 = vld [vmem:[#allocation117_spill] sm:$0xff] }
 0x3a4   :  { %v1840_v8 = vadd.f32 %v1836_v52, %v9662_v55  ;;  %v1820_v52 = vadd.f32 %v1816_v42, %v11280_v50 }
 0x3a5   :  { %v1841_v14 = vadd.f32 %v1837_v53, %v11277_v36  ;;  %v1821_v53 = vadd.f32 %v1817_v41, %v11281_v0 }
 0x3a6   :  { %v6879_v20 = vmul.f32 -1.442695, %v1840_v8 }
 0x3a7   :  { %v6880_v10 = vmul.f32 -1.442695, %v1841_v14 }
 0x3a8   :  { %7789 = vpow2.f32 %v6879_v20 }
 0x3a9   :  { %7791 = vpow2.f32 %v6880_v10  ;;  %v6877_v10 = vmul.f32 -1.442695, %v1820_v52 }
 0x3b2   :  { %v7790_v61 = vpop.eup %7789 }
 0x3b3   :  { %v1848_v29 = vadd.f32 1.0, %v7790_v61  ;;  %v7792_v31 = vpop.eup %7791  ;;  %v6878_v61 = vmul.f32 -1.442695, %v1821_v53 }
 0x3b4   :  { %v1849_v33 = vadd.f32 1.0, %v7792_v31 }
 0x3b5   :  { %7793 = vrcp.f32 %v1848_v29 }
 0x3b6   :  { %7795 = vrcp.f32 %v1849_v33 }
 0x3b7   :  { %7797 = vpow2.f32 %v6877_v10 }
 0x3b8   :  { %7799 = vpow2.f32 %v6878_v61 }
 0x3bf   :  { %v7794_v48 = vpop.eup %7793 }
 0x3c0   :  { %v1876_v8 = vmul.f32 %v7794_v48, %v1872_v46  ;;  %v7796_v14 = vpop.eup %7795 }
 0x3c1   :  { %v1877_v20 = vmul.f32 %v7796_v14, %v1873_v57  ;;  %v7798_v39 = vpop.eup %7797 }
 0x3c2   :  { %v7800_v44 = vpop.eup %7799  ;;  %v1828_v29 = vadd.f32 1.0, %v7798_v39 }
 0x3c3   :  { %v1829_v31 = vadd.f32 1.0, %v7800_v44  ;;  %v1866_v44 = vsub.f32 1.0, %v7794_v48 }
 0x3c4   :  { %7801 = vrcp.f32 %v1828_v29 }
 0x3c5   :  { %7803 = vrcp.f32 %v1829_v31  ;;  %v1867_v31 = vsub.f32 1.0, %v7796_v14 }
 0x3ce   :  { %v7802_v46 = vpop.eup %7801 }
 0x3cf   :  { %v7804_v57 = vpop.eup %7803 }
 0x3df   :  { %v1807_v43 = vpop.f32.mrb[16].mxu0 }
 0x3e0   :  { %v1808_v33 = vadd.f32 %v1807_v43, %v9677_v51  ;;  %v1809_v37 = vpop.f32.mrb[17].mxu0 }
 0x3e1   :  { %v1810_v49 = vadd.f32 %v1809_v37, %v9680_v6  ;;  %v1811_v40 = vpop.f32.mrb[18].mxu0 }
 0x3e2   :  { %v1856_v42 = vrot.slane %v1808_v33, 7  ;;  %v1812_v41 = vpop.f32.mrb[19].mxu0 }
 0x3e3   :  { %v1857_v52 = vrot.slane %v1810_v49, 7 }
 0x3e4   :  { %v1860_v53 = vmul.f32 %v7802_v46, %v1856_v42 }
 0x3e5   :  { %v1861_v10 = vmul.f32 %v7804_v57, %v1857_v52 }
 0x3e6   :  { %v1862_v61 = vadd.f32 %v1860_v53, %v9689_v59 }
 0x3e7   :  { %v1863_v39 = vadd.f32 %v1861_v10, %v9692_v32 }
 0x3e8   :  { %7805 = vtanh.f32 %v1862_v61 }
 0x3e9   :  { %7807 = vtanh.f32 %v1863_v39 }
 0x3f2   :  { %v7806_v29 = vpop.eup %7805 }
 0x3f3   :  { %v7808_v43 = vpop.eup %7807  ;;  %v1868_v51 = vmul.f32 %v7806_v29, %v1866_v44 }
 0x3f4   :  { %v1869_v37 = vmul.f32 %v7808_v43, %v1867_v31 }
 0x3f5   :  { %v9822_v40 = vadd.f32 %v1876_v8, %v1868_v51 }
 0x3f6   :  { %v9824_v33 = vadd.f32 %v1877_v20, %v1869_v37 }
 0x3f7   :  { %v1880_v49 = vpack.c.bf16 %v9822_v40, %v9822_v40 }
 0x3f8   :  { %v1881_v42 = vpack.c.bf16 %v9824_v33, %v9824_v33 }
 0x3f9   :  { %v1883_v46 = vshrl.u32 %v1880_v49, 16 }
 0x3fa   :  { %v1886_v41 = vshrl.u32 %v1881_v42, 16 }
 0x3fc   :  { %1922 = vmatprep.mubr.bf16.mxu1 %v1886_v41  ;;  %1963 = vmatprep.mubr.bf16.mxu0 %v1886_v41 }
 0x3fd   :  { %1923 = vmatmul.mubr.bf16.vlgmr.msra.gmra.mrb[16].mxu1 %v1883_v46  ;;  %1964 = vmatmul.mubr.bf16.vlgmr.msra.gmra.mrb[20].mxu0 %v1883_v46 }
 0x3fe   :  { %1973 = vmatpush1.bf16.msra.mxu1 %v11222_v24  ;;  %2004 = vmatprep.mubr.bf16.mxu1 %v1886_v41 }
 0x3ff   :  { %1974 = vmatprep.subr.bf16.mxu1 %v11223_v26 }
 0x402   :  { %1975 = vmatpush1.bf16.msra.mxu1 %v11224_v16 }
 0x403   :  { %1976 = vmatprep.subr.bf16.mxu1 %v11225_v22 }
 0x406   :  { %1977 = vmatpush1.bf16.msra.mxu1 %v11226_v28 }
 0x407   :  { %1978 = vmatprep.subr.bf16.mxu1 %v11227_v4 }
 0x40a   :  { %1979 = vmatpush1.bf16.msra.mxu1 %v11228_v12 }
 0x40b   :  { %1980 = vmatprep.subr.bf16.mxu1 %v11229_v45 }
 0x40e   :  { %1981 = vmatpush1.bf16.msra.mxu1 %v11230_v47 }
 0x40f   :  { %1982 = vmatprep.subr.bf16.mxu1 %v11231_v60 }
 0x412   :  { %1983 = vmatpush1.bf16.msra.mxu1 %v11232_v62 }
 0x413   :  { %1984 = vmatprep.subr.bf16.mxu1 %v11233_v1 }
 0x416   :  { %1985 = vmatpush1.bf16.msra.mxu1 %v11234_v3 }
 0x417   :  { %1986 = vmatprep.subr.bf16.mxu1 %v11235_v5 }
 0x41a   :  { %1987 = vmatpush1.bf16.msra.mxu1 %v11236_v7 }
 0x41b   :  { %1988 = vmatprep.subr.bf16.mxu1 %v11237_v9 }
 0x41e   :  { %1989 = vmatpush1.bf16.msra.mxu1 %v11238_v11 }
 0x41f   :  { %1990 = vmatprep.subr.bf16.mxu1 %v11239_v13 }
 0x422   :  { %1991 = vmatpush1.bf16.msra.mxu1 %v11240_v15 }
 0x423   :  { %1992 = vmatprep.subr.bf16.mxu1 %v11241_v17 }
 0x426   :  { %1993 = vmatpush1.bf16.msra.mxu1 %v11242_v19 }
 0x427   :  { %1994 = vmatprep.subr.bf16.mxu1 %v11243_v21 }
 0x42a   :  { %1995 = vmatpush1.bf16.msra.mxu1 %v11244_v23 }
 0x42b   :  { %1996 = vmatprep.subr.bf16.mxu1 %v11245_v25 }
 0x42e   :  { %1997 = vmatpush1.bf16.msra.mxu1 %v11246_v27 }
 0x42f   :  { %1998 = vmatprep.subr.bf16.mxu1 %v9511_v34 }
 0x432   :  { %1999 = vmatpush1.bf16.msra.mxu1 %v9519_v63 }
 0x433   :  { %2000 = vmatprep.subr.bf16.mxu1 %v9526_v2 }
 0x436   :  { %2001 = vmatpush1.bf16.msra.mxu1 %v9533_v30 }
 0x437   :  { %2002 = vmatprep.subr.bf16.mxu1 %v9540_v56 }
 0x43a   :  { %2003 = vmatpush1.bf16.msra.mxu1 %v9547_v58 }
 0x43d   :  { %2005 = vmatmul.mubr.bf16.vlgmr.msra.gmra.mrb[20].mxu1 %v1883_v46 }
 0x43e   :  { %8478 = shalt.err (!%p8475_p0)  }
 0x43f   :  { %s8479_s20 = scalar_lea.vmem %s304_s28, 12288  ;;  %p8484_p2 = scmp.lt.s32.totalorder %s304_s28, %s304_s28 }
 0x440   :  { %p8480_p1 = scmp.ne.s32.totalorder %s304_s28, %s8479_s20  ;;  %p8485_p3 = scmp.lt.s32.totalorder %s8479_s20, %s8479_s20 }
 0x442   :  { %p8486_p4 = por %p8485_p3, %p8484_p2 }
 0x444   :  { %p8487_p5 = pnand %p8486_p4, %p8480_p1 }
 0x446   :  { %8490 = shalt.err (!%p8487_p5)  }
 0x447   :  { %306 = dma.hbm_to_vmem [thread:$0]  %s10987_s23, 12288, %s304_s28, [#allocation7 + $0x3] }
 0x448   :  { %s8491_s7 = scalar_lea.hbm %s10988_s24, 8192 }
 0x449   :  { %p8492_p6 = scmp.ne.s32.totalorder %s10988_s24, %s8491_s7  ;;  %p8495_p7 = scmp.lt.u32.totalorder %s8491_s7, %s10988_s24 }
 0x44b   :  { %p8497_p8 = pnand %p8495_p7, %p8492_p6 }
 0x44d   :  { %8500 = shalt.err (!%p8497_p8)  }
 0x44e   :  { %s8501_s19 = scalar_lea.vmem %s316_s21, 8192  ;;  %p8506_p10 = scmp.lt.s32.totalorder %s316_s21, %s316_s21 }
 0x44f   :  { %p8502_p9 = scmp.ne.s32.totalorder %s316_s21, %s8501_s19  ;;  %p8507_p11 = scmp.lt.s32.totalorder %s8501_s19, %s8501_s19 }
 0x451   :  { %p8508_p12 = por %p8507_p11, %p8506_p10 }
 0x453   :  { %p8509_p13 = pnand %p8508_p12, %p8502_p9 }
 0x455   :  { %8512 = shalt.err (!%p8509_p13)  }
 0x456   :  { %318 = dma.hbm_to_vmem [thread:$0]  %s10988_s24, 8192, %s316_s21, [#allocation7 + $0x4]  ;;  %v2072_v13 = vrot.slane %v9824_v33, 7  ;;  %v11282_v8 = vld [vmem:[#allocation123_spill] sm:$0xff]  ;;  %vm2081_vm1 = vcmask 1042434  }
 0x4d0   :  { %v1924_v63 = vpop.f32.mrb[16].mxu1  ;;  %v1965_v2 = vpop.f32.mrb[20].mxu0 }
 0x4d1   :  { %v1966_v30 = vadd.f32 %v1965_v2, %v9655_v18  ;;  %v1926_v34 = vpop.f32.mrb[17].mxu1  ;;  %v1967_v56 = vpop.f32.mrb[21].mxu0 }
 0x4d2   :  { %v1968_v58 = vadd.f32 %v1967_v56, %v9660_v54  ;;  %v1928_v51 = vpop.f32.mrb[18].mxu1  ;;  %v1969_v24 = vpop.f32.mrb[22].mxu0  ;;  %v1925_v54 = vadd.f32 %v1924_v63, %v11278_v35  ;;  %v1927_v3 = vadd.f32 %v1926_v34, %v11279_v38 }
 0x4d3   :  { %v2035_v26 = vrot.slane %v1966_v30, 6  ;;  %v1929_v16 = vpop.f32.mrb[19].mxu1  ;;  %v1970_v22 = vpop.f32.mrb[23].mxu0 }
 0x4d4   :  { %v2036_v28 = vrot.slane %v1968_v58, 6  ;;  %v2015_v5 = vrot.slane %v1925_v54, 6  ;;  %v2016_v7 = vrot.slane %v1927_v3, 6 }
 0x4d5   :  { %v2039_v4 = vadd.f32 %v2035_v26, %v9662_v55  ;;  %v2071_v55 = vrot.slane %v9822_v40, 7 }
 0x4d6   :  { %v2040_v12 = vadd.f32 %v2036_v28, %v11277_v36  ;;  %v2019_v11 = vadd.f32 %v2015_v5, %v11280_v50  ;;  %v2020_v15 = vadd.f32 %v2016_v7, %v11281_v0 }
 0x4d7   :  { %v6883_v45 = vmul.f32 -1.442695, %v2039_v4 }
 0x4d8   :  { %v6884_v47 = vmul.f32 -1.442695, %v2040_v12  ;;  %v6881_v23 = vmul.f32 -1.442695, %v2019_v11  ;;  %v6882_v25 = vmul.f32 -1.442695, %v2020_v15 }
 0x4d9   :  { %7809 = vpow2.f32 %v6883_v45 }
 0x4da   :  { %7811 = vpow2.f32 %v6884_v47 }
 0x4e3   :  { %v7810_v60 = vpop.eup %7809 }
 0x4e4   :  { %v2047_v18 = vadd.f32 1.0, %v7810_v60  ;;  %v7812_v62 = vpop.eup %7811 }
 0x4e5   :  { %v2048_v1 = vadd.f32 1.0, %v7812_v62 }
 0x4e6   :  { %7813 = vrcp.f32 %v2047_v18 }
 0x4e7   :  { %7815 = vrcp.f32 %v2048_v1 }
 0x4e8   :  { %7817 = vpow2.f32 %v6881_v23 }
 0x4e9   :  { %7819 = vpow2.f32 %v6882_v25 }
 0x4f0   :  { %v7814_v9 = vpop.eup %7813 }
 0x4f1   :  { %v2075_v17 = vmul.f32 %v7814_v9, %v2071_v55  ;;  %v7816_v19 = vpop.eup %7815  ;;  %v2065_v43 = vsub.f32 1.0, %v7814_v9 }
 0x4f2   :  { %v2076_v21 = vmul.f32 %v7816_v19, %v2072_v13  ;;  %v7818_v27 = vpop.eup %7817  ;;  %v2066_v40 = vsub.f32 1.0, %v7816_v19 }
 0x4f3   :  { %v7820_v36 = vpop.eup %7819  ;;  %v2027_v35 = vadd.f32 1.0, %v7818_v27 }
 0x4f4   :  { %v2028_v38 = vadd.f32 1.0, %v7820_v36 }
 0x4f5   :  { %7821 = vrcp.f32 %v2027_v35 }
 0x4f6   :  { %7823 = vrcp.f32 %v2028_v38 }
 0x4ff   :  { %v7822_v53 = vpop.eup %7821 }
 0x500   :  { %v7824_v61 = vpop.eup %7823 }
 0x510   :  { %v2006_v48 = vpop.f32.mrb[20].mxu1 }
 0x511   :  { %v2007_v50 = vadd.f32 %v2006_v48, %v11282_v8  ;;  %v2008_v14 = vpop.f32.mrb[21].mxu1 }
 0x512   :  { %v2009_v20 = vadd.f32 %v2008_v14, %v9680_v6  ;;  %v2010_v0 = vpop.f32.mrb[22].mxu1 }
 0x513   :  { %v2055_v52 = vrot.slane %v2007_v50, 6  ;;  %v2011_v57 = vpop.f32.mrb[23].mxu1 }
 0x514   :  { %v2056_v10 = vrot.slane %v2009_v20, 6 }
 0x515   :  { %v2059_v39 = vmul.f32 %v7822_v53, %v2055_v52 }
 0x516   :  { %v2060_v44 = vmul.f32 %v7824_v61, %v2056_v10 }
 0x517   :  { %v2061_v29 = vadd.f32 %v2059_v39, %v9689_v59 }
 0x518   :  { %v2062_v31 = vadd.f32 %v2060_v44, %v9692_v32 }
 0x519   :  { %7825 = vtanh.f32 %v2061_v29 }
 0x51a   :  { %7827 = vtanh.f32 %v2062_v31 }
 0x523   :  { %v7826_v37 = vpop.eup %7825 }
 0x524   :  { %v7828_v33 = vpop.eup %7827  ;;  %v2067_v49 = vmul.f32 %v7826_v37, %v2065_v43 }
 0x525   :  { %v2068_v6 = vmul.f32 %v7828_v33, %v2066_v40 }
 0x526   :  { %v9899_v42 = vadd.f32 %v2075_v17, %v2067_v49 }
 0x527   :  { %v9901_v41 = vadd.f32 %v2076_v21, %v2068_v6 }
 0x528   :  { %v2079_v46 = vpack.c.bf16 %v9899_v42, %v9899_v42  ;;  %v2080_v59 = vmul.f32 %v9899_v42, %v9899_v42 }
 0x52a   :  { %v2082_v32 = vsel %vm2081_vm1, %v2080_v59, 0.0 }
 0x52b   :  { %2083 = vadd.xlane.f32.xlu0 %v2082_v32 }
 0x5b8   :  { %v9907_v63 = vpop.xlane.xlu0 %2083 }
 0x5b9   :  { %8591 = dma.done.wait [#allocation7], 24576 }
 0x5ba   :  { %8592 = vsyncadd [#allocation7], 4294942720 }
 0x5bb   :  { %8593 = dma.done.wait [#allocation7 + $0x1], 16384 }
 0x5bc   :  { %8594 = vsyncadd [#allocation7 + $0x1], 4294950912  ;;  %v11283_v2 = vmov 0   ;;  %s11284_s28 = sld [smem:[#allocation129_spill]]  ;;  %v2096_v16 = vld [vmem:[#allocation2 + $0x8] sm:$0xff]  ;;  %v2095_v28 = vld [vmem:[#allocation2] sm:$0xff] }
 0x5bd   :  { %2560 = vmatprep.mubr.bf16.mxu0 %v11283_v2  ;;  %2658 = vmatprep.subr.bf16.mxu1 %v2096_v16  ;;  %v2112_v12 = vld [vmem:[#allocation2 + $0x88] sm:$0xff]  ;;  %v2111_v45 = vld [vmem:[#allocation2 + $0x80] sm:$0xff]  ;;  %v2098_v17 = vld [vmem:[#allocation2 + $0x18] sm:$0xff]  ;;  %v9961_v21 = vrot.slane %v2079_v46, 1  ;;  %vm2986_vm2 = vcmask 1040384  }
 0x5be   :  { %2659 = vmatpush1.bf16.msra.mxu1 %v2095_v28  ;;  %v2128_v47 = vld [vmem:[#allocation2 + $0x108] sm:$0xff]  ;;  %v2127_v62 = vld [vmem:[#allocation2 + $0x100] sm:$0xff]  ;;  %v2097_v25 = vld [vmem:[#allocation2 + $0x10] sm:$0xff] }
 0x5bf   :  { %2660 = vmatprep.subr.bf16.mxu1 %v2112_v12  ;;  %v2144_v1 = vld [vmem:[#allocation2 + $0x188] sm:$0xff]  ;;  %v2143_v5 = vld [vmem:[#allocation2 + $0x180] sm:$0xff]  ;;  %v2114_v27 = vld [vmem:[#allocation2 + $0x98] sm:$0xff] }
 0x5c0   :  { %v2160_v7 = vld [vmem:[#allocation2 + $0x208] sm:$0xff]  ;;  %v2159_v11 = vld [vmem:[#allocation2 + $0x200] sm:$0xff]  ;;  %v2113_v38 = vld [vmem:[#allocation2 + $0x90] sm:$0xff] }
 0x5c1   :  { %v2176_v13 = vld [vmem:[#allocation2 + $0x288] sm:$0xff]  ;;  %v2175_v19 = vld [vmem:[#allocation2 + $0x280] sm:$0xff]  ;;  %v2130_v48 = vld [vmem:[#allocation2 + $0x118] sm:$0xff] }
 0x5c2   :  { %v7831_v30 = vld [vmem:[%s11284_s28 + $0x4] ss:$8 sps:$4 sm:$0xff]   ;;  %v7833_v34 = vld [vmem:[%s11284_s28] ss:$8 sps:$4 sm:$0xff]   ;;  %v7834_v56 = vld [vmem:[%s11284_s28 + $0x14] ss:$8 sps:$4 sm:$0xff]   ;;  %2661 = vmatpush1.bf16.msra.mxu1 %v2111_v45 }
 0x5c3   :  { %2528 = vmatprep.subr.bf16.mxu0 %v7831_v30  ;;  %v7836_v58 = vld [vmem:[%s11284_s28 + $0x10] ss:$8 sps:$4 sm:$0xff]   ;;  %v7837_v51 = vld [vmem:[%s11284_s28 + $0x24] ss:$8 sps:$4 sm:$0xff]   ;;  %v7839_v24 = vld [vmem:[%s11284_s28 + $0x20] ss:$8 sps:$4 sm:$0xff]   ;;  %2662 = vmatprep.subr.bf16.mxu1 %v2128_v47 }
 0x5c4   :  { %2529 = vmatpush1.bf16.msra.mxu0 %v7833_v34  ;;  %v7840_v26 = vld [vmem:[%s11284_s28 + $0x34] ss:$8 sps:$4 sm:$0xff]   ;;  %v7842_v22 = vld [vmem:[%s11284_s28 + $0x30] ss:$8 sps:$4 sm:$0xff]   ;;  %v7843_v4 = vld [vmem:[%s11284_s28 + $0x44] ss:$8 sps:$4 sm:$0xff]  }
 0x5c5   :  { %2530 = vmatprep.subr.bf16.mxu0 %v7834_v56  ;;  %v7845_v60 = vld [vmem:[%s11284_s28 + $0x40] ss:$8 sps:$4 sm:$0xff]   ;;  %v7846_v18 = vld [vmem:[%s11284_s28 + $0x54] ss:$8 sps:$4 sm:$0xff]   ;;  %v7848_v54 = vld [vmem:[%s11284_s28 + $0x50] ss:$8 sps:$4 sm:$0xff]  }
 0x5c6   :  { %v7849_v3 = vld [vmem:[%s11284_s28 + $0x64] ss:$8 sps:$4 sm:$0xff]   ;;  %2663 = vmatpush1.bf16.msra.mxu1 %v2127_v62  ;;  %v7851_v55 = vld [vmem:[%s11284_s28 + $0x60] ss:$8 sps:$4 sm:$0xff]   ;;  %v7852_v9 = vld [vmem:[%s11284_s28 + $0x74] ss:$8 sps:$4 sm:$0xff]  }
 0x5c7   :  { %2664 = vmatprep.subr.bf16.mxu1 %v2144_v1  ;;  %v7854_v15 = vld [vmem:[%s11284_s28 + $0x70] ss:$8 sps:$4 sm:$0xff]   ;;  %v2192_v23 = vld [vmem:[#allocation2 + $0x308] sm:$0xff]  ;;  %v2191_v36 = vld [vmem:[#allocation2 + $0x300] sm:$0xff] }
 0x5c8   :  { %2531 = vmatpush1.bf16.msra.mxu0 %v7836_v58  ;;  %v2208_v35 = vld [vmem:[#allocation2 + $0x388] sm:$0xff]  ;;  %v2207_v8 = vld [vmem:[#allocation2 + $0x380] sm:$0xff]  ;;  %v2129_v14 = vld [vmem:[#allocation2 + $0x110] sm:$0xff] }
 0x5c9   :  { %2532 = vmatprep.subr.bf16.mxu0 %v7837_v51  ;;  %v2224_v50 = vld [vmem:[#allocation2 + $0x408] sm:$0xff]  ;;  %v2146_v20 = vld [vmem:[#allocation2 + $0x198] sm:$0xff]  ;;  %v2223_v0 = vld [vmem:[#allocation2 + $0x400] sm:$0xff] }
 0x5ca   :  { %2665 = vmatpush1.bf16.msra.mxu1 %v2143_v5  ;;  %v2240_v52 = vld [vmem:[#allocation2 + $0x488] sm:$0xff]  ;;  %v2145_v57 = vld [vmem:[#allocation2 + $0x190] sm:$0xff]  ;;  %v2162_v53 = vld [vmem:[#allocation2 + $0x218] sm:$0xff] }
 0x5cb   :  { %2666 = vmatprep.subr.bf16.mxu1 %v2160_v7  ;;  %v2239_v10 = vld [vmem:[#allocation2 + $0x480] sm:$0xff]  ;;  %v2161_v61 = vld [vmem:[#allocation2 + $0x210] sm:$0xff]  ;;  %v2178_v39 = vld [vmem:[#allocation2 + $0x298] sm:$0xff] }
 0x5cc   :  { %2533 = vmatpush1.bf16.msra.mxu0 %v7839_v24  ;;  %v2177_v44 = vld [vmem:[#allocation2 + $0x290] sm:$0xff]  ;;  %v2194_v29 = vld [vmem:[#allocation2 + $0x318] sm:$0xff]  ;;  %v2256_v46 = vld [vmem:[#allocation2 + $0x508] sm:$0xff] }
 0x5cd   :  { %2534 = vmatprep.subr.bf16.mxu0 %v7840_v26  ;;  %v2193_v31 = vld [vmem:[#allocation2 + $0x310] sm:$0xff]  ;;  %v2210_v43 = vld [vmem:[#allocation2 + $0x398] sm:$0xff]  ;;  %v2255_v32 = vld [vmem:[#allocation2 + $0x500] sm:$0xff] }
 0x5ce   :  { %2667 = vmatpush1.bf16.msra.mxu1 %v2159_v11  ;;  %v2209_v37 = vld [vmem:[#allocation2 + $0x390] sm:$0xff]  ;;  %v2226_v40 = vld [vmem:[#allocation2 + $0x418] sm:$0xff]  ;;  %v2272_v34 = vld [vmem:[#allocation2 + $0x588] sm:$0xff] }
 0x5cf   :  { %2668 = vmatprep.subr.bf16.mxu1 %v2176_v13  ;;  %v2225_v33 = vld [vmem:[#allocation2 + $0x410] sm:$0xff]  ;;  %v2242_v49 = vld [vmem:[#allocation2 + $0x498] sm:$0xff]  ;;  %v2271_v58 = vld [vmem:[#allocation2 + $0x580] sm:$0xff] }
 0x5d0   :  { %2535 = vmatpush1.bf16.msra.mxu0 %v7842_v22  ;;  %v2241_v6 = vld [vmem:[#allocation2 + $0x490] sm:$0xff]  ;;  %v2258_v59 = vld [vmem:[#allocation2 + $0x518] sm:$0xff]  ;;  %v2100_v24 = vld [vmem:[#allocation2 + $0x28] sm:$0xff] }
 0x5d1   :  { %2536 = vmatprep.subr.bf16.mxu0 %v7843_v4  ;;  %v2257_v30 = vld [vmem:[#allocation2 + $0x510] sm:$0xff]  ;;  %v2274_v56 = vld [vmem:[#allocation2 + $0x598] sm:$0xff]  ;;  %v2116_v11 = vld [vmem:[#allocation2 + $0xa8] sm:$0xff] }
 0x5d2   :  { %2669 = vmatpush1.bf16.msra.mxu1 %v2175_v19  ;;  %v2273_v51 = vld [vmem:[#allocation2 + $0x590] sm:$0xff]  ;;  %v2102_v26 = vld [vmem:[#allocation2 + $0x38] sm:$0xff]  ;;  %v2132_v19 = vld [vmem:[#allocation2 + $0x128] sm:$0xff] }
 0x5d3   :  { %2670 = vmatprep.subr.bf16.mxu1 %v2192_v23  ;;  %v2433_v16 = vld [vmem:[#allocation17] sm:$0x3]  ;;  %v11285_v22 = vld [vmem:[#allocation112_spill] sm:$0xff]  ;;  %v11286_v4 = vld [vmem:[#allocation114_spill] sm:$0xff] }
 0x5d4   :  { %2537 = vmatpush1.bf16.msra.mxu0 %v7845_v60  ;;  %v2521_v28 = vrot.slane %v2433_v16, %v11285_v22  ;;  %v2525_v12 = vrot.slane %v2433_v16, %v11286_v4  ;;  %v2118_v13 = vld [vmem:[#allocation2 + $0xb8] sm:$0xff]  ;;  %v2275_v16 = vld [vmem:[#allocation2 + $0x5a0] sm:$0xff] }
 0x5d5   :  { %2538 = vmatprep.subr.bf16.mxu0 %v7846_v18  ;;  %v2134_v23 = vld [vmem:[#allocation2 + $0x138] sm:$0xff] }
 0x5d6   :  { %2671 = vmatpush1.bf16.msra.mxu1 %v2191_v36  ;;  %v2148_v36 = vld [vmem:[#allocation2 + $0x1a8] sm:$0xff] }
 0x5d7   :  { %2672 = vmatprep.subr.bf16.mxu1 %v2208_v35  ;;  %v2150_v35 = vld [vmem:[#allocation2 + $0x1b8] sm:$0xff] }
 0x5d8   :  { %2539 = vmatpush1.bf16.msra.mxu0 %v7848_v54 }
 0x5d9   :  { %2540 = vmatprep.subr.bf16.mxu0 %v7849_v3 }
 0x5da   :  { %2673 = vmatpush1.bf16.msra.mxu1 %v2207_v8  ;;  %v2164_v8 = vld [vmem:[#allocation2 + $0x228] sm:$0xff] }
 0x5db   :  { %2674 = vmatprep.subr.bf16.mxu1 %v2224_v50  ;;  %v2166_v50 = vld [vmem:[#allocation2 + $0x238] sm:$0xff] }
 0x5dc   :  { %2541 = vmatpush1.bf16.msra.mxu0 %v7851_v55  ;;  %v2099_v55 = vld [vmem:[#allocation2 + $0x20] sm:$0xff] }
 0x5dd   :  { %2542 = vmatprep.subr.bf16.mxu0 %v7852_v9  ;;  %v2101_v9 = vld [vmem:[#allocation2 + $0x30] sm:$0xff] }
 0x5de   :  { %2675 = vmatpush1.bf16.msra.mxu1 %v2223_v0  ;;  %v2180_v0 = vld [vmem:[#allocation2 + $0x2a8] sm:$0xff] }
 0x5df   :  { %2676 = vmatprep.subr.bf16.mxu1 %v2240_v52  ;;  %v2182_v52 = vld [vmem:[#allocation2 + $0x2b8] sm:$0xff] }
 0x5e0   :  { %2543 = vmatpush1.bf16.msra.mxu0 %v7854_v15  ;;  %v2115_v15 = vld [vmem:[#allocation2 + $0xa0] sm:$0xff] }
 0x5e1   :  { %2699 = vmatprep.subr.bf16.mxu0 %v2098_v17  ;;  %v2117_v17 = vld [vmem:[#allocation2 + $0xb0] sm:$0xff] }
 0x5e2   :  { %2677 = vmatpush1.bf16.msra.mxu1 %v2239_v10  ;;  %v2196_v10 = vld [vmem:[#allocation2 + $0x328] sm:$0xff] }
 0x5e3   :  { %2561 = vmatmul.mubr.bf16.vlgmr.msra.gmra.mrb[24].mxu0 %v9961_v21  ;;  %2678 = vmatprep.subr.bf16.mxu1 %v2256_v46  ;;  %v2244_v46 = vld [vmem:[#allocation2 + $0x4a8] sm:$0xff] }
 0x5e4   :  { %2700 = vmatpush1.bf16.msra.mxu0 %v2097_v25  ;;  %v2131_v25 = vld [vmem:[#allocation2 + $0x120] sm:$0xff] }
 0x5e5   :  { %2701 = vmatprep.subr.bf16.mxu0 %v2114_v27  ;;  %v2133_v27 = vld [vmem:[#allocation2 + $0x130] sm:$0xff] }
 0x5e6   :  { %2679 = vmatpush1.bf16.msra.mxu1 %v2255_v32  ;;  %v2243_v32 = vld [vmem:[#allocation2 + $0x4a0] sm:$0xff] }
 0x5e7   :  { %2680 = vmatprep.subr.bf16.mxu1 %v2272_v34  ;;  %v2260_v34 = vld [vmem:[#allocation2 + $0x528] sm:$0xff] }
 0x5e8   :  { %2702 = vmatpush1.bf16.msra.mxu0 %v2113_v38  ;;  %v2147_v38 = vld [vmem:[#allocation2 + $0x1a0] sm:$0xff] }
 0x5e9   :  { %2703 = vmatprep.subr.bf16.mxu0 %v2130_v48  ;;  %v2149_v48 = vld [vmem:[#allocation2 + $0x1b0] sm:$0xff] }
 0x5ea   :  { %2681 = vmatpush1.bf16.msra.mxu1 %v2271_v58  ;;  %v2259_v58 = vld [vmem:[#allocation2 + $0x520] sm:$0xff] }
 0x5eb   :  { %2740 = vmatprep.subr.bf16.mxu1 %v2100_v24  ;;  %v2276_v24 = vld [vmem:[#allocation2 + $0x5a8] sm:$0xff] }
 0x5ec   :  { %2704 = vmatpush1.bf16.msra.mxu0 %v2129_v14  ;;  %v2163_v14 = vld [vmem:[#allocation2 + $0x220] sm:$0xff] }
 0x5ed   :  { %2705 = vmatprep.subr.bf16.mxu0 %v2146_v20  ;;  %v2165_v20 = vld [vmem:[#allocation2 + $0x230] sm:$0xff] }
 0x5f0   :  { %2706 = vmatpush1.bf16.msra.mxu0 %v2145_v57  ;;  %v2179_v57 = vld [vmem:[#allocation2 + $0x2a0] sm:$0xff] }
 0x5f1   :  { %2707 = vmatprep.subr.bf16.mxu0 %v2162_v53  ;;  %v2181_v53 = vld [vmem:[#allocation2 + $0x2b0] sm:$0xff] }
 0x5f4   :  { %2708 = vmatpush1.bf16.msra.mxu0 %v2161_v61  ;;  %v2198_v61 = vld [vmem:[#allocation2 + $0x338] sm:$0xff] }
 0x5f5   :  { %2709 = vmatprep.subr.bf16.mxu0 %v2178_v39  ;;  %v2195_v39 = vld [vmem:[#allocation2 + $0x320] sm:$0xff] }
 0x5f8   :  { %2710 = vmatpush1.bf16.msra.mxu0 %v2177_v44  ;;  %v2197_v44 = vld [vmem:[#allocation2 + $0x330] sm:$0xff] }
 0x5f9   :  { %2711 = vmatprep.subr.bf16.mxu0 %v2194_v29  ;;  %v2212_v29 = vld [vmem:[#allocation2 + $0x3a8] sm:$0xff] }
 0x5fc   :  { %2712 = vmatpush1.bf16.msra.mxu0 %v2193_v31  ;;  %v2214_v31 = vld [vmem:[#allocation2 + $0x3b8] sm:$0xff] }
 0x5fd   :  { %2713 = vmatprep.subr.bf16.mxu0 %v2210_v43  ;;  %v2211_v43 = vld [vmem:[#allocation2 + $0x3a0] sm:$0xff] }
 0x600   :  { %2714 = vmatpush1.bf16.msra.mxu0 %v2209_v37  ;;  %v2213_v37 = vld [vmem:[#allocation2 + $0x3b0] sm:$0xff] }
 0x601   :  { %2715 = vmatprep.subr.bf16.mxu0 %v2226_v40  ;;  %v2228_v40 = vld [vmem:[#allocation2 + $0x428] sm:$0xff] }
 0x604   :  { %2716 = vmatpush1.bf16.msra.mxu0 %v2225_v33  ;;  %v2230_v33 = vld [vmem:[#allocation2 + $0x438] sm:$0xff] }
 0x605   :  { %2717 = vmatprep.subr.bf16.mxu0 %v2242_v49  ;;  %v2227_v49 = vld [vmem:[#allocation2 + $0x420] sm:$0xff] }
 0x608   :  { %2718 = vmatpush1.bf16.msra.mxu0 %v2241_v6  ;;  %v2229_v6 = vld [vmem:[#allocation2 + $0x430] sm:$0xff] }
 0x609   :  { %2719 = vmatprep.subr.bf16.mxu0 %v2258_v59  ;;  %v2246_v59 = vld [vmem:[#allocation2 + $0x4b8] sm:$0xff] }
 0x60c   :  { %2720 = vmatpush1.bf16.msra.mxu0 %v2257_v30  ;;  %v2245_v30 = vld [vmem:[#allocation2 + $0x4b0] sm:$0xff] }
 0x60d   :  { %2721 = vmatprep.subr.bf16.mxu0 %v2274_v56  ;;  %v2262_v56 = vld [vmem:[#allocation2 + $0x538] sm:$0xff] }
 0x610   :  { %2722 = vmatpush1.bf16.msra.mxu0 %v2273_v51  ;;  %v2261_v51 = vld [vmem:[#allocation2 + $0x530] sm:$0xff] }
 0x611   :  { %2781 = vmatprep.subr.bf16.mxu0 %v2102_v26  ;;  %v2278_v26 = vld [vmem:[#allocation2 + $0x5b8] sm:$0xff] }
 0x6b6   :  { %v2562_v45 = vpop.f32.mrb[24].mxu0 }
 0x6b7   :  { %v2563_v47 = vadd.f32 %v2562_v45, %v2521_v28  ;;  %v2564_v60 = vpop.f32.mrb[25].mxu0  ;;  %v2277_v28 = vld [vmem:[#allocation2 + $0x5b0] sm:$0xff]  ;;  %v2106_v45 = vld [vmem:[#allocation2 + $0x58] sm:$0xff] }
 0x6b8   :  { %v2565_v18 = vadd.f32 %v2564_v60, %v2525_v12  ;;  %v2566_v62 = vpop.f32.mrb[26].mxu0  ;;  %v2104_v12 = vld [vmem:[#allocation2 + $0x48] sm:$0xff]  ;;  %v2105_v60 = vld [vmem:[#allocation2 + $0x50] sm:$0xff] }
 0x6b9   :  { %v2569_v1 = vmax.f32 %v2563_v47, 0.0  ;;  %v2567_v54 = vpop.f32.mrb[27].mxu0  ;;  %v2103_v47 = vld [vmem:[#allocation2 + $0x40] sm:$0xff]  ;;  %v2122_v62 = vld [vmem:[#allocation2 + $0xd8] sm:$0xff] }
 0x6ba   :  { %v2570_v3 = vmax.f32 %v2565_v18, 0.0  ;;  %v2120_v18 = vld [vmem:[#allocation2 + $0xc8] sm:$0xff]  ;;  %v2121_v54 = vld [vmem:[#allocation2 + $0xd0] sm:$0xff] }
 0x6bb   :  { %v9968_v7 = vpack.c.bf16 %v2569_v1, %v2569_v1  ;;  %v2119_v1 = vld [vmem:[#allocation2 + $0xc0] sm:$0xff] }
 0x6bc   :  { %v9966_v5 = vpack.c.bf16 %v2570_v3, %v2570_v3  ;;  %v2136_v3 = vld [vmem:[#allocation2 + $0x148] sm:$0xff] }
 0x6be   :  { %6901 = vmatprep.mubr.msk.bf16.mxu1 %vm789_vm0, %v9966_v5  ;;  %6902 = vmatprep.mubr.msk.bf16.mxu0 %vm789_vm0, %v9966_v5 }
 0x6bf   :  { %2691 = vmatmul.mubr.bf16.vlgmr.msra.gmra.mrb[24].mxu1 %v9968_v7  ;;  %2732 = vmatmul.mubr.bf16.vlgmr.msra.gmra.mrb[28].mxu0 %v9968_v7 }
 0x6c0   :  { %2741 = vmatpush1.bf16.msra.mxu1 %v2099_v55  ;;  %2782 = vmatpush1.bf16.msra.mxu0 %v2101_v9  ;;  %v2138_v55 = vld [vmem:[#allocation2 + $0x158] sm:$0xff]  ;;  %v2135_v9 = vld [vmem:[#allocation2 + $0x140] sm:$0xff] }
 0x6c1   :  { %6903 = vmatprep.mubr.msk.bf16.mxu1 %vm789_vm0, %v9966_v5  ;;  %6904 = vmatprep.mubr.msk.bf16.mxu0 %vm789_vm0, %v9966_v5 }
 0x6c2   :  { %2742 = vmatprep.subr.bf16.mxu1 %v2116_v11  ;;  %2783 = vmatprep.subr.bf16.mxu0 %v2118_v13  ;;  %v2137_v11 = vld [vmem:[#allocation2 + $0x150] sm:$0xff]  ;;  %v2152_v13 = vld [vmem:[#allocation2 + $0x1c8] sm:$0xff] }
 0x6c4   :  { %2743 = vmatpush1.bf16.msra.mxu1 %v2115_v15  ;;  %2784 = vmatpush1.bf16.msra.mxu0 %v2117_v17  ;;  %v2154_v15 = vld [vmem:[#allocation2 + $0x1d8] sm:$0xff]  ;;  %v2151_v17 = vld [vmem:[#allocation2 + $0x1c0] sm:$0xff] }
 0x6c5   :  { %2744 = vmatprep.subr.bf16.mxu1 %v2132_v19  ;;  %2785 = vmatprep.subr.bf16.mxu0 %v2134_v23  ;;  %v2153_v19 = vld [vmem:[#allocation2 + $0x1d0] sm:$0xff]  ;;  %v2168_v23 = vld [vmem:[#allocation2 + $0x248] sm:$0xff] }
 0x6c8   :  { %2745 = vmatpush1.bf16.msra.mxu1 %v2131_v25  ;;  %2786 = vmatpush1.bf16.msra.mxu0 %v2133_v27  ;;  %v2170_v25 = vld [vmem:[#allocation2 + $0x258] sm:$0xff]  ;;  %v2167_v27 = vld [vmem:[#allocation2 + $0x240] sm:$0xff] }
 0x6c9   :  { %2746 = vmatprep.subr.bf16.mxu1 %v2148_v36  ;;  %2787 = vmatprep.subr.bf16.mxu0 %v2150_v35  ;;  %v2169_v36 = vld [vmem:[#allocation2 + $0x250] sm:$0xff]  ;;  %v2184_v35 = vld [vmem:[#allocation2 + $0x2c8] sm:$0xff] }
 0x6cc   :  { %2747 = vmatpush1.bf16.msra.mxu1 %v2147_v38  ;;  %2788 = vmatpush1.bf16.msra.mxu0 %v2149_v48  ;;  %v2186_v38 = vld [vmem:[#allocation2 + $0x2d8] sm:$0xff]  ;;  %v2183_v48 = vld [vmem:[#allocation2 + $0x2c0] sm:$0xff] }
 0x6cd   :  { %2748 = vmatprep.subr.bf16.mxu1 %v2164_v8  ;;  %2789 = vmatprep.subr.bf16.mxu0 %v2166_v50  ;;  %v2185_v8 = vld [vmem:[#allocation2 + $0x2d0] sm:$0xff]  ;;  %v2200_v50 = vld [vmem:[#allocation2 + $0x348] sm:$0xff] }
 0x6d0   :  { %2749 = vmatpush1.bf16.msra.mxu1 %v2163_v14  ;;  %2790 = vmatpush1.bf16.msra.mxu0 %v2165_v20  ;;  %v2202_v14 = vld [vmem:[#allocation2 + $0x358] sm:$0xff]  ;;  %v2199_v20 = vld [vmem:[#allocation2 + $0x340] sm:$0xff] }
 0x6d1   :  { %2750 = vmatprep.subr.bf16.mxu1 %v2180_v0  ;;  %2791 = vmatprep.subr.bf16.mxu0 %v2182_v52  ;;  %v2201_v0 = vld [vmem:[#allocation2 + $0x350] sm:$0xff]  ;;  %v2216_v52 = vld [vmem:[#allocation2 + $0x3c8] sm:$0xff] }
 0x6d4   :  { %2751 = vmatpush1.bf16.msra.mxu1 %v2179_v57  ;;  %2792 = vmatpush1.bf16.msra.mxu0 %v2181_v53  ;;  %v2218_v57 = vld [vmem:[#allocation2 + $0x3d8] sm:$0xff]  ;;  %v2215_v53 = vld [vmem:[#allocation2 + $0x3c0] sm:$0xff] }
 0x6d5   :  { %2752 = vmatprep.subr.bf16.mxu1 %v2196_v10  ;;  %2793 = vmatprep.subr.bf16.mxu0 %v2198_v61  ;;  %v2217_v10 = vld [vmem:[#allocation2 + $0x3d0] sm:$0xff]  ;;  %v2232_v61 = vld [vmem:[#allocation2 + $0x448] sm:$0xff] }
 0x6d8   :  { %2753 = vmatpush1.bf16.msra.mxu1 %v2195_v39  ;;  %2794 = vmatpush1.bf16.msra.mxu0 %v2197_v44  ;;  %v2234_v39 = vld [vmem:[#allocation2 + $0x458] sm:$0xff]  ;;  %v2231_v44 = vld [vmem:[#allocation2 + $0x440] sm:$0xff] }
 0x6d9   :  { %2754 = vmatprep.subr.bf16.mxu1 %v2212_v29  ;;  %2795 = vmatprep.subr.bf16.mxu0 %v2214_v31  ;;  %v2233_v29 = vld [vmem:[#allocation2 + $0x450] sm:$0xff]  ;;  %v2248_v31 = vld [vmem:[#allocation2 + $0x4c8] sm:$0xff] }
 0x6dc   :  { %2755 = vmatpush1.bf16.msra.mxu1 %v2211_v43  ;;  %2796 = vmatpush1.bf16.msra.mxu0 %v2213_v37  ;;  %v2250_v43 = vld [vmem:[#allocation2 + $0x4d8] sm:$0xff]  ;;  %v2247_v37 = vld [vmem:[#allocation2 + $0x4c0] sm:$0xff] }
 0x6dd   :  { %2756 = vmatprep.subr.bf16.mxu1 %v2228_v40  ;;  %2797 = vmatprep.subr.bf16.mxu0 %v2230_v33  ;;  %v2249_v40 = vld [vmem:[#allocation2 + $0x4d0] sm:$0xff]  ;;  %v2264_v33 = vld [vmem:[#allocation2 + $0x548] sm:$0xff] }
 0x6e0   :  { %2757 = vmatpush1.bf16.msra.mxu1 %v2227_v49  ;;  %2798 = vmatpush1.bf16.msra.mxu0 %v2229_v6  ;;  %v2266_v49 = vld [vmem:[#allocation2 + $0x558] sm:$0xff]  ;;  %v2263_v6 = vld [vmem:[#allocation2 + $0x540] sm:$0xff] }
 0x6e1   :  { %2758 = vmatprep.subr.bf16.mxu1 %v2244_v46  ;;  %2799 = vmatprep.subr.bf16.mxu0 %v2246_v59  ;;  %v2265_v46 = vld [vmem:[#allocation2 + $0x550] sm:$0xff]  ;;  %v2280_v59 = vld [vmem:[#allocation2 + $0x5c8] sm:$0xff] }
 0x6e4   :  { %2759 = vmatpush1.bf16.msra.mxu1 %v2243_v32  ;;  %2800 = vmatpush1.bf16.msra.mxu0 %v2245_v30  ;;  %v2282_v32 = vld [vmem:[#allocation2 + $0x5d8] sm:$0xff]  ;;  %v2279_v30 = vld [vmem:[#allocation2 + $0x5c0] sm:$0xff] }
 0x6e5   :  { %2760 = vmatprep.subr.bf16.mxu1 %v2260_v34  ;;  %2801 = vmatprep.subr.bf16.mxu0 %v2262_v56  ;;  %v2281_v34 = vld [vmem:[#allocation2 + $0x5d0] sm:$0xff]  ;;  %v2108_v56 = vld [vmem:[#allocation2 + $0x68] sm:$0xff] }
 0x6e8   :  { %2761 = vmatpush1.bf16.msra.mxu1 %v2259_v58  ;;  %2802 = vmatpush1.bf16.msra.mxu0 %v2261_v51  ;;  %v2110_v58 = vld [vmem:[#allocation2 + $0x78] sm:$0xff]  ;;  %v2107_v51 = vld [vmem:[#allocation2 + $0x60] sm:$0xff] }
 0x6e9   :  { %2762 = vmatprep.subr.bf16.mxu1 %v2276_v24  ;;  %2803 = vmatprep.subr.bf16.mxu0 %v2278_v26  ;;  %v2109_v24 = vld [vmem:[#allocation2 + $0x70] sm:$0xff]  ;;  %v2124_v26 = vld [vmem:[#allocation2 + $0xe8] sm:$0xff] }
 0x6ec   :  { %2763 = vmatpush1.bf16.msra.mxu1 %v2275_v16  ;;  %2804 = vmatpush1.bf16.msra.mxu0 %v2277_v28  ;;  %v2126_v16 = vld [vmem:[#allocation2 + $0xf8] sm:$0xff]  ;;  %v2123_v28 = vld [vmem:[#allocation2 + $0xe0] sm:$0xff] }
 0x6ed   :  { %2822 = vmatprep.subr.bf16.mxu1 %v2104_v12  ;;  %2863 = vmatprep.subr.bf16.mxu0 %v2106_v45  ;;  %v2125_v12 = vld [vmem:[#allocation2 + $0xf0] sm:$0xff]  ;;  %v2140_v45 = vld [vmem:[#allocation2 + $0x168] sm:$0xff] }
 0x6ef   :  { %2773 = vmatmul.mubr.bf16.vlgmr.msra.gmra.mrb[28].mxu1 %v9968_v7  ;;  %2814 = vmatmul.mubr.bf16.vlgmr.msra.gmra.mrb[32].mxu0 %v9968_v7 }
 0x6f0   :  { %2823 = vmatpush1.bf16.msra.mxu1 %v2103_v47  ;;  %6905 = vmatprep.mubr.msk.bf16.mxu1 %vm789_vm0, %v9966_v5  ;;  %v2142_v47 = vld [vmem:[#allocation2 + $0x178] sm:$0xff] }
 0x6f1   :  { %2864 = vmatpush1.bf16.msra.mxu0 %v2105_v60  ;;  %6906 = vmatprep.mubr.msk.bf16.mxu0 %vm789_vm0, %v9966_v5  ;;  %v2139_v60 = vld [vmem:[#allocation2 + $0x160] sm:$0xff] }
 0x6f2   :  { %2824 = vmatprep.subr.bf16.mxu1 %v2120_v18  ;;  %2865 = vmatprep.subr.bf16.mxu0 %v2122_v62  ;;  %v2141_v18 = vld [vmem:[#allocation2 + $0x170] sm:$0xff]  ;;  %v2156_v62 = vld [vmem:[#allocation2 + $0x1e8] sm:$0xff] }
 0x6f4   :  { %2825 = vmatpush1.bf16.msra.mxu1 %v2119_v1  ;;  %v2158_v1 = vld [vmem:[#allocation2 + $0x1f8] sm:$0xff] }
 0x6f5   :  { %2866 = vmatpush1.bf16.msra.mxu0 %v2121_v54  ;;  %2826 = vmatprep.subr.bf16.mxu1 %v2136_v3  ;;  %v2155_v54 = vld [vmem:[#allocation2 + $0x1e0] sm:$0xff]  ;;  %v2157_v3 = vld [vmem:[#allocation2 + $0x1f0] sm:$0xff] }
 0x6f6   :  { %2867 = vmatprep.subr.bf16.mxu0 %v2138_v55  ;;  %v2174_v55 = vld [vmem:[#allocation2 + $0x278] sm:$0xff] }
 0x6f8   :  { %2827 = vmatpush1.bf16.msra.mxu1 %v2135_v9  ;;  %v2171_v9 = vld [vmem:[#allocation2 + $0x260] sm:$0xff] }
 0x6f9   :  { %2868 = vmatpush1.bf16.msra.mxu0 %v2137_v11  ;;  %2828 = vmatprep.subr.bf16.mxu1 %v2152_v13  ;;  %v2173_v11 = vld [vmem:[#allocation2 + $0x270] sm:$0xff]  ;;  %v2188_v13 = vld [vmem:[#allocation2 + $0x2e8] sm:$0xff] }
 0x6fa   :  { %2869 = vmatprep.subr.bf16.mxu0 %v2154_v15  ;;  %v2190_v15 = vld [vmem:[#allocation2 + $0x2f8] sm:$0xff] }
 0x6fc   :  { %2829 = vmatpush1.bf16.msra.mxu1 %v2151_v17  ;;  %v2187_v17 = vld [vmem:[#allocation2 + $0x2e0] sm:$0xff] }
 0x6fd   :  { %2870 = vmatpush1.bf16.msra.mxu0 %v2153_v19  ;;  %2830 = vmatprep.subr.bf16.mxu1 %v2168_v23  ;;  %v2189_v19 = vld [vmem:[#allocation2 + $0x2f0] sm:$0xff]  ;;  %v2204_v23 = vld [vmem:[#allocation2 + $0x368] sm:$0xff] }
 0x6fe   :  { %2871 = vmatprep.subr.bf16.mxu0 %v2170_v25  ;;  %v2206_v25 = vld [vmem:[#allocation2 + $0x378] sm:$0xff] }
 0x700   :  { %2831 = vmatpush1.bf16.msra.mxu1 %v2167_v27  ;;  %v2203_v27 = vld [vmem:[#allocation2 + $0x360] sm:$0xff] }
 0x701   :  { %2872 = vmatpush1.bf16.msra.mxu0 %v2169_v36  ;;  %2832 = vmatprep.subr.bf16.mxu1 %v2184_v35  ;;  %v2205_v36 = vld [vmem:[#allocation2 + $0x370] sm:$0xff]  ;;  %v2220_v35 = vld [vmem:[#allocation2 + $0x3e8] sm:$0xff] }
 0x702   :  { %2873 = vmatprep.subr.bf16.mxu0 %v2186_v38  ;;  %v2222_v38 = vld [vmem:[#allocation2 + $0x3f8] sm:$0xff] }
 0x704   :  { %2833 = vmatpush1.bf16.msra.mxu1 %v2183_v48  ;;  %v2219_v48 = vld [vmem:[#allocation2 + $0x3e0] sm:$0xff] }
 0x705   :  { %2874 = vmatpush1.bf16.msra.mxu0 %v2185_v8  ;;  %2834 = vmatprep.subr.bf16.mxu1 %v2200_v50  ;;  %v2221_v8 = vld [vmem:[#allocation2 + $0x3f0] sm:$0xff]  ;;  %v2236_v50 = vld [vmem:[#allocation2 + $0x468] sm:$0xff] }
 0x706   :  { %2875 = vmatprep.subr.bf16.mxu0 %v2202_v14  ;;  %v2238_v14 = vld [vmem:[#allocation2 + $0x478] sm:$0xff] }
 0x708   :  { %2835 = vmatpush1.bf16.msra.mxu1 %v2199_v20  ;;  %v2235_v20 = vld [vmem:[#allocation2 + $0x460] sm:$0xff] }
 0x709   :  { %2876 = vmatpush1.bf16.msra.mxu0 %v2201_v0  ;;  %2836 = vmatprep.subr.bf16.mxu1 %v2216_v52  ;;  %v2237_v0 = vld [vmem:[#allocation2 + $0x470] sm:$0xff]  ;;  %v2252_v52 = vld [vmem:[#allocation2 + $0x4e8] sm:$0xff] }
 0x70a   :  { %2877 = vmatprep.subr.bf16.mxu0 %v2218_v57  ;;  %v2254_v57 = vld [vmem:[#allocation2 + $0x4f8] sm:$0xff] }
 0x70c   :  { %2837 = vmatpush1.bf16.msra.mxu1 %v2215_v53  ;;  %v2251_v53 = vld [vmem:[#allocation2 + $0x4e0] sm:$0xff] }
 0x70d   :  { %2878 = vmatpush1.bf16.msra.mxu0 %v2217_v10  ;;  %2838 = vmatprep.subr.bf16.mxu1 %v2232_v61  ;;  %v2253_v10 = vld [vmem:[#allocation2 + $0x4f0] sm:$0xff]  ;;  %v2268_v61 = vld [vmem:[#allocation2 + $0x568] sm:$0xff] }
 0x70e   :  { %2879 = vmatprep.subr.bf16.mxu0 %v2234_v39  ;;  %v2270_v39 = vld [vmem:[#allocation2 + $0x578] sm:$0xff] }
 0x710   :  { %2839 = vmatpush1.bf16.msra.mxu1 %v2231_v44  ;;  %v2267_v44 = vld [vmem:[#allocation2 + $0x560] sm:$0xff] }
 0x711   :  { %2880 = vmatpush1.bf16.msra.mxu0 %v2233_v29  ;;  %2840 = vmatprep.subr.bf16.mxu1 %v2248_v31  ;;  %v2269_v29 = vld [vmem:[#allocation2 + $0x570] sm:$0xff]  ;;  %v2284_v31 = vld [vmem:[#allocation2 + $0x5e8] sm:$0xff] }
 0x712   :  { %2881 = vmatprep.subr.bf16.mxu0 %v2250_v43  ;;  %v2286_v43 = vld [vmem:[#allocation2 + $0x5f8] sm:$0xff] }
 0x714   :  { %2841 = vmatpush1.bf16.msra.mxu1 %v2247_v37  ;;  %v2283_v37 = vld [vmem:[#allocation2 + $0x5e0] sm:$0xff] }
 0x715   :  { %2882 = vmatpush1.bf16.msra.mxu0 %v2249_v40  ;;  %2842 = vmatprep.subr.bf16.mxu1 %v2264_v33  ;;  %v2285_v40 = vld [vmem:[#allocation2 + $0x5f0] sm:$0xff] }
 0x716   :  { %2883 = vmatprep.subr.bf16.mxu0 %v2266_v49 }
 0x718   :  { %2843 = vmatpush1.bf16.msra.mxu1 %v2263_v6 }
 0x719   :  { %2884 = vmatpush1.bf16.msra.mxu0 %v2265_v46  ;;  %2844 = vmatprep.subr.bf16.mxu1 %v2280_v59 }
 0x71a   :  { %2885 = vmatprep.subr.bf16.mxu0 %v2282_v32 }
 0x71c   :  { %2845 = vmatpush1.bf16.msra.mxu1 %v2279_v30 }
 0x71d   :  { %2886 = vmatpush1.bf16.msra.mxu0 %v2281_v34  ;;  %2904 = vmatprep.subr.bf16.mxu1 %v2108_v56 }
 0x71e   :  { %2945 = vmatprep.subr.bf16.mxu0 %v2110_v58 }
 0x71f   :  { %2855 = vmatmul.mubr.bf16.vlgmr.msra.gmra.mrb[32].mxu1 %v9968_v7 }
 0x720   :  { %2896 = vmatmul.mubr.bf16.vlgmr.msra.gmra.mrb[36].mxu0 %v9968_v7  ;;  %2905 = vmatpush1.bf16.msra.mxu1 %v2107_v51 }
 0x721   :  { %6907 = vmatprep.mubr.msk.bf16.mxu1 %vm789_vm0, %v9966_v5  ;;  %2946 = vmatpush1.bf16.msra.mxu0 %v2109_v24 }
 0x722   :  { %6908 = vmatprep.mubr.msk.bf16.mxu0 %vm789_vm0, %v9966_v5  ;;  %2906 = vmatprep.subr.bf16.mxu1 %v2124_v26  ;;  %v2172_v5 = vld [vmem:[#allocation2 + $0x268] sm:$0xff] }
 0x723   :  { %2947 = vmatprep.subr.bf16.mxu0 %v2126_v16 }
 0x724   :  { %2907 = vmatpush1.bf16.msra.mxu1 %v2123_v28 }
 0x725   :  { %2948 = vmatpush1.bf16.msra.mxu0 %v2125_v12  ;;  %2908 = vmatprep.subr.bf16.mxu1 %v2140_v45 }
 0x726   :  { %2949 = vmatprep.subr.bf16.mxu0 %v2142_v47 }
 0x728   :  { %2909 = vmatpush1.bf16.msra.mxu1 %v2139_v60 }
 0x729   :  { %2950 = vmatpush1.bf16.msra.mxu0 %v2141_v18  ;;  %2910 = vmatprep.subr.bf16.mxu1 %v2156_v62 }
 0x72a   :  { %2951 = vmatprep.subr.bf16.mxu0 %v2158_v1 }
 0x72c   :  { %2911 = vmatpush1.bf16.msra.mxu1 %v2155_v54 }
 0x72d   :  { %2952 = vmatpush1.bf16.msra.mxu0 %v2157_v3  ;;  %2912 = vmatprep.subr.bf16.mxu1 %v2172_v5  ;;  %v2287_v3 = vld [vmem:[#allocation20] sm:$0xff] }
 0x72e   :  { %2953 = vmatprep.subr.bf16.mxu0 %v2174_v55  ;;  %v11287_v5 = vld [vmem:[#allocation111_spill] sm:$0xff] }
 0x72f   :  { %v9995_v55 = vsub.s32 6, %v11287_v5 }
 0x730   :  { %2913 = vmatpush1.bf16.msra.mxu1 %v2171_v9  ;;  %v9998_v9 = vsub.s32 7, %v11287_v5 }
 0x731   :  { %2954 = vmatpush1.bf16.msra.mxu0 %v2173_v11  ;;  %2914 = vmatprep.subr.bf16.mxu1 %v2188_v13  ;;  %v2288_v11 = vld [vmem:[#allocation20 + $0x8] sm:$0xff]  ;;  %v2578_v13 = vrot.slane %v2287_v3, %v11285_v22 }
 0x732   :  { %2955 = vmatprep.subr.bf16.mxu0 %v2190_v15  ;;  %v11288_v15 = vld [vmem:[#allocation118_spill] sm:$0xff] }
 0x734   :  { %2915 = vmatpush1.bf16.msra.mxu1 %v2187_v17  ;;  %v2586_v17 = vrot.slane %v2287_v3, %v11288_v15 }
 0x735   :  { %2956 = vmatpush1.bf16.msra.mxu0 %v2189_v19  ;;  %2916 = vmatprep.subr.bf16.mxu1 %v2204_v23  ;;  %v11289_v19 = vld [vmem:[#allocation121_spill] sm:$0xff] }
 0x736   :  { %2957 = vmatprep.subr.bf16.mxu0 %v2206_v25  ;;  %v2594_v23 = vrot.slane %v2287_v3, %v11289_v19  ;;  %v2602_v25 = vrot.slane %v2287_v3, %v9995_v55 }
 0x738   :  { %2917 = vmatpush1.bf16.msra.mxu1 %v2203_v27  ;;  %v11290_v27 = vld [vmem:[#allocation122_spill] sm:$0xff] }
 0x739   :  { %2958 = vmatpush1.bf16.msra.mxu0 %v2205_v36  ;;  %2918 = vmatprep.subr.bf16.mxu1 %v2220_v35  ;;  %v2598_v36 = vrot.slane %v2287_v3, %v11290_v27  ;;  %v2582_v35 = vrot.slane %v2287_v3, %v11286_v4 }
 0x73a   :  { %2959 = vmatprep.subr.bf16.mxu0 %v2222_v38  ;;  %v2606_v38 = vrot.slane %v2287_v3, %v9998_v9 }
 0x73c   :  { %2919 = vmatpush1.bf16.msra.mxu1 %v2219_v48  ;;  %v2610_v48 = vrot.slane %v2288_v11, %v11285_v22 }
 0x73d   :  { %2960 = vmatpush1.bf16.msra.mxu0 %v2221_v8  ;;  %2920 = vmatprep.subr.bf16.mxu1 %v2236_v50  ;;  %v11291_v8 = vld [vmem:[#allocation119_spill] sm:$0xff] }
 0x73e   :  { %2961 = vmatprep.subr.bf16.mxu0 %v2238_v14  ;;  %v2590_v50 = vrot.slane %v2287_v3, %v11291_v8  ;;  %v2618_v14 = vrot.slane %v2288_v11, %v11288_v15 }
 0x740   :  { %2921 = vmatpush1.bf16.msra.mxu1 %v2235_v20  ;;  %v2614_v20 = vrot.slane %v2288_v11, %v11286_v4 }
 0x741   :  { %2962 = vmatpush1.bf16.msra.mxu0 %v2237_v0  ;;  %2922 = vmatprep.subr.bf16.mxu1 %v2252_v52 }
 0x742   :  { %2963 = vmatprep.subr.bf16.mxu0 %v2254_v57 }
 0x744   :  { %2923 = vmatpush1.bf16.msra.mxu1 %v2251_v53  ;;  %v2622_v53 = vrot.slane %v2288_v11, %v11291_v8 }
 0x745   :  { %2964 = vmatpush1.bf16.msra.mxu0 %v2253_v10  ;;  %2924 = vmatprep.subr.bf16.mxu1 %v2268_v61 }
 0x746   :  { %2965 = vmatprep.subr.bf16.mxu0 %v2270_v39 }
 0x748   :  { %2925 = vmatpush1.bf16.msra.mxu1 %v2267_v44 }
 0x749   :  { %2966 = vmatpush1.bf16.msra.mxu0 %v2269_v29  ;;  %2926 = vmatprep.subr.bf16.mxu1 %v2284_v31 }
 0x74a   :  { %2967 = vmatprep.subr.bf16.mxu0 %v2286_v43 }
 0x74c   :  { %2927 = vmatpush1.bf16.msra.mxu1 %v2283_v37 }
 0x74d   :  { %2968 = vmatpush1.bf16.msra.mxu0 %v2285_v40  ;;  %v2626_v40 = vrot.slane %v2288_v11, %v11289_v19 }
 0x74f   :  { %2937 = vmatmul.mubr.bf16.vlgmr.msra.gmra.mrb[36].mxu1 %v9968_v7 }
 0x750   :  { %2978 = vmatmul.mubr.bf16.vlgmr.msra.gmra.mrb[40].mxu0 %v9968_v7 }
 0x792   :  { %v2692_v33 = vpop.f32.mrb[24].mxu1  ;;  %v2733_v49 = vpop.f32.mrb[28].mxu0 }
 0x793   :  { %v2694_v6 = vpop.f32.mrb[25].mxu1  ;;  %v2735_v46 = vpop.f32.mrb[29].mxu0  ;;  %v10011_v0 = vadd.f32 %v2692_v33, %v2578_v13  ;;  %v10013_v52 = vadd.f32 %v2733_v49, %v2586_v17 }
 0x794   :  { %v2696_v59 = vpop.f32.mrb[26].mxu1  ;;  %v2737_v32 = vpop.f32.mrb[30].mxu0  ;;  %v10022_v39 = vadd.f32 %v2694_v6, %v2582_v35  ;;  %v10028_v31 = vadd.f32 %v2735_v46, %v2590_v50 }
 0x795   :  { %v2697_v30 = vpop.f32.mrb[27].mxu1  ;;  %v2738_v34 = vpop.f32.mrb[31].mxu0  ;;  %v2987_v33 = vsel %vm2986_vm2, %v10011_v0, -inf  ;;  %v2989_v49 = vsel %vm2986_vm2, %v10013_v52, -inf }
 0x796   :  { %v2634_v30 = vrot.slane %v2288_v11, %v9995_v55  ;;  %v2630_v34 = vrot.slane %v2288_v11, %v11290_v27 }
 0x7c2   :  { %v2774_v56 = vpop.f32.mrb[28].mxu1  ;;  %v2815_v58 = vpop.f32.mrb[32].mxu0 }
 0x7c3   :  { %v2776_v51 = vpop.f32.mrb[29].mxu1  ;;  %v2817_v24 = vpop.f32.mrb[33].mxu0  ;;  %v10015_v57 = vadd.f32 %v2774_v56, %v2594_v23  ;;  %v10018_v10 = vadd.f32 %v2815_v58, %v2602_v25  ;;  %v2988_v56 = vsel %vm2986_vm2, %v10022_v39, -inf }
 0x7c4   :  { %v2778_v26 = vpop.f32.mrb[30].mxu1  ;;  %v2819_v16 = vpop.f32.mrb[34].mxu0  ;;  %v10020_v61 = vadd.f32 %v2776_v51, %v2598_v36  ;;  %v10024_v44 = vadd.f32 %v2817_v24, %v2606_v38  ;;  %v2638_v24 = vrot.slane %v2288_v11, %v9998_v9 }
 0x7c5   :  { %v2779_v28 = vpop.f32.mrb[31].mxu1  ;;  %v2820_v12 = vpop.f32.mrb[35].mxu0  ;;  %v2991_v6 = vsel %vm2986_vm2, %v10015_v57, -inf  ;;  %v2995_v46 = vsel %vm2986_vm2, %v10018_v10, -inf  ;;  %v2990_v26 = vsel %vm2986_vm2, %v10028_v31, -inf }
 0x7c6   :  { %v2993_v32 = vsel %vm2986_vm2, %v10020_v61, -inf  ;;  %v2997_v58 = vsel %vm2986_vm2, %v10024_v44, -inf  ;;  %v2992_v16 = vmax.f32 %v2987_v33, %v2991_v6 }
 0x7f2   :  { %v2856_v45 = vpop.f32.mrb[32].mxu1 }
 0x7f3   :  { %v2897_v47 = vpop.f32.mrb[36].mxu0  ;;  %v2858_v60 = vpop.f32.mrb[33].mxu1  ;;  %v10026_v29 = vadd.f32 %v2856_v45, %v2610_v48 }
 0x7f4   :  { %v2899_v7 = vpop.f32.mrb[37].mxu0  ;;  %v2860_v18 = vpop.f32.mrb[34].mxu1  ;;  %v10030_v43 = vadd.f32 %v2897_v47, %v2618_v14  ;;  %v10032_v37 = vadd.f32 %v2858_v60, %v2614_v20  ;;  %v2996_v47 = vmax.f32 %v2989_v49, %v2995_v46  ;;  %v2994_v60 = vmax.f32 %v2988_v56, %v2993_v32 }
 0x7f5   :  { %v2901_v62 = vpop.f32.mrb[38].mxu0  ;;  %v2861_v1 = vpop.f32.mrb[35].mxu1  ;;  %v10041_v59 = vadd.f32 %v2899_v7, %v2622_v53  ;;  %v2999_v51 = vsel %vm2986_vm2, %v10026_v29, -inf }
 0x7f6   :  { %v2902_v54 = vpop.f32.mrb[39].mxu0  ;;  %v3003_v28 = vsel %vm2986_vm2, %v10030_v43, -inf  ;;  %v3001_v12 = vsel %vm2986_vm2, %v10032_v37, -inf  ;;  %v3000_v3 = vmax.f32 %v2992_v16, %v2999_v51  ;;  %v2313_v51 = vld [vmem:[#allocation3 + $0xc0] sm:$0xff] }
 0x7f7   :  { %v3005_v7 = vsel %vm2986_vm2, %v10041_v59, -inf  ;;  %v2998_v54 = vmax.f32 %v2990_v26, %v2997_v58  ;;  %v3004_v25 = vmax.f32 %v2996_v47, %v3003_v28  ;;  %v3002_v36 = vmax.f32 %v2994_v60, %v3001_v12  ;;  %v2297_v58 = vld [vmem:[#allocation3 + $0x40] sm:$0xff]  ;;  %7142 = vmatprep.subr.bf16.mxu0 %v2313_v51 }
 0x7f8   :  { %7120 = vmatprep.subr.bf16.mxu1 %v2297_v58  ;;  %v2305_v26 = vld [vmem:[#allocation3 + $0x80] sm:$0xff] }
 0x7f9   :  { %v3006_v14 = vmax.f32 %v2998_v54, %v3005_v7  ;;  %7143 = vmatpush3.bf16.msra.mxu0 %v2305_v26 }
 0x822   :  { %v2938_v45 = vpop.f32.mrb[36].mxu1 }
 0x823   :  { %v10064_v18 = vadd.f32 %v2938_v45, %v2626_v40  ;;  %v2979_v62 = vpop.f32.mrb[40].mxu0  ;;  %v2940_v1 = vpop.f32.mrb[37].mxu1 }
 0x824   :  { %v10066_v11 = vadd.f32 %v2979_v62, %v2634_v30  ;;  %v10068_v13 = vadd.f32 %v2940_v1, %v2630_v34  ;;  %v2981_v17 = vpop.f32.mrb[41].mxu0  ;;  %v2942_v23 = vpop.f32.mrb[38].mxu1 }
 0x825   :  { %v3007_v35 = vsel %vm2986_vm2, %v10064_v18, -inf  ;;  %v10072_v38 = vadd.f32 %v2981_v17, %v2638_v24  ;;  %v2983_v48 = vpop.f32.mrb[42].mxu0  ;;  %v2943_v50 = vpop.f32.mrb[39].mxu1  ;;  %v2289_v24 = vld [vmem:[#allocation3] sm:$0xff] }
 0x826   :  { %v3008_v20 = vmax.f32 %v3000_v3, %v3007_v35  ;;  %v3011_v53 = vsel %vm2986_vm2, %v10066_v11, -inf  ;;  %v3009_v40 = vsel %vm2986_vm2, %v10068_v13, -inf  ;;  %v2984_v33 = vpop.f32.mrb[43].mxu0  ;;  %7121 = vmatpush3.bf16.msra.mxu1 %v2289_v24 }
 0x827   :  { %v3012_v49 = vmax.f32 %v3004_v25, %v3011_v53  ;;  %v3010_v6 = vmax.f32 %v3002_v36, %v3009_v40  ;;  %v3013_v46 = vsel %vm2986_vm2, %v10072_v38, -inf }
 0x828   :  { %v3014_v32 = vmax.f32 %v3006_v14, %v3013_v46 }
 0x829   :  { %v3015_v30 = vmax.f32 %v3008_v20, %v3010_v6 }
 0x82a   :  { %v3016_v34 = vmax.f32 %v3012_v49, %v3014_v32 }
 0x82c   :  { %v3017_v56 = vmax.f32 %v3015_v30, %v3016_v34 }
 0x82e   :  { %3018 = vmax.xlane.f32.xlu0 %v3017_v56 }
 0x8bb   :  { %v10080_v16 = vpop.xlane.xlu0 %3018 }
 0x8bc   :  { %v3020_v28 = vsub.f32 %v10011_v0, %v10080_v16  ;;  %v3021_v12 = vsub.f32 %v10022_v39, %v10080_v16  ;;  %v3022_v45 = vsub.f32 %v10013_v52, %v10080_v16  ;;  %v3023_v47 = vsub.f32 %v10028_v31, %v10080_v16 }
 0x8bd   :  { %v3024_v60 = vsub.f32 %v10015_v57, %v10080_v16  ;;  %v3025_v54 = vsub.f32 %v10020_v61, %v10080_v16  ;;  %v3026_v0 = vsub.f32 %v10018_v10, %v10080_v16  ;;  %v3027_v52 = vsub.f32 %v10024_v44, %v10080_v16 }
 0x8be   :  { %v3036_v7 = vmul.f32 1.442695, %v3020_v28  ;;  %v3038_v62 = vmul.f32 1.442695, %v3021_v12  ;;  %v3040_v1 = vmul.f32 1.442695, %v3022_v45  ;;  %v3028_v57 = vsub.f32 %v10026_v29, %v10080_v16 }
 0x8bf   :  { %v3042_v3 = vmul.f32 1.442695, %v3023_v47  ;;  %v3044_v39 = vmul.f32 1.442695, %v3024_v60  ;;  %v3046_v31 = vmul.f32 1.442695, %v3025_v54  ;;  %v3029_v61 = vsub.f32 %v10032_v37, %v10080_v16 }
 0x8c0   :  { %7855 = vpow2.f32 %v3036_v7  ;;  %v3048_v17 = vmul.f32 1.442695, %v3026_v0  ;;  %v3050_v23 = vmul.f32 1.442695, %v3027_v52  ;;  %v3030_v10 = vsub.f32 %v10030_v43, %v10080_v16 }
 0x8c1   :  { %7857 = vpow2.f32 %v3038_v62  ;;  %v3052_v25 = vmul.f32 1.442695, %v3028_v57  ;;  %v3031_v35 = vsub.f32 %v10041_v59, %v10080_v16  ;;  %v3054_v29 = vmul.f32 1.442695, %v3029_v61 }
 0x8c2   :  { %7859 = vpow2.f32 %v3040_v1  ;;  %v3032_v14 = vsub.f32 %v10064_v18, %v10080_v16  ;;  %v3056_v20 = vmul.f32 1.442695, %v3030_v10  ;;  %v3033_v33 = vsub.f32 %v10068_v13, %v10080_v16 }
 0x8c3   :  { %7861 = vpow2.f32 %v3042_v3  ;;  %v3058_v49 = vmul.f32 1.442695, %v3031_v35  ;;  %v3034_v18 = vsub.f32 %v10066_v11, %v10080_v16  ;;  %v3035_v13 = vsub.f32 %v10072_v38, %v10080_v16 }
 0x8c4   :  { %7863 = vpow2.f32 %v3044_v39  ;;  %v3060_v30 = vmul.f32 1.442695, %v3032_v14  ;;  %v3062_v51 = vmul.f32 1.442695, %v3033_v33 }
 0x8c5   :  { %7865 = vpow2.f32 %v3046_v31  ;;  %v3064_v11 = vmul.f32 1.442695, %v3034_v18  ;;  %v3066_v60 = vmul.f32 1.442695, %v3035_v13  ;;  %v2306_v18 = vld [vmem:[#allocation3 + $0x88] sm:$0xff]  ;;  %v2307_v13 = vld [vmem:[#allocation3 + $0x90] sm:$0xff] }
 0x8c6   :  { %7867 = vpow2.f32 %v3048_v17 }
 0x8c7   :  { %7869 = vpow2.f32 %v3050_v23 }
 0x8c8   :  { %7871 = vpow2.f32 %v3052_v25 }
 0x8c9   :  { %7873 = vpow2.f32 %v3054_v29 }
 0x8ca   :  { %v10104_v36 = vpop.eup %7855  ;;  %7875 = vpow2.f32 %v3056_v20 }
 0x8cb   :  { %v10106_v44 = vpop.eup %7857  ;;  %v3068_v48 = vsel %vm2986_vm2, %v10104_v36, 0.0  ;;  %7877 = vpow2.f32 %v3058_v49  ;;  %v2298_v49 = vld [vmem:[#allocation3 + $0x48] sm:$0xff] }
 0x8cc   :  { %v10112_v37 = vpop.eup %7859  ;;  %v3069_v50 = vsel %vm2986_vm2, %v10106_v44, 0.0  ;;  %7879 = vpow2.f32 %v3060_v30  ;;  %7122 = vmatprep.subr.bf16.mxu1 %v2298_v49  ;;  %v2299_v30 = vld [vmem:[#allocation3 + $0x50] sm:$0xff] }
 0x8cd   :  { %v10116_v43 = vpop.eup %7861  ;;  %v3070_v53 = vadd.f32 %v3069_v50, %v3068_v48  ;;  %v3071_v59 = vsel %vm2986_vm2, %v10112_v37, 0.0  ;;  %7881 = vpow2.f32 %v3062_v51  ;;  %v2300_v51 = vld [vmem:[#allocation3 + $0x58] sm:$0xff] }
 0x8ce   :  { %v10122_v40 = vpop.eup %7863  ;;  %v3073_v46 = vsel %vm2986_vm2, %v10116_v43, 0.0  ;;  %7883 = vpow2.f32 %v3064_v11  ;;  %v2308_v11 = vld [vmem:[#allocation3 + $0x98] sm:$0xff] }
 0x8cf   :  { %v3072_v6 = vadd.f32 %v3071_v59, %v3070_v53  ;;  %v10128_v32 = vpop.eup %7865  ;;  %v3075_v56 = vsel %vm2986_vm2, %v10122_v40, 0.0  ;;  %7885 = vpow2.f32 %v3066_v60  ;;  %v2293_v60 = vld [vmem:[#allocation3 + $0x20] sm:$0xff] }
 0x8d0   :  { %v10134_v58 = vpop.eup %7867  ;;  %v3077_v26 = vsel %vm2986_vm2, %v10128_v32, 0.0 }
 0x8d1   :  { %v3074_v34 = vadd.f32 %v3073_v46, %v3072_v6  ;;  %v10140_v28 = vpop.eup %7869  ;;  %v3079_v45 = vsel %vm2986_vm2, %v10134_v58, 0.0  ;;  %v2314_v6 = vld [vmem:[#allocation3 + $0xc8] sm:$0xff] }
 0x8d2   :  { %v10144_v47 = vpop.eup %7871  ;;  %v3081_v38 = vsel %vm2986_vm2, %v10140_v28, 0.0  ;;  %v2290_v46 = vld [vmem:[#allocation3 + $0x8] sm:$0xff]  ;;  %7144 = vmatprep.subr.bf16.mxu0 %v2314_v6 }
 0x8d3   :  { %v3076_v24 = vadd.f32 %v3075_v56, %v3074_v34  ;;  %v10148_v16 = vpop.eup %7873  ;;  %v3083_v1 = vsel %vm2986_vm2, %v10144_v47, 0.0  ;;  %v2315_v34 = vld [vmem:[#allocation3 + $0xd0] sm:$0xff]  ;;  %7123 = vmatpush3.bf16.msra.mxu1 %v2290_v46  ;;  %7145 = vmatpush3.bf16.msra.mxu0 %v2306_v18 }
 0x8d4   :  { %v10152_v54 = vpop.eup %7875  ;;  %v3085_v0 = vsel %vm2986_vm2, %v10148_v16, 0.0  ;;  %7124 = vmatprep.subr.bf16.mxu1 %v2299_v30  ;;  %7146 = vmatprep.subr.bf16.mxu0 %v2315_v34  ;;  %v2291_v56 = vld [vmem:[#allocation3 + $0x10] sm:$0xff] }
 0x8d5   :  { %v3078_v12 = vadd.f32 %v3077_v26, %v3076_v24  ;;  %v10156_v39 = vpop.eup %7877  ;;  %v3087_v31 = vsel %vm2986_vm2, %v10152_v54, 0.0  ;;  %v2316_v24 = vld [vmem:[#allocation3 + $0xd8] sm:$0xff] }
 0x8d6   :  { %v10160_v57 = vpop.eup %7879  ;;  %v3089_v61 = vsel %vm2986_vm2, %v10156_v39, 0.0  ;;  %v2292_v26 = vld [vmem:[#allocation3 + $0x18] sm:$0xff] }
 0x8d7   :  { %v3080_v7 = vadd.f32 %v3079_v45, %v3078_v12  ;;  %v10164_v23 = vpop.eup %7881  ;;  %v3091_v25 = vsel %vm2986_vm2, %v10160_v57, 0.0  ;;  %7125 = vmatpush3.bf16.msra.mxu1 %v2291_v56  ;;  %7147 = vmatpush3.bf16.msra.mxu0 %v2307_v13  ;;  %v2301_v12 = vld [vmem:[#allocation3 + $0x60] sm:$0xff] }
 0x8d8   :  { %v10168_v35 = vpop.eup %7883  ;;  %v3093_v48 = vsel %vm2986_vm2, %v10164_v23, 0.0  ;;  %7126 = vmatprep.subr.bf16.mxu1 %v2300_v51  ;;  %7148 = vmatprep.subr.bf16.mxu0 %v2316_v24  ;;  %v2317_v45 = vld [vmem:[#allocation3 + $0xe0] sm:$0xff] }
 0x8d9   :  { %v3082_v62 = vadd.f32 %v3081_v38, %v3080_v7  ;;  %v10172_v50 = vpop.eup %7885  ;;  %v3095_v20 = vsel %vm2986_vm2, %v10168_v35, 0.0  ;;  %v2309_v7 = vld [vmem:[#allocation3 + $0xa0] sm:$0xff]  ;;  %v2302_v38 = vld [vmem:[#allocation3 + $0x68] sm:$0xff] }
 0x8da   :  { %v3097_v59 = vsel %vm2986_vm2, %v10172_v50, 0.0 }
 0x8db   :  { %v3084_v3 = vadd.f32 %v3083_v1, %v3082_v62  ;;  %7127 = vmatpush3.bf16.msra.mxu1 %v2292_v26  ;;  %7149 = vmatpush3.bf16.msra.mxu0 %v2308_v11  ;;  %v2318_v62 = vld [vmem:[#allocation3 + $0xe8] sm:$0xff] }
 0x8dc   :  { %7128 = vmatprep.subr.bf16.mxu1 %v2301_v12  ;;  %7150 = vmatprep.subr.bf16.mxu0 %v2317_v45  ;;  %v2294_v1 = vld [vmem:[#allocation3 + $0x28] sm:$0xff] }
 0x8dd   :  { %v3086_v52 = vadd.f32 %v3085_v0, %v3084_v3  ;;  %v2310_v3 = vld [vmem:[#allocation3 + $0xa8] sm:$0xff]  ;;  %v2303_v0 = vld [vmem:[#allocation3 + $0x70] sm:$0xff] }
 0x8df   :  { %v3088_v17 = vadd.f32 %v3087_v31, %v3086_v52  ;;  %7129 = vmatpush3.bf16.msra.mxu1 %v2293_v60  ;;  %7151 = vmatpush3.bf16.msra.mxu0 %v2309_v7  ;;  %v2319_v52 = vld [vmem:[#allocation3 + $0xf0] sm:$0xff]  ;;  %v2093_v60 = vld [vmem:[#allocation18] sm:$0xff] }
 0x8e0   :  { %7130 = vmatprep.subr.bf16.mxu1 %v2302_v38  ;;  %7152 = vmatprep.subr.bf16.mxu0 %v2318_v62  ;;  %v2295_v31 = vld [vmem:[#allocation3 + $0x30] sm:$0xff] }
 0x8e1   :  { %v3090_v10 = vadd.f32 %v3089_v61, %v3088_v17  ;;  %v2311_v17 = vld [vmem:[#allocation3 + $0xb0] sm:$0xff]  ;;  %v2304_v61 = vld [vmem:[#allocation3 + $0x78] sm:$0xff] }
 0x8e3   :  { %v3092_v29 = vadd.f32 %v3091_v25, %v3090_v10  ;;  %7131 = vmatpush3.bf16.msra.mxu1 %v2294_v1  ;;  %7153 = vmatpush3.bf16.msra.mxu0 %v2310_v3  ;;  %v2320_v10 = vld [vmem:[#allocation3 + $0xf8] sm:$0xff] }
 0x8e4   :  { %7132 = vmatprep.subr.bf16.mxu1 %v2303_v0  ;;  %7154 = vmatprep.subr.bf16.mxu0 %v2319_v52  ;;  %v2296_v25 = vld [vmem:[#allocation3 + $0x38] sm:$0xff] }
 0x8e5   :  { %v3094_v14 = vadd.f32 %v3093_v48, %v3092_v29  ;;  %v2312_v29 = vld [vmem:[#allocation3 + $0xb8] sm:$0xff]  ;;  %v2329_v48 = vld [vmem:[#allocation3 + $0x140] sm:$0xff] }
 0x8e7   :  { %v3096_v53 = vadd.f32 %v3095_v20, %v3094_v14  ;;  %7133 = vmatpush3.bf16.msra.mxu1 %v2295_v31  ;;  %7155 = vmatpush3.bf16.msra.mxu0 %v2311_v17  ;;  %v2345_v14 = vld [vmem:[#allocation3 + $0x1c0] sm:$0xff] }
 0x8e8   :  { %7134 = vmatprep.subr.bf16.mxu1 %v2304_v61  ;;  %7156 = vmatprep.subr.bf16.mxu0 %v2320_v10 }
 0x8e9   :  { %v3098_v33 = vadd.f32 %v3097_v59, %v3096_v53  ;;  %v8640_v53 = vmov 1966171168  }
 0x8ea   :  { %v3139_v59 = vunpack.c.l.s4 %v8640_v53 }
 0x8eb   :  { %3099 = vadd.xlane.f32.xlu0 %v3098_v33  ;;  %7135 = vmatpush3.bf16.msra.mxu1 %v2296_v25 }
 0x8ec   :  { %7157 = vmatpush3.bf16.msra.mxu0 %v2312_v29  ;;  %7164 = vmatprep.subr.bf16.mxu1 %v2329_v48  ;;  %v3140_v33 = vunpack.c.0.s8 %v3139_v59  ;;  %v2321_v29 = vld [vmem:[#allocation3 + $0x100] sm:$0xff] }
 0x8ed   :  { %7186 = vmatprep.subr.bf16.mxu0 %v2345_v14  ;;  %v2337_v48 = vld [vmem:[#allocation3 + $0x180] sm:$0xff] }
 0x8ee   :  { %v10179_v6 = vsub.s32 %v3140_v33, %v11287_v5 }
 0x978   :  { %v3100_v20 = vpop.xlane.xlu0 %3099 }
 0x979   :  { %7887 = vrcp.f32 %v3100_v20 }
 0x983   :  { %v7888_v49 = vpop.eup %7887 }
 0x984   :  { %v3102_v46 = vmul.f32 %v7888_v49, %v10104_v36  ;;  %v3103_v18 = vmul.f32 %v7888_v49, %v10106_v44  ;;  %v3104_v30 = vmul.f32 %v7888_v49, %v10112_v37  ;;  %v3105_v34 = vmul.f32 %v7888_v49, %v10116_v43 }
 0x985   :  { %v3106_v56 = vmul.f32 %v7888_v49, %v10122_v40  ;;  %v3107_v13 = vmul.f32 %v7888_v49, %v10128_v32  ;;  %v3108_v51 = vmul.f32 %v7888_v49, %v10134_v58  ;;  %v3109_v24 = vmul.f32 %v7888_v49, %v10140_v28 }
 0x986   :  { %v3134_v26 = vcombine.low %v3102_v46, %v3103_v18  ;;  %v3135_v11 = vcombine.low %v3104_v30, %v3105_v34  ;;  %v3110_v31 = vmul.f32 %v7888_v49, %v10144_v47  ;;  %v3111_v14 = vmul.f32 %v7888_v49, %v10148_v16  ;;  %v2330_v34 = vld [vmem:[#allocation3 + $0x148] sm:$0xff] }
 0x987   :  { %v3136_v5 = vcombine.low %v3106_v56, %v3107_v13  ;;  %v3137_v12 = vcombine.low %v3108_v51, %v3109_v24  ;;  %v3112_v20 = vmul.f32 %v7888_v49, %v10152_v54  ;;  %v3113_v53 = vmul.f32 %v7888_v49, %v10156_v39  ;;  %v2346_v16 = vld [vmem:[#allocation3 + $0x1c8] sm:$0xff]  ;;  %v2347_v56 = vld [vmem:[#allocation3 + $0x1d0] sm:$0xff]  ;;  %v2332_v24 = vld [vmem:[#allocation3 + $0x158] sm:$0xff] }
 0x988   :  { %v3144_v36 = vrot.slane %v3134_v26, %v10179_v6  ;;  %v3151_v44 = vrot.slane %v3135_v11, %v10179_v6  ;;  %v3114_v59 = vmul.f32 %v7888_v49, %v10160_v57  ;;  %v3115_v33 = vmul.f32 %v7888_v49, %v10164_v23  ;;  %v2322_v54 = vld [vmem:[#allocation3 + $0x108] sm:$0xff]  ;;  %v2331_v23 = vld [vmem:[#allocation3 + $0x150] sm:$0xff]  ;;  %v2348_v26 = vld [vmem:[#allocation3 + $0x1d8] sm:$0xff] }
 0x989   :  { %v3158_v37 = vrot.slane %v3136_v5, %v10179_v6  ;;  %v3165_v43 = vrot.slane %v3137_v12, %v10179_v6  ;;  %v3116_v47 = vmul.f32 %v7888_v49, %v10168_v35  ;;  %v3117_v46 = vmul.f32 %v7888_v49, %v10172_v50  ;;  %v2338_v39 = vld [vmem:[#allocation3 + $0x188] sm:$0xff]  ;;  %v2323_v49 = vld [vmem:[#allocation3 + $0x110] sm:$0xff] }
 0x98a   :  { %v3166_v45 = vcombine.low %v3144_v36, %v3151_v44  ;;  %v3183_v57 = vcombine.low %v3110_v31, %v3111_v14  ;;  %v3184_v35 = vcombine.low %v3112_v20, %v3113_v53  ;;  %v3185_v13 = vcombine.low %v3114_v59, %v3115_v33  ;;  %v2339_v51 = vld [vmem:[#allocation3 + $0x190] sm:$0xff]  ;;  %v2324_v44 = vld [vmem:[#allocation3 + $0x118] sm:$0xff] }
 0x98b   :  { %v3167_v40 = vcombine.low %v3158_v37, %v3165_v43  ;;  %v3186_v50 = vcombine.low %v3116_v47, %v3117_v46  ;;  %v2340_v37 = vld [vmem:[#allocation3 + $0x198] sm:$0xff]  ;;  %v2333_v43 = vld [vmem:[#allocation3 + $0x160] sm:$0xff]  ;;  %v2351_v31 = vld [vmem:[#allocation3 + $0x1f0] sm:$0xff] }
 0x98c   :  { %v3174_v32 = vrot.slane %v3166_v45, %v10179_v6  ;;  %v3193_v11 = vrot.slane %v3183_v57, %v10179_v6  ;;  %v3200_v5 = vrot.slane %v3184_v35, %v10179_v6  ;;  %v3207_v12 = vrot.slane %v3185_v13, %v10179_v6  ;;  %v2349_v45 = vld [vmem:[#allocation3 + $0x1e0] sm:$0xff]  ;;  %v2328_v20 = vld [vmem:[#allocation3 + $0x138] sm:$0xff]  ;;  %v2354_v35 = vld [vmem:[#allocation3 + $0x208] sm:$0xff] }
 0x98d   :  { %v3181_v58 = vrot.slane %v3167_v40, %v10179_v6  ;;  %v3214_v36 = vrot.slane %v3186_v50, %v10179_v6  ;;  %v2344_v53 = vld [vmem:[#allocation3 + $0x1b8] sm:$0xff]  ;;  %v2361_v47 = vld [vmem:[#allocation3 + $0x240] sm:$0xff]  ;;  %v2370_v13 = vld [vmem:[#allocation3 + $0x288] sm:$0xff] }
 0x98e   :  { %v3215_v40 = vcombine.low %v3193_v11, %v3200_v5  ;;  %v2377_v46 = vld [vmem:[#allocation3 + $0x2c0] sm:$0xff]  ;;  %v2363_v50 = vld [vmem:[#allocation3 + $0x250] sm:$0xff]  ;;  %v2380_v11 = vld [vmem:[#allocation3 + $0x2d8] sm:$0xff] }
 0x98f   :  { %v3182_v28 = vcombine.low %v3174_v32, %v3181_v58  ;;  %v3216_v32 = vcombine.low %v3207_v12, %v3214_v36  ;;  %v2325_v58 = vld [vmem:[#allocation3 + $0x120] sm:$0xff]  ;;  %v2356_v5 = vld [vmem:[#allocation3 + $0x218] sm:$0xff] }
 0x990   :  { %v2369_v57 = vld [vmem:[#allocation3 + $0x280] sm:$0xff]  ;;  %v2372_v12 = vld [vmem:[#allocation3 + $0x298] sm:$0xff] }
 0x991   :  { %v10195_v7 = vmul.f32 %v3182_v28, %v2093_v60  ;;  %v2341_v60 = vld [vmem:[#allocation3 + $0x1a0] sm:$0xff]  ;;  %v2334_v28 = vld [vmem:[#allocation3 + $0x168] sm:$0xff] }
 0x992   :  { %v2365_v36 = vld [vmem:[#allocation3 + $0x260] sm:$0xff] }
 0x993   :  { %v3245_v38 = vrot.slane %v10195_v7, %v11286_v4  ;;  %v3253_v62 = vrot.slane %v10195_v7, %v11291_v8  ;;  %v3241_v1 = vrot.slane %v10195_v7, %v11285_v22  ;;  %v3249_v3 = vrot.slane %v10195_v7, %v11288_v15 }
 0x994   :  { %v3261_v0 = vrot.slane %v10195_v7, %v11290_v27  ;;  %v3269_v52 = vrot.slane %v10195_v7, %v9998_v9  ;;  %v3257_v59 = vrot.slane %v10195_v7, %v11289_v19  ;;  %v3265_v33 = vrot.slane %v10195_v7, %v9995_v55 }
 0x995   :  { %v3319_v17 = vpack.c.bf16 %v3245_v38, %v3245_v38  ;;  %v3321_v61 = vpack.c.bf16 %v3253_v62, %v3253_v62  ;;  %v3318_v10 = vpack.c.bf16 %v3241_v1, %v3241_v1  ;;  %v3320_v25 = vpack.c.bf16 %v3249_v3, %v3249_v3  ;;  %v2350_v38 = vld [vmem:[#allocation3 + $0x1e8] sm:$0xff] }
 0x996   :  { %v3323_v18 = vpack.c.bf16 %v3261_v0, %v3261_v0  ;;  %v3325_v30 = vpack.c.bf16 %v3269_v52, %v3269_v52  ;;  %v3223_v62 = vrot.slane %v3215_v40, %v10179_v6  ;;  %v3230_v1 = vrot.slane %v3216_v32, %v10179_v6  ;;  %v2326_v3 = vld [vmem:[#allocation3 + $0x128] sm:$0xff]  ;;  %v2335_v52 = vld [vmem:[#allocation3 + $0x170] sm:$0xff] }
 0x997   :  { %3366 = vmatprep.mubr.bf16.mxu1 %v3319_v17  ;;  %3406 = vmatprep.mubr.bf16.mxu0 %v3321_v61  ;;  %v2342_v0 = vld [vmem:[#allocation3 + $0x1a8] sm:$0xff] }
 0x998   :  { %3367 = vmatmul.mubr.bf16.vlgmr.msra.gmra.mrb[40].mxu1 %v3318_v10  ;;  %3407 = vmatmul.mubr.bf16.vlgmr.msra.gmra.mrb[44].mxu0 %v3320_v25  ;;  %v3231_v17 = vcombine.low %v3223_v62, %v3230_v1  ;;  %v2094_v61 = vld [vmem:[#allocation18 + $0x8] sm:$0xff]  ;;  %v2327_v10 = vld [vmem:[#allocation3 + $0x130] sm:$0xff]  ;;  %v2368_v1 = vld [vmem:[#allocation3 + $0x278] sm:$0xff] }
 0x999   :  { %7165 = vmatpush3.bf16.msra.mxu1 %v2321_v29  ;;  %7187 = vmatpush3.bf16.msra.mxu0 %v2337_v48  ;;  %v2343_v25 = vld [vmem:[#allocation3 + $0x1b0] sm:$0xff]  ;;  %v2336_v29 = vld [vmem:[#allocation3 + $0x178] sm:$0xff]  ;;  %v2382_v40 = vld [vmem:[#allocation3 + $0x2e8] sm:$0xff] }
 0x99a   :  { %3446 = vmatprep.mubr.bf16.mxu1 %v3323_v18  ;;  %3486 = vmatprep.mubr.bf16.mxu0 %v3325_v30  ;;  %v2352_v48 = vld [vmem:[#allocation3 + $0x1f8] sm:$0xff]  ;;  %v10223_v14 = vmul.f32 %v3231_v17, %v2094_v61  ;;  %v2358_v32 = vld [vmem:[#allocation3 + $0x228] sm:$0xff]  ;;  %v2375_v62 = vld [vmem:[#allocation3 + $0x2b0] sm:$0xff] }
 0x99b   :  { %7166 = vmatprep.subr.bf16.mxu1 %v2330_v34  ;;  %7188 = vmatprep.subr.bf16.mxu0 %v2346_v16  ;;  %v3322_v34 = vpack.c.bf16 %v3257_v59, %v3257_v59  ;;  %v3324_v16 = vpack.c.bf16 %v3265_v33, %v3265_v33  ;;  %v2393_v61 = vld [vmem:[#allocation3 + $0x340] sm:$0xff] }
 0x99c   :  { %v3277_v18 = vrot.slane %v10223_v14, %v11286_v4  ;;  %v3285_v30 = vrot.slane %v10223_v14, %v11291_v8  ;;  %v3281_v17 = vrot.slane %v10223_v14, %v11288_v15  ;;  %v2401_v59 = vld [vmem:[#allocation3 + $0x380] sm:$0xff] }
 0x99d   :  { %7167 = vmatpush3.bf16.msra.mxu1 %v2322_v54  ;;  %7189 = vmatpush3.bf16.msra.mxu0 %v2338_v39  ;;  %v2353_v54 = vld [vmem:[#allocation3 + $0x200] sm:$0xff] }
 0x99e   :  { %7168 = vmatprep.subr.bf16.mxu1 %v2331_v23  ;;  %7190 = vmatprep.subr.bf16.mxu0 %v2347_v56  ;;  %v3327_v39 = vpack.c.bf16 %v3277_v18, %v3277_v18  ;;  %v3329_v7 = vpack.c.bf16 %v3285_v30, %v3285_v30  ;;  %v2362_v23 = vld [vmem:[#allocation3 + $0x248] sm:$0xff] }
 0x99f   :  { %v2378_v56 = vld [vmem:[#allocation3 + $0x2c8] sm:$0xff] }
 0x9a0   :  { %v2410_v18 = vld [vmem:[#allocation3 + $0x3c8] sm:$0xff] }
 0x9a1   :  { %7169 = vmatpush3.bf16.msra.mxu1 %v2323_v49  ;;  %7191 = vmatpush3.bf16.msra.mxu0 %v2339_v51  ;;  %v2379_v49 = vld [vmem:[#allocation3 + $0x2d0] sm:$0xff]  ;;  %v2386_v30 = vld [vmem:[#allocation3 + $0x308] sm:$0xff] }
 0x9a2   :  { %7170 = vmatprep.subr.bf16.mxu1 %v2332_v24  ;;  %7192 = vmatprep.subr.bf16.mxu0 %v2348_v26  ;;  %v2355_v51 = vld [vmem:[#allocation3 + $0x210] sm:$0xff]  ;;  %v2364_v26 = vld [vmem:[#allocation3 + $0x258] sm:$0xff] }
 0x9a3   :  { %v2371_v24 = vld [vmem:[#allocation3 + $0x290] sm:$0xff] }
 0x9a5   :  { %7171 = vmatpush3.bf16.msra.mxu1 %v2324_v44  ;;  %7193 = vmatpush3.bf16.msra.mxu0 %v2340_v37  ;;  %v2381_v44 = vld [vmem:[#allocation3 + $0x2e0] sm:$0xff] }
 0x9a6   :  { %7172 = vmatprep.subr.bf16.mxu1 %v2333_v43  ;;  %7194 = vmatprep.subr.bf16.mxu0 %v2349_v45  ;;  %v2357_v37 = vld [vmem:[#allocation3 + $0x220] sm:$0xff]  ;;  %v2366_v45 = vld [vmem:[#allocation3 + $0x268] sm:$0xff] }
 0x9a7   :  { %v2373_v43 = vld [vmem:[#allocation3 + $0x2a0] sm:$0xff] }
 0x9a9   :  { %7173 = vmatpush3.bf16.msra.mxu1 %v2325_v58  ;;  %7195 = vmatpush3.bf16.msra.mxu0 %v2341_v60  ;;  %v2374_v58 = vld [vmem:[#allocation3 + $0x2a8] sm:$0xff]  ;;  %v2367_v60 = vld [vmem:[#allocation3 + $0x270] sm:$0xff] }
 0x9aa   :  { %7174 = vmatprep.subr.bf16.mxu1 %v2334_v28  ;;  %7196 = vmatprep.subr.bf16.mxu0 %v2350_v38  ;;  %v2383_v28 = vld [vmem:[#allocation3 + $0x2f0] sm:$0xff] }
 0x9ab   :  { %v2359_v38 = vld [vmem:[#allocation3 + $0x230] sm:$0xff] }
 0x9ad   :  { %7175 = vmatpush3.bf16.msra.mxu1 %v2326_v3  ;;  %7197 = vmatpush3.bf16.msra.mxu0 %v2342_v0  ;;  %v2384_v3 = vld [vmem:[#allocation3 + $0x2f8] sm:$0xff] }
 0x9ae   :  { %7176 = vmatprep.subr.bf16.mxu1 %v2335_v52  ;;  %7198 = vmatprep.subr.bf16.mxu0 %v2351_v31  ;;  %v2360_v0 = vld [vmem:[#allocation3 + $0x238] sm:$0xff]  ;;  %v3273_v52 = vrot.slane %v10223_v14, %v11285_v22 }
 0x9af   :  { %v2376_v31 = vld [vmem:[#allocation3 + $0x2b8] sm:$0xff] }
 0x9b1   :  { %7177 = vmatpush3.bf16.msra.mxu1 %v2327_v10  ;;  %7199 = vmatpush3.bf16.msra.mxu0 %v2343_v25  ;;  %v2409_v10 = vld [vmem:[#allocation3 + $0x3c0] sm:$0xff]  ;;  %v3293_v25 = vrot.slane %v10223_v14, %v11290_v27 }
 0x9b2   :  { %7178 = vmatprep.subr.bf16.mxu1 %v2336_v29  ;;  %7200 = vmatprep.subr.bf16.mxu0 %v2352_v48  ;;  %v3301_v29 = vrot.slane %v10223_v14, %v9998_v9  ;;  %v3326_v48 = vpack.c.bf16 %v3273_v52, %v3273_v52 }
 0x9b3   :  { %v3331_v33 = vpack.c.bf16 %v3293_v25, %v3293_v25 }
 0x9b5   :  { %7179 = vmatpush3.bf16.msra.mxu1 %v2328_v20  ;;  %7201 = vmatpush3.bf16.msra.mxu0 %v2344_v53  ;;  %v2385_v20 = vld [vmem:[#allocation3 + $0x300] sm:$0xff]  ;;  %v3328_v53 = vpack.c.bf16 %v3281_v17, %v3281_v17 }
 0x9b6   :  { %7208 = vmatprep.subr.bf16.mxu1 %v2361_v47  ;;  %7230 = vmatprep.subr.bf16.mxu0 %v2377_v46  ;;  %v2394_v47 = vld [vmem:[#allocation3 + $0x348] sm:$0xff]  ;;  %v3333_v46 = vpack.c.bf16 %v3301_v29, %v3301_v29 }
 0x9b8   :  { %3447 = vmatmul.mubr.bf16.vlgmr.msra.gmra.mrb[44].mxu1 %v3322_v34  ;;  %3487 = vmatmul.mubr.bf16.vlgmr.msra.gmra.mrb[48].mxu0 %v3324_v16  ;;  %v2402_v34 = vld [vmem:[#allocation3 + $0x388] sm:$0xff]  ;;  %v2395_v16 = vld [vmem:[#allocation3 + $0x350] sm:$0xff] }
 0x9b9   :  { %7209 = vmatpush3.bf16.msra.mxu1 %v2353_v54  ;;  %3526 = vmatprep.mubr.bf16.mxu1 %v3327_v39  ;;  %v2411_v54 = vld [vmem:[#allocation3 + $0x3d0] sm:$0xff] }
 0x9ba   :  { %7231 = vmatpush3.bf16.msra.mxu0 %v2369_v57  ;;  %3566 = vmatprep.mubr.bf16.mxu0 %v3329_v7  ;;  %v2387_v39 = vld [vmem:[#allocation3 + $0x310] sm:$0xff]  ;;  %v2396_v7 = vld [vmem:[#allocation3 + $0x358] sm:$0xff] }
 0x9bb   :  { %7210 = vmatprep.subr.bf16.mxu1 %v2362_v23  ;;  %7232 = vmatprep.subr.bf16.mxu0 %v2378_v56  ;;  %v2403_v57 = vld [vmem:[#allocation3 + $0x390] sm:$0xff]  ;;  %v2412_v23 = vld [vmem:[#allocation3 + $0x3d8] sm:$0xff] }
 0x9bc   :  { %v2388_v56 = vld [vmem:[#allocation3 + $0x318] sm:$0xff] }
 0x9bd   :  { %7211 = vmatpush3.bf16.msra.mxu1 %v2354_v35  ;;  %v2404_v35 = vld [vmem:[#allocation3 + $0x398] sm:$0xff] }
 0x9be   :  { %7233 = vmatpush3.bf16.msra.mxu0 %v2370_v13  ;;  %7212 = vmatprep.subr.bf16.mxu1 %v2363_v50  ;;  %v2397_v13 = vld [vmem:[#allocation3 + $0x360] sm:$0xff] }
 0x9bf   :  { %7234 = vmatprep.subr.bf16.mxu0 %v2379_v49  ;;  %v2413_v50 = vld [vmem:[#allocation3 + $0x3e0] sm:$0xff] }
 0x9c0   :  { %v2389_v49 = vld [vmem:[#allocation3 + $0x320] sm:$0xff] }
 0x9c1   :  { %7213 = vmatpush3.bf16.msra.mxu1 %v2355_v51  ;;  %v2405_v51 = vld [vmem:[#allocation3 + $0x3a0] sm:$0xff] }
 0x9c2   :  { %7235 = vmatpush3.bf16.msra.mxu0 %v2371_v24  ;;  %7214 = vmatprep.subr.bf16.mxu1 %v2364_v26  ;;  %v2398_v24 = vld [vmem:[#allocation3 + $0x368] sm:$0xff] }
 0x9c3   :  { %7236 = vmatprep.subr.bf16.mxu0 %v2380_v11  ;;  %v2414_v26 = vld [vmem:[#allocation3 + $0x3e8] sm:$0xff] }
 0x9c4   :  { %v2390_v11 = vld [vmem:[#allocation3 + $0x328] sm:$0xff] }
 0x9c5   :  { %7215 = vmatpush3.bf16.msra.mxu1 %v2356_v5  ;;  %v2406_v5 = vld [vmem:[#allocation3 + $0x3a8] sm:$0xff] }
 0x9c6   :  { %7237 = vmatpush3.bf16.msra.mxu0 %v2372_v12  ;;  %7216 = vmatprep.subr.bf16.mxu1 %v2365_v36  ;;  %v2399_v12 = vld [vmem:[#allocation3 + $0x370] sm:$0xff] }
 0x9c7   :  { %7238 = vmatprep.subr.bf16.mxu0 %v2381_v44  ;;  %v2415_v36 = vld [vmem:[#allocation3 + $0x3f0] sm:$0xff] }
 0x9c8   :  { %v2391_v44 = vld [vmem:[#allocation3 + $0x330] sm:$0xff] }
 0x9c9   :  { %7217 = vmatpush3.bf16.msra.mxu1 %v2357_v37  ;;  %v2407_v37 = vld [vmem:[#allocation3 + $0x3b0] sm:$0xff] }
 0x9ca   :  { %7239 = vmatpush3.bf16.msra.mxu0 %v2373_v43  ;;  %7218 = vmatprep.subr.bf16.mxu1 %v2366_v45  ;;  %v2400_v43 = vld [vmem:[#allocation3 + $0x378] sm:$0xff] }
 0x9cb   :  { %7240 = vmatprep.subr.bf16.mxu0 %v2382_v40  ;;  %v2416_v45 = vld [vmem:[#allocation3 + $0x3f8] sm:$0xff] }
 0x9cc   :  { %v2392_v40 = vld [vmem:[#allocation3 + $0x338] sm:$0xff] }
 0x9cd   :  { %7219 = vmatpush3.bf16.msra.mxu1 %v2358_v32  ;;  %v3289_v32 = vrot.slane %v10223_v14, %v11289_v19 }
 0x9ce   :  { %7241 = vmatpush3.bf16.msra.mxu0 %v2374_v58  ;;  %7220 = vmatprep.subr.bf16.mxu1 %v2367_v60  ;;  %v2408_v58 = vld [vmem:[#allocation3 + $0x3b8] sm:$0xff]  ;;  %v3297_v60 = vrot.slane %v10223_v14, %v9995_v55 }
 0x9cf   :  { %7242 = vmatprep.subr.bf16.mxu0 %v2383_v28  ;;  %v3330_v28 = vpack.c.bf16 %v3289_v32, %v3289_v32 }
 0x9d1   :  { %7221 = vmatpush3.bf16.msra.mxu1 %v2359_v38  ;;  %v3332_v38 = vpack.c.bf16 %v3297_v60, %v3297_v60  ;;  %v10246_v60 = vrot.slane %v9899_v42, 2 }
 0x9d2   :  { %7243 = vmatpush3.bf16.msra.mxu0 %v2375_v62  ;;  %7222 = vmatprep.subr.bf16.mxu1 %v2368_v1 }
 0x9d3   :  { %7244 = vmatprep.subr.bf16.mxu0 %v2384_v3 }
 0x9d5   :  { %7223 = vmatpush3.bf16.msra.mxu1 %v2360_v0 }
 0x9d6   :  { %7245 = vmatpush3.bf16.msra.mxu0 %v2376_v31  ;;  %7252 = vmatprep.subr.bf16.mxu1 %v2393_v61 }
 0x9d7   :  { %7274 = vmatprep.subr.bf16.mxu0 %v2409_v10 }
 0x9d8   :  { %3527 = vmatmul.mubr.bf16.vlgmr.msra.gmra.mrb[48].mxu1 %v3326_v48 }
 0x9d9   :  { %3567 = vmatmul.mubr.bf16.vlgmr.msra.gmra.mrb[52].mxu0 %v3328_v53  ;;  %7253 = vmatpush3.bf16.msra.mxu1 %v2385_v20 }
 0x9da   :  { %3606 = vmatprep.mubr.bf16.mxu1 %v3331_v33  ;;  %7275 = vmatpush3.bf16.msra.mxu0 %v2401_v59 }
 0x9db   :  { %3646 = vmatprep.mubr.bf16.mxu0 %v3333_v46  ;;  %7254 = vmatprep.subr.bf16.mxu1 %v2394_v47 }
 0x9dc   :  { %7276 = vmatprep.subr.bf16.mxu0 %v2410_v18 }
 0x9dd   :  { %7255 = vmatpush3.bf16.msra.mxu1 %v2386_v30 }
 0x9de   :  { %7277 = vmatpush3.bf16.msra.mxu0 %v2402_v34  ;;  %7256 = vmatprep.subr.bf16.mxu1 %v2395_v16 }
 0x9df   :  { %7278 = vmatprep.subr.bf16.mxu0 %v2411_v54 }
 0x9e1   :  { %7257 = vmatpush3.bf16.msra.mxu1 %v2387_v39 }
 0x9e2   :  { %7279 = vmatpush3.bf16.msra.mxu0 %v2403_v57  ;;  %7258 = vmatprep.subr.bf16.mxu1 %v2396_v7 }
 0x9e3   :  { %7280 = vmatprep.subr.bf16.mxu0 %v2412_v23 }
 0x9e5   :  { %7259 = vmatpush3.bf16.msra.mxu1 %v2388_v56 }
 0x9e6   :  { %7281 = vmatpush3.bf16.msra.mxu0 %v2404_v35  ;;  %7260 = vmatprep.subr.bf16.mxu1 %v2397_v13 }
 0x9e7   :  { %7282 = vmatprep.subr.bf16.mxu0 %v2413_v50 }
 0x9e9   :  { %7261 = vmatpush3.bf16.msra.mxu1 %v2389_v49 }
 0x9ea   :  { %7283 = vmatpush3.bf16.msra.mxu0 %v2405_v51  ;;  %7262 = vmatprep.subr.bf16.mxu1 %v2398_v24 }
 0x9eb   :  { %7284 = vmatprep.subr.bf16.mxu0 %v2414_v26 }
 0x9ed   :  { %7263 = vmatpush3.bf16.msra.mxu1 %v2390_v11 }
 0x9ee   :  { %7285 = vmatpush3.bf16.msra.mxu0 %v2406_v5  ;;  %7264 = vmatprep.subr.bf16.mxu1 %v2399_v12 }
 0x9ef   :  { %7286 = vmatprep.subr.bf16.mxu0 %v2415_v36 }
 0x9f1   :  { %7265 = vmatpush3.bf16.msra.mxu1 %v2391_v44 }
 0x9f2   :  { %7287 = vmatpush3.bf16.msra.mxu0 %v2407_v37  ;;  %7266 = vmatprep.subr.bf16.mxu1 %v2400_v43 }
 0x9f3   :  { %7288 = vmatprep.subr.bf16.mxu0 %v2416_v45 }
 0x9f5   :  { %7267 = vmatpush3.bf16.msra.mxu1 %v2392_v40 }
 0x9f6   :  { %7289 = vmatpush3.bf16.msra.mxu0 %v2408_v58 }
 0x9f8   :  { %3607 = vmatmul.mubr.bf16.vlgmr.msra.gmra.mrb[52].mxu1 %v3330_v28 }
 0x9f9   :  { %3647 = vmatmul.mubr.bf16.vlgmr.msra.gmra.mrb[56].mxu0 %v3332_v38 }
 0xa6b   :  { %v7136_v62 = vpop.f32.mrb[40].mxu1  ;;  %v7158_v1 = vpop.f32.mrb[44].mxu0 }
 0xa6c   :  { %v7137_v3 = vpop.f32.mrb[41].mxu1  ;;  %v7159_v0 = vpop.f32.mrb[45].mxu0 }
 0xa6d   :  { %v7138_v52 = vadd.f32 %v7137_v3, %v7136_v62  ;;  %v7160_v31 = vadd.f32 %v7159_v0, %v7158_v1  ;;  %v7139_v17 = vpop.f32.mrb[42].mxu1  ;;  %v7161_v61 = vpop.f32.mrb[46].mxu0  ;;  %v10252_v3 = vrot.slane %v9907_v63, 2 }
 0xa6e   :  { %v7140_v10 = vpop.f32.mrb[43].mxu1  ;;  %v7162_v25 = vpop.f32.mrb[47].mxu0 }
 0xa6f   :  { %v3409_v29 = vadd.f32 %v7160_v31, %v7138_v52 }
 0xa8b   :  { %v7180_v48 = vpop.f32.mrb[44].mxu1  ;;  %v7202_v20 = vpop.f32.mrb[48].mxu0 }
 0xa8c   :  { %v7181_v14 = vpop.f32.mrb[45].mxu1  ;;  %v7203_v53 = vpop.f32.mrb[49].mxu0 }
 0xa8d   :  { %v7182_v59 = vadd.f32 %v7181_v14, %v7180_v48  ;;  %v7204_v33 = vadd.f32 %v7203_v53, %v7202_v20  ;;  %v7183_v47 = vpop.f32.mrb[46].mxu1  ;;  %v7205_v46 = vpop.f32.mrb[50].mxu0 }
 0xa8e   :  { %v7184_v18 = vpop.f32.mrb[47].mxu1  ;;  %v7206_v30 = vpop.f32.mrb[51].mxu0 }
 0xa8f   :  { %v3449_v34 = vadd.f32 %v7182_v59, %v3409_v29 }
 0xa91   :  { %v3489_v16 = vadd.f32 %v7204_v33, %v3449_v34 }
 0xaab   :  { %v7224_v54 = vpop.f32.mrb[48].mxu1 }
 0xaac   :  { %v7246_v39 = vpop.f32.mrb[52].mxu0  ;;  %v7225_v57 = vpop.f32.mrb[49].mxu1 }
 0xaad   :  { %v7226_v7 = vadd.f32 %v7225_v57, %v7224_v54  ;;  %v7247_v23 = vpop.f32.mrb[53].mxu0  ;;  %v7227_v56 = vpop.f32.mrb[50].mxu1 }
 0xaae   :  { %v7248_v35 = vadd.f32 %v7247_v23, %v7246_v39  ;;  %v7249_v13 = vpop.f32.mrb[54].mxu0  ;;  %v7228_v50 = vpop.f32.mrb[51].mxu1 }
 0xaaf   :  { %v3529_v49 = vadd.f32 %v7226_v7, %v3489_v16  ;;  %v7250_v51 = vpop.f32.mrb[55].mxu0 }
 0xab1   :  { %v3569_v24 = vadd.f32 %v7248_v35, %v3529_v49 }
 0xacb   :  { %v7268_v26 = vpop.f32.mrb[52].mxu1 }
 0xacc   :  { %v7290_v11 = vpop.f32.mrb[56].mxu0  ;;  %v7269_v5 = vpop.f32.mrb[53].mxu1 }
 0xacd   :  { %v7270_v12 = vadd.f32 %v7269_v5, %v7268_v26  ;;  %v7291_v36 = vpop.f32.mrb[57].mxu0  ;;  %v7271_v44 = vpop.f32.mrb[54].mxu1 }
 0xace   :  { %v7292_v37 = vadd.f32 %v7291_v36, %v7290_v11  ;;  %v7293_v43 = vpop.f32.mrb[58].mxu0  ;;  %v7272_v45 = vpop.f32.mrb[55].mxu1 }
 0xacf   :  { %v3609_v40 = vadd.f32 %v7270_v12, %v3569_v24  ;;  %v7294_v32 = vpop.f32.mrb[59].mxu0 }
 0xad1   :  { %v3649_v58 = vadd.f32 %v7292_v37, %v3609_v40 }
 0xad3   :  { %v3661_v28 = vmul.f32 %v3649_v58, %v3649_v58  ;;  %v3657_v62 = vmul.f32 %v10246_v60, %v3649_v58 }
 0xad5   :  { %v3662_v38 = vsel %vm2986_vm2, %v3661_v28, 0.0  ;;  %v3658_v1 = vsel %vm2986_vm2, %v3657_v62, 0.0 }
 0xad6   :  { %3663 = vadd.xlane.f32.xlu1 %v3662_v38 }
 0xada   :  { %3659 = vadd.xlane.f32.xlu1 %v3658_v1 }
 0xb63   :  { %v3664_v0 = vpop.xlane.xlu1 %3663 }
 0xb64   :  { %v3668_v52 = vmul.f32 %v10252_v3, %v3664_v0 }
 0xb66   :  { %7889 = vrsqrt.f32 %v3668_v52  ;;  %vm3671_vm3 = vcmp.eq.f32.partialorder %v3668_v52, inf  ;;  %v3674_v42 = vand.u32 2147483648, %v3668_v52  ;;  %vm3673_vm4 = vcmp.eq.f32.partialorder %v3668_v52, 0.0 }
 0xb67   :  { %v3660_v48 = vpop.xlane.xlu1 %3659 }
 0xb70   :  { %v7890_v31 = vpop.eup %7889 }
 0xb71   :  { %v3670_v17 = vmul.f32 %v7890_v31, %v3668_v52 }
 0xb73   :  { %v3672_v61 = vsel %vm3671_vm3, %v3668_v52, %v3670_v17 }
 0xb74   :  { %v3675_v10 = vsel %vm3673_vm4, %v3674_v42, %v3672_v61 }
 0xb75   :  { %v3676_v25 = vmax.f32 %v3675_v10, 1e-08 }
 0xb77   :  { %7891 = vrcp.f32 %v3676_v25 }
 0xb81   :  { %v7892_v29 = vpop.eup %7891 }
 0xb82   :  { %v10255_v20 = vmul.f32 %v7892_v29, %v3660_v48 }
 0xb84   :  { %v3679_v63 = vsub.f32 0.0, %v10255_v20 }
 0xb85   :  { %8595 = dma.done.wait [#allocation7 + $0x2], 18432 }
 0xb86   :  { %8596 = vsyncadd [#allocation7 + $0x2], 4294948864 }
 0xb87   :  { %8597 = dma.done.wait [#allocation7 + $0x3], 12288 }
 0xb88   :  { %8598 = vsyncadd [#allocation7 + $0x3], 4294955008  ;;  %4073 = vmatprep.mubr.bf16.mxu1 %v11283_v2  ;;  %v7893_v14 = vld [vmem:[%s11284_s28 + $0x84] ss:$8 sps:$4 sm:$0xff]   ;;  %v7895_v53 = vld [vmem:[%s11284_s28 + $0x80] ss:$8 sps:$4 sm:$0xff]  }
 0xb89   :  { %4041 = vmatprep.subr.bf16.mxu1 %v7893_v14  ;;  %v7896_v59 = vld [vmem:[%s11284_s28 + $0x94] ss:$8 sps:$4 sm:$0xff]   ;;  %v7898_v33 = vld [vmem:[%s11284_s28 + $0x90] ss:$8 sps:$4 sm:$0xff]   ;;  %v7899_v47 = vld [vmem:[%s11284_s28 + $0xa4] ss:$8 sps:$4 sm:$0xff]  }
 0xb8a   :  { %4042 = vmatpush1.bf16.msra.mxu1 %v7895_v53  ;;  %v7901_v46 = vld [vmem:[%s11284_s28 + $0xa0] ss:$8 sps:$4 sm:$0xff]   ;;  %v7902_v18 = vld [vmem:[%s11284_s28 + $0xb4] ss:$8 sps:$4 sm:$0xff]   ;;  %v7904_v34 = vld [vmem:[%s11284_s28 + $0xb0] ss:$8 sps:$4 sm:$0xff]  }
 0xb8b   :  { %4043 = vmatprep.subr.bf16.mxu1 %v7896_v59  ;;  %v3690_v30 = vld [vmem:[#allocation4 + $0x8] sm:$0xff]  ;;  %v3689_v16 = vld [vmem:[#allocation4] sm:$0xff]  ;;  %v7908_v56 = vld [vmem:[%s11284_s28 + $0xd4] ss:$8 sps:$4 sm:$0xff]   ;;  %s11292_s8 = sld [smem:[#allocation135_spill]]  ;;  %vm5517_vm9 = vcmask 0  }
 0xb8c   :  { %4151 = vmatprep.subr.bf16.mxu0 %v3690_v30  ;;  %v7905_v54 = vld [vmem:[%s11284_s28 + $0xc4] ss:$8 sps:$4 sm:$0xff]   ;;  %v7907_v23 = vld [vmem:[%s11284_s28 + $0xc0] ss:$8 sps:$4 sm:$0xff]   ;;  %v7910_v50 = vld [vmem:[%s11284_s28 + $0xd0] ss:$8 sps:$4 sm:$0xff]  }
 0xb8d   :  { %4152 = vmatpush1.bf16.msra.mxu0 %v3689_v16  ;;  %v3702_v39 = vld [vmem:[#allocation4 + $0x68] sm:$0xff]  ;;  %v3701_v57 = vld [vmem:[#allocation4 + $0x60] sm:$0xff]  ;;  %v7914_v11 = vld [vmem:[%s11284_s28 + $0xf4] ss:$8 sps:$4 sm:$0xff]  }
 0xb8e   :  { %4044 = vmatpush1.bf16.msra.mxu1 %v7898_v33  ;;  %4153 = vmatprep.subr.bf16.mxu0 %v3702_v39  ;;  %v3714_v7 = vld [vmem:[#allocation4 + $0xc8] sm:$0xff]  ;;  %v3713_v35 = vld [vmem:[#allocation4 + $0xc0] sm:$0xff]  ;;  %v7916_v36 = vld [vmem:[%s11284_s28 + $0xf0] ss:$8 sps:$4 sm:$0xff]  }
 0xb8f   :  { %4045 = vmatprep.subr.bf16.mxu1 %v7899_v47  ;;  %v3726_v13 = vld [vmem:[#allocation4 + $0x128] sm:$0xff]  ;;  %v3725_v51 = vld [vmem:[#allocation4 + $0x120] sm:$0xff]  ;;  %v3692_v44 = vld [vmem:[#allocation4 + $0x18] sm:$0xff] }
 0xb90   :  { %v7911_v49 = vld [vmem:[%s11284_s28 + $0xe4] ss:$8 sps:$4 sm:$0xff]   ;;  %v7913_v26 = vld [vmem:[%s11284_s28 + $0xe0] ss:$8 sps:$4 sm:$0xff]   ;;  %v3691_v45 = vld [vmem:[#allocation4 + $0x10] sm:$0xff] }
 0xb91   :  { %4154 = vmatpush1.bf16.msra.mxu0 %v3701_v57  ;;  %v3738_v24 = vld [vmem:[#allocation4 + $0x188] sm:$0xff]  ;;  %v3737_v5 = vld [vmem:[#allocation4 + $0x180] sm:$0xff]  ;;  %v3704_v40 = vld [vmem:[#allocation4 + $0x78] sm:$0xff] }
 0xb92   :  { %4046 = vmatpush1.bf16.msra.mxu1 %v7901_v46  ;;  %4155 = vmatprep.subr.bf16.mxu0 %v3714_v7  ;;  %v3750_v12 = vld [vmem:[#allocation4 + $0x1e8] sm:$0xff]  ;;  %v3749_v37 = vld [vmem:[#allocation4 + $0x1e0] sm:$0xff]  ;;  %v3703_v28 = vld [vmem:[#allocation4 + $0x70] sm:$0xff] }
 0xb93   :  { %4047 = vmatprep.subr.bf16.mxu1 %v7902_v18  ;;  %v3762_v43 = vld [vmem:[#allocation4 + $0x248] sm:$0xff]  ;;  %v3761_v32 = vld [vmem:[#allocation4 + $0x240] sm:$0xff]  ;;  %v3716_v38 = vld [vmem:[#allocation4 + $0xd8] sm:$0xff] }
 0xb94   :  { %v3774_v58 = vld [vmem:[#allocation4 + $0x2a8] sm:$0xff]  ;;  %v3773_v62 = vld [vmem:[#allocation4 + $0x2a0] sm:$0xff]  ;;  %v3715_v0 = vld [vmem:[#allocation4 + $0xd0] sm:$0xff] }
 0xb95   :  { %4156 = vmatpush1.bf16.msra.mxu0 %v3713_v35  ;;  %v3786_v1 = vld [vmem:[#allocation4 + $0x308] sm:$0xff]  ;;  %v3728_v52 = vld [vmem:[#allocation4 + $0x138] sm:$0xff]  ;;  %v3785_v31 = vld [vmem:[#allocation4 + $0x300] sm:$0xff] }
 0xb96   :  { %4048 = vmatpush1.bf16.msra.mxu1 %v7904_v34  ;;  %4157 = vmatprep.subr.bf16.mxu0 %v3726_v13  ;;  %v3798_v17 = vld [vmem:[#allocation4 + $0x368] sm:$0xff]  ;;  %v3727_v42 = vld [vmem:[#allocation4 + $0x130] sm:$0xff]  ;;  %v3740_v61 = vld [vmem:[#allocation4 + $0x198] sm:$0xff] }
 0xb97   :  { %4049 = vmatprep.subr.bf16.mxu1 %v7905_v54  ;;  %v3797_v10 = vld [vmem:[#allocation4 + $0x360] sm:$0xff]  ;;  %v3739_v25 = vld [vmem:[#allocation4 + $0x190] sm:$0xff]  ;;  %v3752_v29 = vld [vmem:[#allocation4 + $0x1f8] sm:$0xff] }
 0xb98   :  { %v3751_v48 = vld [vmem:[#allocation4 + $0x1f0] sm:$0xff]  ;;  %v3764_v14 = vld [vmem:[#allocation4 + $0x258] sm:$0xff]  ;;  %v3810_v34 = vld [vmem:[#allocation4 + $0x3c8] sm:$0xff] }
 0xb99   :  { %4158 = vmatpush1.bf16.msra.mxu0 %v3725_v51  ;;  %v3763_v53 = vld [vmem:[#allocation4 + $0x250] sm:$0xff]  ;;  %v3776_v59 = vld [vmem:[#allocation4 + $0x2b8] sm:$0xff]  ;;  %v3809_v54 = vld [vmem:[#allocation4 + $0x3c0] sm:$0xff] }
 0xb9a   :  { %4050 = vmatpush1.bf16.msra.mxu1 %v7907_v23  ;;  %4159 = vmatprep.subr.bf16.mxu0 %v3738_v24  ;;  %v3775_v33 = vld [vmem:[#allocation4 + $0x2b0] sm:$0xff]  ;;  %v3788_v47 = vld [vmem:[#allocation4 + $0x318] sm:$0xff]  ;;  %v3822_v57 = vld [vmem:[#allocation4 + $0x428] sm:$0xff] }
 0xb9b   :  { %4051 = vmatprep.subr.bf16.mxu1 %v7908_v56  ;;  %v3787_v46 = vld [vmem:[#allocation4 + $0x310] sm:$0xff]  ;;  %v3800_v18 = vld [vmem:[#allocation4 + $0x378] sm:$0xff]  ;;  %v3821_v23 = vld [vmem:[#allocation4 + $0x420] sm:$0xff] }
 0xb9c   :  { %v3799_v30 = vld [vmem:[#allocation4 + $0x370] sm:$0xff]  ;;  %v3812_v16 = vld [vmem:[#allocation4 + $0x3d8] sm:$0xff]  ;;  %v3694_v35 = vld [vmem:[#allocation4 + $0x28] sm:$0xff] }
 0xb9d   :  { %4160 = vmatpush1.bf16.msra.mxu0 %v3737_v5  ;;  %v3811_v39 = vld [vmem:[#allocation4 + $0x3d0] sm:$0xff]  ;;  %v3824_v7 = vld [vmem:[#allocation4 + $0x438] sm:$0xff] }
 0xb9e   :  { %4052 = vmatpush1.bf16.msra.mxu1 %v7910_v50  ;;  %4161 = vmatprep.subr.bf16.mxu0 %v3750_v12  ;;  %v3823_v56 = vld [vmem:[#allocation4 + $0x430] sm:$0xff]  ;;  %v3696_v13 = vld [vmem:[#allocation4 + $0x38] sm:$0xff] }
 0xb9f   :  { %4053 = vmatprep.subr.bf16.mxu1 %v7911_v49  ;;  %v3949_v50 = vld [vmem:[#allocation17 + $0x2] sm:$0x3] }
 0xba0   :  { %v4034_v49 = vrot.slane %v3949_v50, %v11285_v22  ;;  %v4038_v51 = vrot.slane %v3949_v50, %v11286_v4  ;;  %v3804_v50 = vld [vmem:[#allocation4 + $0x398] sm:$0xff] }
 0xba1   :  { %4162 = vmatpush1.bf16.msra.mxu0 %v3749_v37 }
 0xba2   :  { %4054 = vmatpush1.bf16.msra.mxu1 %v7913_v26  ;;  %4163 = vmatprep.subr.bf16.mxu0 %v3762_v43 }
 0xba3   :  { %4055 = vmatprep.subr.bf16.mxu1 %v7914_v11 }
 0xba5   :  { %4164 = vmatpush1.bf16.msra.mxu0 %v3761_v32  ;;  %v3695_v32 = vld [vmem:[#allocation4 + $0x30] sm:$0xff] }
 0xba6   :  { %4056 = vmatpush1.bf16.msra.mxu1 %v7916_v36  ;;  %4165 = vmatprep.subr.bf16.mxu0 %v3774_v58  ;;  %v3706_v58 = vld [vmem:[#allocation4 + $0x88] sm:$0xff] }
 0xba7   :  { %4192 = vmatprep.subr.bf16.mxu1 %v3692_v44 }
 0xba9   :  { %4074 = vmatmul.mubr.bf16.vlgmr.msra.gmra.mrb[56].mxu1 %v9961_v21  ;;  %4166 = vmatpush1.bf16.msra.mxu0 %v3773_v62  ;;  %v3707_v62 = vld [vmem:[#allocation4 + $0x90] sm:$0xff] }
 0xbaa   :  { %4193 = vmatpush1.bf16.msra.mxu1 %v3691_v45  ;;  %4167 = vmatprep.subr.bf16.mxu0 %v3786_v1  ;;  %v3718_v1 = vld [vmem:[#allocation4 + $0xe8] sm:$0xff] }
 0xbab   :  { %4194 = vmatprep.subr.bf16.mxu1 %v3704_v40  ;;  %v3693_v40 = vld [vmem:[#allocation4 + $0x20] sm:$0xff] }
 0xbad   :  { %4168 = vmatpush1.bf16.msra.mxu0 %v3785_v31  ;;  %v3719_v31 = vld [vmem:[#allocation4 + $0xf0] sm:$0xff] }
 0xbae   :  { %4195 = vmatpush1.bf16.msra.mxu1 %v3703_v28  ;;  %4169 = vmatprep.subr.bf16.mxu0 %v3798_v17  ;;  %v3708_v28 = vld [vmem:[#allocation4 + $0x98] sm:$0xff]  ;;  %v3730_v17 = vld [vmem:[#allocation4 + $0x148] sm:$0xff] }
 0xbaf   :  { %4196 = vmatprep.subr.bf16.mxu1 %v3716_v38  ;;  %v3705_v38 = vld [vmem:[#allocation4 + $0x80] sm:$0xff] }
 0xbb1   :  { %4170 = vmatpush1.bf16.msra.mxu0 %v3797_v10  ;;  %v3731_v10 = vld [vmem:[#allocation4 + $0x150] sm:$0xff] }
 0xbb2   :  { %4197 = vmatpush1.bf16.msra.mxu1 %v3715_v0  ;;  %4171 = vmatprep.subr.bf16.mxu0 %v3810_v34  ;;  %v3720_v0 = vld [vmem:[#allocation4 + $0xf8] sm:$0xff]  ;;  %v3767_v34 = vld [vmem:[#allocation4 + $0x270] sm:$0xff] }
 0xbb3   :  { %4198 = vmatprep.subr.bf16.mxu1 %v3728_v52  ;;  %v3717_v52 = vld [vmem:[#allocation4 + $0xe0] sm:$0xff] }
 0xbb5   :  { %4172 = vmatpush1.bf16.msra.mxu0 %v3809_v54  ;;  %v3780_v54 = vld [vmem:[#allocation4 + $0x2d8] sm:$0xff] }
 0xbb6   :  { %4199 = vmatpush1.bf16.msra.mxu1 %v3727_v42  ;;  %4173 = vmatprep.subr.bf16.mxu0 %v3822_v57  ;;  %v3732_v42 = vld [vmem:[#allocation4 + $0x158] sm:$0xff]  ;;  %v3779_v57 = vld [vmem:[#allocation4 + $0x2d0] sm:$0xff] }
 0xbb7   :  { %4200 = vmatprep.subr.bf16.mxu1 %v3740_v61  ;;  %v3729_v61 = vld [vmem:[#allocation4 + $0x140] sm:$0xff] }
 0xbb9   :  { %4174 = vmatpush1.bf16.msra.mxu0 %v3821_v23  ;;  %v3792_v23 = vld [vmem:[#allocation4 + $0x338] sm:$0xff] }
 0xbba   :  { %4201 = vmatpush1.bf16.msra.mxu1 %v3739_v25  ;;  %4233 = vmatprep.subr.bf16.mxu0 %v3694_v35  ;;  %v3742_v25 = vld [vmem:[#allocation4 + $0x1a8] sm:$0xff]  ;;  %v3791_v35 = vld [vmem:[#allocation4 + $0x330] sm:$0xff] }
 0xbbb   :  { %4202 = vmatprep.subr.bf16.mxu1 %v3752_v29  ;;  %v3744_v29 = vld [vmem:[#allocation4 + $0x1b8] sm:$0xff] }
 0xbbe   :  { %4203 = vmatpush1.bf16.msra.mxu1 %v3751_v48  ;;  %v3741_v48 = vld [vmem:[#allocation4 + $0x1a0] sm:$0xff] }
 0xbbf   :  { %4204 = vmatprep.subr.bf16.mxu1 %v3764_v14  ;;  %v3743_v14 = vld [vmem:[#allocation4 + $0x1b0] sm:$0xff] }
 0xbc2   :  { %4205 = vmatpush1.bf16.msra.mxu1 %v3763_v53  ;;  %v3754_v53 = vld [vmem:[#allocation4 + $0x208] sm:$0xff] }
 0xbc3   :  { %4206 = vmatprep.subr.bf16.mxu1 %v3776_v59  ;;  %v3756_v59 = vld [vmem:[#allocation4 + $0x218] sm:$0xff] }
 0xbc6   :  { %4207 = vmatpush1.bf16.msra.mxu1 %v3775_v33  ;;  %v3753_v33 = vld [vmem:[#allocation4 + $0x200] sm:$0xff] }
 0xbc7   :  { %4208 = vmatprep.subr.bf16.mxu1 %v3788_v47  ;;  %v3755_v47 = vld [vmem:[#allocation4 + $0x210] sm:$0xff] }
 0xbca   :  { %4209 = vmatpush1.bf16.msra.mxu1 %v3787_v46  ;;  %v3766_v46 = vld [vmem:[#allocation4 + $0x268] sm:$0xff] }
 0xbcb   :  { %4210 = vmatprep.subr.bf16.mxu1 %v3800_v18  ;;  %v3768_v18 = vld [vmem:[#allocation4 + $0x278] sm:$0xff] }
 0xbce   :  { %4211 = vmatpush1.bf16.msra.mxu1 %v3799_v30  ;;  %v3765_v30 = vld [vmem:[#allocation4 + $0x260] sm:$0xff] }
 0xbcf   :  { %4212 = vmatprep.subr.bf16.mxu1 %v3812_v16  ;;  %v3778_v16 = vld [vmem:[#allocation4 + $0x2c8] sm:$0xff] }
 0xbd2   :  { %4213 = vmatpush1.bf16.msra.mxu1 %v3811_v39  ;;  %v3777_v39 = vld [vmem:[#allocation4 + $0x2c0] sm:$0xff] }
 0xbd3   :  { %4214 = vmatprep.subr.bf16.mxu1 %v3824_v7  ;;  %v3790_v7 = vld [vmem:[#allocation4 + $0x328] sm:$0xff] }
 0xbd6   :  { %4215 = vmatpush1.bf16.msra.mxu1 %v3823_v56  ;;  %v3789_v56 = vld [vmem:[#allocation4 + $0x320] sm:$0xff] }
 0xbd7   :  { %4274 = vmatprep.subr.bf16.mxu1 %v3696_v13  ;;  %v3802_v13 = vld [vmem:[#allocation4 + $0x388] sm:$0xff] }
 0xc7c   :  { %v4075_v24 = vpop.f32.mrb[56].mxu1 }
 0xc7d   :  { %v4076_v26 = vadd.f32 %v4075_v24, %v4034_v49  ;;  %v4077_v11 = vpop.f32.mrb[57].mxu1  ;;  %v3801_v49 = vld [vmem:[#allocation4 + $0x380] sm:$0xff]  ;;  %v3814_v24 = vld [vmem:[#allocation4 + $0x3e8] sm:$0xff] }
 0xc7e   :  { %v4078_v5 = vadd.f32 %v4077_v11, %v4038_v51  ;;  %v4079_v12 = vpop.f32.mrb[58].mxu1  ;;  %v3803_v51 = vld [vmem:[#allocation4 + $0x390] sm:$0xff]  ;;  %v3813_v11 = vld [vmem:[#allocation4 + $0x3e0] sm:$0xff] }
 0xc7f   :  { %v4082_v36 = vmax.f32 %v4076_v26, 0.0  ;;  %v4080_v44 = vpop.f32.mrb[59].mxu1  ;;  %v3816_v26 = vld [vmem:[#allocation4 + $0x3f8] sm:$0xff]  ;;  %v3826_v12 = vld [vmem:[#allocation4 + $0x448] sm:$0xff] }
 0xc80   :  { %v4083_v37 = vmax.f32 %v4078_v5, 0.0  ;;  %v3815_v5 = vld [vmem:[#allocation4 + $0x3f0] sm:$0xff]  ;;  %v3825_v44 = vld [vmem:[#allocation4 + $0x440] sm:$0xff] }
 0xc81   :  { %v10312_v45 = vpack.c.bf16 %v4082_v36, %v4082_v36  ;;  %v3828_v36 = vld [vmem:[#allocation4 + $0x458] sm:$0xff] }
 0xc82   :  { %v10310_v43 = vpack.c.bf16 %v4083_v37, %v4083_v37  ;;  %v3827_v37 = vld [vmem:[#allocation4 + $0x450] sm:$0xff] }
 0xc84   :  { %6941 = vmatprep.mubr.msk.bf16.mxu0 %vm789_vm0, %v10310_v43  ;;  %6942 = vmatprep.mubr.msk.bf16.mxu1 %vm789_vm0, %v10310_v43 }
 0xc85   :  { %4184 = vmatmul.mubr.bf16.vlgmr.msra.gmra.mrb[60].mxu0 %v10312_v45  ;;  %4225 = vmatmul.mubr.bf16.vlgmr.msra.gmra.mrb[60].mxu1 %v10312_v45 }
 0xc86   :  { %4234 = vmatpush1.bf16.msra.mxu0 %v3693_v40  ;;  %4275 = vmatpush1.bf16.msra.mxu1 %v3695_v32  ;;  %v3698_v40 = vld [vmem:[#allocation4 + $0x48] sm:$0xff]  ;;  %v3700_v32 = vld [vmem:[#allocation4 + $0x58] sm:$0xff] }
 0xc87   :  { %6943 = vmatprep.mubr.msk.bf16.mxu0 %vm789_vm0, %v10310_v43  ;;  %6944 = vmatprep.mubr.msk.bf16.mxu1 %vm789_vm0, %v10310_v43 }
 0xc88   :  { %4235 = vmatprep.subr.bf16.mxu0 %v3706_v58  ;;  %4276 = vmatprep.subr.bf16.mxu1 %v3708_v28  ;;  %v3697_v58 = vld [vmem:[#allocation4 + $0x40] sm:$0xff]  ;;  %v3699_v28 = vld [vmem:[#allocation4 + $0x50] sm:$0xff] }
 0xc8a   :  { %4236 = vmatpush1.bf16.msra.mxu0 %v3705_v38  ;;  %4277 = vmatpush1.bf16.msra.mxu1 %v3707_v62  ;;  %v3710_v38 = vld [vmem:[#allocation4 + $0xa8] sm:$0xff]  ;;  %v3712_v62 = vld [vmem:[#allocation4 + $0xb8] sm:$0xff] }
 0xc8b   :  { %4237 = vmatprep.subr.bf16.mxu0 %v3718_v1  ;;  %4278 = vmatprep.subr.bf16.mxu1 %v3720_v0  ;;  %v3709_v1 = vld [vmem:[#allocation4 + $0xa0] sm:$0xff]  ;;  %v3711_v0 = vld [vmem:[#allocation4 + $0xb0] sm:$0xff] }
 0xc8e   :  { %4238 = vmatpush1.bf16.msra.mxu0 %v3717_v52  ;;  %4279 = vmatpush1.bf16.msra.mxu1 %v3719_v31  ;;  %v3722_v52 = vld [vmem:[#allocation4 + $0x108] sm:$0xff]  ;;  %v3724_v31 = vld [vmem:[#allocation4 + $0x118] sm:$0xff] }
 0xc8f   :  { %4239 = vmatprep.subr.bf16.mxu0 %v3730_v17  ;;  %4280 = vmatprep.subr.bf16.mxu1 %v3732_v42  ;;  %v3721_v17 = vld [vmem:[#allocation4 + $0x100] sm:$0xff]  ;;  %v3723_v42 = vld [vmem:[#allocation4 + $0x110] sm:$0xff] }
 0xc92   :  { %4240 = vmatpush1.bf16.msra.mxu0 %v3729_v61  ;;  %4281 = vmatpush1.bf16.msra.mxu1 %v3731_v10  ;;  %v3734_v61 = vld [vmem:[#allocation4 + $0x168] sm:$0xff]  ;;  %v3736_v10 = vld [vmem:[#allocation4 + $0x178] sm:$0xff] }
 0xc93   :  { %4241 = vmatprep.subr.bf16.mxu0 %v3742_v25  ;;  %4282 = vmatprep.subr.bf16.mxu1 %v3744_v29  ;;  %v3733_v25 = vld [vmem:[#allocation4 + $0x160] sm:$0xff]  ;;  %v3746_v29 = vld [vmem:[#allocation4 + $0x1c8] sm:$0xff] }
 0xc96   :  { %4242 = vmatpush1.bf16.msra.mxu0 %v3741_v48  ;;  %4283 = vmatpush1.bf16.msra.mxu1 %v3743_v14  ;;  %v3748_v48 = vld [vmem:[#allocation4 + $0x1d8] sm:$0xff]  ;;  %v3745_v14 = vld [vmem:[#allocation4 + $0x1c0] sm:$0xff] }
 0xc97   :  { %4243 = vmatprep.subr.bf16.mxu0 %v3754_v53  ;;  %4284 = vmatprep.subr.bf16.mxu1 %v3756_v59  ;;  %v3747_v53 = vld [vmem:[#allocation4 + $0x1d0] sm:$0xff]  ;;  %v3758_v59 = vld [vmem:[#allocation4 + $0x228] sm:$0xff] }
 0xc9a   :  { %4244 = vmatpush1.bf16.msra.mxu0 %v3753_v33  ;;  %4285 = vmatpush1.bf16.msra.mxu1 %v3755_v47  ;;  %v3760_v33 = vld [vmem:[#allocation4 + $0x238] sm:$0xff]  ;;  %v3757_v47 = vld [vmem:[#allocation4 + $0x220] sm:$0xff] }
 0xc9b   :  { %4245 = vmatprep.subr.bf16.mxu0 %v3766_v46  ;;  %4286 = vmatprep.subr.bf16.mxu1 %v3768_v18  ;;  %v3759_v46 = vld [vmem:[#allocation4 + $0x230] sm:$0xff]  ;;  %v3770_v18 = vld [vmem:[#allocation4 + $0x288] sm:$0xff] }
 0xc9e   :  { %4246 = vmatpush1.bf16.msra.mxu0 %v3765_v30  ;;  %4287 = vmatpush1.bf16.msra.mxu1 %v3767_v34  ;;  %v3772_v30 = vld [vmem:[#allocation4 + $0x298] sm:$0xff]  ;;  %v3769_v34 = vld [vmem:[#allocation4 + $0x280] sm:$0xff] }
 0xc9f   :  { %4247 = vmatprep.subr.bf16.mxu0 %v3778_v16  ;;  %4288 = vmatprep.subr.bf16.mxu1 %v3780_v54  ;;  %v3771_v16 = vld [vmem:[#allocation4 + $0x290] sm:$0xff]  ;;  %v3782_v54 = vld [vmem:[#allocation4 + $0x2e8] sm:$0xff] }
 0xca2   :  { %4248 = vmatpush1.bf16.msra.mxu0 %v3777_v39  ;;  %4289 = vmatpush1.bf16.msra.mxu1 %v3779_v57  ;;  %v3784_v39 = vld [vmem:[#allocation4 + $0x2f8] sm:$0xff]  ;;  %v3781_v57 = vld [vmem:[#allocation4 + $0x2e0] sm:$0xff] }
 0xca3   :  { %4249 = vmatprep.subr.bf16.mxu0 %v3790_v7  ;;  %4290 = vmatprep.subr.bf16.mxu1 %v3792_v23  ;;  %v3783_v7 = vld [vmem:[#allocation4 + $0x2f0] sm:$0xff]  ;;  %v3794_v23 = vld [vmem:[#allocation4 + $0x348] sm:$0xff] }
 0xca6   :  { %4250 = vmatpush1.bf16.msra.mxu0 %v3789_v56  ;;  %4291 = vmatpush1.bf16.msra.mxu1 %v3791_v35  ;;  %v3796_v56 = vld [vmem:[#allocation4 + $0x358] sm:$0xff]  ;;  %v3793_v35 = vld [vmem:[#allocation4 + $0x340] sm:$0xff] }
 0xca7   :  { %4251 = vmatprep.subr.bf16.mxu0 %v3802_v13  ;;  %4292 = vmatprep.subr.bf16.mxu1 %v3804_v50  ;;  %v3795_v13 = vld [vmem:[#allocation4 + $0x350] sm:$0xff]  ;;  %v3806_v50 = vld [vmem:[#allocation4 + $0x3a8] sm:$0xff] }
 0xcaa   :  { %4252 = vmatpush1.bf16.msra.mxu0 %v3801_v49  ;;  %4293 = vmatpush1.bf16.msra.mxu1 %v3803_v51  ;;  %v3808_v49 = vld [vmem:[#allocation4 + $0x3b8] sm:$0xff]  ;;  %v3805_v51 = vld [vmem:[#allocation4 + $0x3a0] sm:$0xff] }
 0xcab   :  { %4253 = vmatprep.subr.bf16.mxu0 %v3814_v24  ;;  %4294 = vmatprep.subr.bf16.mxu1 %v3816_v26  ;;  %v3807_v24 = vld [vmem:[#allocation4 + $0x3b0] sm:$0xff]  ;;  %v3818_v26 = vld [vmem:[#allocation4 + $0x408] sm:$0xff] }
 0xcae   :  { %4254 = vmatpush1.bf16.msra.mxu0 %v3813_v11  ;;  %4295 = vmatpush1.bf16.msra.mxu1 %v3815_v5  ;;  %v3820_v11 = vld [vmem:[#allocation4 + $0x418] sm:$0xff]  ;;  %v3817_v5 = vld [vmem:[#allocation4 + $0x400] sm:$0xff] }
 0xcaf   :  { %4255 = vmatprep.subr.bf16.mxu0 %v3826_v12  ;;  %4296 = vmatprep.subr.bf16.mxu1 %v3828_v36  ;;  %v3819_v12 = vld [vmem:[#allocation4 + $0x410] sm:$0xff]  ;;  %v3830_v36 = vld [vmem:[#allocation4 + $0x468] sm:$0xff] }
 0xcb2   :  { %4256 = vmatpush1.bf16.msra.mxu0 %v3825_v44  ;;  %4297 = vmatpush1.bf16.msra.mxu1 %v3827_v37  ;;  %v3832_v44 = vld [vmem:[#allocation4 + $0x478] sm:$0xff]  ;;  %v3829_v37 = vld [vmem:[#allocation4 + $0x460] sm:$0xff] }
 0xcb3   :  { %4315 = vmatprep.subr.bf16.mxu0 %v3698_v40  ;;  %4356 = vmatprep.subr.bf16.mxu1 %v3700_v32  ;;  %v3831_v40 = vld [vmem:[#allocation4 + $0x470] sm:$0xff] }
 0xcb5   :  { %4266 = vmatmul.mubr.bf16.vlgmr.msra.gmra.mrb[64].mxu0 %v10312_v45  ;;  %4307 = vmatmul.mubr.bf16.vlgmr.msra.gmra.mrb[64].mxu1 %v10312_v45 }
 0xcb6   :  { %4316 = vmatpush1.bf16.msra.mxu0 %v3697_v58  ;;  %6945 = vmatprep.mubr.msk.bf16.mxu0 %vm789_vm0, %v10310_v43 }
 0xcb7   :  { %4357 = vmatpush1.bf16.msra.mxu1 %v3699_v28  ;;  %6946 = vmatprep.mubr.msk.bf16.mxu1 %vm789_vm0, %v10310_v43  ;;  %v3735_v43 = vld [vmem:[#allocation4 + $0x170] sm:$0xff] }
 0xcb8   :  { %4317 = vmatprep.subr.bf16.mxu0 %v3710_v38  ;;  %4358 = vmatprep.subr.bf16.mxu1 %v3712_v62 }
 0xcba   :  { %4318 = vmatpush1.bf16.msra.mxu0 %v3709_v1 }
 0xcbb   :  { %4359 = vmatpush1.bf16.msra.mxu1 %v3711_v0  ;;  %4319 = vmatprep.subr.bf16.mxu0 %v3722_v52 }
 0xcbc   :  { %4360 = vmatprep.subr.bf16.mxu1 %v3724_v31 }
 0xcbe   :  { %4320 = vmatpush1.bf16.msra.mxu0 %v3721_v17 }
 0xcbf   :  { %4361 = vmatpush1.bf16.msra.mxu1 %v3723_v42  ;;  %4321 = vmatprep.subr.bf16.mxu0 %v3734_v61 }
 0xcc0   :  { %4362 = vmatprep.subr.bf16.mxu1 %v3736_v10 }
 0xcc2   :  { %4322 = vmatpush1.bf16.msra.mxu0 %v3733_v25 }
 0xcc3   :  { %4363 = vmatpush1.bf16.msra.mxu1 %v3735_v43  ;;  %4323 = vmatprep.subr.bf16.mxu0 %v3746_v29 }
 0xcc4   :  { %4364 = vmatprep.subr.bf16.mxu1 %v3748_v48  ;;  %v3833_v48 = vld [vmem:[#allocation23] sm:$0xff] }
 0xcc6   :  { %4324 = vmatpush1.bf16.msra.mxu0 %v3745_v14  ;;  %v4107_v14 = vrot.slane %v3833_v48, %v11289_v19 }
 0xcc7   :  { %4365 = vmatpush1.bf16.msra.mxu1 %v3747_v53  ;;  %4325 = vmatprep.subr.bf16.mxu0 %v3758_v59  ;;  %v4115_v53 = vrot.slane %v3833_v48, %v9995_v55  ;;  %v4111_v59 = vrot.slane %v3833_v48, %v11290_v27 }
 0xcc8   :  { %4366 = vmatprep.subr.bf16.mxu1 %v3760_v33  ;;  %v4099_v33 = vrot.slane %v3833_v48, %v11288_v15 }
 0xcca   :  { %4326 = vmatpush1.bf16.msra.mxu0 %v3757_v47  ;;  %v4095_v47 = vrot.slane %v3833_v48, %v11286_v4 }
 0xccb   :  { %4367 = vmatpush1.bf16.msra.mxu1 %v3759_v46  ;;  %4327 = vmatprep.subr.bf16.mxu0 %v3770_v18  ;;  %v4119_v46 = vrot.slane %v3833_v48, %v9998_v9  ;;  %v4103_v18 = vrot.slane %v3833_v48, %v11291_v8 }
 0xccc   :  { %4368 = vmatprep.subr.bf16.mxu1 %v3772_v30  ;;  %v3834_v30 = vld [vmem:[#allocation23 + $0x8] sm:$0xf] }
 0xcce   :  { %4328 = vmatpush1.bf16.msra.mxu0 %v3769_v34 }
 0xccf   :  { %4369 = vmatpush1.bf16.msra.mxu1 %v3771_v16  ;;  %4329 = vmatprep.subr.bf16.mxu0 %v3782_v54 }
 0xcd0   :  { %4370 = vmatprep.subr.bf16.mxu1 %v3784_v39 }
 0xcd2   :  { %4330 = vmatpush1.bf16.msra.mxu0 %v3781_v57 }
 0xcd3   :  { %4371 = vmatpush1.bf16.msra.mxu1 %v3783_v7  ;;  %4331 = vmatprep.subr.bf16.mxu0 %v3794_v23 }
 0xcd4   :  { %4372 = vmatprep.subr.bf16.mxu1 %v3796_v56  ;;  %v4123_v56 = vrot.slane %v3834_v30, %v11285_v22 }
 0xcd6   :  { %4332 = vmatpush1.bf16.msra.mxu0 %v3793_v35 }
 0xcd7   :  { %4373 = vmatpush1.bf16.msra.mxu1 %v3795_v13  ;;  %4333 = vmatprep.subr.bf16.mxu0 %v3806_v50  ;;  %v4131_v13 = vrot.slane %v3834_v30, %v11288_v15  ;;  %v4127_v50 = vrot.slane %v3834_v30, %v11286_v4 }
 0xcd8   :  { %4374 = vmatprep.subr.bf16.mxu1 %v3808_v49 }
 0xcda   :  { %4334 = vmatpush1.bf16.msra.mxu0 %v3805_v51  ;;  %v4135_v51 = vrot.slane %v3834_v30, %v11291_v8  ;;  %v3843_v30 = vld [vmem:[#allocation5 + $0x40] sm:$0xff] }
 0xcdb   :  { %4375 = vmatpush1.bf16.msra.mxu1 %v3807_v24  ;;  %4335 = vmatprep.subr.bf16.mxu0 %v3818_v26 }
 0xcdc   :  { %4376 = vmatprep.subr.bf16.mxu1 %v3820_v11 }
 0xcde   :  { %4336 = vmatpush1.bf16.msra.mxu0 %v3817_v5 }
 0xcdf   :  { %4377 = vmatpush1.bf16.msra.mxu1 %v3819_v12  ;;  %4337 = vmatprep.subr.bf16.mxu0 %v3830_v36 }
 0xce0   :  { %4378 = vmatprep.subr.bf16.mxu1 %v3832_v44 }
 0xce2   :  { %4338 = vmatpush1.bf16.msra.mxu0 %v3829_v37 }
 0xce3   :  { %4379 = vmatpush1.bf16.msra.mxu1 %v3831_v40  ;;  %7296 = vmatprep.subr.bf16.mxu0 %v3843_v30 }
 0xce5   :  { %4348 = vmatmul.mubr.bf16.vlgmr.msra.gmra.mrb[68].mxu0 %v10312_v45 }
 0xce6   :  { %4389 = vmatmul.mubr.bf16.vlgmr.msra.gmra.mrb[68].mxu1 %v10312_v45  ;;  %v4091_v45 = vrot.slane %v3833_v48, %v11285_v22 }
 0xd58   :  { %v4185_v32 = vpop.f32.mrb[60].mxu0  ;;  %v4226_v58 = vpop.f32.mrb[60].mxu1 }
 0xd59   :  { %v4187_v28 = vpop.f32.mrb[61].mxu0  ;;  %v4228_v38 = vpop.f32.mrb[61].mxu1  ;;  %v4186_v16 = vadd.f32 %v4185_v32, %v4091_v45  ;;  %v4227_v57 = vadd.f32 %v4226_v58, %v4099_v33 }
 0xd5a   :  { %v4189_v62 = vpop.f32.mrb[62].mxu0  ;;  %v4230_v1 = vpop.f32.mrb[62].mxu1  ;;  %v4188_v7 = vadd.f32 %v4187_v28, %v4095_v47  ;;  %v4229_v35 = vadd.f32 %v4228_v38, %v4103_v18 }
 0xd5b   :  { %v4190_v0 = vpop.f32.mrb[63].mxu0  ;;  %v4231_v52 = vpop.f32.mrb[63].mxu1  ;;  %v4397_v24 = vsel %vm2986_vm2, %v4186_v16, -inf  ;;  %v4399_v12 = vsel %vm2986_vm2, %v4227_v57, -inf }
 0xd5c   :  { %v4398_v36 = vsel %vm2986_vm2, %v4188_v7, -inf  ;;  %v4400_v58 = vsel %vm2986_vm2, %v4229_v35, -inf }
 0xd88   :  { %v4267_v31 = vpop.f32.mrb[64].mxu0  ;;  %v4308_v17 = vpop.f32.mrb[64].mxu1 }
 0xd89   :  { %v4269_v42 = vpop.f32.mrb[65].mxu0  ;;  %v4310_v61 = vpop.f32.mrb[65].mxu1  ;;  %v10340_v34 = vadd.f32 %v4267_v31, %v4107_v14  ;;  %v10342_v54 = vadd.f32 %v4308_v17, %v4115_v53 }
 0xd8a   :  { %v4271_v10 = vpop.f32.mrb[66].mxu0  ;;  %v4312_v25 = vpop.f32.mrb[66].mxu1  ;;  %v10344_v39 = vadd.f32 %v4269_v42, %v4111_v59  ;;  %v10346_v23 = vadd.f32 %v4310_v61, %v4119_v46 }
 0xd8b   :  { %v4272_v43 = vpop.f32.mrb[67].mxu0  ;;  %v4313_v29 = vpop.f32.mrb[67].mxu1  ;;  %v4401_v49 = vsel %vm2986_vm2, %v10340_v34, -inf  ;;  %v4405_v26 = vsel %vm2986_vm2, %v10342_v54, -inf }
 0xd8c   :  { %v4403_v11 = vsel %vm2986_vm2, %v10344_v39, -inf  ;;  %v4407_v44 = vsel %vm2986_vm2, %v10346_v23, -inf  ;;  %v4402_v28 = vmax.f32 %v4397_v24, %v4401_v49  ;;  %v4406_v52 = vmax.f32 %v4399_v12, %v4405_v26 }
 0xd8d   :  { %v4404_v31 = vmax.f32 %v4398_v36, %v4403_v11  ;;  %v4408_v25 = vmax.f32 %v4400_v58, %v4407_v44 }
 0xdb8   :  { %v4349_v5 = vpop.f32.mrb[68].mxu0 }
 0xdb9   :  { %v10363_v37 = vadd.f32 %v4349_v5, %v4123_v56  ;;  %v4390_v40 = vpop.f32.mrb[68].mxu1  ;;  %v4351_v32 = vpop.f32.mrb[69].mxu0  ;;  %v3859_v56 = vld [vmem:[#allocation5 + $0xc0] sm:$0xff] }
 0xdba   :  { %v10366_v38 = vadd.f32 %v4390_v40, %v4131_v13  ;;  %v4352_v62 = vadd.f32 %v4351_v32, %v4127_v50  ;;  %v4392_v1 = vpop.f32.mrb[69].mxu1  ;;  %v4353_v0 = vpop.f32.mrb[70].mxu0  ;;  %v3835_v13 = vld [vmem:[#allocation5] sm:$0xff]  ;;  %7318 = vmatprep.subr.bf16.mxu1 %v3859_v56 }
 0xdbb   :  { %v4409_v17 = vsel %vm2986_vm2, %v10363_v37, -inf  ;;  %v10370_v42 = vadd.f32 %v4392_v1, %v4135_v51  ;;  %v4394_v61 = vpop.f32.mrb[70].mxu1  ;;  %v4354_v10 = vpop.f32.mrb[71].mxu0  ;;  %v3851_v50 = vld [vmem:[#allocation5 + $0x80] sm:$0xff]  ;;  %7297 = vmatpush3.bf16.msra.mxu0 %v3835_v13 }
 0xdbc   :  { %v4410_v43 = vmax.f32 %v4402_v28, %v4409_v17  ;;  %v4413_v29 = vsel %vm2986_vm2, %v10366_v38, -inf  ;;  %v4411_v48 = vsel %vm2986_vm2, %v4352_v62, -inf  ;;  %v4395_v14 = vpop.f32.mrb[71].mxu1  ;;  %7319 = vmatpush3.bf16.msra.mxu1 %v3851_v50 }
 0xdbd   :  { %v4414_v45 = vmax.f32 %v4406_v52, %v4413_v29  ;;  %v4412_v53 = vmax.f32 %v4404_v31, %v4411_v48  ;;  %v4415_v59 = vsel %vm2986_vm2, %v10370_v42, -inf }
 0xdbe   :  { %v4416_v33 = vmax.f32 %v4408_v25, %v4415_v59 }
 0xdbf   :  { %v4417_v47 = vmax.f32 %v4410_v43, %v4412_v53 }
 0xdc0   :  { %v4418_v46 = vmax.f32 %v4414_v45, %v4416_v33 }
 0xdc2   :  { %v4419_v18 = vmax.f32 %v4417_v47, %v4418_v46 }
 0xdc4   :  { %4420 = vmax.xlane.f32.xlu0 %v4419_v18 }
 0xe51   :  { %v4421_v49 = vpop.xlane.xlu0 %4420 }
 0xe52   :  { %v4422_v51 = vsub.f32 %v4186_v16, %v4421_v49  ;;  %v4423_v24 = vsub.f32 %v4188_v7, %v4421_v49  ;;  %v4424_v26 = vsub.f32 %v4227_v57, %v4421_v49  ;;  %v4425_v11 = vsub.f32 %v4229_v35, %v4421_v49 }
 0xe53   :  { %v4426_v5 = vsub.f32 %v10340_v34, %v4421_v49  ;;  %v4427_v40 = vsub.f32 %v10344_v39, %v4421_v49  ;;  %v4428_v58 = vsub.f32 %v10342_v54, %v4421_v49  ;;  %v4429_v1 = vsub.f32 %v10346_v23, %v4421_v49 }
 0xe54   :  { %v4434_v12 = vmul.f32 1.442695, %v4422_v51  ;;  %v4436_v36 = vmul.f32 1.442695, %v4423_v24  ;;  %v4438_v44 = vmul.f32 1.442695, %v4424_v26  ;;  %v4430_v57 = vsub.f32 %v10363_v37, %v4421_v49 }
 0xe55   :  { %v4440_v32 = vmul.f32 1.442695, %v4425_v11  ;;  %v4442_v28 = vmul.f32 1.442695, %v4426_v5  ;;  %v4444_v16 = vmul.f32 1.442695, %v4427_v40  ;;  %v4431_v7 = vsub.f32 %v4352_v62, %v4421_v49 }
 0xe56   :  { %8021 = vpow2.f32 %v4434_v12  ;;  %v4446_v34 = vmul.f32 1.442695, %v4428_v58  ;;  %v4448_v35 = vmul.f32 1.442695, %v4429_v1  ;;  %v4432_v39 = vsub.f32 %v10366_v38, %v4421_v49  ;;  %v3860_v1 = vld [vmem:[#allocation5 + $0xc8] sm:$0xff] }
 0xe57   :  { %8023 = vpow2.f32 %v4436_v36  ;;  %v4450_v0 = vmul.f32 1.442695, %v4430_v57  ;;  %v4433_v31 = vsub.f32 %v10370_v42, %v4421_v49  ;;  %v4452_v23 = vmul.f32 1.442695, %v4431_v7  ;;  %7320 = vmatprep.subr.bf16.mxu1 %v3860_v1  ;;  %v3852_v57 = vld [vmem:[#allocation5 + $0x88] sm:$0xff]  ;;  %v3861_v7 = vld [vmem:[#allocation5 + $0xd0] sm:$0xff] }
 0xe58   :  { %8025 = vpow2.f32 %v4438_v44  ;;  %v4454_v38 = vmul.f32 1.442695, %v4432_v39  ;;  %7321 = vmatpush3.bf16.msra.mxu1 %v3852_v57  ;;  %v3853_v39 = vld [vmem:[#allocation5 + $0x90] sm:$0xff] }
 0xe59   :  { %8027 = vpow2.f32 %v4440_v32  ;;  %v4456_v42 = vmul.f32 1.442695, %v4433_v31  ;;  %7322 = vmatprep.subr.bf16.mxu1 %v3861_v7  ;;  %v3862_v31 = vld [vmem:[#allocation5 + $0xd8] sm:$0xff] }
 0xe5a   :  { %8029 = vpow2.f32 %v4442_v28  ;;  %v3844_v28 = vld [vmem:[#allocation5 + $0x48] sm:$0xff] }
 0xe5b   :  { %8031 = vpow2.f32 %v4444_v16  ;;  %v3836_v16 = vld [vmem:[#allocation5 + $0x8] sm:$0xff]  ;;  %7298 = vmatprep.subr.bf16.mxu0 %v3844_v28 }
 0xe5c   :  { %8033 = vpow2.f32 %v4446_v34  ;;  %v3845_v34 = vld [vmem:[#allocation5 + $0x50] sm:$0xff]  ;;  %7299 = vmatpush3.bf16.msra.mxu0 %v3836_v16  ;;  %7323 = vmatpush3.bf16.msra.mxu1 %v3853_v39 }
 0xe5d   :  { %8035 = vpow2.f32 %v4448_v35  ;;  %7300 = vmatprep.subr.bf16.mxu0 %v3845_v34  ;;  %v3837_v35 = vld [vmem:[#allocation5 + $0x10] sm:$0xff]  ;;  %7324 = vmatprep.subr.bf16.mxu1 %v3862_v31  ;;  %v3687_v31 = vld [vmem:[#allocation21] sm:$0xff] }
 0xe5e   :  { %8037 = vpow2.f32 %v4450_v0  ;;  %v3846_v0 = vld [vmem:[#allocation5 + $0x58] sm:$0xff] }
 0xe5f   :  { %8039 = vpow2.f32 %v4452_v23  ;;  %v3838_v23 = vld [vmem:[#allocation5 + $0x18] sm:$0xff] }
 0xe60   :  { %v10383_v52 = vpop.eup %8021  ;;  %8041 = vpow2.f32 %v4454_v38  ;;  %7301 = vmatpush3.bf16.msra.mxu0 %v3837_v35  ;;  %v3863_v38 = vld [vmem:[#allocation5 + $0xe0] sm:$0xff] }
 0xe61   :  { %v10385_v54 = vpop.eup %8023  ;;  %v4458_v37 = vsel %vm2986_vm2, %v10383_v52, 0.0  ;;  %8043 = vpow2.f32 %v4456_v42  ;;  %7302 = vmatprep.subr.bf16.mxu0 %v3846_v0  ;;  %v3848_v42 = vld [vmem:[#allocation5 + $0x68] sm:$0xff] }
 0xe62   :  { %v10390_v17 = vpop.eup %8025  ;;  %v4459_v62 = vsel %vm2986_vm2, %v10385_v54, 0.0 }
 0xe63   :  { %v10394_v61 = vpop.eup %8027  ;;  %v4460_v10 = vadd.f32 %v4459_v62, %v4458_v37  ;;  %v4461_v25 = vsel %vm2986_vm2, %v10390_v17, 0.0  ;;  %v3854_v37 = vld [vmem:[#allocation5 + $0x98] sm:$0xff]  ;;  %v3847_v62 = vld [vmem:[#allocation5 + $0x60] sm:$0xff] }
 0xe64   :  { %v10398_v43 = vpop.eup %8029  ;;  %v4463_v48 = vsel %vm2986_vm2, %v10394_v61, 0.0  ;;  %7303 = vmatpush3.bf16.msra.mxu0 %v3838_v23  ;;  %7325 = vmatpush3.bf16.msra.mxu1 %v3854_v37 }
 0xe65   :  { %v4462_v29 = vadd.f32 %v4461_v25, %v4460_v10  ;;  %v10402_v14 = vpop.eup %8031  ;;  %v4465_v53 = vsel %vm2986_vm2, %v10398_v43, 0.0  ;;  %7304 = vmatprep.subr.bf16.mxu0 %v3847_v62  ;;  %7326 = vmatprep.subr.bf16.mxu1 %v3863_v38  ;;  %v3839_v10 = vld [vmem:[#allocation5 + $0x20] sm:$0xff] }
 0xe66   :  { %v10406_v59 = vpop.eup %8033  ;;  %v4467_v47 = vsel %vm2986_vm2, %v10402_v14, 0.0  ;;  %v3855_v25 = vld [vmem:[#allocation5 + $0xa0] sm:$0xff] }
 0xe67   :  { %v4464_v45 = vadd.f32 %v4463_v48, %v4462_v29  ;;  %v10410_v46 = vpop.eup %8035  ;;  %v4469_v30 = vsel %vm2986_vm2, %v10406_v59, 0.0  ;;  %v3864_v29 = vld [vmem:[#allocation5 + $0xe8] sm:$0xff] }
 0xe68   :  { %v10414_v56 = vpop.eup %8037  ;;  %v4471_v50 = vsel %vm2986_vm2, %v10410_v46, 0.0  ;;  %7305 = vmatpush3.bf16.msra.mxu0 %v3839_v10  ;;  %7327 = vmatpush3.bf16.msra.mxu1 %v3855_v25  ;;  %v3840_v48 = vld [vmem:[#allocation5 + $0x28] sm:$0xff] }
 0xe69   :  { %v4466_v33 = vadd.f32 %v4465_v53, %v4464_v45  ;;  %v10418_v49 = vpop.eup %8039  ;;  %v4473_v24 = vsel %vm2986_vm2, %v10414_v56, 0.0  ;;  %7306 = vmatprep.subr.bf16.mxu0 %v3848_v42  ;;  %7328 = vmatprep.subr.bf16.mxu1 %v3864_v29  ;;  %v3856_v45 = vld [vmem:[#allocation5 + $0xa8] sm:$0xff]  ;;  %v3849_v53 = vld [vmem:[#allocation5 + $0x70] sm:$0xff] }
 0xe6a   :  { %v10422_v26 = vpop.eup %8041  ;;  %v4475_v5 = vsel %vm2986_vm2, %v10418_v49, 0.0 }
 0xe6b   :  { %v4468_v18 = vadd.f32 %v4467_v47, %v4466_v33  ;;  %v10426_v12 = vpop.eup %8043  ;;  %v4477_v44 = vsel %vm2986_vm2, %v10422_v26, 0.0  ;;  %v3865_v33 = vld [vmem:[#allocation5 + $0xf0] sm:$0xff] }
 0xe6c   :  { %v4479_v32 = vsel %vm2986_vm2, %v10426_v12, 0.0  ;;  %7307 = vmatpush3.bf16.msra.mxu0 %v3840_v48  ;;  %7329 = vmatpush3.bf16.msra.mxu1 %v3856_v45  ;;  %v3841_v47 = vld [vmem:[#allocation5 + $0x30] sm:$0xff] }
 0xe6d   :  { %v4470_v13 = vadd.f32 %v4469_v30, %v4468_v18  ;;  %7308 = vmatprep.subr.bf16.mxu0 %v3849_v53  ;;  %7330 = vmatprep.subr.bf16.mxu1 %v3865_v33  ;;  %v3857_v18 = vld [vmem:[#allocation5 + $0xb0] sm:$0xff]  ;;  %v3850_v30 = vld [vmem:[#allocation5 + $0x78] sm:$0xff]  ;;  %v3867_v33 = vld [vmem:[#allocation5 + $0x100] sm:$0xff] }
 0xe6f   :  { %v4472_v51 = vadd.f32 %v4471_v50, %v4470_v13  ;;  %v3866_v13 = vld [vmem:[#allocation5 + $0xf8] sm:$0xff] }
 0xe70   :  { %7309 = vmatpush3.bf16.msra.mxu0 %v3841_v47  ;;  %7331 = vmatpush3.bf16.msra.mxu1 %v3857_v18  ;;  %v3842_v50 = vld [vmem:[#allocation5 + $0x38] sm:$0xff]  ;;  %v3883_v47 = vld [vmem:[#allocation5 + $0x180] sm:$0xff] }
 0xe71   :  { %v4474_v11 = vadd.f32 %v4473_v24, %v4472_v51  ;;  %7310 = vmatprep.subr.bf16.mxu0 %v3850_v30  ;;  %7332 = vmatprep.subr.bf16.mxu1 %v3866_v13  ;;  %v3858_v51 = vld [vmem:[#allocation5 + $0xb8] sm:$0xff]  ;;  %v3875_v24 = vld [vmem:[#allocation5 + $0x140] sm:$0xff]  ;;  %v3876_v13 = vld [vmem:[#allocation5 + $0x148] sm:$0xff] }
 0xe73   :  { %v4476_v36 = vadd.f32 %v4475_v5, %v4474_v11  ;;  %v3891_v11 = vld [vmem:[#allocation5 + $0x1c0] sm:$0xff] }
 0xe74   :  { %7311 = vmatpush3.bf16.msra.mxu0 %v3842_v50  ;;  %7333 = vmatpush3.bf16.msra.mxu1 %v3858_v51  ;;  %v3892_v50 = vld [vmem:[#allocation5 + $0x1c8] sm:$0xff] }
 0xe75   :  { %v4478_v40 = vadd.f32 %v4477_v44, %v4476_v36  ;;  %7340 = vmatprep.subr.bf16.mxu0 %v3875_v24  ;;  %7362 = vmatprep.subr.bf16.mxu1 %v3891_v11  ;;  %v3877_v24 = vld [vmem:[#allocation5 + $0x150] sm:$0xff] }
 0xe76   :  { %v3893_v11 = vld [vmem:[#allocation5 + $0x1d0] sm:$0xff] }
 0xe77   :  { %v4480_v58 = vadd.f32 %v4479_v32, %v4478_v40 }
 0xe79   :  { %4481 = vadd.xlane.f32.xlu0 %v4480_v58 }
 0xf06   :  { %v4482_v5 = vpop.xlane.xlu0 %4481 }
 0xf07   :  { %8045 = vrcp.f32 %v4482_v5 }
 0xf11   :  { %v8046_v36 = vpop.eup %8045 }
 0xf12   :  { %v4484_v44 = vmul.f32 %v8046_v36, %v10383_v52  ;;  %v4485_v40 = vmul.f32 %v8046_v36, %v10385_v54  ;;  %v4486_v32 = vmul.f32 %v8046_v36, %v10390_v17  ;;  %v4487_v58 = vmul.f32 %v8046_v36, %v10394_v61 }
 0xf13   :  { %v4488_v28 = vmul.f32 %v8046_v36, %v10398_v43  ;;  %v4489_v1 = vmul.f32 %v8046_v36, %v10402_v14  ;;  %v4490_v16 = vmul.f32 %v8046_v36, %v10406_v59  ;;  %v4491_v57 = vmul.f32 %v8046_v36, %v10410_v46 }
 0xf14   :  { %v4508_v34 = vcombine.low %v4484_v44, %v4485_v40  ;;  %v4509_v7 = vcombine.low %v4486_v32, %v4487_v58  ;;  %v4492_v51 = vmul.f32 %v8046_v36, %v10414_v56  ;;  %v4493_v5 = vmul.f32 %v8046_v36, %v10418_v49  ;;  %v3869_v32 = vld [vmem:[#allocation5 + $0x110] sm:$0xff]  ;;  %v3886_v49 = vld [vmem:[#allocation5 + $0x198] sm:$0xff] }
 0xf15   :  { %v4510_v35 = vcombine.low %v4488_v28, %v4489_v1  ;;  %v4511_v39 = vcombine.low %v4490_v16, %v4491_v57  ;;  %v4494_v44 = vmul.f32 %v8046_v36, %v10422_v26  ;;  %v4495_v40 = vmul.f32 %v8046_v36, %v10426_v12  ;;  %v3885_v58 = vld [vmem:[#allocation5 + $0x190] sm:$0xff]  ;;  %v3878_v28 = vld [vmem:[#allocation5 + $0x158] sm:$0xff]  ;;  %v3895_v26 = vld [vmem:[#allocation5 + $0x1e0] sm:$0xff] }
 0xf16   :  { %v4518_v52 = vrot.slane %v4508_v34, %v10179_v6  ;;  %v4525_v54 = vrot.slane %v4509_v7, %v10179_v6  ;;  %v3894_v1 = vld [vmem:[#allocation5 + $0x1d8] sm:$0xff]  ;;  %v4557_v16 = vcombine.low %v4492_v51, %v4493_v5  ;;  %v3879_v34 = vld [vmem:[#allocation5 + $0x160] sm:$0xff]  ;;  %v3925_v51 = vld [vmem:[#allocation5 + $0x2d0] sm:$0xff] }
 0xf17   :  { %v4532_v17 = vrot.slane %v4510_v35, %v10179_v6  ;;  %v4539_v61 = vrot.slane %v4511_v39, %v10179_v6  ;;  %v4558_v56 = vcombine.low %v4494_v44, %v4495_v40  ;;  %v3870_v57 = vld [vmem:[#allocation5 + $0x118] sm:$0xff]  ;;  %v3871_v7 = vld [vmem:[#allocation5 + $0x120] sm:$0xff]  ;;  %v3880_v39 = vld [vmem:[#allocation5 + $0x168] sm:$0xff] }
 0xf18   :  { %v4540_v0 = vcombine.low %v4518_v52, %v4525_v54  ;;  %v4565_v12 = vrot.slane %v4557_v16, %v10179_v6  ;;  %v3887_v35 = vld [vmem:[#allocation5 + $0x1a0] sm:$0xff]  ;;  %v3896_v52 = vld [vmem:[#allocation5 + $0x1e8] sm:$0xff]  ;;  %v3910_v5 = vld [vmem:[#allocation5 + $0x258] sm:$0xff] }
 0xf19   :  { %v4541_v43 = vcombine.low %v4532_v17, %v4539_v61  ;;  %v4572_v36 = vrot.slane %v4558_v56, %v10179_v6  ;;  %v3872_v17 = vld [vmem:[#allocation5 + $0x128] sm:$0xff]  ;;  %v3926_v44 = vld [vmem:[#allocation5 + $0x2d8] sm:$0xff]  ;;  %v3919_v16 = vld [vmem:[#allocation5 + $0x2a0] sm:$0xff] }
 0xf1a   :  { %v4548_v14 = vrot.slane %v4540_v0, %v10179_v6  ;;  %v3888_v61 = vld [vmem:[#allocation5 + $0x1a8] sm:$0xff]  ;;  %v3881_v0 = vld [vmem:[#allocation5 + $0x170] sm:$0xff]  ;;  %v3902_v40 = vld [vmem:[#allocation5 + $0x218] sm:$0xff] }
 0xf1b   :  { %v4555_v59 = vrot.slane %v4541_v43, %v10179_v6  ;;  %v4573_v54 = vcombine.low %v4565_v12, %v4572_v36  ;;  %v3897_v43 = vld [vmem:[#allocation5 + $0x1f0] sm:$0xff]  ;;  %v3912_v56 = vld [vmem:[#allocation5 + $0x268] sm:$0xff] }
 0xf1c   :  { %v3929_v12 = vld [vmem:[#allocation5 + $0x2f0] sm:$0xff] }
 0xf1d   :  { %v4556_v46 = vcombine.low %v4548_v14, %v4555_v59  ;;  %v4580_v14 = vrot.slane %v4573_v54, %v10179_v6  ;;  %v3688_v59 = vld [vmem:[#allocation21 + $0x8] sm:$0xf]  ;;  %v3905_v36 = vld [vmem:[#allocation5 + $0x230] sm:$0xff] }
 0xf1f   :  { %v10446_v23 = vmul.f32 %v4556_v46, %v3687_v31  ;;  %v3873_v31 = vld [vmem:[#allocation5 + $0x130] sm:$0xff] }
 0xf20   :  { %v3889_v46 = vld [vmem:[#allocation5 + $0x1b0] sm:$0xff] }
 0xf21   :  { %v4594_v37 = vrot.slane %v10446_v23, %v11286_v4  ;;  %v4602_v62 = vrot.slane %v10446_v23, %v11291_v8  ;;  %v4590_v38 = vrot.slane %v10446_v23, %v11285_v22  ;;  %v4598_v10 = vrot.slane %v10446_v23, %v11288_v15 }
 0xf22   :  { %v4610_v25 = vrot.slane %v10446_v23, %v11290_v27  ;;  %v4618_v42 = vrot.slane %v10446_v23, %v9998_v9  ;;  %v3868_v27 = vld [vmem:[#allocation5 + $0x108] sm:$0xff] }
 0xf23   :  { %v4648_v29 = vpack.c.bf16 %v4594_v37, %v4594_v37  ;;  %v4650_v48 = vpack.c.bf16 %v4602_v62, %v4602_v62  ;;  %v4647_v45 = vpack.c.bf16 %v4590_v38, %v4590_v38  ;;  %v4649_v53 = vpack.c.bf16 %v4598_v10, %v4598_v10  ;;  %v3884_v9 = vld [vmem:[#allocation5 + $0x188] sm:$0xff]  ;;  %v3882_v37 = vld [vmem:[#allocation5 + $0x178] sm:$0xff] }
 0xf24   :  { %v4652_v18 = vpack.c.bf16 %v4610_v25, %v4610_v25  ;;  %v4654_v30 = vpack.c.bf16 %v4618_v42, %v4618_v42  ;;  %v3898_v62 = vld [vmem:[#allocation5 + $0x1f8] sm:$0xff]  ;;  %v10467_v38 = vmul.f32 %v4580_v14, %v3688_v59  ;;  %v4606_v42 = vrot.slane %v10446_v23, %v11289_v19  ;;  %v3915_v19 = vld [vmem:[#allocation5 + $0x280] sm:$0xff] }
 0xf25   :  { %4691 = vmatprep.mubr.bf16.mxu0 %v4648_v29  ;;  %4731 = vmatprep.mubr.bf16.mxu1 %v4650_v48  ;;  %v3874_v10 = vld [vmem:[#allocation5 + $0x138] sm:$0xff]  ;;  %v4614_v29 = vrot.slane %v10446_v23, %v9995_v55  ;;  %v3907_v48 = vld [vmem:[#allocation5 + $0x240] sm:$0xff]  ;;  %v3908_v23 = vld [vmem:[#allocation5 + $0x248] sm:$0xff] }
 0xf26   :  { %4692 = vmatmul.mubr.bf16.vlgmr.msra.gmra.mrb[72].mxu0 %v4647_v45  ;;  %4732 = vmatmul.mubr.bf16.vlgmr.msra.gmra.mrb[72].mxu1 %v4649_v53  ;;  %v3890_v25 = vld [vmem:[#allocation5 + $0x1b8] sm:$0xff]  ;;  %v3923_v45 = vld [vmem:[#allocation5 + $0x2c0] sm:$0xff]  ;;  %v4626_v53 = vrot.slane %v10467_v38, %v11286_v4  ;;  %v4622_v54 = vrot.slane %v10467_v38, %v11285_v22 }
 0xf27   :  { %7341 = vmatpush3.bf16.msra.mxu0 %v3867_v33  ;;  %7363 = vmatpush3.bf16.msra.mxu1 %v3883_v47  ;;  %v4634_v33 = vrot.slane %v10467_v38, %v11291_v8  ;;  %v4651_v47 = vpack.c.bf16 %v4606_v42, %v4606_v42  ;;  %v3916_v8 = vld [vmem:[#allocation5 + $0x288] sm:$0xff]  ;;  %v7922_v59 = vld [vmem:[%s11284_s28 + $0x114] ss:$8 sps:$4 sm:$0xff]  }
 0xf28   :  { %4771 = vmatprep.mubr.bf16.mxu0 %v4652_v18  ;;  %4811 = vmatprep.mubr.bf16.mxu1 %v4654_v30  ;;  %v4653_v18 = vpack.c.bf16 %v4614_v29, %v4614_v29  ;;  %v3899_v30 = vld [vmem:[#allocation5 + $0x200] sm:$0xff]  ;;  %v4655_v14 = vpack.c.bf16 %v4622_v54, %v4622_v54  ;;  %v7934_v42 = vld [vmem:[%s11284_s28 + $0x154] ss:$8 sps:$4 sm:$0xff]   ;;  %v7932_v29 = vld [vmem:[%s11284_s28 + $0x150] ss:$8 sps:$4 sm:$0xff]  }
 0xf29   :  { %7342 = vmatprep.subr.bf16.mxu0 %v3876_v13  ;;  %7364 = vmatprep.subr.bf16.mxu1 %v3892_v50  ;;  %v4656_v13 = vpack.c.bf16 %v4626_v53, %v4626_v53  ;;  %v4658_v55 = vpack.c.bf16 %v4634_v33, %v4634_v33  ;;  %v3924_v50 = vld [vmem:[#allocation5 + $0x2c8] sm:$0xff]  ;;  %v7940_v53 = vld [vmem:[%s11284_s28 + $0x174] ss:$8 sps:$4 sm:$0xff]   ;;  %v7938_v33 = vld [vmem:[%s11284_s28 + $0x170] ss:$8 sps:$4 sm:$0xff]  }
 0xf2b   :  { %7343 = vmatpush3.bf16.msra.mxu0 %v3868_v27  ;;  %7365 = vmatpush3.bf16.msra.mxu1 %v3884_v9  ;;  %v3900_v27 = vld [vmem:[#allocation5 + $0x208] sm:$0xff]  ;;  %v3909_v9 = vld [vmem:[#allocation5 + $0x250] sm:$0xff] }
 0xf2c   :  { %7344 = vmatprep.subr.bf16.mxu0 %v3877_v24  ;;  %7366 = vmatprep.subr.bf16.mxu1 %v3893_v11  ;;  %v3901_v24 = vld [vmem:[#allocation5 + $0x210] sm:$0xff] }
 0xf2d   :  { %v3917_v11 = vld [vmem:[#allocation5 + $0x290] sm:$0xff] }
 0xf2f   :  { %7345 = vmatpush3.bf16.msra.mxu0 %v3869_v32  ;;  %7367 = vmatpush3.bf16.msra.mxu1 %v3885_v58  ;;  %v3918_v32 = vld [vmem:[#allocation5 + $0x298] sm:$0xff]  ;;  %v3911_v58 = vld [vmem:[#allocation5 + $0x260] sm:$0xff] }
 0xf30   :  { %7346 = vmatprep.subr.bf16.mxu0 %v3878_v28  ;;  %7368 = vmatprep.subr.bf16.mxu1 %v3894_v1  ;;  %v3927_v28 = vld [vmem:[#allocation5 + $0x2e0] sm:$0xff] }
 0xf31   :  { %v3903_v1 = vld [vmem:[#allocation5 + $0x220] sm:$0xff] }
 0xf33   :  { %7347 = vmatpush3.bf16.msra.mxu0 %v3870_v57  ;;  %7369 = vmatpush3.bf16.msra.mxu1 %v3886_v49  ;;  %v3928_v57 = vld [vmem:[#allocation5 + $0x2e8] sm:$0xff] }
 0xf34   :  { %7348 = vmatprep.subr.bf16.mxu0 %v3879_v34  ;;  %7370 = vmatprep.subr.bf16.mxu1 %v3895_v26  ;;  %v3904_v49 = vld [vmem:[#allocation5 + $0x228] sm:$0xff]  ;;  %v3913_v26 = vld [vmem:[#allocation5 + $0x270] sm:$0xff] }
 0xf35   :  { %v3920_v34 = vld [vmem:[#allocation5 + $0x2a8] sm:$0xff] }
 0xf37   :  { %7349 = vmatpush3.bf16.msra.mxu0 %v3871_v7  ;;  %7371 = vmatpush3.bf16.msra.mxu1 %v3887_v35  ;;  %v3921_v7 = vld [vmem:[#allocation5 + $0x2b0] sm:$0xff]  ;;  %v3914_v35 = vld [vmem:[#allocation5 + $0x278] sm:$0xff] }
 0xf38   :  { %7350 = vmatprep.subr.bf16.mxu0 %v3880_v39  ;;  %7372 = vmatprep.subr.bf16.mxu1 %v3896_v52  ;;  %v3930_v39 = vld [vmem:[#allocation5 + $0x2f8] sm:$0xff] }
 0xf39   :  { %v3906_v52 = vld [vmem:[#allocation5 + $0x238] sm:$0xff] }
 0xf3b   :  { %7351 = vmatpush3.bf16.msra.mxu0 %v3872_v17  ;;  %7373 = vmatpush3.bf16.msra.mxu1 %v3888_v61  ;;  %v7919_v17 = vld [vmem:[%s11284_s28 + $0x104] ss:$8 sps:$4 sm:$0xff]   ;;  %v3922_v61 = vld [vmem:[#allocation5 + $0x2b8] sm:$0xff] }
 0xf3c   :  { %7352 = vmatprep.subr.bf16.mxu0 %v3881_v0  ;;  %7374 = vmatprep.subr.bf16.mxu1 %v3897_v43  ;;  %v4630_v0 = vrot.slane %v10467_v38, %v11288_v15  ;;  %v7917_v43 = vld [vmem:[%s11284_s28 + $0x100] ss:$8 sps:$4 sm:$0xff]   ;;  %v7920_v15 = vld [vmem:[%s11284_s28 + $0x110] ss:$8 sps:$4 sm:$0xff]  }
 0xf3d   :  { %v7926_v38 = vld [vmem:[%s11284_s28 + $0x130] ss:$8 sps:$4 sm:$0xff]  }
 0xf3f   :  { %7353 = vmatpush3.bf16.msra.mxu0 %v3873_v31  ;;  %7375 = vmatpush3.bf16.msra.mxu1 %v3889_v46  ;;  %v4657_v31 = vpack.c.bf16 %v4630_v0, %v4630_v0  ;;  %v7925_v46 = vld [vmem:[%s11284_s28 + $0x124] ss:$8 sps:$4 sm:$0xff]  }
 0xf40   :  { %7354 = vmatprep.subr.bf16.mxu0 %v3882_v37  ;;  %7376 = vmatprep.subr.bf16.mxu1 %v3898_v62  ;;  %v7923_v37 = vld [vmem:[%s11284_s28 + $0x120] ss:$8 sps:$4 sm:$0xff]   ;;  %v7928_v62 = vld [vmem:[%s11284_s28 + $0x134] ss:$8 sps:$4 sm:$0xff]  }
 0xf43   :  { %7355 = vmatpush3.bf16.msra.mxu0 %v3874_v10  ;;  %7377 = vmatpush3.bf16.msra.mxu1 %v3890_v25  ;;  %v7931_v10 = vld [vmem:[%s11284_s28 + $0x144] ss:$8 sps:$4 sm:$0xff]   ;;  %v7929_v25 = vld [vmem:[%s11284_s28 + $0x140] ss:$8 sps:$4 sm:$0xff]  }
 0xf44   :  { %7384 = vmatprep.subr.bf16.mxu0 %v3907_v48  ;;  %7406 = vmatprep.subr.bf16.mxu1 %v3923_v45  ;;  %v7937_v48 = vld [vmem:[%s11284_s28 + $0x164] ss:$8 sps:$4 sm:$0xff]   ;;  %v7935_v45 = vld [vmem:[%s11284_s28 + $0x160] ss:$8 sps:$4 sm:$0xff]  }
 0xf46   :  { %4772 = vmatmul.mubr.bf16.vlgmr.msra.gmra.mrb[76].mxu0 %v4651_v47  ;;  %4812 = vmatmul.mubr.bf16.vlgmr.msra.gmra.mrb[76].mxu1 %v4653_v18  ;;  %v7941_v47 = vld [vmem:[#allocation24] ss:$8 sps:$4 sm:$0xff]   ;;  %v7943_v18 = vld [vmem:[#allocation24 + $0x4] ss:$8 sps:$4 sm:$0xff]  }
 0xf47   :  { %7385 = vmatpush3.bf16.msra.mxu0 %v3899_v30  ;;  %4851 = vmatprep.mubr.bf16.mxu0 %v4656_v13  ;;  %v7946_v30 = vld [vmem:[#allocation24 + $0x14] ss:$8 sps:$4 sm:$0xff]   ;;  %v7944_v13 = vld [vmem:[#allocation24 + $0x10] ss:$8 sps:$4 sm:$0xff]  }
 0xf48   :  { %7407 = vmatpush3.bf16.msra.mxu1 %v3915_v19  ;;  %4891 = vmatprep.mubr.bf16.mxu1 %v4658_v55  ;;  %v7947_v19 = vld [vmem:[#allocation24 + $0x20] ss:$8 sps:$4 sm:$0xff]   ;;  %v7949_v55 = vld [vmem:[#allocation24 + $0x24] ss:$8 sps:$4 sm:$0xff]  }
 0xf49   :  { %7386 = vmatprep.subr.bf16.mxu0 %v3908_v23  ;;  %7408 = vmatprep.subr.bf16.mxu1 %v3924_v50  ;;  %v7952_v23 = vld [vmem:[#allocation24 + $0x34] ss:$8 sps:$4 sm:$0xff]   ;;  %v7950_v50 = vld [vmem:[#allocation24 + $0x30] ss:$8 sps:$4 sm:$0xff]  }
 0xf4b   :  { %7387 = vmatpush3.bf16.msra.mxu0 %v3900_v27  ;;  %v7955_v27 = vld [vmem:[#allocation24 + $0x44] ss:$8 sps:$4 sm:$0xff]  }
 0xf4c   :  { %7409 = vmatpush3.bf16.msra.mxu1 %v3916_v8  ;;  %7388 = vmatprep.subr.bf16.mxu0 %v3909_v9  ;;  %v7953_v8 = vld [vmem:[#allocation24 + $0x40] ss:$8 sps:$4 sm:$0xff]   ;;  %v7958_v9 = vld [vmem:[#allocation24 + $0x54] ss:$8 sps:$4 sm:$0xff]  }
 0xf4d   :  { %7410 = vmatprep.subr.bf16.mxu1 %v3925_v51  ;;  %v7956_v51 = vld [vmem:[#allocation24 + $0x50] ss:$8 sps:$4 sm:$0xff]  }
 0xf4f   :  { %7389 = vmatpush3.bf16.msra.mxu0 %v3901_v24  ;;  %v7961_v24 = vld [vmem:[#allocation24 + $0x64] ss:$8 sps:$4 sm:$0xff]  }
 0xf50   :  { %7411 = vmatpush3.bf16.msra.mxu1 %v3917_v11  ;;  %7390 = vmatprep.subr.bf16.mxu0 %v3910_v5  ;;  %v7959_v11 = vld [vmem:[#allocation24 + $0x60] ss:$8 sps:$4 sm:$0xff]   ;;  %v7964_v5 = vld [vmem:[#allocation24 + $0x74] ss:$8 sps:$4 sm:$0xff]  }
 0xf51   :  { %7412 = vmatprep.subr.bf16.mxu1 %v3926_v44  ;;  %v7962_v44 = vld [vmem:[#allocation24 + $0x70] ss:$8 sps:$4 sm:$0xff]  }
 0xf53   :  { %7391 = vmatpush3.bf16.msra.mxu0 %v3902_v40  ;;  %v7967_v40 = vld [vmem:[#allocation24 + $0x84] ss:$8 sps:$4 sm:$0xff]  }
 0xf54   :  { %7413 = vmatpush3.bf16.msra.mxu1 %v3918_v32  ;;  %7392 = vmatprep.subr.bf16.mxu0 %v3911_v58  ;;  %v7965_v32 = vld [vmem:[#allocation24 + $0x80] ss:$8 sps:$4 sm:$0xff]   ;;  %v7970_v58 = vld [vmem:[#allocation24 + $0x94] ss:$8 sps:$4 sm:$0xff]  }
 0xf55   :  { %7414 = vmatprep.subr.bf16.mxu1 %v3927_v28  ;;  %v7968_v28 = vld [vmem:[#allocation24 + $0x90] ss:$8 sps:$4 sm:$0xff]  }
 0xf57   :  { %7393 = vmatpush3.bf16.msra.mxu0 %v3903_v1  ;;  %v7971_v1 = vld [vmem:[#allocation24 + $0xa0] ss:$8 sps:$4 sm:$0xff]  }
 0xf58   :  { %7415 = vmatpush3.bf16.msra.mxu1 %v3919_v16  ;;  %7394 = vmatprep.subr.bf16.mxu0 %v3912_v56  ;;  %v7973_v16 = vld [vmem:[#allocation24 + $0xa4] ss:$8 sps:$4 sm:$0xff]   ;;  %v7976_v56 = vld [vmem:[#allocation24 + $0xb4] ss:$8 sps:$4 sm:$0xff]  }
 0xf59   :  { %7416 = vmatprep.subr.bf16.mxu1 %v3928_v57  ;;  %v7974_v57 = vld [vmem:[#allocation24 + $0xb0] ss:$8 sps:$4 sm:$0xff]  }
 0xf5b   :  { %7395 = vmatpush3.bf16.msra.mxu0 %v3904_v49 }
 0xf5c   :  { %7417 = vmatpush3.bf16.msra.mxu1 %v3920_v34  ;;  %7396 = vmatprep.subr.bf16.mxu0 %v3913_v26 }
 0xf5d   :  { %7418 = vmatprep.subr.bf16.mxu1 %v3929_v12 }
 0xf5f   :  { %7397 = vmatpush3.bf16.msra.mxu0 %v3905_v36 }
 0xf60   :  { %7419 = vmatpush3.bf16.msra.mxu1 %v3921_v7  ;;  %7398 = vmatprep.subr.bf16.mxu0 %v3914_v35 }
 0xf61   :  { %7420 = vmatprep.subr.bf16.mxu1 %v3930_v39 }
 0xf63   :  { %7399 = vmatpush3.bf16.msra.mxu0 %v3906_v52 }
 0xf64   :  { %7421 = vmatpush3.bf16.msra.mxu1 %v3922_v61  ;;  %5087 = vmatprep.subr.bf16.mxu0 %v7919_v17 }
 0xf65   :  { %5266 = vmatprep.subr.bf16.mxu1 %v7943_v18 }
 0xf66   :  { %4852 = vmatmul.mubr.bf16.vlgmr.msra.gmra.mrb[80].mxu0 %v4655_v14 }
 0xf67   :  { %4892 = vmatmul.mubr.bf16.vlgmr.msra.gmra.mrb[80].mxu1 %v4657_v31  ;;  %5088 = vmatpush1.bf16.msra.mxu0 %v7917_v43 }
 0xf68   :  { %5089 = vmatprep.subr.bf16.mxu0 %v7922_v59  ;;  %5119 = vmatprep.mubr.bf16.mxu0 %v11283_v2 }
 0xf69   :  { %5267 = vmatpush1.bf16.msra.mxu1 %v7941_v47 }
 0xf6a   :  { %5268 = vmatprep.subr.bf16.mxu1 %v7946_v30 }
 0xf6b   :  { %5090 = vmatpush1.bf16.msra.mxu0 %v7920_v15 }
 0xf6c   :  { %5091 = vmatprep.subr.bf16.mxu0 %v7925_v46 }
 0xf6d   :  { %5269 = vmatpush1.bf16.msra.mxu1 %v7944_v13 }
 0xf6e   :  { %5270 = vmatprep.subr.bf16.mxu1 %v7949_v55 }
 0xf6f   :  { %5092 = vmatpush1.bf16.msra.mxu0 %v7923_v37 }
 0xf70   :  { %5093 = vmatprep.subr.bf16.mxu0 %v7928_v62 }
 0xf71   :  { %5271 = vmatpush1.bf16.msra.mxu1 %v7947_v19 }
 0xf72   :  { %5272 = vmatprep.subr.bf16.mxu1 %v7952_v23 }
 0xf73   :  { %5094 = vmatpush1.bf16.msra.mxu0 %v7926_v38 }
 0xf74   :  { %5095 = vmatprep.subr.bf16.mxu0 %v7931_v10 }
 0xf75   :  { %5273 = vmatpush1.bf16.msra.mxu1 %v7950_v50 }
 0xf76   :  { %5274 = vmatprep.subr.bf16.mxu1 %v7955_v27 }
 0xf77   :  { %5096 = vmatpush1.bf16.msra.mxu0 %v7929_v25 }
 0xf78   :  { %5097 = vmatprep.subr.bf16.mxu0 %v7934_v42 }
 0xf79   :  { %5275 = vmatpush1.bf16.msra.mxu1 %v7953_v8  ;;  %v4995_v8 = vld [vmem:[#allocation17 + $0x4] sm:$0x3] }
 0xf7a   :  { %5276 = vmatprep.subr.bf16.mxu1 %v7958_v9  ;;  %v5080_v9 = vrot.slane %v4995_v8, %v11285_v22 }
 0xf7b   :  { %5098 = vmatpush1.bf16.msra.mxu0 %v7932_v29 }
 0xf7c   :  { %5099 = vmatprep.subr.bf16.mxu0 %v7937_v48 }
 0xf7d   :  { %5277 = vmatpush1.bf16.msra.mxu1 %v7956_v51  ;;  %v5084_v51 = vrot.slane %v4995_v8, %v11286_v4 }
 0xf7e   :  { %5278 = vmatprep.subr.bf16.mxu1 %v7961_v24 }
 0xf7f   :  { %5100 = vmatpush1.bf16.msra.mxu0 %v7935_v45 }
 0xf80   :  { %5101 = vmatprep.subr.bf16.mxu0 %v7940_v53 }
 0xf81   :  { %5279 = vmatpush1.bf16.msra.mxu1 %v7959_v11 }
 0xf82   :  { %5280 = vmatprep.subr.bf16.mxu1 %v7964_v5 }
 0xf83   :  { %5102 = vmatpush1.bf16.msra.mxu0 %v7938_v33 }
 0xf85   :  { %5281 = vmatpush1.bf16.msra.mxu1 %v7962_v44 }
 0xf86   :  { %5120 = vmatmul.mubr.bf16.vlgmr.msra.gmra.mrb[84].mxu0 %v9961_v21  ;;  %5282 = vmatprep.subr.bf16.mxu1 %v7967_v40 }
 0xf89   :  { %5283 = vmatpush1.bf16.msra.mxu1 %v7965_v32 }
 0xf8a   :  { %5284 = vmatprep.subr.bf16.mxu1 %v7970_v58 }
 0xf8d   :  { %5285 = vmatpush1.bf16.msra.mxu1 %v7968_v28 }
 0xf8e   :  { %5286 = vmatprep.subr.bf16.mxu1 %v7973_v16 }
 0xf91   :  { %5287 = vmatpush1.bf16.msra.mxu1 %v7971_v1 }
 0xf92   :  { %5288 = vmatprep.subr.bf16.mxu1 %v7976_v56  ;;  %v4944_v56 = vld [vmem:[%s10978_s14] sm:$0x3] }
 0xf95   :  { %5289 = vmatpush1.bf16.msra.mxu1 %v7974_v57  ;;  %v5256_v57 = vrot.slane %v4944_v56, %v11285_v22 }
 0xff9   :  { %v7312_v49 = vpop.f32.mrb[72].mxu0  ;;  %v7334_v34 = vpop.f32.mrb[72].mxu1 }
 0xffa   :  { %v7313_v26 = vpop.f32.mrb[73].mxu0  ;;  %v7335_v12 = vpop.f32.mrb[73].mxu1 }
 0xffb   :  { %v7314_v36 = vadd.f32 %v7313_v26, %v7312_v49  ;;  %v7336_v7 = vadd.f32 %v7335_v12, %v7334_v34  ;;  %v7315_v35 = vpop.f32.mrb[74].mxu0  ;;  %v7337_v39 = vpop.f32.mrb[74].mxu1  ;;  %v5260_v49 = vrot.slane %v4944_v56, %v11286_v4  ;;  %v7995_v56 = vld [vmem:[%s10979_s15 + $0x48] sm:$0xff]  }
 0xffc   :  { %v7316_v52 = vpop.f32.mrb[75].mxu0  ;;  %v7338_v54 = vpop.f32.mrb[75].mxu1 }
 0xffd   :  { %v4734_v17 = vadd.f32 %v7336_v7, %v7314_v36 }
0x1019   :  { %v7356_v61 = vpop.f32.mrb[76].mxu0  ;;  %v7378_v0 = vpop.f32.mrb[76].mxu1 }
0x101a   :  { %v7357_v43 = vpop.f32.mrb[77].mxu0  ;;  %v7379_v14 = vpop.f32.mrb[77].mxu1 }
0x101b   :  { %v7358_v59 = vadd.f32 %v7357_v43, %v7356_v61  ;;  %v7380_v31 = vadd.f32 %v7379_v14, %v7378_v0  ;;  %v7359_v15 = vpop.f32.mrb[78].mxu0  ;;  %v7381_v46 = vpop.f32.mrb[78].mxu1  ;;  %v7979_v61 = vld [vmem:[%s10976_s12 + $0x48] sm:$0xff]  }
0x101c   :  { %v7360_v37 = vpop.f32.mrb[79].mxu0  ;;  %v7382_v62 = vpop.f32.mrb[79].mxu1  ;;  %v7980_v0 = vld [vmem:[%s10976_s12 + $0x8] sm:$0xff]  }
0x101d   :  { %v4774_v38 = vadd.f32 %v7358_v59, %v4734_v17  ;;  %v7978_v17 = vld [vmem:[%s10976_s12] sm:$0xff]  }
0x101f   :  { %v4814_v10 = vadd.f32 %v7380_v31, %v4774_v38 }
0x1039   :  { %v7400_v25 = vpop.f32.mrb[80].mxu0 }
0x103a   :  { %v7422_v42 = vpop.f32.mrb[80].mxu1  ;;  %v7401_v29 = vpop.f32.mrb[81].mxu0 }
0x103b   :  { %v7402_v48 = vadd.f32 %v7401_v29, %v7400_v25  ;;  %v7423_v45 = vpop.f32.mrb[81].mxu1  ;;  %v7403_v53 = vpop.f32.mrb[82].mxu0  ;;  %v7981_v25 = vld [vmem:[%s10976_s12 + $0x50] sm:$0xff]   ;;  %v7983_v29 = vld [vmem:[%s10976_s12 + $0x58] sm:$0xff]  }
0x103c   :  { %v7424_v33 = vadd.f32 %v7423_v45, %v7422_v42  ;;  %v7425_v47 = vpop.f32.mrb[82].mxu1  ;;  %v7404_v18 = vpop.f32.mrb[83].mxu0  ;;  %v7982_v42 = vld [vmem:[%s10976_s12 + $0x10] sm:$0xff]   ;;  %v7985_v45 = vld [vmem:[%s10976_s12 + $0x60] sm:$0xff]  }
0x103d   :  { %v4854_v30 = vadd.f32 %v7402_v48, %v4814_v10  ;;  %v7426_v13 = vpop.f32.mrb[83].mxu1  ;;  %v7984_v48 = vld [vmem:[%s10976_s12 + $0x18] sm:$0xff]   ;;  %v7986_v53 = vld [vmem:[%s10976_s12 + $0x20] sm:$0xff]   ;;  %v7988_v47 = vld [vmem:[%s10976_s12 + $0x28] sm:$0xff]  }
0x103e   :  { %v7989_v18 = vld [vmem:[%s10976_s12 + $0x70] sm:$0xff]   ;;  %v7991_v13 = vld [vmem:[%s10976_s12 + $0x78] sm:$0xff]  }
0x103f   :  { %v4894_v19 = vadd.f32 %v7424_v33, %v4854_v30  ;;  %v7987_v33 = vld [vmem:[%s10976_s12 + $0x68] sm:$0xff]   ;;  %v7990_v30 = vld [vmem:[%s10976_s12 + $0x30] sm:$0xff]  }
0x1041   :  { %v4903_v55 = vmul.f32 %v4894_v19, %v4894_v19  ;;  %v4899_v50 = vmul.f32 %v4894_v19, %v10246_v60  ;;  %v7992_v19 = vld [vmem:[%s10976_s12 + $0x38] sm:$0xff]  }
0x1043   :  { %v4904_v23 = vsel %vm2986_vm2, %v4903_v55, 0.0  ;;  %v4900_v27 = vsel %vm2986_vm2, %v4899_v50, 0.0  ;;  %v7993_v55 = vld [vmem:[%s10979_s15 + $0x40] sm:$0xff]  }
0x1044   :  { %4905 = vadd.xlane.f32.xlu0 %v4904_v23 }
0x1048   :  { %4901 = vadd.xlane.f32.xlu0 %v4900_v27 }
0x1059   :  { %v5121_v24 = vpop.f32.mrb[84].mxu0 }
0x105a   :  { %v5122_v11 = vadd.f32 %v5121_v24, %v5080_v9  ;;  %v5123_v5 = vpop.f32.mrb[85].mxu0  ;;  %v4919_v24 = vld [vmem:[%s11292_s8] sm:$0x3] }
0x105b   :  { %v5124_v44 = vadd.f32 %v5123_v5, %v5084_v51  ;;  %v5125_v40 = vpop.f32.mrb[86].mxu0 }
0x105c   :  { %v5128_v32 = vmax.f32 %v5122_v11, 0.0  ;;  %v5126_v58 = vpop.f32.mrb[87].mxu0 }
0x105d   :  { %v5129_v28 = vmax.f32 %v5124_v44, 0.0  ;;  %v5519_v44 = vpack.c.bf16 %v9901_v41, %v9901_v41  ;;  %v7996_v41 = vld [vmem:[%s10979_s15 + $0x8] sm:$0xff]  }
0x105e   :  { %v5130_v16 = vpack.c.bf16 %v5128_v32, %v5128_v32 }
0x105f   :  { %v5131_v1 = vpack.c.bf16 %v5129_v28, %v5129_v28 }
0x1061   :  { %7003 = vmatprep.mubr.msk.bf16.mxu1 %vm789_vm0, %v5131_v1  ;;  %v7994_v1 = vld [vmem:[%s10979_s15] sm:$0xff]  }
0x1062   :  { %5299 = vmatmul.mubr.bf16.vlgmr.msra.gmra.mrb[84].mxu1 %v5130_v16  ;;  %v5554_v16 = vrot.slane %v5519_v44, 1 }
0x1063   :  { %5789 = vmatprep.mubr.bf16.mxu1 %v11283_v2  ;;  %v7977_v2 = vld [vmem:[%s10976_s12 + $0x40] sm:$0xff]  }
0x1064   :  { %7428 = vmatprep.subr.bf16.mxu0 %v7977_v2  ;;  %v8008_v2 = vld [vmem:[%s10979_s15 + $0x38] sm:$0xff]  }
0x1065   :  { %7429 = vmatpush3.bf16.msra.mxu0 %v7978_v17  ;;  %v8009_v17 = vld [vmem:[#allocation26] ss:$8 sps:$4 sm:$0xff]  }
0x1066   :  { %7430 = vmatprep.subr.bf16.mxu0 %v7979_v61  ;;  %v8011_v61 = vld [vmem:[#allocation26 + $0x4] ss:$8 sps:$4 sm:$0xff]  }
0x1067   :  { %5757 = vmatprep.subr.bf16.mxu1 %v8011_v61 }
0x1068   :  { %5758 = vmatpush1.bf16.msra.mxu1 %v8009_v17 }
0x1069   :  { %7431 = vmatpush3.bf16.msra.mxu0 %v7980_v0  ;;  %v8014_v0 = vld [vmem:[#allocation26 + $0x14] ss:$8 sps:$4 sm:$0xff]  }
0x106a   :  { %7432 = vmatprep.subr.bf16.mxu0 %v7981_v25  ;;  %5759 = vmatprep.subr.bf16.mxu1 %v8014_v0 }
0x106d   :  { %7433 = vmatpush3.bf16.msra.mxu0 %v7982_v42 }
0x106e   :  { %7434 = vmatprep.subr.bf16.mxu0 %v7983_v29 }
0x1071   :  { %7435 = vmatpush3.bf16.msra.mxu0 %v7984_v48 }
0x1072   :  { %7436 = vmatprep.subr.bf16.mxu0 %v7985_v45  ;;  %v5552_v45 = vld [vmem:[%s10980_s16] sm:$0x1] }
0x1075   :  { %7437 = vmatpush3.bf16.msra.mxu0 %v7986_v53 }
0x1076   :  { %7438 = vmatprep.subr.bf16.mxu0 %v7987_v33 }
0x1079   :  { %7439 = vmatpush3.bf16.msra.mxu0 %v7988_v47 }
0x107a   :  { %7440 = vmatprep.subr.bf16.mxu0 %v7989_v18 }
0x107d   :  { %7441 = vmatpush3.bf16.msra.mxu0 %v7990_v30 }
0x107e   :  { %7442 = vmatprep.subr.bf16.mxu0 %v7991_v13 }
0x1081   :  { %7443 = vmatpush3.bf16.msra.mxu0 %v7992_v19 }
0x1082   :  { %7450 = vmatprep.subr.bf16.mxu0 %v7993_v55 }
0x10d1   :  { %v4906_v55 = vpop.xlane.xlu0 %4905 }
0x1135   :  { %v5300_v34 = vpop.f32.mrb[84].mxu1 }
0x1136   :  { %v5301_v26 = vadd.f32 %v5300_v34, %v5256_v57  ;;  %v5302_v12 = vpop.f32.mrb[85].mxu1  ;;  %v7997_v57 = vld [vmem:[%s10979_s15 + $0x50] sm:$0xff]   ;;  %v7999_v34 = vld [vmem:[%s10979_s15 + $0x58] sm:$0xff]  }
0x1137   :  { %v5303_v36 = vadd.f32 %v5302_v12, %v5260_v49  ;;  %v5304_v7 = vpop.f32.mrb[86].mxu1  ;;  %v7998_v49 = vld [vmem:[%s10979_s15 + $0x10] sm:$0xff]   ;;  %v8001_v12 = vld [vmem:[%s10979_s15 + $0x60] sm:$0xff]  }
0x1138   :  { %v5305_v35 = vpop.f32.mrb[87].mxu1  ;;  %v5307_v39 = vsel %vm2986_vm2, %v5301_v26, -inf  ;;  %v8003_v7 = vld [vmem:[%s10979_s15 + $0x68] sm:$0xff]  }
0x1139   :  { %v5308_v52 = vsel %vm2986_vm2, %v5303_v36, -inf  ;;  %v8004_v35 = vld [vmem:[%s10979_s15 + $0x28] sm:$0xff]  }
0x113a   :  { %v5309_v54 = vmax.f32 %v5307_v39, %v5308_v52  ;;  %v8005_v39 = vld [vmem:[%s10979_s15 + $0x70] sm:$0xff]  }
0x113b   :  { %v8006_v52 = vld [vmem:[%s10979_s15 + $0x30] sm:$0xff]  }
0x113c   :  { %5310 = vmax.xlane.f32.xlu1 %v5309_v54  ;;  %v8007_v54 = vld [vmem:[%s10979_s15 + $0x78] sm:$0xff]  }
0x11c9   :  { %v5311_v43 = vpop.xlane.xlu1 %5310 }
0x11ca   :  { %v5312_v14 = vsub.f32 %v5301_v26, %v5311_v43  ;;  %v5313_v59 = vsub.f32 %v5303_v36, %v5311_v43  ;;  %v8000_v26 = vld [vmem:[%s10979_s15 + $0x18] sm:$0xff]   ;;  %v8002_v36 = vld [vmem:[%s10979_s15 + $0x20] sm:$0xff]  }
0x11cb   :  { %v8012_v43 = vld [vmem:[#allocation26 + $0x10] ss:$8 sps:$4 sm:$0xff]  }
0x11cc   :  { %v5314_v31 = vmul.f32 1.442695, %v5312_v14  ;;  %v5316_v15 = vmul.f32 1.442695, %v5313_v59  ;;  %5760 = vmatpush1.bf16.msra.mxu1 %v8012_v43  ;;  %v8017_v14 = vld [vmem:[#allocation26 + $0x24] ss:$8 sps:$4 sm:$0xff]  }
0x11cd   :  { %v8015_v59 = vld [vmem:[#allocation26 + $0x20] ss:$8 sps:$4 sm:$0xff]   ;;  %5761 = vmatprep.subr.bf16.mxu1 %v8017_v14 }
0x11ce   :  { %8047 = vpow2.f32 %v5314_v31  ;;  %v8020_v31 = vld [vmem:[#allocation26 + $0x34] ss:$8 sps:$4 sm:$0xff]  }
0x11cf   :  { %8049 = vpow2.f32 %v5316_v15  ;;  %v8018_v15 = vld [vmem:[#allocation26 + $0x30] ss:$8 sps:$4 sm:$0xff]  }
0x11d0   :  { %5762 = vmatpush1.bf16.msra.mxu1 %v8015_v59  ;;  %v11293_v59 = vlaneseq }
0x11d1   :  { %5763 = vmatprep.subr.bf16.mxu1 %v8020_v31 }
0x11d2   :  { %vm5818_vm10 = vcmp.lt.s32.totalorder %v11293_v59, 256 }
0x11d4   :  { %5764 = vmatpush1.bf16.msra.mxu1 %v8018_v15 }
0x11d8   :  { %v8048_v46 = vpop.eup %8047 }
0x11d9   :  { %v8050_v37 = vpop.eup %8049  ;;  %v5318_v62 = vsel %vm2986_vm2, %v8048_v46, 0.0 }
0x11da   :  { %v5319_v38 = vsel %vm2986_vm2, %v8050_v37, 0.0 }
0x11db   :  { %v5320_v10 = vadd.f32 %v5319_v38, %v5318_v62 }
0x11dd   :  { %5321 = vadd.xlane.f32.xlu1 %v5320_v10 }
0x126a   :  { %v5322_v23 = vpop.xlane.xlu1 %5321 }
0x126b   :  { %8051 = vrcp.f32 %v5322_v23 }
0x1275   :  { %v8052_v50 = vpop.eup %8051 }
0x1276   :  { %v5324_v27 = vmul.f32 %v8052_v50, %v8048_v46  ;;  %v5325_v8 = vmul.f32 %v8052_v50, %v8050_v37 }
0x1278   :  { %v5328_v9 = vcombine.low %v5324_v27, %v5325_v8 }
0x127a   :  { %v5335_v51 = vrot.slane %v5328_v9, %v10179_v6 }
0x127c   :  { %v5342_v11 = vrot.slane %v5335_v51, %v10179_v6 }
0x127e   :  { %v5344_v5 = vmul.f32 %v5342_v11, %v4919_v24 }
0x1280   :  { %v5353_v40 = vrot.slane %v5344_v5, %v11286_v4  ;;  %v5349_v32 = vrot.slane %v5344_v5, %v11285_v22 }
0x1282   :  { %v5357_v58 = vpack.c.bf16 %v5353_v40, %v5353_v40  ;;  %v5356_v28 = vpack.c.bf16 %v5349_v32, %v5349_v32 }
0x1284   :  { %5486 = vmatprep.mubr.bf16.mxu0 %v5357_v58 }
0x1285   :  { %5487 = vmatmul.mubr.bf16.vlgmr.msra.gmra.mrb[88].mxu0 %v5356_v28 }
0x1286   :  { %7451 = vmatpush3.bf16.msra.mxu0 %v7994_v1  ;;  %5684 = vmatprep.mubr.bf16.mxu0 %v5554_v16  ;;  %v4902_v16 = vpop.xlane.xlu0 %4901 }
0x1287   :  { %7452 = vmatprep.subr.bf16.mxu0 %v7995_v56 }
0x128a   :  { %7453 = vmatpush3.bf16.msra.mxu0 %v7996_v41 }
0x128b   :  { %7454 = vmatprep.subr.bf16.mxu0 %v7997_v57 }
0x128e   :  { %7455 = vmatpush3.bf16.msra.mxu0 %v7998_v49 }
0x128f   :  { %7456 = vmatprep.subr.bf16.mxu0 %v7999_v34 }
0x1292   :  { %7457 = vmatpush3.bf16.msra.mxu0 %v8000_v26 }
0x1293   :  { %7458 = vmatprep.subr.bf16.mxu0 %v8001_v12 }
0x1296   :  { %7459 = vmatpush3.bf16.msra.mxu0 %v8002_v36 }
0x1297   :  { %7460 = vmatprep.subr.bf16.mxu0 %v8003_v7  ;;  %v5702_v7 = vld [vmem:[%s10982_s18] sm:$0x3] }
0x129a   :  { %7461 = vmatpush3.bf16.msra.mxu0 %v8004_v35  ;;  %v5747_v35 = vrot.slane %v5702_v7, %v11285_v22 }
0x129b   :  { %7462 = vmatprep.subr.bf16.mxu0 %v8005_v39  ;;  %v5751_v39 = vrot.slane %v5702_v7, %v11286_v4 }
0x129e   :  { %7463 = vmatpush3.bf16.msra.mxu0 %v8006_v52 }
0x129f   :  { %7464 = vmatprep.subr.bf16.mxu0 %v8007_v54 }
0x12a2   :  { %7465 = vmatpush3.bf16.msra.mxu0 %v8008_v2 }
0x12a5   :  { %5685 = vmatmul.mubr.bf16.vlgmr.msra.gmra.mrb[92].mxu0 %v9961_v21 }
0x1358   :  { %v7444_v46 = vpop.f32.mrb[88].mxu0 }
0x1359   :  { %v7445_v37 = vpop.f32.mrb[89].mxu0 }
0x135a   :  { %v7446_v62 = vadd.f32 %v7445_v37, %v7444_v46  ;;  %v7447_v21 = vpop.f32.mrb[90].mxu0 }
0x135b   :  { %v7448_v38 = vpop.f32.mrb[91].mxu0 }
0x135c   :  { %v5498_v10 = vmul.f32 %v7446_v62, %v7446_v62  ;;  %v5494_v42 = vmul.f32 %v7446_v62, %v10246_v60  ;;  %v4907_v60 = vmul.f32 %v4906_v55, %v10252_v3 }
0x135e   :  { %v5499_v25 = vsel %vm2986_vm2, %v5498_v10, 0.0  ;;  %v5495_v29 = vsel %vm2986_vm2, %v5494_v42, 0.0  ;;  %8053 = vrsqrt.f32 %v4907_v60  ;;  %vm4910_vm5 = vcmp.eq.f32.partialorder %v4907_v60, inf }
0x135f   :  { %5500 = vadd.xlane.f32.xlu1 %v5499_v25  ;;  %v4913_v51 = vand.u32 2147483648, %v4907_v60  ;;  %vm4912_vm6 = vcmp.eq.f32.partialorder %v4907_v60, 0.0 }
0x1363   :  { %5496 = vadd.xlane.f32.xlu1 %v5495_v29 }
0x1368   :  { %v8054_v23 = vpop.eup %8053 }
0x1369   :  { %v4909_v50 = vmul.f32 %v8054_v23, %v4907_v60 }
0x136b   :  { %v4911_v9 = vsel %vm4910_vm5, %v4907_v60, %v4909_v50 }
0x136c   :  { %v4914_v24 = vsel %vm4912_vm6, %v4913_v51, %v4911_v9 }
0x136d   :  { %v4915_v11 = vmax.f32 %v4914_v24, 1e-08 }
0x1378   :  { %v7466_v48 = vpop.f32.mrb[92].mxu0 }
0x1379   :  { %v7467_v53 = vpop.f32.mrb[93].mxu0 }
0x137a   :  { %v7468_v33 = vadd.f32 %v7467_v53, %v7466_v48  ;;  %v7469_v47 = vpop.f32.mrb[94].mxu0 }
0x137b   :  { %v7470_v18 = vpop.f32.mrb[95].mxu0 }
0x137c   :  { %v5687_v30 = vadd.f32 %v7468_v33, %v5552_v45 }
0x137e   :  { %v5692_v13 = vmax.f32 %v5687_v30, 0.0 }
0x1380   :  { %v5693_v19 = vpack.c.bf16 %v5692_v13, %v5692_v13 }
0x1382   :  { %7044 = vmatmul.mubr.msk.bf16.vlgmr.msra.gmra.mrb[88].mxu1 %vm789_vm0, %v5693_v19 }
0x13ec   :  { %v5501_v27 = vpop.xlane.xlu1 %5500 }
0x13ed   :  { %v5502_v8 = vmul.f32 %v5501_v27, %v10252_v3 }
0x13ef   :  { %8055 = vrsqrt.f32 %v5502_v8  ;;  %vm5505_vm7 = vcmp.eq.f32.partialorder %v5502_v8, inf  ;;  %v5508_v40 = vand.u32 2147483648, %v5502_v8  ;;  %vm5507_vm8 = vcmp.eq.f32.partialorder %v5502_v8, 0.0 }
0x13f0   :  { %8057 = vrcp.f32 %v4915_v11  ;;  %v5497_v57 = vpop.xlane.xlu1 %5496 }
0x13f9   :  { %v8056_v5 = vpop.eup %8055 }
0x13fa   :  { %v5504_v44 = vmul.f32 %v8056_v5, %v5502_v8  ;;  %v8058_v1 = vpop.eup %8057 }
0x13fb   :  { %v4917_v56 = vmul.f32 %v8058_v1, %v4902_v16 }
0x13fc   :  { %v5506_v32 = vsel %vm5505_vm7, %v5502_v8, %v5504_v44 }
0x13fd   :  { %v5509_v58 = vsel %vm5507_vm8, %v5508_v40, %v5506_v32  ;;  %v4918_v3 = vsub.f32 0.0, %v4917_v56 }
0x13fe   :  { %v5510_v28 = vmax.f32 %v5509_v58, 1e-08 }
0x13ff   :  { %v5514_v34 = vadd.f32 %v4918_v3, %v3679_v63 }
0x1400   :  { %8059 = vrcp.f32 %v5510_v28 }
0x140a   :  { %v8060_v41 = vpop.eup %8059 }
0x140b   :  { %v5512_v49 = vmul.f32 %v8060_v41, %v5497_v57 }
0x140d   :  { %v5513_v26 = vsub.f32 0.0, %v5512_v49 }
0x140f   :  { %v5515_v12 = vadd.f32 %v5514_v34, %v5513_v26 }
0x1411   :  { %v5516_v36 = vmul.f32 0.33333334, %v5515_v12 }
0x1413   :  { %5518 = vst.msk [vmem:[#allocation30] sm:$0x1] %vm5517_vm9, %v5516_v36 }
0x1455   :  { %v5791_v52 = vpop.f32.mrb[88].mxu1 }
0x1456   :  { %v5792_v54 = vadd.f32 %v5791_v52, %v5747_v35  ;;  %v5793_v2 = vpop.f32.mrb[89].mxu1 }
0x1457   :  { %v5794_v17 = vadd.f32 %v5793_v2, %v5751_v39  ;;  %v5795_v20 = vpop.f32.mrb[90].mxu1 }
0x1458   :  { %v7045_v63 = vmul.f32 -1.442695, %v5792_v54  ;;  %v5796_v61 = vpop.f32.mrb[91].mxu1 }
0x1459   :  { %v5800_v0 = vcombine.low %v5792_v54, %v5794_v17  ;;  %v7046_v43 = vmul.f32 -1.442695, %v5794_v17 }
0x145a   :  { %8061 = vpow2.f32 %v7045_v63 }
0x145b   :  { %v5807_v14 = vrot.slane %v5800_v0, %v10179_v6  ;;  %8063 = vpow2.f32 %v7046_v43 }
0x145d   :  { %v5814_v31 = vrot.slane %v5807_v14, %v10179_v6 }
0x145f   :  { %5820 = vst.msk [vmem:[#allocation27] sm:$0x3] %vm5818_vm10, %v5814_v31 }
0x1464   :  { %v8062_v22 = vpop.eup %8061 }
0x1465   :  { %v8064_v4 = vpop.eup %8063  ;;  %v5827_v15 = vadd.f32 1.0, %v8062_v22 }
0x1466   :  { %v5828_v46 = vadd.f32 1.0, %v8064_v4 }
0x1467   :  { %8065 = vrcp.f32 %v5827_v15 }
0x1468   :  { %8067 = vrcp.f32 %v5828_v46 }
0x1471   :  { %v8066_v37 = vpop.eup %8065 }
0x1472   :  { %v8068_v62 = vpop.eup %8067  ;;  %5837 = vxpose.xlu0.b32.start.end [1/1] (short) %v8066_v37, 128 }
0x1473   :  { %7047 = vmatprep.subr.msk.mxu0 %vm2986_vm2, %v8068_v62 }
0x1474   :  { %8599 = dma.done.wait [#allocation7 + $0x4], 8192 }
0x1475   :  { %8600 = vsyncadd [#allocation7 + $0x4], 4294959104  ;;  %7048 = vmatpush1.msk.msra.mxu0 %vm2986_vm2, %v8066_v37  ;;  %v8641_v21 = vmov 0.0   ;;  %7472 = vmatprep.subr.msk.mxu1 %vm2986_vm2, %v8068_v62  ;;  %vm5901_vm11 = vcmask 7168   ;;  %v10741_v16 = vld [vmem:[#allocation6] sm:$0xff]  ;;  %v10743_v56 = vld [vmem:[#allocation6 + $0x8] sm:$0xff] }
0x1476   :  { %6068 = vmatprep.mubr.f32.mxu0 %v8641_v21  ;;  %6152 = vmatprep.mubr.f32.mxu1 %v8641_v21  ;;  %v10747_v34 = vld [vmem:[#allocation6 + $0x10] sm:$0xff]  ;;  %v10749_v12 = vld [vmem:[#allocation6 + $0x18] sm:$0xff]  ;;  %v10753_v54 = vld [vmem:[#allocation6 + $0x20] sm:$0xff]  ;;  %vm6265_vm12 = vcmp.gt.f32.partialorder %v10741_v16, 0.0  ;;  %vm6266_vm13 = vcmp.gt.f32.partialorder %v10743_v56, 0.0  ;;  %s8642_s18 = smov [#allocation27]  }
0x1477   :  { %7473 = vmatpush1.msk.msra.mxu1 %vm2986_vm2, %v8066_v37  ;;  %v10755_v17 = vld [vmem:[#allocation6 + $0x28] sm:$0xff]  ;;  %v10759_v14 = vld [vmem:[#allocation6 + $0x30] sm:$0xff]  ;;  %v10761_v31 = vld [vmem:[#allocation6 + $0x38] sm:$0xff]  ;;  %vm6267_vm14 = vcmp.gt.f32.partialorder %v10747_v34, 0.0  ;;  %vm6268_vm15 = vcmp.gt.f32.partialorder %v10749_v12, 0.0  ;;  %vm6269_vm0 = vcmp.gt.f32.partialorder %v10753_v54, 0.0 }
0x1478   :  { %vm6270_vm1 = vcmp.gt.f32.partialorder %v10755_v17, 0.0  ;;  %vm6271_vm2 = vcmp.gt.f32.partialorder %v10759_v14, 0.0  ;;  %vm6272_vm3 = vcmp.gt.f32.partialorder %v10761_v31, 0.0  ;;  %s6623_s29 = sshll.u32 %s8642_s18, 4  ;;  %s6624_s29 = int_to_ptr.vmem [resolvable:$true] %s6623_s29 }
0x1479   :  { %s8513_s7 = scalar_lea.vmem %s6624_s29, 32  ;;  %p8518_p1 = scmp.lt.s32.totalorder %s6624_s29, %s6624_s29 }
0x147a   :  { %p8514_p0 = scmp.ne.s32.totalorder %s6624_s29, %s8513_s7  ;;  %p8519_p2 = scmp.lt.s32.totalorder %s8513_s7, %s8513_s7 }
0x147c   :  { %p8520_p3 = por %p8519_p2, %p8518_p1 }
0x147e   :  { %p8521_p4 = pnand %p8520_p3, %p8514_p0 }
0x14af   :  { %5869 = vxpose.xlu0.b32.start.end [1/1] (short) %v8068_v62, 128  ;;  %v10765_v62 = vld [vmem:[#allocation6 + $0x40] sm:$0xff] }
0x14b0   :  { %vm6273_vm4 = vcmp.gt.f32.partialorder %v10765_v62, 0.0 }
0x14f2   :  { %v5853_v6 = vpop.trf.xlu0 }
0x14f3   :  { %7049 = vmatmul.mubr.msk.f32.vlgmr.msra.gmra.mrb[96].mxu0 %vm5901_vm11, %v5853_v6 }
0x14f4   :  { %6074 = vmatprep.mubr.f32.mxu0 %v8641_v21 }
0x14f6   :  { %v5854_v38 = vpop.trf.xlu0 }
0x14f7   :  { %7050 = vmatmul.mubr.msk.f32.gmra.mrb[98].mxu0 %vm5901_vm11, %v5854_v38  ;;  %v10767_v38 = vld [vmem:[#allocation6 + $0x48] sm:$0xff] }
0x14f8   :  { %6080 = vmatprep.mubr.f32.mxu0 %v8641_v21  ;;  %vm6274_vm5 = vcmp.gt.f32.partialorder %v10767_v38, 0.0 }
0x14fa   :  { %v5855_v10 = vpop.trf.xlu0 }
0x14fb   :  { %7051 = vmatmul.mubr.msk.f32.gmra.mrb[100].mxu0 %vm5901_vm11, %v5855_v10 }
0x14fc   :  { %6086 = vmatprep.mubr.f32.mxu0 %v8641_v21 }
0x14fe   :  { %v5856_v25 = vpop.trf.xlu0 }
0x14ff   :  { %7052 = vmatmul.mubr.msk.f32.gmra.mrb[102].mxu0 %vm5901_vm11, %v5856_v25 }
0x1500   :  { %6092 = vmatprep.mubr.f32.mxu0 %v8641_v21 }
0x1502   :  { %v5857_v42 = vpop.trf.xlu0 }
0x1503   :  { %7053 = vmatmul.mubr.msk.f32.gmra.mrb[104].mxu0 %vm5901_vm11, %v5857_v42 }
0x1504   :  { %6098 = vmatprep.mubr.f32.mxu0 %v8641_v21 }
0x1506   :  { %v5858_v29 = vpop.trf.xlu0 }
0x1507   :  { %7054 = vmatmul.mubr.msk.f32.gmra.mrb[106].mxu0 %vm5901_vm11, %v5858_v29 }
0x1508   :  { %6104 = vmatprep.mubr.f32.mxu0 %v8641_v21 }
0x150a   :  { %v5859_v48 = vpop.trf.xlu0 }
0x150b   :  { %7055 = vmatmul.mubr.msk.f32.gmra.mrb[108].mxu0 %vm5901_vm11, %v5859_v48 }
0x150c   :  { %6110 = vmatprep.mubr.f32.mxu0 %v8641_v21 }
0x150e   :  { %v5860_v45 = vpop.trf.xlu0 }
0x150f   :  { %7056 = vmatmul.mubr.msk.f32.gmra.mrb[110].mxu0 %vm5901_vm11, %v5860_v45 }
0x1510   :  { %6116 = vmatprep.mubr.f32.mxu0 %v8641_v21 }
0x1512   :  { %v5861_v53 = vpop.trf.xlu0 }
0x1513   :  { %7057 = vmatmul.mubr.msk.f32.gmra.mrb[112].mxu0 %vm5901_vm11, %v5861_v53 }
0x1514   :  { %6122 = vmatprep.mubr.f32.mxu0 %v8641_v21 }
0x1516   :  { %v5862_v33 = vpop.trf.xlu0 }
0x1517   :  { %7058 = vmatmul.mubr.msk.f32.gmra.mrb[114].mxu0 %vm5901_vm11, %v5862_v33 }
0x1518   :  { %6128 = vmatprep.mubr.f32.mxu0 %v8641_v21 }
0x151a   :  { %v5863_v47 = vpop.trf.xlu0 }
0x151b   :  { %7059 = vmatmul.mubr.msk.f32.gmra.mrb[116].mxu0 %vm5901_vm11, %v5863_v47  ;;  %v10771_v47 = vld [vmem:[#allocation6 + $0x50] sm:$0xff] }
0x151c   :  { %6134 = vmatprep.mubr.f32.mxu0 %v8641_v21  ;;  %vm6275_vm6 = vcmp.gt.f32.partialorder %v10771_v47, 0.0 }
0x151e   :  { %v5864_v18 = vpop.trf.xlu0 }
0x151f   :  { %7060 = vmatmul.mubr.msk.f32.gmra.mrb[118].mxu0 %vm5901_vm11, %v5864_v18 }
0x1520   :  { %6140 = vmatprep.mubr.f32.mxu0 %v8641_v21 }
0x1522   :  { %v5865_v30 = vpop.trf.xlu0 }
0x1523   :  { %7061 = vmatmul.mubr.msk.f32.gmra.mrb[120].mxu0 %vm5901_vm11, %v5865_v30 }
0x1524   :  { %6146 = vmatprep.mubr.f32.mxu0 %v8641_v21 }
0x1526   :  { %v5866_v13 = vpop.trf.xlu0 }
0x1527   :  { %7062 = vmatmul.mubr.msk.f32.gmra.mrb[122].mxu0 %vm5901_vm11, %v5866_v13  ;;  %v10773_v13 = vld [vmem:[#allocation6 + $0x58] sm:$0xff] }
0x1528   :  { %vm6276_vm7 = vcmp.gt.f32.partialorder %v10773_v13, 0.0 }
0x152a   :  { %v5867_v19 = vpop.trf.xlu0 }
0x152b   :  { %7063 = vmatmul.mubr.msk.f32.vlgmr.msra.gmra.mrb[92].mxu1 %vm5901_vm11, %v5867_v19 }
0x152c   :  { %6158 = vmatprep.mubr.f32.mxu1 %v8641_v21 }
0x152e   :  { %v5868_v55 = vpop.trf.xlu0 }
0x152f   :  { %7064 = vmatmul.mubr.msk.f32.gmra.mrb[94].mxu1 %vm5901_vm11, %v5868_v55 }
0x1530   :  { %6164 = vmatprep.mubr.f32.mxu1 %v8641_v21 }
0x1532   :  { %v5885_v60 = vpop.trf.xlu0 }
0x1533   :  { %7065 = vmatmul.mubr.msk.f32.gmra.mrb[96].mxu1 %vm5901_vm11, %v5885_v60 }
0x1534   :  { %6170 = vmatprep.mubr.f32.mxu1 %v8641_v21 }
0x1536   :  { %v5886_v23 = vpop.trf.xlu0 }
0x1537   :  { %7066 = vmatmul.mubr.msk.f32.gmra.mrb[98].mxu1 %vm5901_vm11, %v5886_v23 }
0x1538   :  { %6174 = vmatprep.mubr.f32.mxu1 %v8641_v21 }
0x153a   :  { %v5887_v50 = vpop.trf.xlu0 }
0x153b   :  { %7067 = vmatmul.mubr.msk.f32.gmra.mrb[100].mxu1 %vm5901_vm11, %v5887_v50 }
0x153c   :  { %6178 = vmatprep.mubr.f32.mxu1 %v8641_v21 }
0x153e   :  { %v5888_v27 = vpop.trf.xlu0 }
0x153f   :  { %7068 = vmatmul.mubr.msk.f32.gmra.mrb[102].mxu1 %vm5901_vm11, %v5888_v27 }
0x1540   :  { %6182 = vmatprep.mubr.f32.mxu1 %v8641_v21 }
0x1542   :  { %v5889_v8 = vpop.trf.xlu0 }
0x1543   :  { %7069 = vmatmul.mubr.msk.f32.gmra.mrb[104].mxu1 %vm5901_vm11, %v5889_v8 }
0x1544   :  { %6186 = vmatprep.mubr.f32.mxu1 %v8641_v21 }
0x1546   :  { %v5890_v9 = vpop.trf.xlu0 }
0x1547   :  { %7070 = vmatmul.mubr.msk.f32.gmra.mrb[106].mxu1 %vm5901_vm11, %v5890_v9 }
0x1548   :  { %6190 = vmatprep.mubr.f32.mxu1 %v8641_v21 }
0x154a   :  { %v5891_v51 = vpop.trf.xlu0 }
0x154b   :  { %7071 = vmatmul.mubr.msk.f32.gmra.mrb[108].mxu1 %vm5901_vm11, %v5891_v51  ;;  %v10777_v51 = vld [vmem:[#allocation6 + $0x60] sm:$0xff] }
0x154c   :  { %6194 = vmatprep.mubr.f32.mxu1 %v8641_v21  ;;  %vm6277_vm8 = vcmp.gt.f32.partialorder %v10777_v51, 0.0 }
0x154e   :  { %v5892_v24 = vpop.trf.xlu0 }
0x154f   :  { %7072 = vmatmul.mubr.msk.f32.gmra.mrb[110].mxu1 %vm5901_vm11, %v5892_v24 }
0x1550   :  { %6198 = vmatprep.mubr.f32.mxu1 %v8641_v21 }
0x1552   :  { %v5893_v11 = vpop.trf.xlu0 }
0x1553   :  { %7073 = vmatmul.mubr.msk.f32.gmra.mrb[112].mxu1 %vm5901_vm11, %v5893_v11 }
0x1554   :  { %6202 = vmatprep.mubr.f32.mxu1 %v8641_v21 }
0x1556   :  { %v5894_v5 = vpop.trf.xlu0 }
0x1557   :  { %7074 = vmatmul.mubr.msk.f32.gmra.mrb[114].mxu1 %vm5901_vm11, %v5894_v5  ;;  %v10779_v5 = vld [vmem:[#allocation6 + $0x68] sm:$0xff] }
0x1558   :  { %6206 = vmatprep.mubr.f32.mxu1 %v8641_v21  ;;  %vm6278_vm10 = vcmp.gt.f32.partialorder %v10779_v5, 0.0 }
0x155a   :  { %v5895_v44 = vpop.trf.xlu0 }
0x155b   :  { %7075 = vmatmul.mubr.msk.f32.gmra.mrb[116].mxu1 %vm5901_vm11, %v5895_v44 }
0x155c   :  { %6210 = vmatprep.mubr.f32.mxu1 %v8641_v21 }
0x155e   :  { %v5896_v40 = vpop.trf.xlu0 }
0x155f   :  { %7076 = vmatmul.mubr.msk.f32.gmra.mrb[118].mxu1 %vm5901_vm11, %v5896_v40 }
0x1560   :  { %6214 = vmatprep.mubr.f32.mxu1 %v8641_v21 }
0x1562   :  { %v5897_v32 = vpop.trf.xlu0 }
0x1563   :  { %7077 = vmatmul.mubr.msk.f32.gmra.mrb[120].mxu1 %vm5901_vm11, %v5897_v32 }
0x1564   :  { %6218 = vmatprep.mubr.f32.mxu1 %v8641_v21 }
0x1566   :  { %v5898_v58 = vpop.trf.xlu0 }
0x1567   :  { %7078 = vmatmul.mubr.msk.f32.gmra.mrb[122].mxu1 %vm5901_vm11, %v5898_v58 }
0x1568   :  { %6222 = vmatprep.mubr.f32.mxu1 %v8641_v21 }
0x156a   :  { %v5899_v28 = vpop.trf.xlu0 }
0x156b   :  { %7079 = vmatmul.mubr.msk.f32.gmra.mrb[124].mxu1 %vm5901_vm11, %v5899_v28 }
0x156c   :  { %6226 = vmatprep.mubr.f32.mxu1 %v8641_v21 }
0x156e   :  { %v5900_v1 = vpop.trf.xlu0 }
0x156f   :  { %7080 = vmatmul.mubr.msk.f32.gmra.mrb[126].mxu1 %vm5901_vm11, %v5900_v1 }
0x15c6   :  { %v6070_v3 = vpop.f32.mrb[96].mxu0 }
0x15c7   :  { %v6299_v41 = vmul.f32 %v10741_v16, %v6070_v3  ;;  %v6072_v57 = vpop.f32.mrb[97].mxu0 }
0x15c8   :  { %v6300_v49 = vmul.f32 %v10743_v56, %v6072_v57  ;;  %v10784_v57 = vld [vmem:[#allocation6 + $0x70] sm:$0xff] }
0x15c9   :  { %v7081_v26 = vmul.f32 -1.442695, %v6299_v41  ;;  %vm6279_vm11 = vcmp.gt.f32.partialorder %v10784_v57, 0.0 }
0x15ca   :  { %v7082_v36 = vmul.f32 -1.442695, %v6300_v49  ;;  %v6076_v7 = vpop.f32.mrb[98].mxu0 }
0x15cb   :  { %8069 = vpow2.f32 %v7081_v26  ;;  %v6301_v35 = vmul.f32 %v10747_v34, %v6076_v7  ;;  %v6078_v39 = vpop.f32.mrb[99].mxu0 }
0x15cc   :  { %8071 = vpow2.f32 %v7082_v36  ;;  %v6302_v52 = vmul.f32 %v10749_v12, %v6078_v39  ;;  %v10787_v36 = vld [vmem:[#allocation6 + $0x78] sm:$0xff] }
0x15cd   :  { %v7083_v2 = vmul.f32 -1.442695, %v6301_v35 }
0x15ce   :  { %v7084_v20 = vmul.f32 -1.442695, %v6302_v52  ;;  %v6082_v63 = vpop.f32.mrb[100].mxu0 }
0x15cf   :  { %8073 = vpow2.f32 %v7083_v2  ;;  %v6303_v61 = vmul.f32 %v10753_v54, %v6082_v63  ;;  %v6084_v0 = vpop.f32.mrb[101].mxu0 }
0x15d0   :  { %8075 = vpow2.f32 %v7084_v20  ;;  %v6304_v43 = vmul.f32 %v10755_v17, %v6084_v0 }
0x15d1   :  { %v7085_v59 = vmul.f32 -1.442695, %v6303_v61 }
0x15d2   :  { %v7086_v22 = vmul.f32 -1.442695, %v6304_v43  ;;  %v6088_v4 = vpop.f32.mrb[102].mxu0 }
0x15d3   :  { %8077 = vpow2.f32 %v7085_v59  ;;  %v6305_v15 = vmul.f32 %v10759_v14, %v6088_v4  ;;  %v6090_v46 = vpop.f32.mrb[103].mxu0  ;;  %v10795_v59 = vld [vmem:[#allocation6 + $0x80] sm:$0xff] }
0x15d4   :  { %8079 = vpow2.f32 %v7086_v22  ;;  %v6306_v37 = vmul.f32 %v10761_v31, %v6090_v46 }
0x15d5   :  { %v8070_v21 = vpop.eup %8069  ;;  %v7087_v6 = vmul.f32 -1.442695, %v6305_v15 }
0x15d6   :  { %v8072_v10 = vpop.eup %8071  ;;  %v6435_v25 = vadd.f32 1.0, %v8070_v21  ;;  %v7088_v42 = vmul.f32 -1.442695, %v6306_v37  ;;  %v6094_v29 = vpop.f32.mrb[104].mxu0  ;;  %v10797_v37 = vld [vmem:[#allocation6 + $0x88] sm:$0xff] }
0x15d7   :  { %v6436_v48 = vadd.f32 1.0, %v8072_v10  ;;  %8081 = vpow2.f32 %v7087_v6  ;;  %v6307_v45 = vmul.f32 %v10765_v62, %v6094_v29  ;;  %v6096_v53 = vpop.f32.mrb[105].mxu0  ;;  %v10842_v62 = vld [vmem:[#allocation6 + $0xc8] sm:$0xff] }
0x15d8   :  { %8083 = vrcp.f32 %v6435_v25  ;;  %v6308_v33 = vmul.f32 %v10767_v38, %v6096_v53 }
0x15d9   :  { %v8074_v18 = vpop.eup %8073  ;;  %8085 = vrcp.f32 %v6436_v48  ;;  %v7089_v30 = vmul.f32 -1.442695, %v6307_v45 }
0x15da   :  { %v8076_v19 = vpop.eup %8075  ;;  %v6437_v55 = vadd.f32 1.0, %v8074_v18  ;;  %8087 = vpow2.f32 %v7088_v42  ;;  %v7090_v60 = vmul.f32 -1.442695, %v6308_v33  ;;  %v6100_v23 = vpop.f32.mrb[106].mxu0 }
0x15db   :  { %v6438_v50 = vadd.f32 1.0, %v8076_v19  ;;  %8089 = vpow2.f32 %v7089_v30  ;;  %v6309_v27 = vmul.f32 %v10771_v47, %v6100_v23  ;;  %v6102_v8 = vpop.f32.mrb[107].mxu0  ;;  %v10806_v30 = vld [vmem:[#allocation6 + $0x90] sm:$0xff]  ;;  %v10854_v47 = vld [vmem:[#allocation6 + $0xd8] sm:$0xff] }
0x15dc   :  { %8091 = vrcp.f32 %v6437_v55  ;;  %v6310_v9 = vmul.f32 %v10773_v13, %v6102_v8 }
0x15dd   :  { %v8078_v24 = vpop.eup %8077  ;;  %8093 = vrcp.f32 %v6438_v50  ;;  %v7091_v11 = vmul.f32 -1.442695, %v6309_v27 }
0x15de   :  { %v8080_v44 = vpop.eup %8079  ;;  %v6439_v40 = vadd.f32 1.0, %v8078_v24  ;;  %8095 = vpow2.f32 %v7090_v60  ;;  %v7092_v32 = vmul.f32 -1.442695, %v6310_v9  ;;  %v6106_v58 = vpop.f32.mrb[108].mxu0  ;;  %v10809_v60 = vld [vmem:[#allocation6 + $0x98] sm:$0xff] }
0x15df   :  { %v6440_v28 = vadd.f32 1.0, %v8080_v44  ;;  %8097 = vpow2.f32 %v7091_v11  ;;  %v6311_v1 = vmul.f32 %v10777_v51, %v6106_v58  ;;  %v6108_v3 = vpop.f32.mrb[109].mxu0 }
0x15e0   :  { %8099 = vrcp.f32 %v6439_v40  ;;  %v6312_v41 = vmul.f32 %v10779_v5, %v6108_v3 }
0x15e1   :  { %v8082_v49 = vpop.eup %8081  ;;  %8101 = vrcp.f32 %v6440_v28  ;;  %v7093_v26 = vmul.f32 -1.442695, %v6311_v1  ;;  %v10818_v1 = vld [vmem:[#allocation6 + $0xa0] sm:$0xff] }
0x15e2   :  { %v8084_v7 = vpop.eup %8083  ;;  %v6441_v35 = vadd.f32 1.0, %v8082_v49  ;;  %8103 = vpow2.f32 %v7092_v32  ;;  %v7094_v39 = vmul.f32 -1.442695, %v6312_v41  ;;  %v6112_v52 = vpop.f32.mrb[110].mxu0  ;;  %v10821_v49 = vld [vmem:[#allocation6 + $0xa8] sm:$0xff] }
0x15e3   :  { %v8086_v2 = vpop.eup %8085  ;;  %v6537_v20 = vsel %vm6265_vm12, %v8084_v7, 0.0  ;;  %8105 = vpow2.f32 %v7093_v26  ;;  %v6313_v16 = vmul.f32 %v10784_v57, %v6112_v52  ;;  %v6114_v63 = vpop.f32.mrb[111].mxu0  ;;  %vm6280_vm12 = vcmp.gt.f32.partialorder %v10787_v36, 0.0 }
0x15e4   :  { %v8088_v61 = vpop.eup %8087  ;;  %v6538_v0 = vsel %vm6266_vm13, %v8086_v2, 0.0  ;;  %8107 = vrcp.f32 %v6441_v35  ;;  %v6314_v43 = vmul.f32 %v10787_v36, %v6114_v63  ;;  %vm6281_vm13 = vcmp.gt.f32.partialorder %v10795_v59, 0.0 }
0x15e5   :  { %v8090_v22 = vpop.eup %8089  ;;  %v6571_v4 = vadd.f32 %v6538_v0, %v6537_v20  ;;  %v6442_v15 = vadd.f32 1.0, %v8088_v61  ;;  %8109 = vpow2.f32 %v7094_v39  ;;  %v7095_v46 = vmul.f32 -1.442695, %v6313_v16 }
0x15e6   :  { %v8092_v21 = vpop.eup %8091  ;;  %v6443_v6 = vadd.f32 1.0, %v8090_v22  ;;  %v7096_v10 = vmul.f32 -1.442695, %v6314_v43  ;;  %v6118_v25 = vpop.f32.mrb[112].mxu0  ;;  %v10828_v43 = vld [vmem:[#allocation6 + $0xb0] sm:$0xff] }
0x15e7   :  { %v8094_v56 = vpop.eup %8093  ;;  %v6539_v42 = vsel %vm6267_vm14, %v8092_v21, 0.0  ;;  %8111 = vrcp.f32 %v6442_v15  ;;  %v6315_v29 = vmul.f32 %v10795_v59, %v6118_v25  ;;  %v6120_v48 = vpop.f32.mrb[113].mxu0  ;;  %v10830_v15 = vld [vmem:[#allocation6 + $0xb8] sm:$0xff]  ;;  %vm6282_vm14 = vcmp.gt.f32.partialorder %v10797_v37, 0.0 }
0x15e8   :  { %v8096_v45 = vpop.eup %8095  ;;  %v6572_v53 = vadd.f32 %v6571_v4, %v6539_v42  ;;  %v6540_v33 = vsel %vm6268_vm15, %v8094_v56, 0.0  ;;  %8113 = vrcp.f32 %v6443_v6  ;;  %v6316_v18 = vmul.f32 %v10797_v37, %v6120_v48 }
0x15e9   :  { %v8098_v19 = vpop.eup %8097  ;;  %v6444_v34 = vadd.f32 1.0, %v8096_v45  ;;  %8115 = vpow2.f32 %v7095_v46  ;;  %v7097_v55 = vmul.f32 -1.442695, %v6315_v29  ;;  %vm6283_vm15 = vcmp.gt.f32.partialorder %v10806_v30, 0.0 }
0x15ea   :  { %v8100_v23 = vpop.eup %8099  ;;  %v6573_v50 = vadd.f32 %v6572_v53, %v6540_v33  ;;  %v6445_v27 = vadd.f32 1.0, %v8098_v19  ;;  %8117 = vpow2.f32 %v7096_v10  ;;  %v7098_v8 = vmul.f32 -1.442695, %v6316_v18  ;;  %v6124_v12 = vpop.f32.mrb[114].mxu0  ;;  %v10840_v53 = vld [vmem:[#allocation6 + $0xc0] sm:$0xff] }
0x15eb   :  { %v8102_v9 = vpop.eup %8101  ;;  %v6541_v24 = vsel %vm6269_vm0, %v8100_v23, 0.0  ;;  %8119 = vrcp.f32 %v6444_v34  ;;  %v6317_v11 = vmul.f32 %v10806_v30, %v6124_v12  ;;  %v6126_v44 = vpop.f32.mrb[115].mxu0  ;;  %vm6284_vm0 = vcmp.gt.f32.partialorder %v10809_v60, 0.0 }
0x15ec   :  { %v8104_v40 = vpop.eup %8103  ;;  %v6574_v32 = vadd.f32 %v6573_v50, %v6541_v24  ;;  %v6542_v58 = vsel %vm6270_vm1, %v8102_v9, 0.0  ;;  %8121 = vrcp.f32 %v6445_v27  ;;  %v6318_v28 = vmul.f32 %v10809_v60, %v6126_v44 }
0x15ed   :  { %v8106_v3 = vpop.eup %8105  ;;  %v6446_v54 = vadd.f32 1.0, %v8104_v40  ;;  %8123 = vpow2.f32 %v7097_v55  ;;  %v7099_v41 = vmul.f32 -1.442695, %v6317_v11  ;;  %vm6285_vm1 = vcmp.gt.f32.partialorder %v10818_v1, 0.0 }
0x15ee   :  { %v8108_v26 = vpop.eup %8107  ;;  %v6575_v7 = vadd.f32 %v6574_v32, %v6542_v58  ;;  %v6447_v35 = vadd.f32 1.0, %v8106_v3  ;;  %8125 = vpow2.f32 %v7098_v8  ;;  %v6130_v17 = vpop.f32.mrb[116].mxu0  ;;  %v7100_v2 = vmul.f32 -1.442695, %v6318_v28  ;;  %v10852_v32 = vld [vmem:[#allocation6 + $0xd0] sm:$0xff] }
0x15ef   :  { %v8110_v39 = vpop.eup %8109  ;;  %v6543_v52 = vsel %vm6271_vm2, %v8108_v26, 0.0  ;;  %8127 = vrcp.f32 %v6446_v54  ;;  %v6319_v20 = vmul.f32 %v10818_v1, %v6130_v17  ;;  %v6132_v16 = vpop.f32.mrb[117].mxu0  ;;  %vm6286_vm2 = vcmp.gt.f32.partialorder %v10821_v49, 0.0 }
0x15f0   :  { %v6576_v63 = vadd.f32 %v6575_v7, %v6543_v52  ;;  %8129 = vrcp.f32 %v6447_v35  ;;  %v6448_v61 = vadd.f32 1.0, %v8110_v39  ;;  %v6320_v0 = vmul.f32 %v10821_v49, %v6132_v16 }
0x15f1   :  { %v8112_v22 = vpop.eup %8111  ;;  %8131 = vpow2.f32 %v7099_v41  ;;  %v7101_v4 = vmul.f32 -1.442695, %v6319_v20 }
0x15f2   :  { %v8114_v46 = vpop.eup %8113  ;;  %v6544_v14 = vsel %vm6272_vm3, %v8112_v22, 0.0  ;;  %8133 = vrcp.f32 %v6448_v61  ;;  %v7102_v21 = vmul.f32 -1.442695, %v6320_v0  ;;  %v6136_v6 = vpop.f32.mrb[118].mxu0  ;;  %v10864_v61 = vld [vmem:[#allocation6 + $0xe0] sm:$0xff]  ;;  %vm6287_vm3 = vcmp.gt.f32.partialorder %v10828_v43, 0.0 }
0x15f3   :  { %v8116_v10 = vpop.eup %8115  ;;  %v6577_v25 = vadd.f32 %v6576_v63, %v6544_v14  ;;  %v6545_v56 = vsel %vm6273_vm4, %v8114_v46, 0.0  ;;  %8135 = vpow2.f32 %v7100_v2  ;;  %v6321_v42 = vmul.f32 %v10828_v43, %v6136_v6  ;;  %v6138_v29 = vpop.f32.mrb[119].mxu0  ;;  %v10868_v46 = vld [vmem:[#allocation6 + $0xe8] sm:$0xff] }
0x15f4   :  { %v8118_v48 = vpop.eup %8117  ;;  %v6449_v45 = vadd.f32 1.0, %v8116_v10  ;;  %8137 = vpow2.f32 %v7101_v4  ;;  %v6322_v31 = vmul.f32 %v10830_v15, %v6138_v29  ;;  %vm6288_vm4 = vcmp.gt.f32.partialorder %v10830_v15, 0.0 }
0x15f5   :  { %v8120_v33 = vpop.eup %8119  ;;  %v6578_v18 = vadd.f32 %v6577_v25, %v6545_v56  ;;  %v6450_v19 = vadd.f32 1.0, %v8118_v48  ;;  %8139 = vpow2.f32 %v7102_v21  ;;  %v7103_v34 = vmul.f32 -1.442695, %v6321_v42 }
0x15f6   :  { %v8122_v55 = vpop.eup %8121  ;;  %v6546_v23 = vsel %vm6274_vm5, %v8120_v33, 0.0  ;;  %8141 = vrcp.f32 %v6449_v45  ;;  %v7104_v50 = vmul.f32 -1.442695, %v6322_v31  ;;  %v6142_v27 = vpop.f32.mrb[120].mxu0  ;;  %v10874_v33 = vld [vmem:[#allocation6 + $0xf0] sm:$0xff]  ;;  %vm6289_vm5 = vcmp.gt.f32.partialorder %v10840_v53, 0.0 }
0x15f7   :  { %v8124_v8 = vpop.eup %8123  ;;  %v6579_v12 = vadd.f32 %v6578_v18, %v6546_v23  ;;  %v6547_v9 = vsel %vm6275_vm6, %v8122_v55, 0.0  ;;  %8143 = vrcp.f32 %v6450_v19  ;;  %v6323_v24 = vmul.f32 %v10840_v53, %v6142_v27  ;;  %v6144_v11 = vpop.f32.mrb[121].mxu0  ;;  %v10879_v55 = vld [vmem:[#allocation6 + $0xf8] sm:$0xff] }
0x15f8   :  { %v8126_v44 = vpop.eup %8125  ;;  %v6451_v40 = vadd.f32 1.0, %v8124_v8  ;;  %8145 = vpow2.f32 %v7103_v34  ;;  %v6324_v38 = vmul.f32 %v10842_v62, %v6144_v11  ;;  %vm6290_vm6 = vcmp.gt.f32.partialorder %v10842_v62, 0.0 }
0x15f9   :  { %v8128_v58 = vpop.eup %8127  ;;  %v6580_v28 = vadd.f32 %v6579_v12, %v6547_v9  ;;  %v6452_v3 = vadd.f32 1.0, %v8126_v44  ;;  %8147 = vpow2.f32 %v7104_v50  ;;  %v7105_v54 = vmul.f32 -1.442695, %v6323_v24 }
0x15fa   :  { %v8130_v41 = vpop.eup %8129  ;;  %v6548_v26 = vsel %vm6276_vm7, %v8128_v58, 0.0  ;;  %8149 = vrcp.f32 %v6451_v40  ;;  %v7106_v7 = vmul.f32 -1.442695, %v6324_v38  ;;  %v6148_v35 = vpop.f32.mrb[122].mxu0  ;;  %vm6291_vm7 = vcmp.gt.f32.partialorder %v10852_v32, 0.0 }
0x15fb   :  { %v8132_v17 = vpop.eup %8131  ;;  %v6581_v39 = vadd.f32 %v6580_v28, %v6548_v26  ;;  %v6549_v52 = vsel %vm6277_vm8, %v8130_v41, 0.0  ;;  %8151 = vrcp.f32 %v6452_v3  ;;  %v6325_v2 = vmul.f32 %v10852_v32, %v6148_v35  ;;  %v6150_v20 = vpop.f32.mrb[123].mxu0  ;;  %v10886_v28 = vld [vmem:[#allocation6 + $0x100] sm:$0xff]  ;;  %v10891_v41 = vld [vmem:[#allocation6 + $0x108] sm:$0xff] }
0x15fc   :  { %v8134_v16 = vpop.eup %8133  ;;  %v6453_v63 = vadd.f32 1.0, %v8132_v17  ;;  %8153 = vpow2.f32 %v7105_v54  ;;  %v6326_v13 = vmul.f32 %v10854_v47, %v6150_v20  ;;  %vm6292_vm8 = vcmp.gt.f32.partialorder %v10854_v47, 0.0 }
0x15fd   :  { %v8136_v0 = vpop.eup %8135  ;;  %v6582_v22 = vadd.f32 %v6581_v39, %v6549_v52  ;;  %v6550_v4 = vsel %vm6278_vm10, %v8134_v16, 0.0  ;;  %8155 = vpow2.f32 %v7106_v7  ;;  %v7107_v51 = vmul.f32 -1.442695, %v6325_v2 }
0x15fe   :  { %v8138_v14 = vpop.eup %8137  ;;  %8157 = vrcp.f32 %v6453_v63  ;;  %v6454_v21 = vadd.f32 1.0, %v8136_v0  ;;  %v7108_v6 = vmul.f32 -1.442695, %v6326_v13  ;;  %v6154_v10 = vpop.f32.mrb[92].mxu1  ;;  %vm6293_vm10 = vcmp.gt.f32.partialorder %v10864_v61, 0.0 }
0x15ff   :  { %v8140_v25 = vpop.eup %8139  ;;  %v6583_v56 = vadd.f32 %v6582_v22, %v6550_v4  ;;  %v6455_v42 = vadd.f32 1.0, %v8138_v14  ;;  %8159 = vpow2.f32 %v7107_v51  ;;  %v6327_v29 = vmul.f32 %v10864_v61, %v6154_v10  ;;  %v6156_v48 = vpop.f32.mrb[93].mxu1 }
0x1600   :  { %v8142_v5 = vpop.eup %8141  ;;  %8161 = vrcp.f32 %v6454_v21  ;;  %v6456_v45 = vadd.f32 1.0, %v8140_v25  ;;  %v6328_v31 = vmul.f32 %v10868_v46, %v6156_v48 }
0x1601   :  { %v8144_v18 = vpop.eup %8143  ;;  %v6551_v19 = vsel %vm6279_vm11, %v8142_v5, 0.0  ;;  %8163 = vrcp.f32 %v6455_v42  ;;  %v7109_v34 = vmul.f32 -1.442695, %v6327_v29  ;;  %vm6294_vm11 = vcmp.gt.f32.partialorder %v10868_v46, 0.0 }
0x1602   :  { %v8146_v23 = vpop.eup %8145  ;;  %v6584_v50 = vadd.f32 %v6583_v56, %v6551_v19  ;;  %v6552_v27 = vsel %vm6280_vm12, %v8144_v18, 0.0  ;;  %8165 = vrcp.f32 %v6456_v45  ;;  %v6160_v8 = vpop.f32.mrb[94].mxu1  ;;  %v7110_v57 = vmul.f32 -1.442695, %v6328_v31 }
0x1603   :  { %v8148_v12 = vpop.eup %8147  ;;  %v6457_v9 = vadd.f32 1.0, %v8146_v23  ;;  %8167 = vpow2.f32 %v7108_v6  ;;  %v6329_v24 = vmul.f32 %v10874_v33, %v6160_v8  ;;  %v6162_v11 = vpop.f32.mrb[95].mxu1  ;;  %vm6295_vm12 = vcmp.gt.f32.partialorder %v10874_v33, 0.0 }
0x1604   :  { %v8150_v44 = vpop.eup %8149  ;;  %v6585_v40 = vadd.f32 %v6584_v50, %v6552_v27  ;;  %v6458_v38 = vadd.f32 1.0, %v8148_v12  ;;  %8169 = vpow2.f32 %v7109_v34  ;;  %v6330_v58 = vmul.f32 %v10879_v55, %v6162_v11 }
0x1605   :  { %v8152_v36 = vpop.eup %8151  ;;  %v6553_v3 = vsel %vm6281_vm13, %v8150_v44, 0.0  ;;  %8171 = vrcp.f32 %v6457_v9  ;;  %v7111_v54 = vmul.f32 -1.442695, %v6329_v24  ;;  %vm6296_vm13 = vcmp.gt.f32.partialorder %v10879_v55, 0.0 }
0x1606   :  { %v8154_v26 = vpop.eup %8153  ;;  %v6586_v7 = vadd.f32 %v6585_v40, %v6553_v3  ;;  %v6554_v35 = vsel %vm6282_vm14, %v8152_v36, 0.0  ;;  %8173 = vrcp.f32 %v6458_v38  ;;  %v6166_v17 = vpop.f32.mrb[96].mxu1  ;;  %v7112_v59 = vmul.f32 -1.442695, %v6330_v58 }
0x1607   :  { %v8156_v39 = vpop.eup %8155  ;;  %v6459_v52 = vadd.f32 1.0, %v8154_v26  ;;  %8175 = vpow2.f32 %v7110_v57  ;;  %v6331_v2 = vmul.f32 %v10886_v28, %v6166_v17  ;;  %v6168_v20 = vpop.f32.mrb[97].mxu1  ;;  %vm6297_vm14 = vcmp.gt.f32.partialorder %v10886_v28, 0.0 }
0x1608   :  { %v8158_v16 = vpop.eup %8157  ;;  %v6587_v63 = vadd.f32 %v6586_v7, %v6554_v35  ;;  %v6460_v13 = vadd.f32 1.0, %v8156_v39  ;;  %8177 = vpow2.f32 %v7111_v54  ;;  %v6332_v0 = vmul.f32 %v10891_v41, %v6168_v20 }
0x1609   :  { %v8160_v22 = vpop.eup %8159  ;;  %v6555_v37 = vsel %vm6283_vm15, %v8158_v16, 0.0  ;;  %8179 = vrcp.f32 %v6459_v52  ;;  %v7113_v4 = vmul.f32 -1.442695, %v6331_v2  ;;  %vm6298_vm15 = vcmp.gt.f32.partialorder %v10891_v41, 0.0 }
0x160a   :  { %v8162_v51 = vpop.eup %8161  ;;  %v6588_v14 = vadd.f32 %v6587_v63, %v6555_v37  ;;  %8181 = vrcp.f32 %v6460_v13  ;;  %v6461_v21 = vadd.f32 1.0, %v8160_v22  ;;  %v7114_v6 = vmul.f32 -1.442695, %v6332_v0 }
0x160b   :  { %v8164_v10 = vpop.eup %8163  ;;  %v6556_v25 = vsel %vm6284_vm0, %v8162_v51, 0.0  ;;  %8183 = vpow2.f32 %v7112_v59 }
0x160c   :  { %v8166_v56 = vpop.eup %8165  ;;  %v6589_v42 = vadd.f32 %v6588_v14, %v6556_v25  ;;  %v6557_v30 = vsel %vm6285_vm1, %v8164_v10, 0.0  ;;  %8185 = vrcp.f32 %v6461_v21  ;;  %v6172_v14 = vpop.f32.mrb[98].mxu1 }
0x160d   :  { %v8168_v29 = vpop.eup %8167  ;;  %v6558_v48 = vsel %vm6286_vm2, %v8166_v56, 0.0  ;;  %8187 = vpow2.f32 %v7113_v4  ;;  %v6173_v21 = vpop.f32.mrb[99].mxu1 }
0x160e   :  { %v8170_v5 = vpop.eup %8169  ;;  %v6590_v45 = vadd.f32 %v6589_v42, %v6557_v30  ;;  %v6462_v60 = vadd.f32 1.0, %v8168_v29  ;;  %8189 = vpow2.f32 %v7114_v6  ;;  %v6176_v6 = vpop.f32.mrb[100].mxu1 }
0x160f   :  { %v8172_v31 = vpop.eup %8171  ;;  %v6463_v18 = vadd.f32 1.0, %v8170_v5  ;;  %v6177_v10 = vpop.f32.mrb[101].mxu1 }
0x1610   :  { %v8174_v19 = vpop.eup %8173  ;;  %v6591_v34 = vadd.f32 %v6590_v45, %v6558_v48  ;;  %v6559_v1 = vsel %vm6287_vm3, %v8172_v31, 0.0  ;;  %8191 = vrcp.f32 %v6462_v60 }
0x1611   :  { %v8176_v23 = vpop.eup %8175  ;;  %v6560_v50 = vsel %vm6288_vm4, %v8174_v19, 0.0  ;;  %8193 = vrcp.f32 %v6463_v18 }
0x1612   :  { %v8178_v49 = vpop.eup %8177  ;;  %v6592_v43 = vadd.f32 %v6591_v34, %v6559_v1  ;;  %v6464_v27 = vadd.f32 1.0, %v8176_v23  ;;  %v6180_v55 = vpop.f32.mrb[102].mxu1 }
0x1613   :  { %v8180_v8 = vpop.eup %8179  ;;  %v6465_v15 = vadd.f32 1.0, %v8178_v49  ;;  %v6181_v25 = vpop.f32.mrb[103].mxu1 }
0x1614   :  { %v8182_v12 = vpop.eup %8181  ;;  %v6593_v9 = vadd.f32 %v6592_v43, %v6560_v50  ;;  %v6561_v57 = vsel %vm6289_vm5, %v8180_v8, 0.0  ;;  %8195 = vrcp.f32 %v6464_v27 }
0x1615   :  { %v8184_v24 = vpop.eup %8183  ;;  %v6562_v11 = vsel %vm6290_vm6, %v8182_v12, 0.0  ;;  %8197 = vrcp.f32 %v6465_v15 }
0x1616   :  { %v8186_v44 = vpop.eup %8185  ;;  %v6594_v40 = vadd.f32 %v6593_v9, %v6561_v57  ;;  %v6466_v53 = vadd.f32 1.0, %v8184_v24  ;;  %v6184_v56 = vpop.f32.mrb[104].mxu1 }
0x1617   :  { %v8188_v38 = vpop.eup %8187  ;;  %v6563_v58 = vsel %vm6291_vm7, %v8186_v44, 0.0  ;;  %v6185_v42 = vpop.f32.mrb[105].mxu1 }
0x1618   :  { %v8190_v36 = vpop.eup %8189  ;;  %v6595_v3 = vadd.f32 %v6594_v40, %v6562_v11  ;;  %8199 = vrcp.f32 %v6466_v53  ;;  %v6467_v62 = vadd.f32 1.0, %v8188_v38 }
0x1619   :  { %v6468_v54 = vadd.f32 1.0, %v8190_v36 }
0x161a   :  { %v8192_v26 = vpop.eup %8191  ;;  %v6596_v32 = vadd.f32 %v6595_v3, %v6563_v58  ;;  %8201 = vrcp.f32 %v6467_v62  ;;  %v6188_v28 = vpop.f32.mrb[106].mxu1 }
0x161b   :  { %v8194_v7 = vpop.eup %8193  ;;  %v6564_v35 = vsel %vm6292_vm8, %v8192_v26, 0.0  ;;  %8203 = vrcp.f32 %v6468_v54  ;;  %v6189_v30 = vpop.f32.mrb[107].mxu1 }
0x161c   :  { %v6597_v17 = vadd.f32 %v6596_v32, %v6564_v35  ;;  %v6565_v39 = vsel %vm6293_vm10, %v8194_v7, 0.0 }
0x161e   :  { %v8196_v52 = vpop.eup %8195  ;;  %v6598_v59 = vadd.f32 %v6597_v17, %v6565_v39  ;;  %v6192_v29 = vpop.f32.mrb[108].mxu1 }
0x161f   :  { %v8198_v47 = vpop.eup %8197  ;;  %v6566_v2 = vsel %vm6294_vm11, %v8196_v52, 0.0  ;;  %v6193_v41 = vpop.f32.mrb[109].mxu1 }
0x1620   :  { %v6599_v20 = vadd.f32 %v6598_v59, %v6566_v2  ;;  %v6567_v16 = vsel %vm6295_vm12, %v8198_v47, 0.0 }
0x1622   :  { %v8200_v61 = vpop.eup %8199  ;;  %v6600_v63 = vadd.f32 %v6599_v20, %v6567_v16  ;;  %v6196_v48 = vpop.f32.mrb[110].mxu1 }
0x1623   :  { %v6568_v13 = vsel %vm6296_vm13, %v8200_v61, 0.0  ;;  %v6197_v5 = vpop.f32.mrb[111].mxu1 }
0x1624   :  { %v8202_v0 = vpop.eup %8201  ;;  %v6601_v22 = vadd.f32 %v6600_v63, %v6568_v13 }
0x1625   :  { %v8204_v46 = vpop.eup %8203  ;;  %v6569_v37 = vsel %vm6297_vm14, %v8202_v0, 0.0 }
0x1626   :  { %v6570_v33 = vsel %vm6298_vm15, %v8204_v46, 0.0  ;;  %v6602_v4 = vadd.f32 %v6601_v22, %v6569_v37  ;;  %v6200_v45 = vpop.f32.mrb[112].mxu1 }
0x1627   :  { %v6201_v60 = vpop.f32.mrb[113].mxu1 }
0x1628   :  { %v6603_v51 = vadd.f32 %v6602_v4, %v6570_v33 }
0x162a   :  { %6604 = vadd.xlane.f32.xlu1 %v6603_v51  ;;  %v6204_v31 = vpop.f32.mrb[114].mxu1 }
0x162b   :  { %v6205_v18 = vpop.f32.mrb[115].mxu1 }
0x162e   :  { %v6208_v19 = vpop.f32.mrb[116].mxu1 }
0x162f   :  { %v6209_v34 = vpop.f32.mrb[117].mxu1 }
0x1632   :  { %v6212_v1 = vpop.f32.mrb[118].mxu1 }
0x1633   :  { %v6213_v23 = vpop.f32.mrb[119].mxu1 }
0x1636   :  { %v6216_v50 = vpop.f32.mrb[120].mxu1 }
0x1637   :  { %v6217_v49 = vpop.f32.mrb[121].mxu1 }
0x163a   :  { %v6220_v43 = vpop.f32.mrb[122].mxu1 }
0x163b   :  { %v6221_v27 = vpop.f32.mrb[123].mxu1 }
0x163e   :  { %v6224_v8 = vpop.f32.mrb[124].mxu1 }
0x163f   :  { %v6225_v15 = vpop.f32.mrb[125].mxu1 }
0x1642   :  { %v6228_v12 = vpop.f32.mrb[126].mxu1 }
0x1643   :  { %v6229_v9 = vpop.f32.mrb[127].mxu1 }
0x1644   :  { %8524 = shalt.err (!%p8521_p4)
}
0x1645   :  { %s8525_s26 = scalar_lea.hbm %s10989_s25, 32 }
0x1646   :  { %p8526_p5 = scmp.ne.s32.totalorder %s10989_s25, %s8525_s26  ;;  %p8529_p6 = scmp.lt.u32.totalorder %s8525_s26, %s10989_s25 }
0x1648   :  { %p8531_p7 = pnand %p8529_p6, %p8526_p5 }
0x164a   :  { %8534 = shalt.err (!%p8531_p7)
}
0x164b   :  { %6626 = dma.vmem_to_hbm [thread:$0]  %s6624_s29, 32, %s10989_s25, [#allocation11]   ;;  %v6614_v58 = vld [vmem:[#allocation8] sm:$0x1] }
0x164c   :  { %s8643_s11 = smov [#allocation28]   ;;  %s8644_s21 = smov [#allocation30]  }
0x164d   :  { %s6633_s30 = sshll.u32 %s8643_s11, 4  ;;  %s6643_s22 = sshll.u32 %s8644_s21, 4  ;;  %s6634_s30 = int_to_ptr.vmem [resolvable:$true] %s6633_s30  ;;  %s10931_s22 = int_to_ptr.vmem [resolvable:$true] %s6643_s22 }
0x164e   :  { %s8535_s25 = scalar_lea.vmem %s6634_s30, 16  ;;  %s8539_s1 = scalar_lea.vmem %s6634_s30, 32 }
0x164f   :  { %p8536_p8 = scmp.ne.s32.totalorder %s6634_s30, %s8535_s25  ;;  %p8540_p9 = scmp.lt.s32.totalorder %s6634_s30, %s6634_s30 }
0x1650   :  { %p8541_p10 = scmp.lt.s32.totalorder %s8539_s1, %s8535_s25 }
0x1652   :  { %p8542_p11 = por %p8541_p10, %p8540_p9 }
0x1654   :  { %p8543_p12 = pnand %p8542_p11, %p8536_p8 }
0x16b7   :  { %v6605_v57 = vpop.xlane.xlu1 %6604 }
0x16b8   :  { %v6606_v24 = vrot.slane %v6605_v57, 4 }
0x16ba   :  { %v6607_v11 = vadd.f32 %v6606_v24, %v6605_v57 }
0x16bc   :  { %v6608_v44 = vrot.slane %v6607_v11, 2 }
0x16be   :  { %v6609_v40 = vadd.f32 %v6608_v44, %v6607_v11 }
0x16c0   :  { %v6610_v53 = vrot.slane %v6609_v40, 1 }
0x16c2   :  { %v6611_v38 = vadd.f32 %v6610_v53, %v6609_v40 }
0x16c4   :  { %7474 = vpush %v6611_v38 }
0x16f5   :  { %s7475_s14 = spop %7474 }
0x16f6   :  { %v6613_v36 = vstv %s7475_s14 }
0x16f7   :  { %v6615_v3 = vadd.f32 %v6614_v58, %v6613_v36 }
0x16f9   :  { %6616 = vst.msk [vmem:[#allocation28] sm:$0x1] %vm5517_vm9, %v6615_v3 }
0x16fa   :  { %8546 = shalt.err (!%p8543_p12)
}
0x16fb   :  { %s11294_s5 = sld [smem:[#allocation136_spill]] }
0x1701   :  { %s8547_s0 = scalar_lea.hbm %s11294_s5, 16 }
0x1702   :  { %p8548_p13 = scmp.ne.s32.totalorder %s11294_s5, %s8547_s0  ;;  %p8551_p0 = scmp.lt.u32.totalorder %s8547_s0, %s11294_s5 }
0x1704   :  { %p8553_p1 = pnand %p8551_p0, %p8548_p13 }
0x1706   :  { %8556 = shalt.err (!%p8553_p1)
}
0x1707   :  { %6636 = dma.vmem_to_hbm [thread:$0]  %s6634_s30, 16, %s11294_s5, [#allocation29]  }
0x1708   :  { %s8557_s16 = scalar_lea.vmem %s10931_s22, 16  ;;  %s8561_s10 = scalar_lea.vmem %s10931_s22, 32 }
0x1709   :  { %p8558_p2 = scmp.ne.s32.totalorder %s10931_s22, %s8557_s16  ;;  %p8562_p3 = scmp.lt.s32.totalorder %s10931_s22, %s10931_s22 }
0x170a   :  { %p8563_p4 = scmp.lt.s32.totalorder %s8561_s10, %s8557_s16 }
0x170c   :  { %p8564_p5 = por %p8563_p4, %p8562_p3 }
0x170e   :  { %p8565_p6 = pnand %p8564_p5, %p8558_p2 }
0x1710   :  { %8568 = shalt.err (!%p8565_p6)
}
0x1711   :  { %s11295_s7 = sld [smem:[#allocation137_spill]] }
0x1717   :  { %s8569_s13 = scalar_lea.hbm %s11295_s7, 16 }
0x1718   :  { %p8570_p7 = scmp.ne.s32.totalorder %s11295_s7, %s8569_s13  ;;  %p8573_p8 = scmp.lt.u32.totalorder %s8569_s13, %s11295_s7 }
0x171a   :  { %p8575_p9 = pnand %p8573_p8, %p8570_p7 }
0x171c   :  { %8578 = shalt.err (!%p8575_p9)
}
0x171d   :  { %6646 = dma.vmem_to_hbm [thread:$0]  %s10931_s22, 16, %s11295_s7, [#allocation29]  }
0x171e   :  { %8601 = dma.done.wait [#allocation11], 32  }
0x171f   :  { %8602 = vsyncadd [#allocation11], 4294967264 }
0x1720   :  { %8603 = dma.done.wait [#allocation29], 32  }
0x1721   :  { %8604 = vsyncadd [#allocation29], 4294967264 }
0x1722   :  { %6656 = vsyncpa [#allocation10], 1 }
0x1723   :  { %6657 = vsyncpa [#allocation13], 1 }
0x1724   :  { %6658 = vsyncpa [#allocation16], 1 }
0x1725   :  { %6659 = vsyncpa [#allocation19], 1 }
0x1726   :  { %6660 = vsyncpa [#allocation22], 1 }
0x1727   :  { %6661 = vsyncpa [#allocation25], 1 }
0x1728   :  { %6662 = vsyncpa [#allocation11], 1 }
0x1729   :  { %6663 = vsyncpa [#allocation29], 1 }
0x172a   :  { %6664 = vsyncmov [#allocation7] }
0x172d   :  { %s6665_s28 = vpop.sfrf %6664 }
0x172e   :  { %p7115_p10 = scmp.ne.s32.totalorder %s6665_s28, 0 }
0x1730   :  { %6669 = shalt.err (%p7115_p10)  }
0x1731   :  { %6671 = vsyncmov [#allocation7 + $0x1] }
0x1734   :  { %s6672_s24 = vpop.sfrf %6671 }
0x1735   :  { %p7116_p11 = scmp.ne.s32.totalorder %s6672_s24, 0 }
0x1737   :  { %6676 = shalt.err (%p7116_p11)  }
0x1738   :  { %6678 = vsyncmov [#allocation7 + $0x2] }
0x173b   :  { %s6679_s11 = vpop.sfrf %6678 }
0x173c   :  { %p7117_p12 = scmp.ne.s32.totalorder %s6679_s11, 0 }
0x173e   :  { %6683 = shalt.err (%p7117_p12)  }
0x173f   :  { %6685 = vsyncmov [#allocation7 + $0x3] }
0x1742   :  { %s6686_s30 = vpop.sfrf %6685 }
0x1743   :  { %p7118_p13 = scmp.ne.s32.totalorder %s6686_s30, 0 }
0x1745   :  { %6690 = shalt.err (%p7118_p13)  }
0x1746   :  { %6692 = vsyncmov [#allocation7 + $0x4] }
0x1749   :  { %s6693_s14 = vpop.sfrf %6692 }
0x174a   :  { %p7119_p0 = scmp.ne.s32.totalorder %s6693_s14, 0 }
0x174c   :  { %6697 = shalt.err (%p7119_p0)  }

</bundles_post_ra>
